<compile_context>
chip_gen: v5e
topology: v5e:2x2
jax: 0.10.0
libtpu: 0.0.40
codegen_flags: <defaults>
</compile_context>

<pallas_src>
import functools

import jax
import jax.numpy as jnp
from jax.experimental import pallas as pl
from jax.experimental.pallas import tpu as pltpu

N_NODES = 514  # fixed by gwr_weight = nn.Parameter(torch.FloatTensor(514, f_in))
LANE = 128


def _round_up(x, m):
    return ((x + m - 1) // m) * m


def _fused_gwgcn_kernel(*refs, layer_shapes, relus):
    """refs = (x, adj, [gwr_i, w_i, b_i] * L, out_ref)."""
    x_ref, adj_ref = refs[0], refs[1]
    o_ref = refs[-1]
    layer_refs = refs[2:-1]

    adj = adj_ref[...]          # loaded once, resident across all fused layers
    h = x_ref[...]
    for idx, ((f_in, f_out), relu) in enumerate(zip(layer_shapes, relus)):
        gwr_ref, w_ref, b_ref = layer_refs[3 * idx: 3 * idx + 3]
        g = h * gwr_ref[...]                                    # VPU elementwise
        if f_in <= f_out:
            # (adj @ g) @ W : the N^2 matmul has width f_in
            s = jnp.dot(adj, g, preferred_element_type=jnp.float32)
            out = jnp.dot(s, w_ref[...], preferred_element_type=jnp.float32)
        else:
            # adj @ (g @ W) : the N^2 matmul has width f_out (associativity)
            t = jnp.dot(g, w_ref[...], preferred_element_type=jnp.float32)
            out = jnp.dot(adj, t, preferred_element_type=jnp.float32)
        out = out + b_ref[...]
        if relu:
            out = jnp.maximum(out, 0.0)
        h = out
    o_ref[...] = h.astype(o_ref.dtype)


def gwgcn_forward(params, x, adj):
    """Full GWGCN forward (all GW layers) in one fused Pallas kernel."""
    layers = list(params["layers"]) + [params["out"]]
    relus = tuple([True] * len(params["layers"]) + [False])

    n, f_in0 = x.shape
    n_pad = _round_up(n, LANE)

    # Zero-pad node dimension once on the host: aligned, unmasked DMAs for the
    # one large operand (adj). Zero rows/cols leave the first `n` rows exact.
    adj_p = jnp.zeros((n_pad, n_pad), jnp.float32).at[:n, :n].set(adj)
    x_p = jnp.zeros((n_pad, f_in0), jnp.float32).at[:n, :].set(x)

    args = [x_p, adj_p]
    in_specs = [
        pl.BlockSpec((n_pad, f_in0), lambda i: (0, 0)),   # x
        pl.BlockSpec((n_pad, n_pad), lambda i: (0, 0)),   # adj
    ]
    layer_shapes = []
    flops = 0
    for lp in layers:
        f_in, f_out = lp["weight"].shape
        gwr_p = jnp.zeros((n_pad, f_in), jnp.float32).at[:n, :].set(lp["gwr_weight"])
        args += [gwr_p, lp["weight"], lp["bias"].reshape(1, f_out)]
        in_specs += [
            pl.BlockSpec((n_pad, f_in), lambda i: (0, 0)),    # gwr_weight
            pl.BlockSpec((f_in, f_out), lambda i: (0, 0)),    # weight
            pl.BlockSpec((1, f_out), lambda i: (0, 0)),       # bias
        ]
        layer_shapes.append((f_in, f_out))
        flops += 2 * n_pad * n_pad * min(f_in, f_out) + 2 * n_pad * f_in * f_out

    n_classes = layer_shapes[-1][1]
    bytes_accessed = 4 * (adj_p.size + x_p.size + n_pad * n_classes
                          + sum(int(a.size) for a in args[2:]))

    kernel = functools.partial(
        _fused_gwgcn_kernel, layer_shapes=tuple(layer_shapes), relus=relus)

    out_pad = pl.pallas_call(
        kernel,
        out_shape=jax.ShapeDtypeStruct((n_pad, n_classes), jnp.float32),
        grid=(1,),
        in_specs=in_specs,
        out_specs=pl.BlockSpec((n_pad, n_classes), lambda i: (0, 0)),
        compiler_params=pltpu.CompilerParams(
            dimension_semantics=("arbitrary",),
        ),
        cost_estimate=pl.CostEstimate(
            flops=int(flops),
            transcendentals=0,
            bytes_accessed=int(bytes_accessed),
        ),
    )(*args)
    return out_pad[:n, :]


def make_gwgcn_params(f_in, n_classes, hidden=(16,)):
    """Deterministic parameters matching GWGCN.__init__ / initialize_weights."""
    params = {"layers": [], "out": None}
    dims = [f_in] + list(hidden)
    for fi, fo in zip(dims[:-1], dims[1:]):
        params["layers"].append(
            dict(
                gwr_weight=jnp.ones((N_NODES, fi), jnp.float32),
                weight=jnp.ones((fi, fo), jnp.float32),
                bias=jnp.zeros((fo,), jnp.float32),
            )
        )
    last_in = dims[-1]
    params["out"] = dict(
        gwr_weight=jnp.ones((N_NODES, last_in), jnp.float32),
        weight=jnp.ones((last_in, n_classes), jnp.float32),
        bias=jnp.zeros((n_classes,), jnp.float32),
    )
    return params


def gwgcn_reference(params, x, adj):
    """Plain-JAX reference mirroring the PyTorch forward, for a sanity check."""
    def layer(h, p, relu):
        out = adj @ (h * p["gwr_weight"]) @ p["weight"] + p["bias"]
        return jnp.maximum(out, 0.0) if relu else out

    for lp in params["layers"]:
        x = layer(x, lp, True)
    return layer(x, params["out"], False)


if __name__ == "__main__":
    f_in = 4
    n_classes = 3
    hidden = (16,)

    key = jax.random.PRNGKey(0)
    kx, ka = jax.random.split(key)
    x = jax.random.normal(kx, (N_NODES, f_in), dtype=jnp.float32)
    adj = jax.random.uniform(ka, (N_NODES, N_NODES), dtype=jnp.float32) * 0.01

    params = make_gwgcn_params(f_in, n_classes, hidden)

    out = gwgcn_forward(params, x, adj)
    out = jax.block_until_ready(out)

    ref = gwgcn_reference(params, x, adj)
    assert out.shape == (N_NODES, n_classes)
    assert jnp.allclose(out, ref, rtol=1e-3, atol=1e-3), "mismatch vs reference"

    print("KERNEL_OK")
</pallas_src>

<mosaic_0001>
module attributes {stable_mosaic.version = 11 : i64} {
  func.func @_fused_gwgcn_kernel(%arg0: i32, %arg1: memref<640x4xf32, #tpu.memory_space<vmem>>, %arg2: memref<640x640xf32, #tpu.memory_space<vmem>>, %arg3: memref<640x4xf32, #tpu.memory_space<vmem>>, %arg4: memref<4x16xf32, #tpu.memory_space<vmem>>, %arg5: memref<1x16xf32, #tpu.memory_space<vmem>>, %arg6: memref<640x16xf32, #tpu.memory_space<vmem>>, %arg7: memref<16x3xf32, #tpu.memory_space<vmem>>, %arg8: memref<1x3xf32, #tpu.memory_space<vmem>>, %arg9: memref<640x3xf32, #tpu.memory_space<vmem>>) attributes {dimension_semantics = [#tpu.dimension_semantics<arbitrary>], iteration_bounds = array<i64: 1>, scalar_prefetch = 0 : i64, scratch_operands = 0 : i64, tpu.core_type = #tpu.core_type<tc>, window_params = [{pipeline_mode = #tpu.pipeline_mode<synchronous>, transform_indices = @transform_0, window_bounds = array<i64: 640, 4>}, {pipeline_mode = #tpu.pipeline_mode<synchronous>, transform_indices = @transform_1, window_bounds = array<i64: 640, 640>}, {pipeline_mode = #tpu.pipeline_mode<synchronous>, transform_indices = @transform_2, window_bounds = array<i64: 640, 4>}, {pipeline_mode = #tpu.pipeline_mode<synchronous>, transform_indices = @transform_3, window_bounds = array<i64: 4, 16>}, {pipeline_mode = #tpu.pipeline_mode<synchronous>, transform_indices = @transform_4, window_bounds = array<i64: 1, 16>}, {pipeline_mode = #tpu.pipeline_mode<synchronous>, transform_indices = @transform_5, window_bounds = array<i64: 640, 16>}, {pipeline_mode = #tpu.pipeline_mode<synchronous>, transform_indices = @transform_6, window_bounds = array<i64: 16, 3>}, {pipeline_mode = #tpu.pipeline_mode<synchronous>, transform_indices = @transform_7, window_bounds = array<i64: 1, 3>}, {pipeline_mode = #tpu.pipeline_mode<synchronous>, transform_indices = @transform_8, window_bounds = array<i64: 640, 3>}]} {
    %c0 = arith.constant 0 : index
    %c0_0 = arith.constant 0 : index
    %0 = vector.load %arg2[%c0, %c0_0] : memref<640x640xf32, #tpu.memory_space<vmem>>, vector<640x640xf32>
    %c0_1 = arith.constant 0 : index
    %c0_2 = arith.constant 0 : index
    %1 = vector.load %arg1[%c0_1, %c0_2] : memref<640x4xf32, #tpu.memory_space<vmem>>, vector<640x4xf32>
    %c0_3 = arith.constant 0 : index
    %c0_4 = arith.constant 0 : index
    %2 = vector.load %arg3[%c0_3, %c0_4] : memref<640x4xf32, #tpu.memory_space<vmem>>, vector<640x4xf32>
    %3 = arith.mulf %1, %2 : vector<640x4xf32>
    %cst = arith.constant dense<0.000000e+00> : vector<640x4xf32>
    %4 = tpu.matmul %0, %3, %cst {dimension_numbers = #tpu.dot_dimension_numbers<[1], [0], [0], [1], [0, 0, 1, 1], [], []>} : vector<640x640xf32>, vector<640x4xf32>, vector<640x4xf32> -> vector<640x4xf32>
    %c0_5 = arith.constant 0 : index
    %c0_6 = arith.constant 0 : index
    %5 = vector.load %arg4[%c0_5, %c0_6] : memref<4x16xf32, #tpu.memory_space<vmem>>, vector<4x16xf32>
    %cst_7 = arith.constant dense<0.000000e+00> : vector<640x16xf32>
    %6 = tpu.matmul %4, %5, %cst_7 {dimension_numbers = #tpu.dot_dimension_numbers<[1], [0], [0], [1], [0, 0, 1, 1], [], []>} : vector<640x4xf32>, vector<4x16xf32>, vector<640x16xf32> -> vector<640x16xf32>
    %c0_8 = arith.constant 0 : index
    %c0_9 = arith.constant 0 : index
    %7 = vector.load %arg5[%c0_8, %c0_9] : memref<1x16xf32, #tpu.memory_space<vmem>>, vector<1x16xf32>
    %8 = vector.broadcast %7 : vector<1x16xf32> to vector<640x16xf32>
    %9 = arith.addf %6, %8 : vector<640x16xf32>
    %cst_10 = arith.constant 0.000000e+00 : f32
    %10 = vector.broadcast %cst_10 : f32 to vector<640x16xf32>
    %11 = arith.maximumf %9, %10 : vector<640x16xf32>
    %c0_11 = arith.constant 0 : index
    %c0_12 = arith.constant 0 : index
    %12 = vector.load %arg6[%c0_11, %c0_12] : memref<640x16xf32, #tpu.memory_space<vmem>>, vector<640x16xf32>
    %13 = arith.mulf %11, %12 : vector<640x16xf32>
    %c0_13 = arith.constant 0 : index
    %c0_14 = arith.constant 0 : index
    %14 = vector.load %arg7[%c0_13, %c0_14] : memref<16x3xf32, #tpu.memory_space<vmem>>, vector<16x3xf32>
    %cst_15 = arith.constant dense<0.000000e+00> : vector<640x3xf32>
    %15 = tpu.matmul %13, %14, %cst_15 {dimension_numbers = #tpu.dot_dimension_numbers<[1], [0], [0], [1], [0, 0, 1, 1], [], []>} : vector<640x16xf32>, vector<16x3xf32>, vector<640x3xf32> -> vector<640x3xf32>
    %cst_16 = arith.constant dense<0.000000e+00> : vector<640x3xf32>
    %16 = tpu.matmul %0, %15, %cst_16 {dimension_numbers = #tpu.dot_dimension_numbers<[1], [0], [0], [1], [0, 0, 1, 1], [], []>} : vector<640x640xf32>, vector<640x3xf32>, vector<640x3xf32> -> vector<640x3xf32>
    %c0_17 = arith.constant 0 : index
    %c0_18 = arith.constant 0 : index
    %17 = vector.load %arg8[%c0_17, %c0_18] : memref<1x3xf32, #tpu.memory_space<vmem>>, vector<1x3xf32>
    %18 = vector.broadcast %17 : vector<1x3xf32> to vector<640x3xf32>
    %19 = arith.addf %16, %18 : vector<640x3xf32>
    %c0_19 = arith.constant 0 : index
    %c0_20 = arith.constant 0 : index
    %20 = vector.load %arg9[%c0_19, %c0_20] : memref<640x3xf32, #tpu.memory_space<vmem>>, vector<640x3xf32>
    tpu.vector_store %arg9[%c0_19, %c0_20], %19 {strides = array<i32>} : memref<640x3xf32, #tpu.memory_space<vmem>>, vector<640x3xf32>,
    return
  }
  func.func @transform_0(%arg0: i32) -> (i32, i32) {
    %c0_i32 = arith.constant 0 : i32
    %c0_i32_0 = arith.constant 0 : i32
    %c0_i32_1 = arith.constant 0 : i32
    return %c0_i32, %c0_i32_0 : i32, i32
  }
  func.func @transform_1(%arg0: i32) -> (i32, i32) {
    %c0_i32 = arith.constant 0 : i32
    %c0_i32_0 = arith.constant 0 : i32
    %c0_i32_1 = arith.constant 0 : i32
    return %c0_i32, %c0_i32_0 : i32, i32
  }
  func.func @transform_2(%arg0: i32) -> (i32, i32) {
    %c0_i32 = arith.constant 0 : i32
    %c0_i32_0 = arith.constant 0 : i32
    %c0_i32_1 = arith.constant 0 : i32
    return %c0_i32, %c0_i32_0 : i32, i32
  }
  func.func @transform_3(%arg0: i32) -> (i32, i32) {
    %c0_i32 = arith.constant 0 : i32
    %c0_i32_0 = arith.constant 0 : i32
    %c0_i32_1 = arith.constant 0 : i32
    return %c0_i32, %c0_i32_0 : i32, i32
  }
  func.func @transform_4(%arg0: i32) -> (i32, i32) {
    %c0_i32 = arith.constant 0 : i32
    %c0_i32_0 = arith.constant 0 : i32
    %c0_i32_1 = arith.constant 0 : i32
    return %c0_i32, %c0_i32_0 : i32, i32
  }
  func.func @transform_5(%arg0: i32) -> (i32, i32) {
    %c0_i32 = arith.constant 0 : i32
    %c0_i32_0 = arith.constant 0 : i32
    %c0_i32_1 = arith.constant 0 : i32
    return %c0_i32, %c0_i32_0 : i32, i32
  }
  func.func @transform_6(%arg0: i32) -> (i32, i32) {
    %c0_i32 = arith.constant 0 : i32
    %c0_i32_0 = arith.constant 0 : i32
    %c0_i32_1 = arith.constant 0 : i32
    return %c0_i32, %c0_i32_0 : i32, i32
  }
  func.func @transform_7(%arg0: i32) -> (i32, i32) {
    %c0_i32 = arith.constant 0 : i32
    %c0_i32_0 = arith.constant 0 : i32
    %c0_i32_1 = arith.constant 0 : i32
    return %c0_i32, %c0_i32_0 : i32, i32
  }
  func.func @transform_8(%arg0: i32) -> (i32, i32) {
    %c0_i32 = arith.constant 0 : i32
    %c0_i32_0 = arith.constant 0 : i32
    %c0_i32_1 = arith.constant 0 : i32
    return %c0_i32, %c0_i32_0 : i32, i32
  }
}

</mosaic_0001>

<bundles_post_ra>
// kernel: tpu_custom_call.1
= control target key start
LH: loop header
LB: loop body
LE: loop exit
PB: predicated region body
PF: predicated region fallthrough
CT: control target
= control target key end

     0   :  { %13 = vsyncpa [#allocation3], 0  ;;  %s8131_s0 = inlined_call_operand.vmem [shape: f32[640,4], index: 0, kind: input, shape index: {}]   ;;  %s8132_s1 = inlined_call_operand.hbm [shape: f32[640,640], index: 1, kind: input, shape index: {}]   ;;  %s8133_s2 = inlined_call_operand.vmem [shape: f32[640,4], index: 2, kind: input, shape index: {}]   ;;  %s8134_s3 = inlined_call_operand.hbm [shape: f32[4,16], index: 3, kind: input, shape index: {}]   ;;  %s8135_s4 = inlined_call_operand.hbm [shape: f32[1,16], index: 4, kind: input, shape index: {}]   ;;  %s8136_s5 = inlined_call_operand.vmem [shape: f32[640,16], index: 5, kind: input, shape index: {}]   ;;  %s8137_s6 = inlined_call_operand.vmem [shape: f32[16,3], index: 6, kind: input, shape index: {}]   ;;  %s8138_s7 = inlined_call_operand.hbm [shape: f32[1,3], index: 7, kind: input, shape index: {}]   ;;  %s8139_s8 = inlined_call_operand.vmem [shape: f32[640,3], index: 8, kind: output, shape index: {}]  }
   0x1   :  { %14 = vsyncpa [#allocation5], 0  ;;  %s38_s29 = sshll.u32 %s8134_s3, 4  ;;  %s39_s29 = int_to_ptr.hbm [resolvable:$true] %s38_s29 }
   0x2   :  { %15 = vsyncpa [#allocation8], 0  ;;  %s5309_s30 = smov [#allocation4]   ;;  %s22_s12 = sshll.u32 %s8132_s1, 4  ;;  %s23_s12 = int_to_ptr.hbm [resolvable:$true] %s22_s12 }
   0x3   :  { %s40_s9 = sshll.u32 %s5309_s30, 4  ;;  %s5310_s13 = smov [#allocation2]   ;;  %s41_s9 = int_to_ptr.vmem [resolvable:$true] %s40_s9 }
   0x4   :  { %43 = dma.hbm_to_vmem [thread:$0]  %s39_s29, 64, %s41_s9, [#allocation5]  }
   0x5   :  { %s24_s14 = sshll.u32 %s5310_s13, 4  ;;  %s5311_s15 = smov 640   ;;  %s25_s14 = int_to_ptr.vmem [resolvable:$true] %s24_s14 }
   0x6   :  { %s5312_s16 = smov 40   ;;  %s49_s3 = sshll.u32 %s8135_s4, 4  ;;  %s50_s3 = int_to_ptr.hbm [resolvable:$true] %s49_s3 }
   0x7   :  { %30 = dma.hbm_to_vmem [thread:$0]  %s23_s12, 51200, %s25_s14, [#allocation3], %s5311_s15, %s5311_s15, %s5312_s16  }
   0x8   :  { %s5313_s19 = smov [#allocation6]   ;;  %s64_s1 = sshll.u32 %s8138_s7, 4  ;;  %s65_s1 = int_to_ptr.hbm [resolvable:$true] %s64_s1 }
   0x9   :  { %s51_s20 = sshll.u32 %s5313_s19, 4  ;;  %s5314_s23 = smov [#allocation7]   ;;  %s52_s20 = int_to_ptr.vmem [resolvable:$true] %s51_s20 }
   0xa   :  { %54 = dma.hbm_to_vmem [thread:$0]  %s50_s3, 16, %s52_s20, [#allocation5]  }
   0xb   :  { %s66_s24 = sshll.u32 %s5314_s23, 4  ;;  %s67_s24 = int_to_ptr.vmem [resolvable:$true] %s66_s24 }
   0xc   :  { %69 = dma.hbm_to_vmem [thread:$0]  %s65_s1, 16, %s67_s24, [#allocation8]  }
   0xd   :  { %5303 = dma.done.wait [#allocation3], 51200  }
   0xe   :  { %5304 = vsyncadd [#allocation3], 4294916096 }
   0xf   :  { %5305 = dma.done.wait [#allocation5], 80  }
  0x10   :  { %5306 = vsyncadd [#allocation5], 4294967216 }
  0x11   :  { %5307 = dma.done.wait [#allocation8], 16  }
  0x12   :  { %5308 = vsyncadd [#allocation8], 4294967280  ;;  %v501_v0 = vld [vmem:[%s8131_s0 + $0x78] sm:$0xff]  ;;  %v500_v9 = vld [vmem:[%s8131_s0 + $0x70] sm:$0xff]  ;;  %vm2257_vm0 = vcmask 1043456   ;;  %vm2016_vm1 = vcmask 31744  }
  0x13   :  { %v581_v1 = vld [vmem:[%s8133_s2 + $0x78] sm:$0xff]  ;;  %v580_v10 = vld [vmem:[%s8133_s2 + $0x70] sm:$0xff]  ;;  %v499_v20 = vld [vmem:[%s8131_s0 + $0x68] sm:$0xff]  ;;  %vm2760_vm2 = vcmask 130048   ;;  %vm4547_vm3 = vcmask 23552  }
  0x14   :  { %v517_v2 = vld [vmem:[%s8131_s0 + $0xf8] sm:$0xff]  ;;  %v661_v3 = vmul.f32 %v581_v1, %v501_v0  ;;  %v516_v11 = vld [vmem:[%s8131_s0 + $0xf0] sm:$0xff]  ;;  %v660_v12 = vmul.f32 %v580_v10, %v500_v9  ;;  %v579_v22 = vld [vmem:[%s8133_s2 + $0x68] sm:$0xff] }
  0x15   :  { %v597_v4 = vld [vmem:[%s8133_s2 + $0xf8] sm:$0xff]  ;;  %v596_v13 = vld [vmem:[%s8133_s2 + $0xf0] sm:$0xff]  ;;  %v515_v23 = vld [vmem:[%s8131_s0 + $0xe8] sm:$0xff]  ;;  %v659_v25 = vmul.f32 %v579_v22, %v499_v20 }
  0x16   :  { %v533_v5 = vld [vmem:[%s8131_s0 + $0x178] sm:$0xff]  ;;  %v677_v7 = vmul.f32 %v597_v4, %v517_v2  ;;  %726 = vmatpush.msra.mxu0 %v661_v3  ;;  %v532_v14 = vld [vmem:[%s8131_s0 + $0x170] sm:$0xff]  ;;  %v676_v16 = vmul.f32 %v596_v13, %v516_v11  ;;  %v595_v24 = vld [vmem:[%s8133_s2 + $0xe8] sm:$0xff] }
  0x17   :  { %v613_v6 = vld [vmem:[%s8133_s2 + $0x178] sm:$0xff]  ;;  %v612_v15 = vld [vmem:[%s8133_s2 + $0x170] sm:$0xff]  ;;  %v675_v26 = vmul.f32 %v595_v24, %v515_v23  ;;  %v531_v27 = vld [vmem:[%s8131_s0 + $0x168] sm:$0xff] }
  0x18   :  { %v693_v8 = vmul.f32 %v613_v6, %v533_v5  ;;  %983 = vmatpush.msra.mxu1 %v677_v7  ;;  %v692_v17 = vmul.f32 %v612_v15, %v532_v14  ;;  %v549_v18 = vld [vmem:[%s8131_s0 + $0x1f8] sm:$0xff]  ;;  %727 = vmatpush.msra.mxu0 %v660_v12  ;;  %v611_v28 = vld [vmem:[%s8133_s2 + $0x168] sm:$0xff]  ;;  %v548_v29 = vld [vmem:[%s8131_s0 + $0x1f0] sm:$0xff] }
  0x19   :  { %v629_v19 = vld [vmem:[%s8133_s2 + $0x1f8] sm:$0xff]  ;;  %v691_v30 = vmul.f32 %v611_v28, %v531_v27  ;;  %v628_v31 = vld [vmem:[%s8133_s2 + $0x1f0] sm:$0xff]  ;;  %v498_v32 = vld [vmem:[%s8131_s0 + $0x60] sm:$0xff] }
  0x1a   :  { %1240 = vmatpush.msra.mxu2 %v693_v8  ;;  %v709_v21 = vmul.f32 %v629_v19, %v549_v18  ;;  %984 = vmatpush.msra.mxu1 %v676_v16  ;;  %v578_v33 = vld [vmem:[%s8133_s2 + $0x60] sm:$0xff]  ;;  %v708_v34 = vmul.f32 %v628_v31, %v548_v29  ;;  %v547_v41 = vld [vmem:[%s8131_s0 + $0x1e8] sm:$0xff]  ;;  %v497_v45 = vld [vmem:[%s8131_s0 + $0x58] sm:$0xff] }
  0x1b   :  { %728 = vmatpush.msra.mxu0 %v659_v25  ;;  %v658_v35 = vmul.f32 %v578_v33, %v498_v32  ;;  %v514_v36 = vld [vmem:[%s8131_s0 + $0xe0] sm:$0xff]  ;;  %v627_v42 = vld [vmem:[%s8133_s2 + $0x1e8] sm:$0xff]  ;;  %v577_v46 = vld [vmem:[%s8133_s2 + $0x58] sm:$0xff] }
  0x1c   :  { %1241 = vmatpush.msra.mxu2 %v692_v17  ;;  %1497 = vmatpush.msra.mxu3 %v709_v21  ;;  %v594_v37 = vld [vmem:[%s8133_s2 + $0xe0] sm:$0xff]  ;;  %v707_v44 = vmul.f32 %v627_v42, %v547_v41  ;;  %v513_v47 = vld [vmem:[%s8131_s0 + $0xd8] sm:$0xff]  ;;  %v657_v48 = vmul.f32 %v577_v46, %v497_v45  ;;  %v496_v56 = vld [vmem:[%s8131_s0 + $0x50] sm:$0xff] }
  0x1d   :  { %985 = vmatpush.msra.mxu1 %v675_v26  ;;  %v530_v38 = vld [vmem:[%s8131_s0 + $0x160] sm:$0xff]  ;;  %v674_v39 = vmul.f32 %v594_v37, %v514_v36  ;;  %729 = vmatpush.msra.mxu0 %v658_v35  ;;  %v593_v49 = vld [vmem:[%s8133_s2 + $0xd8] sm:$0xff]  ;;  %v576_v58 = vld [vmem:[%s8133_s2 + $0x50] sm:$0xff] }
  0x1e   :  { %1242 = vmatpush.msra.mxu2 %v691_v30  ;;  %v610_v40 = vld [vmem:[%s8133_s2 + $0x160] sm:$0xff]  ;;  %1498 = vmatpush.msra.mxu3 %v708_v34  ;;  %v529_v50 = vld [vmem:[%s8131_s0 + $0x158] sm:$0xff]  ;;  %v673_v52 = vmul.f32 %v593_v49, %v513_v47  ;;  %v512_v59 = vld [vmem:[%s8131_s0 + $0xd0] sm:$0xff]  ;;  %v656_v61 = vmul.f32 %v576_v58, %v496_v56 }
  0x1f   :  { %v690_v43 = vmul.f32 %v610_v40, %v530_v38  ;;  %986 = vmatpush.msra.mxu1 %v674_v39  ;;  %v609_v51 = vld [vmem:[%s8133_s2 + $0x158] sm:$0xff]  ;;  %v546_v54 = vld [vmem:[%s8131_s0 + $0x1e0] sm:$0xff]  ;;  %730 = vmatpush.msra.mxu0 %v657_v48  ;;  %v592_v60 = vld [vmem:[%s8133_s2 + $0xd0] sm:$0xff] }
  0x20   :  { %1499 = vmatpush.msra.mxu3 %v707_v44  ;;  %v689_v53 = vmul.f32 %v609_v51, %v529_v50  ;;  %v626_v55 = vld [vmem:[%s8133_s2 + $0x1e0] sm:$0xff]  ;;  %v672_v62 = vmul.f32 %v592_v60, %v512_v59  ;;  %v528_v63 = vld [vmem:[%s8131_s0 + $0x150] sm:$0xff]  ;;  %v545_v1 = vld [vmem:[%s8131_s0 + $0x1d8] sm:$0xff] }
  0x21   :  { %1243 = vmatpush.msra.mxu2 %v690_v43  ;;  %v706_v57 = vmul.f32 %v626_v55, %v546_v54  ;;  %987 = vmatpush.msra.mxu1 %v673_v52  ;;  %v608_v0 = vld [vmem:[%s8133_s2 + $0x150] sm:$0xff]  ;;  %v625_v3 = vld [vmem:[%s8133_s2 + $0x1d8] sm:$0xff]  ;;  %v495_v4 = vld [vmem:[%s8131_s0 + $0x48] sm:$0xff] }
  0x22   :  { %v688_v2 = vmul.f32 %v608_v0, %v528_v63  ;;  %v575_v5 = vld [vmem:[%s8133_s2 + $0x48] sm:$0xff]  ;;  %731 = vmatpush.msra.mxu0 %v656_v61  ;;  %v705_v6 = vmul.f32 %v625_v3, %v545_v1  ;;  %v544_v13 = vld [vmem:[%s8131_s0 + $0x1d0] sm:$0xff]  ;;  %v494_v17 = vld [vmem:[%s8131_s0 + $0x40] sm:$0xff] }
  0x23   :  { %1244 = vmatpush.msra.mxu2 %v689_v53  ;;  %1500 = vmatpush.msra.mxu3 %v706_v57  ;;  %v655_v7 = vmul.f32 %v575_v5, %v495_v4  ;;  %v511_v8 = vld [vmem:[%s8131_s0 + $0xc8] sm:$0xff]  ;;  %v624_v14 = vld [vmem:[%s8133_s2 + $0x1d0] sm:$0xff]  ;;  %v574_v18 = vld [vmem:[%s8133_s2 + $0x40] sm:$0xff] }
  0x24   :  { %988 = vmatpush.msra.mxu1 %v672_v62  ;;  %v591_v9 = vld [vmem:[%s8133_s2 + $0xc8] sm:$0xff]  ;;  %v704_v16 = vmul.f32 %v624_v14, %v544_v13  ;;  %v510_v19 = vld [vmem:[%s8131_s0 + $0xc0] sm:$0xff]  ;;  %v654_v20 = vmul.f32 %v574_v18, %v494_v17  ;;  %v493_v28 = vld [vmem:[%s8131_s0 + $0x38] sm:$0xff] }
  0x25   :  { %v527_v10 = vld [vmem:[%s8131_s0 + $0x148] sm:$0xff]  ;;  %1245 = vmatpush.msra.mxu2 %v688_v2  ;;  %v671_v11 = vmul.f32 %v591_v9, %v511_v8  ;;  %1501 = vmatpush.msra.mxu3 %v705_v6  ;;  %v590_v21 = vld [vmem:[%s8133_s2 + $0xc0] sm:$0xff]  ;;  %v573_v30 = vld [vmem:[%s8133_s2 + $0x38] sm:$0xff] }
  0x26   :  { %v607_v12 = vld [vmem:[%s8133_s2 + $0x148] sm:$0xff]  ;;  %732 = vmatpush.msra.mxu0 %v655_v7  ;;  %v526_v22 = vld [vmem:[%s8131_s0 + $0x140] sm:$0xff]  ;;  %v670_v24 = vmul.f32 %v590_v21, %v510_v19  ;;  %v509_v31 = vld [vmem:[%s8131_s0 + $0xb8] sm:$0xff]  ;;  %v653_v33 = vmul.f32 %v573_v30, %v493_v28 }
  0x27   :  { %v687_v15 = vmul.f32 %v607_v12, %v527_v10  ;;  %989 = vmatpush.msra.mxu1 %v671_v11  ;;  %v606_v23 = vld [vmem:[%s8133_s2 + $0x140] sm:$0xff]  ;;  %1502 = vmatpush.msra.mxu3 %v704_v16  ;;  %v543_v26 = vld [vmem:[%s8131_s0 + $0x1c8] sm:$0xff]  ;;  %v589_v32 = vld [vmem:[%s8133_s2 + $0xb8] sm:$0xff] }
  0x28   :  { %v686_v25 = vmul.f32 %v606_v23, %v526_v22  ;;  %v623_v27 = vld [vmem:[%s8133_s2 + $0x1c8] sm:$0xff]  ;;  %733 = vmatpush.msra.mxu0 %v654_v20  ;;  %v669_v34 = vmul.f32 %v589_v32, %v509_v31  ;;  %v525_v35 = vld [vmem:[%s8131_s0 + $0x138] sm:$0xff]  ;;  %v542_v37 = vld [vmem:[%s8131_s0 + $0x1c0] sm:$0xff] }
  0x29   :  { %1246 = vmatpush.msra.mxu2 %v687_v15  ;;  %v703_v29 = vmul.f32 %v623_v27, %v543_v26  ;;  %990 = vmatpush.msra.mxu1 %v670_v24  ;;  %v605_v36 = vld [vmem:[%s8133_s2 + $0x138] sm:$0xff]  ;;  %v622_v39 = vld [vmem:[%s8133_s2 + $0x1c0] sm:$0xff]  ;;  %v492_v40 = vld [vmem:[%s8131_s0 + $0x30] sm:$0xff] }
  0x2a   :  { %v685_v38 = vmul.f32 %v605_v36, %v525_v35  ;;  %v572_v41 = vld [vmem:[%s8133_s2 + $0x30] sm:$0xff]  ;;  %734 = vmatpush.msra.mxu0 %v653_v33  ;;  %v702_v42 = vmul.f32 %v622_v39, %v542_v37  ;;  %v541_v49 = vld [vmem:[%s8131_s0 + $0x1b8] sm:$0xff]  ;;  %v491_v53 = vld [vmem:[%s8131_s0 + $0x28] sm:$0xff] }
  0x2b   :  { %1247 = vmatpush.msra.mxu2 %v686_v25  ;;  %1503 = vmatpush.msra.mxu3 %v703_v29  ;;  %v652_v43 = vmul.f32 %v572_v41, %v492_v40  ;;  %v508_v44 = vld [vmem:[%s8131_s0 + $0xb0] sm:$0xff]  ;;  %v621_v50 = vld [vmem:[%s8133_s2 + $0x1b8] sm:$0xff]  ;;  %v571_v54 = vld [vmem:[%s8133_s2 + $0x28] sm:$0xff] }
  0x2c   :  { %991 = vmatpush.msra.mxu1 %v669_v34  ;;  %v588_v45 = vld [vmem:[%s8133_s2 + $0xb0] sm:$0xff]  ;;  %v701_v52 = vmul.f32 %v621_v50, %v541_v49  ;;  %v507_v55 = vld [vmem:[%s8131_s0 + $0xa8] sm:$0xff]  ;;  %v651_v56 = vmul.f32 %v571_v54, %v491_v53  ;;  %v490_v0 = vld [vmem:[%s8131_s0 + $0x20] sm:$0xff] }
  0x2d   :  { %v524_v46 = vld [vmem:[%s8131_s0 + $0x130] sm:$0xff]  ;;  %1248 = vmatpush.msra.mxu2 %v685_v38  ;;  %v668_v47 = vmul.f32 %v588_v45, %v508_v44  ;;  %1504 = vmatpush.msra.mxu3 %v702_v42  ;;  %v587_v57 = vld [vmem:[%s8133_s2 + $0xa8] sm:$0xff]  ;;  %v570_v2 = vld [vmem:[%s8133_s2 + $0x20] sm:$0xff] }
  0x2e   :  { %v604_v48 = vld [vmem:[%s8133_s2 + $0x130] sm:$0xff]  ;;  %735 = vmatpush.msra.mxu0 %v652_v43  ;;  %v523_v58 = vld [vmem:[%s8131_s0 + $0x128] sm:$0xff]  ;;  %v667_v60 = vmul.f32 %v587_v57, %v507_v55  ;;  %v506_v3 = vld [vmem:[%s8131_s0 + $0xa0] sm:$0xff]  ;;  %v650_v5 = vmul.f32 %v570_v2, %v490_v0 }
  0x2f   :  { %v684_v51 = vmul.f32 %v604_v48, %v524_v46  ;;  %992 = vmatpush.msra.mxu1 %v668_v47  ;;  %v603_v59 = vld [vmem:[%s8133_s2 + $0x128] sm:$0xff]  ;;  %1505 = vmatpush.msra.mxu3 %v701_v52  ;;  %v540_v62 = vld [vmem:[%s8131_s0 + $0x1b0] sm:$0xff]  ;;  %v586_v4 = vld [vmem:[%s8133_s2 + $0xa0] sm:$0xff] }
  0x30   :  { %v683_v61 = vmul.f32 %v603_v59, %v523_v58  ;;  %v620_v63 = vld [vmem:[%s8133_s2 + $0x1b0] sm:$0xff]  ;;  %736 = vmatpush.msra.mxu0 %v651_v56  ;;  %v666_v6 = vmul.f32 %v586_v4, %v506_v3  ;;  %v522_v7 = vld [vmem:[%s8131_s0 + $0x120] sm:$0xff]  ;;  %v539_v9 = vld [vmem:[%s8131_s0 + $0x1a8] sm:$0xff] }
  0x31   :  { %1249 = vmatpush.msra.mxu2 %v684_v51  ;;  %v700_v1 = vmul.f32 %v620_v63, %v540_v62  ;;  %993 = vmatpush.msra.mxu1 %v667_v60  ;;  %v602_v8 = vld [vmem:[%s8133_s2 + $0x120] sm:$0xff]  ;;  %v619_v11 = vld [vmem:[%s8133_s2 + $0x1a8] sm:$0xff]  ;;  %v489_v12 = vld [vmem:[%s8131_s0 + $0x18] sm:$0xff] }
  0x32   :  { %v682_v10 = vmul.f32 %v602_v8, %v522_v7  ;;  %v569_v13 = vld [vmem:[%s8133_s2 + $0x18] sm:$0xff]  ;;  %737 = vmatpush.msra.mxu0 %v650_v5  ;;  %v699_v14 = vmul.f32 %v619_v11, %v539_v9  ;;  %v538_v21 = vld [vmem:[%s8131_s0 + $0x1a0] sm:$0xff]  ;;  %v488_v25 = vld [vmem:[%s8131_s0 + $0x10] sm:$0xff] }
  0x33   :  { %1250 = vmatpush.msra.mxu2 %v683_v61  ;;  %1506 = vmatpush.msra.mxu3 %v700_v1  ;;  %v649_v15 = vmul.f32 %v569_v13, %v489_v12  ;;  %v505_v16 = vld [vmem:[%s8131_s0 + $0x98] sm:$0xff]  ;;  %v618_v22 = vld [vmem:[%s8133_s2 + $0x1a0] sm:$0xff]  ;;  %v568_v26 = vld [vmem:[%s8133_s2 + $0x10] sm:$0xff] }
  0x34   :  { %994 = vmatpush.msra.mxu1 %v666_v6  ;;  %v585_v17 = vld [vmem:[%s8133_s2 + $0x98] sm:$0xff]  ;;  %v698_v24 = vmul.f32 %v618_v22, %v538_v21  ;;  %v504_v27 = vld [vmem:[%s8131_s0 + $0x90] sm:$0xff]  ;;  %v648_v28 = vmul.f32 %v568_v26, %v488_v25  ;;  %v487_v36 = vld [vmem:[%s8131_s0 + $0x8] sm:$0xff] }
  0x35   :  { %v521_v18 = vld [vmem:[%s8131_s0 + $0x118] sm:$0xff]  ;;  %1251 = vmatpush.msra.mxu2 %v682_v10  ;;  %v665_v19 = vmul.f32 %v585_v17, %v505_v16  ;;  %1507 = vmatpush.msra.mxu3 %v699_v14  ;;  %v584_v29 = vld [vmem:[%s8133_s2 + $0x90] sm:$0xff]  ;;  %v567_v38 = vld [vmem:[%s8133_s2 + $0x8] sm:$0xff] }
  0x36   :  { %v601_v20 = vld [vmem:[%s8133_s2 + $0x118] sm:$0xff]  ;;  %738 = vmatpush.msra.mxu0 %v649_v15  ;;  %v520_v30 = vld [vmem:[%s8131_s0 + $0x110] sm:$0xff]  ;;  %v664_v32 = vmul.f32 %v584_v29, %v504_v27  ;;  %v503_v39 = vld [vmem:[%s8131_s0 + $0x88] sm:$0xff]  ;;  %v647_v41 = vmul.f32 %v567_v38, %v487_v36 }
  0x37   :  { %v681_v23 = vmul.f32 %v601_v20, %v521_v18  ;;  %995 = vmatpush.msra.mxu1 %v665_v19  ;;  %v600_v31 = vld [vmem:[%s8133_s2 + $0x110] sm:$0xff]  ;;  %1508 = vmatpush.msra.mxu3 %v698_v24  ;;  %v537_v34 = vld [vmem:[%s8131_s0 + $0x198] sm:$0xff]  ;;  %v583_v40 = vld [vmem:[%s8133_s2 + $0x88] sm:$0xff] }
  0x38   :  { %v680_v33 = vmul.f32 %v600_v31, %v520_v30  ;;  %v617_v35 = vld [vmem:[%s8133_s2 + $0x198] sm:$0xff]  ;;  %739 = vmatpush.msra.mxu0 %v648_v28  ;;  %v663_v42 = vmul.f32 %v583_v40, %v503_v39  ;;  %v519_v43 = vld [vmem:[%s8131_s0 + $0x108] sm:$0xff]  ;;  %v536_v45 = vld [vmem:[%s8131_s0 + $0x190] sm:$0xff] }
  0x39   :  { %1252 = vmatpush.msra.mxu2 %v681_v23  ;;  %v697_v37 = vmul.f32 %v617_v35, %v537_v34  ;;  %996 = vmatpush.msra.mxu1 %v664_v32  ;;  %v599_v44 = vld [vmem:[%s8133_s2 + $0x108] sm:$0xff]  ;;  %v616_v47 = vld [vmem:[%s8133_s2 + $0x190] sm:$0xff]  ;;  %v486_v48 = vld [vmem:[%s8131_s0] sm:$0xff] }
  0x3a   :  { %v679_v46 = vmul.f32 %v599_v44, %v519_v43  ;;  %v566_v49 = vld [vmem:[%s8133_s2] sm:$0xff]  ;;  %740 = vmatpush.msra.mxu0 %v647_v41  ;;  %v696_v50 = vmul.f32 %v616_v47, %v536_v45  ;;  %v535_v57 = vld [vmem:[%s8131_s0 + $0x188] sm:$0xff]  ;;  %v88_v63 = vld [vmem:[#allocation2 + $0x10] sm:$0xff] }
  0x3b   :  { %1253 = vmatpush.msra.mxu2 %v680_v33  ;;  %1509 = vmatpush.msra.mxu3 %v697_v37  ;;  %v646_v51 = vmul.f32 %v566_v49, %v486_v48  ;;  %v502_v52 = vld [vmem:[%s8131_s0 + $0x80] sm:$0xff]  ;;  %v615_v58 = vld [vmem:[%s8133_s2 + $0x188] sm:$0xff]  ;;  %v89_v3 = vld [vmem:[#allocation2 + $0x18] sm:$0xff] }
  0x3c   :  { %997 = vmatpush.msra.mxu1 %v663_v42  ;;  %v582_v53 = vld [vmem:[%s8133_s2 + $0x80] sm:$0xff]  ;;  %v695_v60 = vmul.f32 %v615_v58, %v535_v57  ;;  %v87_v62 = vld [vmem:[#allocation2 + $0x8] sm:$0xff]  ;;  %v92_v5 = vld [vmem:[#allocation2 + $0x30] sm:$0xff] }
  0x3d   :  { %v518_v54 = vld [vmem:[%s8131_s0 + $0x100] sm:$0xff]  ;;  %1254 = vmatpush.msra.mxu2 %v679_v46  ;;  %v662_v55 = vmul.f32 %v582_v53, %v502_v52  ;;  %1510 = vmatpush.msra.mxu3 %v696_v50  ;;  %v91_v4 = vld [vmem:[#allocation2 + $0x28] sm:$0xff]  ;;  %v93_v6 = vld [vmem:[#allocation2 + $0x38] sm:$0xff] }
  0x3e   :  { %v598_v56 = vld [vmem:[%s8133_s2 + $0x100] sm:$0xff]  ;;  %741 = vmatpush.msra.mxu0 %v646_v51  ;;  %v96_v8 = vld [vmem:[#allocation2 + $0x50] sm:$0xff]  ;;  %v97_v9 = vld [vmem:[#allocation2 + $0x58] sm:$0xff] }
  0x3f   :  { %v678_v59 = vmul.f32 %v598_v56, %v518_v54  ;;  %v86_v61 = vld [vmem:[#allocation2] sm:$0xff]  ;;  %998 = vmatpush.msra.mxu1 %v662_v55  ;;  %1511 = vmatpush.msra.mxu3 %v695_v60  ;;  %v99_v11 = vld [vmem:[#allocation2 + $0x68] sm:$0xff]  ;;  %v101_v12 = vld [vmem:[#allocation2 + $0x78] sm:$0xff] }
  0x40   :  { %742 = vmatmul.f32.vlgmr.msra.gmra.mxu0 %v86_v61  ;;  %v534_v0 = vld [vmem:[%s8131_s0 + $0x180] sm:$0xff]  ;;  %999 = vmatmul.f32.vlgmr.msra.gmra.mxu1 %v87_v62  ;;  %v103_v14 = vld [vmem:[#allocation2 + $0x88] sm:$0xff]  ;;  %v104_v15 = vld [vmem:[#allocation2 + $0x90] sm:$0xff] }
  0x41   :  { %v614_v1 = vld [vmem:[%s8133_s2 + $0x180] sm:$0xff]  ;;  %1255 = vmatpush.msra.mxu2 %v678_v59  ;;  %v107_v17 = vld [vmem:[#allocation2 + $0xa8] sm:$0xff]  ;;  %v108_v18 = vld [vmem:[#allocation2 + $0xb0] sm:$0xff] }
  0x42   :  { %v694_v2 = vmul.f32 %v614_v1, %v534_v0  ;;  %1256 = vmatmul.f32.vlgmr.msra.gmra.mxu2 %v88_v63  ;;  %v94_v7 = vld [vmem:[#allocation2 + $0x40] sm:$0xff]  ;;  %v109_v19 = vld [vmem:[#allocation2 + $0xb8] sm:$0xff]  ;;  %v111_v20 = vld [vmem:[#allocation2 + $0xc8] sm:$0xff] }
  0x43   :  { %v98_v10 = vld [vmem:[#allocation2 + $0x60] sm:$0xff]  ;;  %v112_v21 = vld [vmem:[#allocation2 + $0xd0] sm:$0xff]  ;;  %v113_v22 = vld [vmem:[#allocation2 + $0xd8] sm:$0xff] }
  0x44   :  { %1512 = vmatpush.msra.mxu3 %v694_v2  ;;  %v102_v13 = vld [vmem:[#allocation2 + $0x80] sm:$0xff]  ;;  %v116_v24 = vld [vmem:[#allocation2 + $0xf0] sm:$0xff]  ;;  %v117_v25 = vld [vmem:[#allocation2 + $0xf8] sm:$0xff] }
  0x45   :  { %1513 = vmatmul.f32.vlgmr.msra.gmra.mxu3 %v89_v3  ;;  %v106_v16 = vld [vmem:[#allocation2 + $0xa0] sm:$0xff]  ;;  %v119_v27 = vld [vmem:[#allocation2 + $0x108] sm:$0xff]  ;;  %v121_v28 = vld [vmem:[#allocation2 + $0x118] sm:$0xff] }
  0x46   :  { %v114_v23 = vld [vmem:[#allocation2 + $0xe0] sm:$0xff]  ;;  %v123_v30 = vld [vmem:[#allocation2 + $0x128] sm:$0xff]  ;;  %v124_v31 = vld [vmem:[#allocation2 + $0x130] sm:$0xff] }
  0x47   :  { %v118_v26 = vld [vmem:[#allocation2 + $0x100] sm:$0xff]  ;;  %v127_v33 = vld [vmem:[#allocation2 + $0x148] sm:$0xff]  ;;  %v128_v34 = vld [vmem:[#allocation2 + $0x150] sm:$0xff] }
  0x48   :  { %745 = vmatmul.f32.gmra.mxu0 %v91_v4  ;;  %1002 = vmatmul.f32.gmra.mxu1 %v92_v5  ;;  %v122_v29 = vld [vmem:[#allocation2 + $0x120] sm:$0xff]  ;;  %v129_v35 = vld [vmem:[#allocation2 + $0x158] sm:$0xff]  ;;  %v131_v36 = vld [vmem:[#allocation2 + $0x168] sm:$0xff] }
  0x49   :  { %v126_v32 = vld [vmem:[#allocation2 + $0x140] sm:$0xff]  ;;  %v132_v37 = vld [vmem:[#allocation2 + $0x170] sm:$0xff]  ;;  %v133_v38 = vld [vmem:[#allocation2 + $0x178] sm:$0xff] }
  0x4a   :  { %1259 = vmatmul.f32.gmra.mxu2 %v93_v6  ;;  %v134_v39 = vld [vmem:[#allocation2 + $0x180] sm:$0xff]  ;;  %v136_v40 = vld [vmem:[#allocation2 + $0x190] sm:$0xff]  ;;  %v137_v41 = vld [vmem:[#allocation2 + $0x198] sm:$0xff] }
  0x4b   :  { %v138_v42 = vld [vmem:[#allocation2 + $0x1a0] sm:$0xff]  ;;  %v139_v43 = vld [vmem:[#allocation2 + $0x1a8] sm:$0xff]  ;;  %v141_v44 = vld [vmem:[#allocation2 + $0x1b8] sm:$0xff] }
  0x4c   :  { %v142_v45 = vld [vmem:[#allocation2 + $0x1c0] sm:$0xff]  ;;  %v143_v46 = vld [vmem:[#allocation2 + $0x1c8] sm:$0xff]  ;;  %v144_v47 = vld [vmem:[#allocation2 + $0x1d0] sm:$0xff] }
  0x4d   :  { %1516 = vmatmul.f32.gmra.mxu3 %v94_v7  ;;  %v146_v48 = vld [vmem:[#allocation2 + $0x1e0] sm:$0xff]  ;;  %v147_v49 = vld [vmem:[#allocation2 + $0x1e8] sm:$0xff]  ;;  %v148_v50 = vld [vmem:[#allocation2 + $0x1f0] sm:$0xff] }
  0x4e   :  { %v149_v51 = vld [vmem:[#allocation2 + $0x1f8] sm:$0xff]  ;;  %v151_v52 = vld [vmem:[#allocation2 + $0x208] sm:$0xff]  ;;  %v152_v53 = vld [vmem:[#allocation2 + $0x210] sm:$0xff] }
  0x4f   :  { %v153_v54 = vld [vmem:[#allocation2 + $0x218] sm:$0xff]  ;;  %v154_v55 = vld [vmem:[#allocation2 + $0x220] sm:$0xff]  ;;  %v156_v56 = vld [vmem:[#allocation2 + $0x230] sm:$0xff] }
  0x50   :  { %748 = vmatmul.f32.gmra.mxu0 %v96_v8  ;;  %1005 = vmatmul.f32.gmra.mxu1 %v97_v9  ;;  %v157_v57 = vld [vmem:[#allocation2 + $0x238] sm:$0xff]  ;;  %v158_v58 = vld [vmem:[#allocation2 + $0x240] sm:$0xff]  ;;  %v159_v59 = vld [vmem:[#allocation2 + $0x248] sm:$0xff] }
  0x51   :  { %v161_v60 = vld [vmem:[#allocation2 + $0x258] sm:$0xff]  ;;  %v162_v61 = vld [vmem:[#allocation2 + $0x260] sm:$0xff]  ;;  %v163_v62 = vld [vmem:[#allocation2 + $0x268] sm:$0xff] }
  0x52   :  { %1262 = vmatmul.f32.gmra.mxu2 %v98_v10  ;;  %v164_v63 = vld [vmem:[#allocation2 + $0x270] sm:$0xff]  ;;  %v166_v1 = vld [vmem:[#allocation2 + $0x280] sm:$0xff]  ;;  %v167_v3 = vld [vmem:[#allocation2 + $0x288] sm:$0xff] }
  0x53   :  { %v168_v4 = vld [vmem:[#allocation2 + $0x290] sm:$0xff]  ;;  %v169_v5 = vld [vmem:[#allocation2 + $0x298] sm:$0xff]  ;;  %v171_v9 = vld [vmem:[#allocation2 + $0x2a8] sm:$0xff] }
  0x55   :  { %1519 = vmatmul.f32.gmra.mxu3 %v99_v11 }
  0x58   :  { %751 = vmatmul.f32.gmra.mxu0 %v101_v12  ;;  %1008 = vmatmul.f32.gmra.mxu1 %v102_v13  ;;  %v172_v13 = vld [vmem:[#allocation2 + $0x2b0] sm:$0xff] }
  0x5a   :  { %1265 = vmatmul.f32.gmra.mxu2 %v103_v14  ;;  %v173_v14 = vld [vmem:[#allocation2 + $0x2b8] sm:$0xff] }
  0x5d   :  { %1522 = vmatmul.f32.gmra.mxu3 %v104_v15 }
  0x60   :  { %754 = vmatmul.f32.gmra.mxu0 %v106_v16  ;;  %1011 = vmatmul.f32.gmra.mxu1 %v107_v17  ;;  %v174_v16 = vld [vmem:[#allocation2 + $0x2c0] sm:$0xff] }
  0x62   :  { %1268 = vmatmul.f32.gmra.mxu2 %v108_v18 }
  0x65   :  { %1525 = vmatmul.f32.gmra.mxu3 %v109_v19 }
  0x68   :  { %757 = vmatmul.f32.gmra.mxu0 %v111_v20  ;;  %1014 = vmatmul.f32.gmra.mxu1 %v112_v21  ;;  %v176_v20 = vld [vmem:[#allocation2 + $0x2d0] sm:$0xff] }
  0x6a   :  { %1271 = vmatmul.f32.gmra.mxu2 %v113_v22 }
  0x6d   :  { %1528 = vmatmul.f32.gmra.mxu3 %v114_v23 }
  0x70   :  { %760 = vmatmul.f32.gmra.mxu0 %v116_v24  ;;  %1017 = vmatmul.f32.gmra.mxu1 %v117_v25  ;;  %v177_v24 = vld [vmem:[#allocation2 + $0x2d8] sm:$0xff]  ;;  %v178_v25 = vld [vmem:[#allocation2 + $0x2e0] sm:$0xff] }
  0x72   :  { %1274 = vmatmul.f32.gmra.mxu2 %v118_v26 }
  0x75   :  { %1531 = vmatmul.f32.gmra.mxu3 %v119_v27  ;;  %v179_v27 = vld [vmem:[#allocation2 + $0x2e8] sm:$0xff] }
  0x78   :  { %763 = vmatmul.f32.gmra.mxu0 %v121_v28  ;;  %1020 = vmatmul.f32.gmra.mxu1 %v122_v29 }
  0x7a   :  { %1277 = vmatmul.f32.gmra.mxu2 %v123_v30 }
  0x7d   :  { %1534 = vmatmul.f32.gmra.mxu3 %v124_v31  ;;  %v181_v31 = vld [vmem:[#allocation2 + $0x2f8] sm:$0xff] }
  0x80   :  { %766 = vmatmul.f32.gmra.mxu0 %v126_v32  ;;  %1023 = vmatmul.f32.gmra.mxu1 %v127_v33 }
  0x82   :  { %1280 = vmatmul.f32.gmra.mxu2 %v128_v34 }
  0x85   :  { %1537 = vmatmul.f32.gmra.mxu3 %v129_v35  ;;  %v182_v35 = vld [vmem:[#allocation2 + $0x300] sm:$0xff] }
  0x88   :  { %769 = vmatmul.f32.gmra.mxu0 %v131_v36  ;;  %1026 = vmatmul.f32.gmra.mxu1 %v132_v37  ;;  %v183_v36 = vld [vmem:[#allocation2 + $0x308] sm:$0xff] }
  0x8a   :  { %1283 = vmatmul.f32.gmra.mxu2 %v133_v38  ;;  %v184_v38 = vld [vmem:[#allocation2 + $0x310] sm:$0xff] }
  0x8d   :  { %1540 = vmatmul.f32.gmra.mxu3 %v134_v39 }
  0x90   :  { %772 = vmatmul.f32.gmra.mxu0 %v136_v40  ;;  %1029 = vmatmul.f32.gmra.mxu1 %v137_v41 }
  0x92   :  { %1286 = vmatmul.f32.gmra.mxu2 %v138_v42  ;;  %v186_v42 = vld [vmem:[#allocation2 + $0x320] sm:$0xff] }
  0x95   :  { %1543 = vmatmul.f32.gmra.mxu3 %v139_v43 }
  0x98   :  { %775 = vmatmul.f32.gmra.mxu0 %v141_v44  ;;  %1032 = vmatmul.f32.gmra.mxu1 %v142_v45 }
  0x9a   :  { %1289 = vmatmul.f32.gmra.mxu2 %v143_v46  ;;  %v187_v46 = vld [vmem:[#allocation2 + $0x328] sm:$0xff] }
  0x9d   :  { %1546 = vmatmul.f32.gmra.mxu3 %v144_v47  ;;  %v188_v47 = vld [vmem:[#allocation2 + $0x330] sm:$0xff] }
  0xa0   :  { %778 = vmatmul.f32.gmra.mxu0 %v146_v48  ;;  %1035 = vmatmul.f32.gmra.mxu1 %v147_v49  ;;  %v189_v49 = vld [vmem:[#allocation2 + $0x338] sm:$0xff] }
  0xa2   :  { %1292 = vmatmul.f32.gmra.mxu2 %v148_v50 }
  0xa5   :  { %1549 = vmatmul.f32.gmra.mxu3 %v149_v51 }
  0xa8   :  { %781 = vmatmul.f32.gmra.mxu0 %v151_v52  ;;  %1038 = vmatmul.f32.gmra.mxu1 %v152_v53  ;;  %v191_v53 = vld [vmem:[#allocation2 + $0x348] sm:$0xff] }
  0xaa   :  { %1295 = vmatmul.f32.gmra.mxu2 %v153_v54 }
  0xad   :  { %1552 = vmatmul.f32.gmra.mxu3 %v154_v55 }
  0xb0   :  { %784 = vmatmul.f32.gmra.mxu0 %v156_v56  ;;  %1041 = vmatmul.f32.gmra.mxu1 %v157_v57  ;;  %v192_v57 = vld [vmem:[#allocation2 + $0x350] sm:$0xff] }
  0xb2   :  { %1298 = vmatmul.f32.gmra.mxu2 %v158_v58  ;;  %v193_v58 = vld [vmem:[#allocation2 + $0x358] sm:$0xff] }
  0xb5   :  { %1555 = vmatmul.f32.gmra.mxu3 %v159_v59 }
  0xb8   :  { %787 = vmatmul.f32.gmra.mxu0 %v161_v60  ;;  %1044 = vmatmul.f32.gmra.mxu1 %v162_v61  ;;  %v194_v60 = vld [vmem:[#allocation2 + $0x360] sm:$0xff] }
  0xba   :  { %1301 = vmatmul.f32.gmra.mxu2 %v163_v62 }
  0xbd   :  { %1558 = vmatmul.f32.gmra.mxu3 %v164_v63  ;;  %v743_v0 = vpop.f32.mrf.mxu0  ;;  %v1000_v2 = vpop.f32.mrf.mxu1 }
  0xbe   :  { %v1001_v6 = vadd.f32 %v1000_v2, %v743_v0  ;;  %v196_v0 = vld [vmem:[#allocation2 + $0x370] sm:$0xff] }
  0xc0   :  { %790 = vmatmul.f32.gmra.mxu0 %v166_v1  ;;  %1047 = vmatmul.f32.gmra.mxu1 %v167_v3 }
  0xc2   :  { %1304 = vmatmul.f32.gmra.mxu2 %v168_v4  ;;  %v197_v4 = vld [vmem:[#allocation2 + $0x378] sm:$0xff] }
  0xc5   :  { %1561 = vmatmul.f32.gmra.mxu3 %v169_v5  ;;  %v1257_v7 = vpop.f32.mrf.mxu2  ;;  %v746_v8 = vpop.f32.mrf.mxu0  ;;  %v198_v5 = vld [vmem:[#allocation2 + $0x380] sm:$0xff] }
  0xc6   :  { %v1258_v10 = vadd.f32 %v1257_v7, %v1001_v6  ;;  %v1003_v11 = vpop.f32.mrf.mxu1  ;;  %v199_v7 = vld [vmem:[#allocation2 + $0x388] sm:$0xff] }
  0xc7   :  { %v1004_v17 = vadd.f32 %v1003_v11, %v746_v8  ;;  %v201_v11 = vld [vmem:[#allocation2 + $0x398] sm:$0xff] }
  0xc8   :  { %v1514_v12 = vpop.f32.mrf.mxu3  ;;  %793 = vmatmul.f32.gmra.mxu0 %v171_v9  ;;  %1050 = vmatmul.f32.gmra.mxu1 %v172_v13 }
  0xc9   :  { %v5756_v15 = vadd.f32 %v1514_v12, %v1258_v10 }
  0xca   :  { %1307 = vmatmul.f32.gmra.mxu2 %v173_v14 }
  0xcd   :  { %1564 = vmatmul.f32.gmra.mxu3 %v174_v16  ;;  %v1260_v18 = vpop.f32.mrf.mxu2  ;;  %v749_v19 = vpop.f32.mrf.mxu0  ;;  %v202_v16 = vld [vmem:[#allocation2 + $0x3a0] sm:$0xff] }
  0xce   :  { %v1261_v21 = vadd.f32 %v1260_v18, %v1004_v17  ;;  %v1006_v22 = vpop.f32.mrf.mxu1  ;;  %v203_v17 = vld [vmem:[#allocation2 + $0x3a8] sm:$0xff] }
  0xcf   :  { %v1007_v28 = vadd.f32 %v1006_v22, %v749_v19  ;;  %v204_v19 = vld [vmem:[#allocation2 + $0x3b0] sm:$0xff] }
  0xd0   :  { %v1517_v23 = vpop.f32.mrf.mxu3  ;;  %796 = vmatmul.f32.gmra.mxu0 %v176_v20  ;;  %1053 = vmatmul.f32.gmra.mxu1 %v177_v24 }
  0xd1   :  { %v5758_v26 = vadd.f32 %v1517_v23, %v1261_v21  ;;  %v206_v23 = vld [vmem:[#allocation2 + $0x3c0] sm:$0xff] }
  0xd2   :  { %1310 = vmatmul.f32.gmra.mxu2 %v178_v25 }
  0xd5   :  { %1567 = vmatmul.f32.gmra.mxu3 %v179_v27  ;;  %v1263_v29 = vpop.f32.mrf.mxu2  ;;  %v752_v30 = vpop.f32.mrf.mxu0 }
  0xd6   :  { %v1264_v32 = vadd.f32 %v1263_v29, %v1007_v28  ;;  %v1009_v33 = vpop.f32.mrf.mxu1  ;;  %v207_v28 = vld [vmem:[#allocation2 + $0x3c8] sm:$0xff]  ;;  %v208_v29 = vld [vmem:[#allocation2 + $0x3d0] sm:$0xff] }
  0xd7   :  { %v1010_v39 = vadd.f32 %v1009_v33, %v752_v30 }
  0xd8   :  { %v1520_v34 = vpop.f32.mrf.mxu3  ;;  %799 = vmatmul.f32.gmra.mxu0 %v181_v31  ;;  %1056 = vmatmul.f32.gmra.mxu1 %v182_v35  ;;  %v209_v31 = vld [vmem:[#allocation2 + $0x3d8] sm:$0xff]  ;;  %v211_v35 = vld [vmem:[#allocation2 + $0x3e8] sm:$0xff] }
  0xd9   :  { %v5760_v37 = vadd.f32 %v1520_v34, %v1264_v32 }
  0xda   :  { %1313 = vmatmul.f32.gmra.mxu2 %v183_v36 }
  0xdd   :  { %1570 = vmatmul.f32.gmra.mxu3 %v184_v38  ;;  %v1266_v40 = vpop.f32.mrf.mxu2  ;;  %v755_v41 = vpop.f32.mrf.mxu0 }
  0xde   :  { %v1267_v43 = vadd.f32 %v1266_v40, %v1010_v39  ;;  %v1012_v44 = vpop.f32.mrf.mxu1  ;;  %v212_v40 = vld [vmem:[#allocation2 + $0x3f0] sm:$0xff] }
  0xdf   :  { %v1013_v50 = vadd.f32 %v1012_v44, %v755_v41  ;;  %v213_v41 = vld [vmem:[#allocation2 + $0x3f8] sm:$0xff] }
  0xe0   :  { %v1523_v45 = vpop.f32.mrf.mxu3  ;;  %802 = vmatmul.f32.gmra.mxu0 %v186_v42  ;;  %1059 = vmatmul.f32.gmra.mxu1 %v187_v46 }
  0xe1   :  { %v5762_v48 = vadd.f32 %v1523_v45, %v1267_v43  ;;  %v214_v43 = vld [vmem:[#allocation2 + $0x400] sm:$0xff] }
  0xe2   :  { %1316 = vmatmul.f32.gmra.mxu2 %v188_v47  ;;  %v216_v47 = vld [vmem:[#allocation2 + $0x410] sm:$0xff] }
  0xe5   :  { %1573 = vmatmul.f32.gmra.mxu3 %v189_v49  ;;  %v1269_v51 = vpop.f32.mrf.mxu2  ;;  %v758_v52 = vpop.f32.mrf.mxu0 }
  0xe6   :  { %v1270_v54 = vadd.f32 %v1269_v51, %v1013_v50  ;;  %v1015_v55 = vpop.f32.mrf.mxu1 }
  0xe7   :  { %v1016_v61 = vadd.f32 %v1015_v55, %v758_v52  ;;  %v217_v52 = vld [vmem:[#allocation2 + $0x418] sm:$0xff]  ;;  %v219_v55 = vld [vmem:[#allocation2 + $0x428] sm:$0xff] }
  0xe8   :  { %v1526_v56 = vpop.f32.mrf.mxu3  ;;  %805 = vmatmul.f32.gmra.mxu0 %v191_v53  ;;  %1062 = vmatmul.f32.gmra.mxu1 %v192_v57  ;;  %v218_v53 = vld [vmem:[#allocation2 + $0x420] sm:$0xff] }
  0xe9   :  { %v5764_v59 = vadd.f32 %v1526_v56, %v1270_v54 }
  0xea   :  { %1319 = vmatmul.f32.gmra.mxu2 %v193_v58 }
  0xed   :  { %1576 = vmatmul.f32.gmra.mxu3 %v194_v60  ;;  %v1272_v62 = vpop.f32.mrf.mxu2  ;;  %v761_v63 = vpop.f32.mrf.mxu0  ;;  %v221_v60 = vld [vmem:[#allocation2 + $0x438] sm:$0xff] }
  0xee   :  { %v1273_v1 = vadd.f32 %v1272_v62, %v1016_v61  ;;  %v1018_v2 = vpop.f32.mrf.mxu1 }
  0xef   :  { %v1019_v8 = vadd.f32 %v1018_v2, %v761_v63 }
  0xf0   :  { %v1529_v3 = vpop.f32.mrf.mxu3  ;;  %808 = vmatmul.f32.gmra.mxu0 %v196_v0  ;;  %1065 = vmatmul.f32.gmra.mxu1 %v197_v4  ;;  %v222_v0 = vld [vmem:[#allocation2 + $0x440] sm:$0xff] }
  0xf1   :  { %v5766_v6 = vadd.f32 %v1529_v3, %v1273_v1  ;;  %v223_v1 = vld [vmem:[#allocation2 + $0x448] sm:$0xff]  ;;  %v224_v3 = vld [vmem:[#allocation2 + $0x450] sm:$0xff] }
  0xf2   :  { %1322 = vmatmul.f32.gmra.mxu2 %v198_v5 }
  0xf5   :  { %1579 = vmatmul.f32.gmra.mxu3 %v199_v7  ;;  %v1275_v9 = vpop.f32.mrf.mxu2  ;;  %v764_v10 = vpop.f32.mrf.mxu0 }
  0xf6   :  { %v1276_v12 = vadd.f32 %v1275_v9, %v1019_v8  ;;  %v1021_v13 = vpop.f32.mrf.mxu1  ;;  %v226_v8 = vld [vmem:[#allocation2 + $0x460] sm:$0xff] }
  0xf7   :  { %v1022_v20 = vadd.f32 %v1021_v13, %v764_v10  ;;  %v228_v13 = vld [vmem:[#allocation2 + $0x470] sm:$0xff] }
  0xf8   :  { %v1532_v14 = vpop.f32.mrf.mxu3  ;;  %811 = vmatmul.f32.gmra.mxu0 %v201_v11  ;;  %1068 = vmatmul.f32.gmra.mxu1 %v202_v16  ;;  %v229_v16 = vld [vmem:[#allocation2 + $0x478] sm:$0xff] }
  0xf9   :  { %v5768_v18 = vadd.f32 %v1532_v14, %v1276_v12  ;;  %v227_v12 = vld [vmem:[#allocation2 + $0x468] sm:$0xff] }
  0xfa   :  { %1325 = vmatmul.f32.gmra.mxu2 %v203_v17 }
  0xfd   :  { %1582 = vmatmul.f32.gmra.mxu3 %v204_v19  ;;  %v1278_v21 = vpop.f32.mrf.mxu2  ;;  %v767_v22 = vpop.f32.mrf.mxu0 }
  0xfe   :  { %v1279_v24 = vadd.f32 %v1278_v21, %v1022_v20  ;;  %v1024_v25 = vpop.f32.mrf.mxu1  ;;  %v231_v21 = vld [vmem:[#allocation2 + $0x488] sm:$0xff] }
  0xff   :  { %v1025_v32 = vadd.f32 %v1024_v25, %v767_v22  ;;  %v232_v25 = vld [vmem:[#allocation2 + $0x490] sm:$0xff] }
 0x100   :  { %v1535_v27 = vpop.f32.mrf.mxu3  ;;  %814 = vmatmul.f32.gmra.mxu0 %v206_v23  ;;  %1071 = vmatmul.f32.gmra.mxu1 %v207_v28 }
 0x101   :  { %v5770_v30 = vadd.f32 %v1535_v27, %v1279_v24  ;;  %v233_v27 = vld [vmem:[#allocation2 + $0x498] sm:$0xff] }
 0x102   :  { %1328 = vmatmul.f32.gmra.mxu2 %v208_v29  ;;  %v234_v29 = vld [vmem:[#allocation2 + $0x4a0] sm:$0xff] }
 0x105   :  { %1585 = vmatmul.f32.gmra.mxu3 %v209_v31  ;;  %v1281_v33 = vpop.f32.mrf.mxu2  ;;  %v770_v34 = vpop.f32.mrf.mxu0 }
 0x106   :  { %v1282_v36 = vadd.f32 %v1281_v33, %v1025_v32  ;;  %v1027_v38 = vpop.f32.mrf.mxu1 }
 0x107   :  { %v1028_v44 = vadd.f32 %v1027_v38, %v770_v34  ;;  %v236_v34 = vld [vmem:[#allocation2 + $0x4b0] sm:$0xff] }
 0x108   :  { %v1538_v39 = vpop.f32.mrf.mxu3  ;;  %817 = vmatmul.f32.gmra.mxu0 %v211_v35  ;;  %1074 = vmatmul.f32.gmra.mxu1 %v212_v40  ;;  %v238_v40 = vld [vmem:[#allocation2 + $0x4c0] sm:$0xff] }
 0x109   :  { %v5772_v42 = vadd.f32 %v1538_v39, %v1282_v36  ;;  %v237_v39 = vld [vmem:[#allocation2 + $0x4b8] sm:$0xff] }
 0x10a   :  { %1331 = vmatmul.f32.gmra.mxu2 %v213_v41 }
 0x10d   :  { %1588 = vmatmul.f32.gmra.mxu3 %v214_v43  ;;  %v1284_v45 = vpop.f32.mrf.mxu2  ;;  %v773_v46 = vpop.f32.mrf.mxu0  ;;  %v239_v43 = vld [vmem:[#allocation2 + $0x4c8] sm:$0xff] }
 0x10e   :  { %v1285_v49 = vadd.f32 %v1284_v45, %v1028_v44  ;;  %v1030_v50 = vpop.f32.mrf.mxu1 }
 0x10f   :  { %v1031_v56 = vadd.f32 %v1030_v50, %v773_v46 }
 0x110   :  { %v1541_v51 = vpop.f32.mrf.mxu3  ;;  %820 = vmatmul.f32.gmra.mxu0 %v216_v47  ;;  %1077 = vmatmul.f32.gmra.mxu1 %v217_v52  ;;  %v241_v47 = vld [vmem:[#allocation2 + $0x4d8] sm:$0xff]  ;;  %v242_v52 = vld [vmem:[#allocation2 + $0x4e0] sm:$0xff] }
 0x111   :  { %v5774_v54 = vadd.f32 %v1541_v51, %v1285_v49 }
 0x112   :  { %1334 = vmatmul.f32.gmra.mxu2 %v218_v53  ;;  %v243_v53 = vld [vmem:[#allocation2 + $0x4e8] sm:$0xff] }
 0x115   :  { %1591 = vmatmul.f32.gmra.mxu3 %v219_v55  ;;  %v1287_v57 = vpop.f32.mrf.mxu2  ;;  %v776_v58 = vpop.f32.mrf.mxu0 }
 0x116   :  { %v1288_v61 = vadd.f32 %v1287_v57, %v1031_v56  ;;  %v1033_v62 = vpop.f32.mrf.mxu1  ;;  %v244_v56 = vld [vmem:[#allocation2 + $0x4f0] sm:$0xff] }
 0x117   :  { %v1034_v4 = vadd.f32 %v1033_v62, %v776_v58 }
 0x118   :  { %v1544_v63 = vpop.f32.mrf.mxu3  ;;  %823 = vmatmul.f32.gmra.mxu0 %v221_v60  ;;  %1080 = vmatmul.f32.gmra.mxu1 %v222_v0 }
 0x119   :  { %v5776_v2 = vadd.f32 %v1544_v63, %v1288_v61  ;;  %v246_v61 = vld [vmem:[#allocation2 + $0x500] sm:$0xff] }
 0x11a   :  { %1337 = vmatmul.f32.gmra.mxu2 %v223_v1  ;;  %v247_v1 = vld [vmem:[#allocation2 + $0x508] sm:$0xff] }
 0x11d   :  { %1594 = vmatmul.f32.gmra.mxu3 %v224_v3  ;;  %v1290_v5 = vpop.f32.mrf.mxu2  ;;  %v779_v7 = vpop.f32.mrf.mxu0  ;;  %v248_v3 = vld [vmem:[#allocation2 + $0x510] sm:$0xff] }
 0x11e   :  { %v1291_v9 = vadd.f32 %v1290_v5, %v1034_v4  ;;  %v1036_v10 = vpop.f32.mrf.mxu1  ;;  %v249_v5 = vld [vmem:[#allocation2 + $0x518] sm:$0xff] }
 0x11f   :  { %v1037_v17 = vadd.f32 %v1036_v10, %v779_v7  ;;  %v251_v10 = vld [vmem:[#allocation2 + $0x528] sm:$0xff] }
 0x120   :  { %v1547_v11 = vpop.f32.mrf.mxu3  ;;  %826 = vmatmul.f32.gmra.mxu0 %v226_v8  ;;  %1083 = vmatmul.f32.gmra.mxu1 %v227_v12 }
 0x121   :  { %v5778_v14 = vadd.f32 %v1547_v11, %v1291_v9 }
 0x122   :  { %1340 = vmatmul.f32.gmra.mxu2 %v228_v13 }
 0x125   :  { %1597 = vmatmul.f32.gmra.mxu3 %v229_v16  ;;  %v1293_v19 = vpop.f32.mrf.mxu2  ;;  %v782_v20 = vpop.f32.mrf.mxu0  ;;  %v252_v16 = vld [vmem:[#allocation2 + $0x530] sm:$0xff] }
 0x126   :  { %v1294_v22 = vadd.f32 %v1293_v19, %v1037_v17  ;;  %v1039_v23 = vpop.f32.mrf.mxu1  ;;  %v253_v17 = vld [vmem:[#allocation2 + $0x538] sm:$0xff] }
 0x127   :  { %v1040_v31 = vadd.f32 %v1039_v23, %v782_v20  ;;  %v254_v20 = vld [vmem:[#allocation2 + $0x540] sm:$0xff] }
 0x128   :  { %v1550_v24 = vpop.f32.mrf.mxu3  ;;  %829 = vmatmul.f32.gmra.mxu0 %v231_v21  ;;  %1086 = vmatmul.f32.gmra.mxu1 %v232_v25 }
 0x129   :  { %v5780_v28 = vadd.f32 %v1550_v24, %v1294_v22  ;;  %v256_v24 = vld [vmem:[#allocation2 + $0x550] sm:$0xff] }
 0x12a   :  { %1343 = vmatmul.f32.gmra.mxu2 %v233_v27 }
 0x12d   :  { %1600 = vmatmul.f32.gmra.mxu3 %v234_v29  ;;  %v1296_v32 = vpop.f32.mrf.mxu2  ;;  %v785_v33 = vpop.f32.mrf.mxu0 }
 0x12e   :  { %v1297_v35 = vadd.f32 %v1296_v32, %v1040_v31  ;;  %v1042_v36 = vpop.f32.mrf.mxu1  ;;  %v257_v31 = vld [vmem:[#allocation2 + $0x558] sm:$0xff]  ;;  %v258_v32 = vld [vmem:[#allocation2 + $0x560] sm:$0xff] }
 0x12f   :  { %v1043_v44 = vadd.f32 %v1042_v36, %v785_v33 }
 0x130   :  { %v1553_v38 = vpop.f32.mrf.mxu3  ;;  %832 = vmatmul.f32.gmra.mxu0 %v236_v34  ;;  %1089 = vmatmul.f32.gmra.mxu1 %v237_v39  ;;  %v259_v34 = vld [vmem:[#allocation2 + $0x568] sm:$0xff]  ;;  %v261_v39 = vld [vmem:[#allocation2 + $0x578] sm:$0xff] }
 0x131   :  { %v5782_v41 = vadd.f32 %v1553_v38, %v1297_v35 }
 0x132   :  { %1346 = vmatmul.f32.gmra.mxu2 %v238_v40 }
 0x135   :  { %1603 = vmatmul.f32.gmra.mxu3 %v239_v43  ;;  %v1299_v45 = vpop.f32.mrf.mxu2  ;;  %v788_v46 = vpop.f32.mrf.mxu0 }
 0x136   :  { %v1300_v49 = vadd.f32 %v1299_v45, %v1043_v44  ;;  %v1045_v50 = vpop.f32.mrf.mxu1  ;;  %v262_v45 = vld [vmem:[#allocation2 + $0x580] sm:$0xff] }
 0x137   :  { %v1046_v57 = vadd.f32 %v1045_v50, %v788_v46  ;;  %v263_v46 = vld [vmem:[#allocation2 + $0x588] sm:$0xff] }
 0x138   :  { %v1556_v51 = vpop.f32.mrf.mxu3  ;;  %835 = vmatmul.f32.gmra.mxu0 %v241_v47  ;;  %1092 = vmatmul.f32.gmra.mxu1 %v242_v52 }
 0x139   :  { %v5784_v55 = vadd.f32 %v1556_v51, %v1300_v49  ;;  %v264_v49 = vld [vmem:[#allocation2 + $0x590] sm:$0xff] }
 0x13a   :  { %1349 = vmatmul.f32.gmra.mxu2 %v243_v53  ;;  %v266_v53 = vld [vmem:[#allocation2 + $0x5a0] sm:$0xff] }
 0x13d   :  { %1606 = vmatmul.f32.gmra.mxu3 %v244_v56  ;;  %v1302_v58 = vpop.f32.mrf.mxu2  ;;  %v791_v60 = vpop.f32.mrf.mxu0 }
 0x13e   :  { %v1303_v62 = vadd.f32 %v1302_v58, %v1046_v57  ;;  %v1048_v63 = vpop.f32.mrf.mxu1 }
 0x13f   :  { %v1049_v7 = vadd.f32 %v1048_v63, %v791_v60  ;;  %v267_v60 = vld [vmem:[#allocation2 + $0x5a8] sm:$0xff]  ;;  %v269_v63 = vld [vmem:[#allocation2 + $0x5b8] sm:$0xff] }
 0x140   :  { %v1559_v0 = vpop.f32.mrf.mxu3  ;;  %838 = vmatmul.f32.gmra.mxu0 %v246_v61  ;;  %1095 = vmatmul.f32.gmra.mxu1 %v247_v1  ;;  %v268_v61 = vld [vmem:[#allocation2 + $0x5b0] sm:$0xff] }
 0x141   :  { %v5786_v4 = vadd.f32 %v1559_v0, %v1303_v62 }
 0x142   :  { %1352 = vmatmul.f32.gmra.mxu2 %v248_v3 }
 0x145   :  { %1609 = vmatmul.f32.gmra.mxu3 %v249_v5  ;;  %v1305_v8 = vpop.f32.mrf.mxu2  ;;  %v794_v9 = vpop.f32.mrf.mxu0  ;;  %v271_v5 = vld [vmem:[#allocation2 + $0x5c8] sm:$0xff] }
 0x146   :  { %v1306_v11 = vadd.f32 %v1305_v8, %v1049_v7  ;;  %v1051_v12 = vpop.f32.mrf.mxu1 }
 0x147   :  { %v1052_v21 = vadd.f32 %v1051_v12, %v794_v9 }
 0x148   :  { %v1562_v13 = vpop.f32.mrf.mxu3  ;;  %841 = vmatmul.f32.gmra.mxu0 %v251_v10  ;;  %1098 = vmatmul.f32.gmra.mxu1 %v252_v16  ;;  %v272_v10 = vld [vmem:[#allocation2 + $0x5d0] sm:$0xff] }
 0x149   :  { %v5788_v19 = vadd.f32 %v1562_v13, %v1306_v11  ;;  %v273_v11 = vld [vmem:[#allocation2 + $0x5d8] sm:$0xff]  ;;  %v274_v13 = vld [vmem:[#allocation2 + $0x5e0] sm:$0xff] }
 0x14a   :  { %1355 = vmatmul.f32.gmra.mxu2 %v253_v17 }
 0x14d   :  { %1612 = vmatmul.f32.gmra.mxu3 %v254_v20  ;;  %v1308_v22 = vpop.f32.mrf.mxu2  ;;  %v797_v23 = vpop.f32.mrf.mxu0 }
 0x14e   :  { %v1309_v25 = vadd.f32 %v1308_v22, %v1052_v21  ;;  %v1054_v27 = vpop.f32.mrf.mxu1  ;;  %v276_v21 = vld [vmem:[#allocation2 + $0x5f0] sm:$0xff] }
 0x14f   :  { %v1055_v35 = vadd.f32 %v1054_v27, %v797_v23  ;;  %v278_v27 = vld [vmem:[#allocation2 + $0x600] sm:$0xff] }
 0x150   :  { %v1565_v29 = vpop.f32.mrf.mxu3  ;;  %844 = vmatmul.f32.gmra.mxu0 %v256_v24  ;;  %1101 = vmatmul.f32.gmra.mxu1 %v257_v31  ;;  %v279_v31 = vld [vmem:[#allocation2 + $0x608] sm:$0xff] }
 0x151   :  { %v5790_v33 = vadd.f32 %v1565_v29, %v1309_v25  ;;  %v277_v25 = vld [vmem:[#allocation2 + $0x5f8] sm:$0xff] }
 0x152   :  { %1358 = vmatmul.f32.gmra.mxu2 %v258_v32 }
 0x155   :  { %1615 = vmatmul.f32.gmra.mxu3 %v259_v34  ;;  %v1311_v36 = vpop.f32.mrf.mxu2  ;;  %v800_v38 = vpop.f32.mrf.mxu0 }
 0x156   :  { %v1312_v40 = vadd.f32 %v1311_v36, %v1055_v35  ;;  %v1057_v43 = vpop.f32.mrf.mxu1  ;;  %v281_v36 = vld [vmem:[#allocation2 + $0x618] sm:$0xff] }
 0x157   :  { %v1058_v50 = vadd.f32 %v1057_v43, %v800_v38  ;;  %v282_v43 = vld [vmem:[#allocation2 + $0x620] sm:$0xff] }
 0x158   :  { %v1568_v44 = vpop.f32.mrf.mxu3  ;;  %847 = vmatmul.f32.gmra.mxu0 %v261_v39  ;;  %1104 = vmatmul.f32.gmra.mxu1 %v262_v45 }
 0x159   :  { %v5792_v47 = vadd.f32 %v1568_v44, %v1312_v40  ;;  %v283_v44 = vld [vmem:[#allocation2 + $0x628] sm:$0xff] }
 0x15a   :  { %1361 = vmatmul.f32.gmra.mxu2 %v263_v46  ;;  %v284_v46 = vld [vmem:[#allocation2 + $0x630] sm:$0xff] }
 0x15d   :  { %1618 = vmatmul.f32.gmra.mxu3 %v264_v49  ;;  %v1314_v51 = vpop.f32.mrf.mxu2  ;;  %v803_v52 = vpop.f32.mrf.mxu0 }
 0x15e   :  { %v1315_v56 = vadd.f32 %v1314_v51, %v1058_v50  ;;  %v1060_v57 = vpop.f32.mrf.mxu1 }
 0x15f   :  { %v1061_v0 = vadd.f32 %v1060_v57, %v803_v52  ;;  %v286_v52 = vld [vmem:[#allocation2 + $0x640] sm:$0xff] }
 0x160   :  { %v1571_v58 = vpop.f32.mrf.mxu3  ;;  %850 = vmatmul.f32.gmra.mxu0 %v266_v53  ;;  %1107 = vmatmul.f32.gmra.mxu1 %v267_v60  ;;  %v288_v60 = vld [vmem:[#allocation2 + $0x650] sm:$0xff] }
 0x161   :  { %v5794_v62 = vadd.f32 %v1571_v58, %v1315_v56  ;;  %v287_v58 = vld [vmem:[#allocation2 + $0x648] sm:$0xff] }
 0x162   :  { %1364 = vmatmul.f32.gmra.mxu2 %v268_v61 }
 0x165   :  { %1621 = vmatmul.f32.gmra.mxu3 %v269_v63  ;;  %v1317_v1 = vpop.f32.mrf.mxu2  ;;  %v806_v3 = vpop.f32.mrf.mxu0  ;;  %v289_v63 = vld [vmem:[#allocation2 + $0x658] sm:$0xff] }
 0x166   :  { %v1318_v7 = vadd.f32 %v1317_v1, %v1061_v0  ;;  %v1063_v8 = vpop.f32.mrf.mxu1 }
 0x167   :  { %v1064_v16 = vadd.f32 %v1063_v8, %v806_v3 }
 0x168   :  { %v1574_v9 = vpop.f32.mrf.mxu3  ;;  %853 = vmatmul.f32.gmra.mxu0 %v271_v5  ;;  %1110 = vmatmul.f32.gmra.mxu1 %v272_v10  ;;  %v291_v5 = vld [vmem:[#allocation2 + $0x668] sm:$0xff]  ;;  %v292_v10 = vld [vmem:[#allocation2 + $0x670] sm:$0xff] }
 0x169   :  { %v5796_v12 = vadd.f32 %v1574_v9, %v1318_v7 }
 0x16a   :  { %1367 = vmatmul.f32.gmra.mxu2 %v273_v11  ;;  %v293_v11 = vld [vmem:[#allocation2 + $0x678] sm:$0xff] }
 0x16d   :  { %1624 = vmatmul.f32.gmra.mxu3 %v274_v13  ;;  %v1320_v17 = vpop.f32.mrf.mxu2  ;;  %v809_v20 = vpop.f32.mrf.mxu0 }
 0x16e   :  { %v1321_v22 = vadd.f32 %v1320_v17, %v1064_v16  ;;  %v1066_v23 = vpop.f32.mrf.mxu1  ;;  %v294_v16 = vld [vmem:[#allocation2 + $0x680] sm:$0xff] }
 0x16f   :  { %v1067_v32 = vadd.f32 %v1066_v23, %v809_v20 }
 0x170   :  { %v1577_v24 = vpop.f32.mrf.mxu3  ;;  %856 = vmatmul.f32.gmra.mxu0 %v276_v21  ;;  %1113 = vmatmul.f32.gmra.mxu1 %v277_v25 }
 0x171   :  { %v5798_v29 = vadd.f32 %v1577_v24, %v1321_v22  ;;  %v296_v22 = vld [vmem:[#allocation2 + $0x690] sm:$0xff] }
 0x172   :  { %1370 = vmatmul.f32.gmra.mxu2 %v278_v27  ;;  %v297_v27 = vld [vmem:[#allocation2 + $0x698] sm:$0xff] }
 0x175   :  { %1627 = vmatmul.f32.gmra.mxu3 %v279_v31  ;;  %v1323_v34 = vpop.f32.mrf.mxu2  ;;  %v812_v35 = vpop.f32.mrf.mxu0  ;;  %v298_v31 = vld [vmem:[#allocation2 + $0x6a0] sm:$0xff] }
 0x176   :  { %v1324_v38 = vadd.f32 %v1323_v34, %v1067_v32  ;;  %v1069_v39 = vpop.f32.mrf.mxu1  ;;  %v299_v34 = vld [vmem:[#allocation2 + $0x6a8] sm:$0xff] }
 0x177   :  { %v1070_v49 = vadd.f32 %v1069_v39, %v812_v35  ;;  %v301_v39 = vld [vmem:[#allocation2 + $0x6b8] sm:$0xff] }
 0x178   :  { %v1580_v40 = vpop.f32.mrf.mxu3  ;;  %859 = vmatmul.f32.gmra.mxu0 %v281_v36  ;;  %1116 = vmatmul.f32.gmra.mxu1 %v282_v43 }
 0x179   :  { %v5800_v45 = vadd.f32 %v1580_v40, %v1324_v38 }
 0x17a   :  { %1373 = vmatmul.f32.gmra.mxu2 %v283_v44 }
 0x17d   :  { %1630 = vmatmul.f32.gmra.mxu3 %v284_v46  ;;  %v1326_v50 = vpop.f32.mrf.mxu2  ;;  %v815_v51 = vpop.f32.mrf.mxu0  ;;  %v302_v46 = vld [vmem:[#allocation2 + $0x6c0] sm:$0xff] }
 0x17e   :  { %v1327_v53 = vadd.f32 %v1326_v50, %v1070_v49  ;;  %v1072_v56 = vpop.f32.mrf.mxu1  ;;  %v303_v49 = vld [vmem:[#allocation2 + $0x6c8] sm:$0xff] }
 0x17f   :  { %v1073_v0 = vadd.f32 %v1072_v56, %v815_v51  ;;  %v304_v51 = vld [vmem:[#allocation2 + $0x6d0] sm:$0xff] }
 0x180   :  { %v1583_v57 = vpop.f32.mrf.mxu3  ;;  %862 = vmatmul.f32.gmra.mxu0 %v286_v52  ;;  %1119 = vmatmul.f32.gmra.mxu1 %v287_v58 }
 0x181   :  { %v5802_v61 = vadd.f32 %v1583_v57, %v1327_v53  ;;  %v306_v57 = vld [vmem:[#allocation2 + $0x6e0] sm:$0xff] }
 0x182   :  { %1376 = vmatmul.f32.gmra.mxu2 %v288_v60 }
 0x185   :  { %1633 = vmatmul.f32.gmra.mxu3 %v289_v63  ;;  %v1329_v1 = vpop.f32.mrf.mxu2  ;;  %v818_v3 = vpop.f32.mrf.mxu0 }
 0x186   :  { %v1330_v7 = vadd.f32 %v1329_v1, %v1073_v0  ;;  %v1075_v8 = vpop.f32.mrf.mxu1  ;;  %v307_v0 = vld [vmem:[#allocation2 + $0x6e8] sm:$0xff]  ;;  %v308_v1 = vld [vmem:[#allocation2 + $0x6f0] sm:$0xff] }
 0x187   :  { %v1076_v17 = vadd.f32 %v1075_v8, %v818_v3 }
 0x188   :  { %v1586_v9 = vpop.f32.mrf.mxu3  ;;  %865 = vmatmul.f32.gmra.mxu0 %v291_v5  ;;  %1122 = vmatmul.f32.gmra.mxu1 %v292_v10  ;;  %v309_v5 = vld [vmem:[#allocation2 + $0x6f8] sm:$0xff]  ;;  %v311_v10 = vld [vmem:[#allocation2 + $0x708] sm:$0xff] }
 0x189   :  { %v5804_v13 = vadd.f32 %v1586_v9, %v1330_v7 }
 0x18a   :  { %1379 = vmatmul.f32.gmra.mxu2 %v293_v11 }
 0x18d   :  { %1636 = vmatmul.f32.gmra.mxu3 %v294_v16  ;;  %v1332_v20 = vpop.f32.mrf.mxu2  ;;  %v821_v21 = vpop.f32.mrf.mxu0 }
 0x18e   :  { %v1333_v23 = vadd.f32 %v1332_v20, %v1076_v17  ;;  %v1078_v24 = vpop.f32.mrf.mxu1  ;;  %v312_v20 = vld [vmem:[#allocation2 + $0x710] sm:$0xff] }
 0x18f   :  { %v1079_v35 = vadd.f32 %v1078_v24, %v821_v21  ;;  %v313_v21 = vld [vmem:[#allocation2 + $0x718] sm:$0xff] }
 0x190   :  { %v1589_v25 = vpop.f32.mrf.mxu3  ;;  %868 = vmatmul.f32.gmra.mxu0 %v296_v22  ;;  %1125 = vmatmul.f32.gmra.mxu1 %v297_v27 }
 0x191   :  { %v5806_v32 = vadd.f32 %v1589_v25, %v1333_v23  ;;  %v314_v23 = vld [vmem:[#allocation2 + $0x720] sm:$0xff] }
 0x192   :  { %1382 = vmatmul.f32.gmra.mxu2 %v298_v31  ;;  %v316_v31 = vld [vmem:[#allocation2 + $0x730] sm:$0xff] }
 0x195   :  { %1639 = vmatmul.f32.gmra.mxu3 %v299_v34  ;;  %v1335_v36 = vpop.f32.mrf.mxu2  ;;  %v824_v38 = vpop.f32.mrf.mxu0 }
 0x196   :  { %v1336_v40 = vadd.f32 %v1335_v36, %v1079_v35  ;;  %v1081_v43 = vpop.f32.mrf.mxu1 }
 0x197   :  { %v1082_v52 = vadd.f32 %v1081_v43, %v824_v38  ;;  %v317_v38 = vld [vmem:[#allocation2 + $0x738] sm:$0xff]  ;;  %v319_v43 = vld [vmem:[#allocation2 + $0x748] sm:$0xff] }
 0x198   :  { %v1592_v44 = vpop.f32.mrf.mxu3  ;;  %871 = vmatmul.f32.gmra.mxu0 %v301_v39  ;;  %1128 = vmatmul.f32.gmra.mxu1 %v302_v46  ;;  %v318_v39 = vld [vmem:[#allocation2 + $0x740] sm:$0xff] }
 0x199   :  { %v5808_v50 = vadd.f32 %v1592_v44, %v1336_v40 }
 0x19a   :  { %1385 = vmatmul.f32.gmra.mxu2 %v303_v49 }
 0x19d   :  { %1642 = vmatmul.f32.gmra.mxu3 %v304_v51  ;;  %v1338_v53 = vpop.f32.mrf.mxu2  ;;  %v827_v56 = vpop.f32.mrf.mxu0  ;;  %v321_v51 = vld [vmem:[#allocation2 + $0x758] sm:$0xff] }
 0x19e   :  { %v1339_v58 = vadd.f32 %v1338_v53, %v1082_v52  ;;  %v1084_v60 = vpop.f32.mrf.mxu1 }
 0x19f   :  { %v1085_v7 = vadd.f32 %v1084_v60, %v827_v56 }
 0x1a0   :  { %v1595_v63 = vpop.f32.mrf.mxu3  ;;  %874 = vmatmul.f32.gmra.mxu0 %v306_v57  ;;  %1131 = vmatmul.f32.gmra.mxu1 %v307_v0  ;;  %v322_v57 = vld [vmem:[#allocation2 + $0x760] sm:$0xff] }
 0x1a1   :  { %v5810_v3 = vadd.f32 %v1595_v63, %v1339_v58  ;;  %v323_v58 = vld [vmem:[#allocation2 + $0x768] sm:$0xff]  ;;  %v324_v63 = vld [vmem:[#allocation2 + $0x770] sm:$0xff] }
 0x1a2   :  { %1388 = vmatmul.f32.gmra.mxu2 %v308_v1 }
 0x1a5   :  { %1645 = vmatmul.f32.gmra.mxu3 %v309_v5  ;;  %v1341_v8 = vpop.f32.mrf.mxu2  ;;  %v830_v9 = vpop.f32.mrf.mxu0 }
 0x1a6   :  { %v1342_v11 = vadd.f32 %v1341_v8, %v1085_v7  ;;  %v1087_v16 = vpop.f32.mrf.mxu1  ;;  %v326_v7 = vld [vmem:[#allocation2 + $0x780] sm:$0xff] }
 0x1a7   :  { %v1088_v24 = vadd.f32 %v1087_v16, %v830_v9  ;;  %v328_v16 = vld [vmem:[#allocation2 + $0x790] sm:$0xff] }
 0x1a8   :  { %v1598_v17 = vpop.f32.mrf.mxu3  ;;  %877 = vmatmul.f32.gmra.mxu0 %v311_v10  ;;  %1134 = vmatmul.f32.gmra.mxu1 %v312_v20  ;;  %v329_v20 = vld [vmem:[#allocation2 + $0x798] sm:$0xff] }
 0x1a9   :  { %v5812_v22 = vadd.f32 %v1598_v17, %v1342_v11  ;;  %v327_v11 = vld [vmem:[#allocation2 + $0x788] sm:$0xff] }
 0x1aa   :  { %1391 = vmatmul.f32.gmra.mxu2 %v313_v21 }
 0x1ad   :  { %1648 = vmatmul.f32.gmra.mxu3 %v314_v23  ;;  %v1344_v25 = vpop.f32.mrf.mxu2  ;;  %v833_v27 = vpop.f32.mrf.mxu0 }
 0x1ae   :  { %v1345_v34 = vadd.f32 %v1344_v25, %v1088_v24  ;;  %v1090_v35 = vpop.f32.mrf.mxu1  ;;  %v331_v25 = vld [vmem:[#allocation2 + $0x7a8] sm:$0xff] }
 0x1af   :  { %v1091_v44 = vadd.f32 %v1090_v35, %v833_v27  ;;  %v332_v35 = vld [vmem:[#allocation2 + $0x7b0] sm:$0xff] }
 0x1b0   :  { %v1601_v36 = vpop.f32.mrf.mxu3  ;;  %880 = vmatmul.f32.gmra.mxu0 %v316_v31  ;;  %1137 = vmatmul.f32.gmra.mxu1 %v317_v38 }
 0x1b1   :  { %v5814_v40 = vadd.f32 %v1601_v36, %v1345_v34  ;;  %v333_v36 = vld [vmem:[#allocation2 + $0x7b8] sm:$0xff] }
 0x1b2   :  { %1394 = vmatmul.f32.gmra.mxu2 %v318_v39  ;;  %v334_v39 = vld [vmem:[#allocation2 + $0x7c0] sm:$0xff] }
 0x1b5   :  { %1651 = vmatmul.f32.gmra.mxu3 %v319_v43  ;;  %v1347_v46 = vpop.f32.mrf.mxu2  ;;  %v836_v49 = vpop.f32.mrf.mxu0 }
 0x1b6   :  { %v1348_v52 = vadd.f32 %v1347_v46, %v1091_v44  ;;  %v1093_v53 = vpop.f32.mrf.mxu1 }
 0x1b7   :  { %v1094_v0 = vadd.f32 %v1093_v53, %v836_v49  ;;  %v336_v49 = vld [vmem:[#allocation2 + $0x7d0] sm:$0xff] }
 0x1b8   :  { %v1604_v56 = vpop.f32.mrf.mxu3  ;;  %883 = vmatmul.f32.gmra.mxu0 %v321_v51  ;;  %1140 = vmatmul.f32.gmra.mxu1 %v322_v57  ;;  %v338_v57 = vld [vmem:[#allocation2 + $0x7e0] sm:$0xff] }
 0x1b9   :  { %v5816_v60 = vadd.f32 %v1604_v56, %v1348_v52  ;;  %v337_v56 = vld [vmem:[#allocation2 + $0x7d8] sm:$0xff] }
 0x1ba   :  { %1397 = vmatmul.f32.gmra.mxu2 %v323_v58 }
 0x1bd   :  { %1654 = vmatmul.f32.gmra.mxu3 %v324_v63  ;;  %v1350_v1 = vpop.f32.mrf.mxu2  ;;  %v839_v5 = vpop.f32.mrf.mxu0  ;;  %v339_v63 = vld [vmem:[#allocation2 + $0x7e8] sm:$0xff] }
 0x1be   :  { %v1351_v8 = vadd.f32 %v1350_v1, %v1094_v0  ;;  %v1096_v9 = vpop.f32.mrf.mxu1 }
 0x1bf   :  { %v1097_v21 = vadd.f32 %v1096_v9, %v839_v5 }
 0x1c0   :  { %v1607_v10 = vpop.f32.mrf.mxu3  ;;  %886 = vmatmul.f32.gmra.mxu0 %v326_v7  ;;  %1143 = vmatmul.f32.gmra.mxu1 %v327_v11  ;;  %v341_v7 = vld [vmem:[#allocation2 + $0x7f8] sm:$0xff]  ;;  %v342_v11 = vld [vmem:[#allocation2 + $0x800] sm:$0xff] }
 0x1c1   :  { %v5818_v17 = vadd.f32 %v1607_v10, %v1351_v8 }
 0x1c2   :  { %1400 = vmatmul.f32.gmra.mxu2 %v328_v16  ;;  %v343_v16 = vld [vmem:[#allocation2 + $0x808] sm:$0xff] }
 0x1c5   :  { %1657 = vmatmul.f32.gmra.mxu3 %v329_v20  ;;  %v1353_v23 = vpop.f32.mrf.mxu2  ;;  %v842_v24 = vpop.f32.mrf.mxu0 }
 0x1c6   :  { %v1354_v27 = vadd.f32 %v1353_v23, %v1097_v21  ;;  %v1099_v31 = vpop.f32.mrf.mxu1  ;;  %v344_v21 = vld [vmem:[#allocation2 + $0x810] sm:$0xff] }
 0x1c7   :  { %v1100_v43 = vadd.f32 %v1099_v31, %v842_v24 }
 0x1c8   :  { %v1610_v34 = vpop.f32.mrf.mxu3  ;;  %889 = vmatmul.f32.gmra.mxu0 %v331_v25  ;;  %1146 = vmatmul.f32.gmra.mxu1 %v332_v35 }
 0x1c9   :  { %v5820_v38 = vadd.f32 %v1610_v34, %v1354_v27  ;;  %v346_v27 = vld [vmem:[#allocation2 + $0x820] sm:$0xff] }
 0x1ca   :  { %1403 = vmatmul.f32.gmra.mxu2 %v333_v36  ;;  %v347_v36 = vld [vmem:[#allocation2 + $0x828] sm:$0xff] }
 0x1cd   :  { %1660 = vmatmul.f32.gmra.mxu3 %v334_v39  ;;  %v1356_v44 = vpop.f32.mrf.mxu2  ;;  %v845_v46 = vpop.f32.mrf.mxu0  ;;  %v348_v39 = vld [vmem:[#allocation2 + $0x830] sm:$0xff] }
 0x1ce   :  { %v1357_v51 = vadd.f32 %v1356_v44, %v1100_v43  ;;  %v1102_v52 = vpop.f32.mrf.mxu1  ;;  %v349_v44 = vld [vmem:[#allocation2 + $0x838] sm:$0xff] }
 0x1cf   :  { %v1103_v0 = vadd.f32 %v1102_v52, %v845_v46  ;;  %v351_v52 = vld [vmem:[#allocation2 + $0x848] sm:$0xff] }
 0x1d0   :  { %v1613_v53 = vpop.f32.mrf.mxu3  ;;  %892 = vmatmul.f32.gmra.mxu0 %v336_v49  ;;  %1149 = vmatmul.f32.gmra.mxu1 %v337_v56 }
 0x1d1   :  { %v5822_v58 = vadd.f32 %v1613_v53, %v1357_v51 }
 0x1d2   :  { %1406 = vmatmul.f32.gmra.mxu2 %v338_v57 }
 0x1d5   :  { %1663 = vmatmul.f32.gmra.mxu3 %v339_v63  ;;  %v1359_v1 = vpop.f32.mrf.mxu2  ;;  %v848_v5 = vpop.f32.mrf.mxu0  ;;  %v352_v63 = vld [vmem:[#allocation2 + $0x850] sm:$0xff] }
 0x1d6   :  { %v1360_v8 = vadd.f32 %v1359_v1, %v1103_v0  ;;  %v1105_v9 = vpop.f32.mrf.mxu1  ;;  %v353_v0 = vld [vmem:[#allocation2 + $0x858] sm:$0xff] }
 0x1d7   :  { %v1106_v23 = vadd.f32 %v1105_v9, %v848_v5  ;;  %v354_v5 = vld [vmem:[#allocation2 + $0x860] sm:$0xff] }
 0x1d8   :  { %v1616_v10 = vpop.f32.mrf.mxu3  ;;  %895 = vmatmul.f32.gmra.mxu0 %v341_v7  ;;  %1152 = vmatmul.f32.gmra.mxu1 %v342_v11 }
 0x1d9   :  { %v5824_v20 = vadd.f32 %v1616_v10, %v1360_v8  ;;  %v356_v10 = vld [vmem:[#allocation2 + $0x870] sm:$0xff] }
 0x1da   :  { %1409 = vmatmul.f32.gmra.mxu2 %v343_v16 }
 0x1dd   :  { %1666 = vmatmul.f32.gmra.mxu3 %v344_v21  ;;  %v1362_v24 = vpop.f32.mrf.mxu2  ;;  %v851_v25 = vpop.f32.mrf.mxu0 }
 0x1de   :  { %v1363_v31 = vadd.f32 %v1362_v24, %v1106_v23  ;;  %v1108_v34 = vpop.f32.mrf.mxu1  ;;  %v357_v23 = vld [vmem:[#allocation2 + $0x878] sm:$0xff]  ;;  %v358_v24 = vld [vmem:[#allocation2 + $0x880] sm:$0xff] }
 0x1df   :  { %v1109_v46 = vadd.f32 %v1108_v34, %v851_v25 }
 0x1e0   :  { %v1619_v35 = vpop.f32.mrf.mxu3  ;;  %898 = vmatmul.f32.gmra.mxu0 %v346_v27  ;;  %1155 = vmatmul.f32.gmra.mxu1 %v347_v36  ;;  %v359_v27 = vld [vmem:[#allocation2 + $0x888] sm:$0xff]  ;;  %v361_v36 = vld [vmem:[#allocation2 + $0x898] sm:$0xff] }
 0x1e1   :  { %v5826_v43 = vadd.f32 %v1619_v35, %v1363_v31 }
 0x1e2   :  { %1412 = vmatmul.f32.gmra.mxu2 %v348_v39 }
 0x1e5   :  { %1669 = vmatmul.f32.gmra.mxu3 %v349_v44  ;;  %v1365_v49 = vpop.f32.mrf.mxu2  ;;  %v854_v51 = vpop.f32.mrf.mxu0 }
 0x1e6   :  { %v1366_v53 = vadd.f32 %v1365_v49, %v1109_v46  ;;  %v1111_v56 = vpop.f32.mrf.mxu1  ;;  %v362_v49 = vld [vmem:[#allocation2 + $0x8a0] sm:$0xff] }
 0x1e7   :  { %v1112_v7 = vadd.f32 %v1111_v56, %v854_v51  ;;  %v363_v51 = vld [vmem:[#allocation2 + $0x8a8] sm:$0xff] }
 0x1e8   :  { %v1622_v57 = vpop.f32.mrf.mxu3  ;;  %901 = vmatmul.f32.gmra.mxu0 %v351_v52  ;;  %1158 = vmatmul.f32.gmra.mxu1 %v352_v63 }
 0x1e9   :  { %v5828_v1 = vadd.f32 %v1622_v57, %v1366_v53  ;;  %v364_v53 = vld [vmem:[#allocation2 + $0x8b0] sm:$0xff] }
 0x1ea   :  { %1415 = vmatmul.f32.gmra.mxu2 %v353_v0  ;;  %v366_v0 = vld [vmem:[#allocation2 + $0x8c0] sm:$0xff] }
 0x1ed   :  { %1672 = vmatmul.f32.gmra.mxu3 %v354_v5  ;;  %v1368_v8 = vpop.f32.mrf.mxu2  ;;  %v857_v9 = vpop.f32.mrf.mxu0 }
 0x1ee   :  { %v1369_v11 = vadd.f32 %v1368_v8, %v1112_v7  ;;  %v1114_v16 = vpop.f32.mrf.mxu1 }
 0x1ef   :  { %v1115_v31 = vadd.f32 %v1114_v16, %v857_v9  ;;  %v367_v9 = vld [vmem:[#allocation2 + $0x8c8] sm:$0xff]  ;;  %v369_v16 = vld [vmem:[#allocation2 + $0x8d8] sm:$0xff] }
 0x1f0   :  { %v1625_v21 = vpop.f32.mrf.mxu3  ;;  %904 = vmatmul.f32.gmra.mxu0 %v356_v10  ;;  %1161 = vmatmul.f32.gmra.mxu1 %v357_v23  ;;  %v368_v10 = vld [vmem:[#allocation2 + $0x8d0] sm:$0xff] }
 0x1f1   :  { %v5830_v25 = vadd.f32 %v1625_v21, %v1369_v11 }
 0x1f2   :  { %1418 = vmatmul.f32.gmra.mxu2 %v358_v24 }
 0x1f5   :  { %1675 = vmatmul.f32.gmra.mxu3 %v359_v27  ;;  %v1371_v34 = vpop.f32.mrf.mxu2  ;;  %v860_v35 = vpop.f32.mrf.mxu0  ;;  %v371_v27 = vld [vmem:[#allocation2 + $0x8e8] sm:$0xff] }
 0x1f6   :  { %v1372_v39 = vadd.f32 %v1371_v34, %v1115_v31  ;;  %v1117_v44 = vpop.f32.mrf.mxu1 }
 0x1f7   :  { %v1118_v56 = vadd.f32 %v1117_v44, %v860_v35 }
 0x1f8   :  { %v1628_v46 = vpop.f32.mrf.mxu3  ;;  %907 = vmatmul.f32.gmra.mxu0 %v361_v36  ;;  %1164 = vmatmul.f32.gmra.mxu1 %v362_v49  ;;  %v372_v36 = vld [vmem:[#allocation2 + $0x8f0] sm:$0xff] }
 0x1f9   :  { %v5832_v52 = vadd.f32 %v1628_v46, %v1372_v39  ;;  %v373_v39 = vld [vmem:[#allocation2 + $0x8f8] sm:$0xff]  ;;  %v374_v46 = vld [vmem:[#allocation2 + $0x900] sm:$0xff] }
 0x1fa   :  { %1421 = vmatmul.f32.gmra.mxu2 %v363_v51 }
 0x1fd   :  { %1678 = vmatmul.f32.gmra.mxu3 %v364_v53  ;;  %v1374_v57 = vpop.f32.mrf.mxu2  ;;  %v863_v63 = vpop.f32.mrf.mxu0 }
 0x1fe   :  { %v1375_v5 = vadd.f32 %v1374_v57, %v1118_v56  ;;  %v1120_v7 = vpop.f32.mrf.mxu1  ;;  %v376_v56 = vld [vmem:[#allocation2 + $0x910] sm:$0xff] }
 0x1ff   :  { %v1121_v21 = vadd.f32 %v1120_v7, %v863_v63  ;;  %v378_v7 = vld [vmem:[#allocation2 + $0x920] sm:$0xff] }
 0x200   :  { %v1631_v8 = vpop.f32.mrf.mxu3  ;;  %910 = vmatmul.f32.gmra.mxu0 %v366_v0  ;;  %1167 = vmatmul.f32.gmra.mxu1 %v367_v9  ;;  %v379_v9 = vld [vmem:[#allocation2 + $0x928] sm:$0xff] }
 0x201   :  { %v5834_v11 = vadd.f32 %v1631_v8, %v1375_v5  ;;  %v377_v5 = vld [vmem:[#allocation2 + $0x918] sm:$0xff] }
 0x202   :  { %1424 = vmatmul.f32.gmra.mxu2 %v368_v10 }
 0x205   :  { %1681 = vmatmul.f32.gmra.mxu3 %v369_v16  ;;  %v1377_v23 = vpop.f32.mrf.mxu2  ;;  %v866_v24 = vpop.f32.mrf.mxu0 }
 0x206   :  { %v1378_v31 = vadd.f32 %v1377_v23, %v1121_v21  ;;  %v1123_v34 = vpop.f32.mrf.mxu1  ;;  %v381_v23 = vld [vmem:[#allocation2 + $0x938] sm:$0xff] }
 0x207   :  { %v1124_v49 = vadd.f32 %v1123_v34, %v866_v24  ;;  %v382_v34 = vld [vmem:[#allocation2 + $0x940] sm:$0xff] }
 0x208   :  { %v1634_v35 = vpop.f32.mrf.mxu3  ;;  %913 = vmatmul.f32.gmra.mxu0 %v371_v27  ;;  %1170 = vmatmul.f32.gmra.mxu1 %v372_v36 }
 0x209   :  { %v5836_v44 = vadd.f32 %v1634_v35, %v1378_v31  ;;  %v383_v35 = vld [vmem:[#allocation2 + $0x948] sm:$0xff] }
 0x20a   :  { %1427 = vmatmul.f32.gmra.mxu2 %v373_v39  ;;  %v384_v39 = vld [vmem:[#allocation2 + $0x950] sm:$0xff] }
 0x20d   :  { %1684 = vmatmul.f32.gmra.mxu3 %v374_v46  ;;  %v1380_v51 = vpop.f32.mrf.mxu2  ;;  %v869_v53 = vpop.f32.mrf.mxu0 }
 0x20e   :  { %v1381_v57 = vadd.f32 %v1380_v51, %v1124_v49  ;;  %v1126_v63 = vpop.f32.mrf.mxu1 }
 0x20f   :  { %v1127_v10 = vadd.f32 %v1126_v63, %v869_v53  ;;  %v386_v53 = vld [vmem:[#allocation2 + $0x960] sm:$0xff] }
 0x210   :  { %v1637_v0 = vpop.f32.mrf.mxu3  ;;  %916 = vmatmul.f32.gmra.mxu0 %v376_v56  ;;  %1173 = vmatmul.f32.gmra.mxu1 %v377_v5  ;;  %v388_v5 = vld [vmem:[#allocation2 + $0x970] sm:$0xff] }
 0x211   :  { %v5838_v8 = vadd.f32 %v1637_v0, %v1381_v57  ;;  %v387_v0 = vld [vmem:[#allocation2 + $0x968] sm:$0xff] }
 0x212   :  { %1430 = vmatmul.f32.gmra.mxu2 %v378_v7 }
 0x215   :  { %1687 = vmatmul.f32.gmra.mxu3 %v379_v9  ;;  %v1383_v16 = vpop.f32.mrf.mxu2  ;;  %v872_v21 = vpop.f32.mrf.mxu0  ;;  %v389_v9 = vld [vmem:[#allocation2 + $0x978] sm:$0xff] }
 0x216   :  { %v1384_v24 = vadd.f32 %v1383_v16, %v1127_v10  ;;  %v1129_v27 = vpop.f32.mrf.mxu1 }
 0x217   :  { %v1130_v46 = vadd.f32 %v1129_v27, %v872_v21  ;;  %v391_v21 = vld [vmem:[#allocation2 + $0x988] sm:$0xff] }
 0x218   :  { %v1640_v31 = vpop.f32.mrf.mxu3  ;;  %919 = vmatmul.f32.gmra.mxu0 %v381_v23  ;;  %1176 = vmatmul.f32.gmra.mxu1 %v382_v34  ;;  %v392_v34 = vld [vmem:[#allocation2 + $0x990] sm:$0xff] }
 0x219   :  { %v5840_v36 = vadd.f32 %v1640_v31, %v1384_v24 }
 0x21a   :  { %1433 = vmatmul.f32.gmra.mxu2 %v383_v35  ;;  %v393_v35 = vld [vmem:[#allocation2 + $0x998] sm:$0xff] }
 0x21d   :  { %1690 = vmatmul.f32.gmra.mxu3 %v384_v39  ;;  %v1386_v49 = vpop.f32.mrf.mxu2  ;;  %v875_v51 = vpop.f32.mrf.mxu0 }
 0x21e   :  { %v1387_v56 = vadd.f32 %v1386_v49, %v1130_v46  ;;  %v1132_v57 = vpop.f32.mrf.mxu1  ;;  %v394_v46 = vld [vmem:[#allocation2 + $0x9a0] sm:$0xff] }
 0x21f   :  { %v1133_v10 = vadd.f32 %v1132_v57, %v875_v51  ;;  %v396_v51 = vld [vmem:[#allocation2 + $0x9b0] sm:$0xff] }
 0x220   :  { %v1643_v63 = vpop.f32.mrf.mxu3  ;;  %922 = vmatmul.f32.gmra.mxu0 %v386_v53  ;;  %1179 = vmatmul.f32.gmra.mxu1 %v387_v0 }
 0x221   :  { %v5842_v7 = vadd.f32 %v1643_v63, %v1387_v56 }
 0x222   :  { %1436 = vmatmul.f32.gmra.mxu2 %v388_v5  ;;  %v397_v5 = vld [vmem:[#allocation2 + $0x9b8] sm:$0xff] }
 0x225   :  { %1693 = vmatmul.f32.gmra.mxu3 %v389_v9  ;;  %v1389_v16 = vpop.f32.mrf.mxu2  ;;  %v878_v23 = vpop.f32.mrf.mxu0  ;;  %v398_v9 = vld [vmem:[#allocation2 + $0x9c0] sm:$0xff] }
 0x226   :  { %v1390_v24 = vadd.f32 %v1389_v16, %v1133_v10  ;;  %v1135_v27 = vpop.f32.mrf.mxu1  ;;  %v399_v16 = vld [vmem:[#allocation2 + $0x9c8] sm:$0xff] }
 0x227   :  { %v1136_v49 = vadd.f32 %v1135_v27, %v878_v23  ;;  %v401_v23 = vld [vmem:[#allocation2 + $0x9d8] sm:$0xff] }
 0x228   :  { %v1646_v31 = vpop.f32.mrf.mxu3  ;;  %925 = vmatmul.f32.gmra.mxu0 %v391_v21  ;;  %1182 = vmatmul.f32.gmra.mxu1 %v392_v34 }
 0x229   :  { %v5844_v39 = vadd.f32 %v1646_v31, %v1390_v24 }
 0x22a   :  { %1439 = vmatmul.f32.gmra.mxu2 %v393_v35 }
 0x22b   :  { %8140 = vst [vmem:[#allocation12_spill] sm:$0xff] %v5844_v39  ;;  %v404_v39 = vld [vmem:[#allocation2 + $0x9f0] sm:$0xff] }
 0x22d   :  { %1696 = vmatmul.f32.gmra.mxu3 %v394_v46  ;;  %v1392_v53 = vpop.f32.mrf.mxu2  ;;  %v881_v56 = vpop.f32.mrf.mxu0  ;;  %v402_v46 = vld [vmem:[#allocation2 + $0x9e0] sm:$0xff] }
 0x22e   :  { %v1393_v57 = vadd.f32 %v1392_v53, %v1136_v49  ;;  %v1138_v63 = vpop.f32.mrf.mxu1  ;;  %v403_v49 = vld [vmem:[#allocation2 + $0x9e8] sm:$0xff] }
 0x22f   :  { %v1139_v21 = vadd.f32 %v1138_v63, %v881_v56  ;;  %v406_v56 = vld [vmem:[#allocation2 + $0xa00] sm:$0xff] }
 0x230   :  { %v1649_v0 = vpop.f32.mrf.mxu3  ;;  %928 = vmatmul.f32.gmra.mxu0 %v396_v51  ;;  %1185 = vmatmul.f32.gmra.mxu1 %v397_v5 }
 0x231   :  { %v5846_v10 = vadd.f32 %v1649_v0, %v1393_v57 }
 0x232   :  { %1442 = vmatmul.f32.gmra.mxu2 %v398_v9 }
 0x233   :  { %8141 = vst [vmem:[#allocation13_spill] sm:$0xff] %v5846_v10  ;;  %v409_v10 = vld [vmem:[#allocation2 + $0xa18] sm:$0xff] }
 0x235   :  { %1699 = vmatmul.f32.gmra.mxu3 %v399_v16  ;;  %v1395_v24 = vpop.f32.mrf.mxu2  ;;  %v884_v31 = vpop.f32.mrf.mxu0  ;;  %v407_v16 = vld [vmem:[#allocation2 + $0xa08] sm:$0xff] }
 0x236   :  { %v1396_v27 = vadd.f32 %v1395_v24, %v1139_v21  ;;  %v1141_v34 = vpop.f32.mrf.mxu1  ;;  %v408_v21 = vld [vmem:[#allocation2 + $0xa10] sm:$0xff] }
 0x237   :  { %v1142_v51 = vadd.f32 %v1141_v34, %v884_v31  ;;  %v411_v31 = vld [vmem:[#allocation2 + $0xa28] sm:$0xff] }
 0x238   :  { %v1652_v35 = vpop.f32.mrf.mxu3  ;;  %931 = vmatmul.f32.gmra.mxu0 %v401_v23  ;;  %1188 = vmatmul.f32.gmra.mxu1 %v402_v46 }
 0x239   :  { %v5848_v53 = vadd.f32 %v1652_v35, %v1396_v27 }
 0x23a   :  { %1445 = vmatmul.f32.gmra.mxu2 %v403_v49  ;;  %v412_v49 = vld [vmem:[#allocation2 + $0xa30] sm:$0xff] }
 0x23b   :  { %8142 = vst [vmem:[#allocation14_spill] sm:$0xff] %v5848_v53  ;;  %v414_v53 = vld [vmem:[#allocation2 + $0xa40] sm:$0xff] }
 0x23d   :  { %1702 = vmatmul.f32.gmra.mxu3 %v404_v39  ;;  %v1398_v57 = vpop.f32.mrf.mxu2  ;;  %v887_v0 = vpop.f32.mrf.mxu0 }
 0x23e   :  { %v1399_v63 = vadd.f32 %v1398_v57, %v1142_v51  ;;  %v1144_v5 = vpop.f32.mrf.mxu1  ;;  %v413_v51 = vld [vmem:[#allocation2 + $0xa38] sm:$0xff] }
 0x23f   :  { %v1145_v23 = vadd.f32 %v1144_v5, %v887_v0  ;;  %v416_v0 = vld [vmem:[#allocation2 + $0xa50] sm:$0xff] }
 0x240   :  { %v1655_v9 = vpop.f32.mrf.mxu3  ;;  %934 = vmatmul.f32.gmra.mxu0 %v406_v56  ;;  %1191 = vmatmul.f32.gmra.mxu1 %v407_v16 }
 0x241   :  { %v5850_v24 = vadd.f32 %v1655_v9, %v1399_v63 }
 0x242   :  { %1448 = vmatmul.f32.gmra.mxu2 %v408_v21  ;;  %v417_v21 = vld [vmem:[#allocation2 + $0xa58] sm:$0xff] }
 0x243   :  { %8143 = vst [vmem:[#allocation15_spill] sm:$0xff] %v5850_v24  ;;  %v419_v24 = vld [vmem:[#allocation2 + $0xa68] sm:$0xff] }
 0x245   :  { %1705 = vmatmul.f32.gmra.mxu3 %v409_v10  ;;  %v1401_v27 = vpop.f32.mrf.mxu2  ;;  %v890_v35 = vpop.f32.mrf.mxu0 }
 0x246   :  { %v1402_v39 = vadd.f32 %v1401_v27, %v1145_v23  ;;  %v1147_v34 = vpop.f32.mrf.mxu1  ;;  %v418_v23 = vld [vmem:[#allocation2 + $0xa60] sm:$0xff] }
 0x247   :  { %v1148_v56 = vadd.f32 %v1147_v34, %v890_v35  ;;  %v421_v35 = vld [vmem:[#allocation2 + $0xa78] sm:$0xff] }
 0x248   :  { %v1658_v46 = vpop.f32.mrf.mxu3  ;;  %937 = vmatmul.f32.gmra.mxu0 %v411_v31  ;;  %1194 = vmatmul.f32.gmra.mxu1 %v412_v49 }
 0x249   :  { %v5852_v57 = vadd.f32 %v1658_v46, %v1402_v39 }
 0x24a   :  { %1451 = vmatmul.f32.gmra.mxu2 %v413_v51  ;;  %v422_v51 = vld [vmem:[#allocation2 + $0xa80] sm:$0xff] }
 0x24b   :  { %8144 = vst [vmem:[#allocation16_spill] sm:$0xff] %v5852_v57  ;;  %v424_v57 = vld [vmem:[#allocation2 + $0xa90] sm:$0xff] }
 0x24d   :  { %1708 = vmatmul.f32.gmra.mxu3 %v414_v53  ;;  %v1404_v63 = vpop.f32.mrf.mxu2  ;;  %v893_v9 = vpop.f32.mrf.mxu0 }
 0x24e   :  { %v1405_v10 = vadd.f32 %v1404_v63, %v1148_v56  ;;  %v1150_v5 = vpop.f32.mrf.mxu1  ;;  %v423_v56 = vld [vmem:[#allocation2 + $0xa88] sm:$0xff] }
 0x24f   :  { %v1151_v31 = vadd.f32 %v1150_v5, %v893_v9  ;;  %v426_v9 = vld [vmem:[#allocation2 + $0xaa0] sm:$0xff] }
 0x250   :  { %v1661_v16 = vpop.f32.mrf.mxu3  ;;  %940 = vmatmul.f32.gmra.mxu0 %v416_v0  ;;  %1197 = vmatmul.f32.gmra.mxu1 %v417_v21 }
 0x251   :  { %v5854_v27 = vadd.f32 %v1661_v16, %v1405_v10 }
 0x252   :  { %1454 = vmatmul.f32.gmra.mxu2 %v418_v23  ;;  %v427_v23 = vld [vmem:[#allocation2 + $0xaa8] sm:$0xff] }
 0x253   :  { %8145 = vst [vmem:[#allocation17_spill] sm:$0xff] %v5854_v27  ;;  %v429_v27 = vld [vmem:[#allocation2 + $0xab8] sm:$0xff] }
 0x255   :  { %1711 = vmatmul.f32.gmra.mxu3 %v419_v24  ;;  %v1407_v39 = vpop.f32.mrf.mxu2  ;;  %v896_v46 = vpop.f32.mrf.mxu0 }
 0x256   :  { %v1408_v53 = vadd.f32 %v1407_v39, %v1151_v31  ;;  %v1153_v34 = vpop.f32.mrf.mxu1  ;;  %v428_v31 = vld [vmem:[#allocation2 + $0xab0] sm:$0xff] }
 0x257   :  { %v1154_v0 = vadd.f32 %v1153_v34, %v896_v46  ;;  %v431_v46 = vld [vmem:[#allocation2 + $0xac8] sm:$0xff] }
 0x258   :  { %v1664_v49 = vpop.f32.mrf.mxu3  ;;  %943 = vmatmul.f32.gmra.mxu0 %v421_v35  ;;  %1200 = vmatmul.f32.gmra.mxu1 %v422_v51 }
 0x259   :  { %v5856_v63 = vadd.f32 %v1664_v49, %v1408_v53 }
 0x25a   :  { %1457 = vmatmul.f32.gmra.mxu2 %v423_v56  ;;  %v432_v56 = vld [vmem:[#allocation2 + $0xad0] sm:$0xff] }
 0x25b   :  { %8146 = vst [vmem:[#allocation18_spill] sm:$0xff] %v5856_v63  ;;  %v434_v63 = vld [vmem:[#allocation2 + $0xae0] sm:$0xff] }
 0x25d   :  { %1714 = vmatmul.f32.gmra.mxu3 %v424_v57  ;;  %v1410_v10 = vpop.f32.mrf.mxu2  ;;  %v899_v16 = vpop.f32.mrf.mxu0 }
 0x25e   :  { %v1411_v24 = vadd.f32 %v1410_v10, %v1154_v0  ;;  %v1156_v5 = vpop.f32.mrf.mxu1  ;;  %v433_v0 = vld [vmem:[#allocation2 + $0xad8] sm:$0xff] }
 0x25f   :  { %v1157_v35 = vadd.f32 %v1156_v5, %v899_v16  ;;  %v436_v16 = vld [vmem:[#allocation2 + $0xaf0] sm:$0xff] }
 0x260   :  { %v1667_v21 = vpop.f32.mrf.mxu3  ;;  %946 = vmatmul.f32.gmra.mxu0 %v426_v9  ;;  %1203 = vmatmul.f32.gmra.mxu1 %v427_v23 }
 0x261   :  { %v5858_v39 = vadd.f32 %v1667_v21, %v1411_v24 }
 0x262   :  { %1460 = vmatmul.f32.gmra.mxu2 %v428_v31  ;;  %v437_v31 = vld [vmem:[#allocation2 + $0xaf8] sm:$0xff] }
 0x263   :  { %8147 = vst [vmem:[#allocation19_spill] sm:$0xff] %v5858_v39  ;;  %v439_v39 = vld [vmem:[#allocation2 + $0xb08] sm:$0xff] }
 0x265   :  { %1717 = vmatmul.f32.gmra.mxu3 %v429_v27  ;;  %v1413_v53 = vpop.f32.mrf.mxu2  ;;  %v902_v49 = vpop.f32.mrf.mxu0 }
 0x266   :  { %v1414_v57 = vadd.f32 %v1413_v53, %v1157_v35  ;;  %v1159_v34 = vpop.f32.mrf.mxu1  ;;  %v438_v35 = vld [vmem:[#allocation2 + $0xb00] sm:$0xff] }
 0x267   :  { %v1160_v9 = vadd.f32 %v1159_v34, %v902_v49  ;;  %v441_v49 = vld [vmem:[#allocation2 + $0xb18] sm:$0xff] }
 0x268   :  { %v1670_v51 = vpop.f32.mrf.mxu3  ;;  %949 = vmatmul.f32.gmra.mxu0 %v431_v46  ;;  %1206 = vmatmul.f32.gmra.mxu1 %v432_v56  ;;  %v442_v56 = vld [vmem:[#allocation2 + $0xb20] sm:$0xff] }
 0x269   :  { %v5860_v10 = vadd.f32 %v1670_v51, %v1414_v57 }
 0x26a   :  { %1463 = vmatmul.f32.gmra.mxu2 %v433_v0  ;;  %v443_v0 = vld [vmem:[#allocation2 + $0xb28] sm:$0xff] }
 0x26b   :  { %8148 = vst [vmem:[#allocation20_spill] sm:$0xff] %v5860_v10  ;;  %v444_v10 = vld [vmem:[#allocation2 + $0xb30] sm:$0xff] }
 0x26d   :  { %1720 = vmatmul.f32.gmra.mxu3 %v434_v63  ;;  %v1416_v24 = vpop.f32.mrf.mxu2  ;;  %v905_v21 = vpop.f32.mrf.mxu0 }
 0x26e   :  { %v1417_v27 = vadd.f32 %v1416_v24, %v1160_v9  ;;  %v1162_v5 = vpop.f32.mrf.mxu1 }
 0x26f   :  { %v1163_v46 = vadd.f32 %v1162_v5, %v905_v21 }
 0x270   :  { %v1673_v23 = vpop.f32.mrf.mxu3  ;;  %952 = vmatmul.f32.gmra.mxu0 %v436_v16  ;;  %1209 = vmatmul.f32.gmra.mxu1 %v437_v31  ;;  %v447_v31 = vld [vmem:[#allocation2 + $0xb48] sm:$0xff] }
 0x271   :  { %v5862_v53 = vadd.f32 %v1673_v23, %v1417_v27 }
 0x272   :  { %1466 = vmatmul.f32.gmra.mxu2 %v438_v35  ;;  %v448_v35 = vld [vmem:[#allocation2 + $0xb50] sm:$0xff] }
 0x275   :  { %1723 = vmatmul.f32.gmra.mxu3 %v439_v39  ;;  %v1419_v57 = vpop.f32.mrf.mxu2  ;;  %v908_v51 = vpop.f32.mrf.mxu0  ;;  %v446_v39 = vld [vmem:[#allocation2 + $0xb40] sm:$0xff] }
 0x276   :  { %v1420_v63 = vadd.f32 %v1419_v57, %v1163_v46  ;;  %v1165_v24 = vpop.f32.mrf.mxu1  ;;  %v565_v57 = vld [vmem:[%s8131_s0 + $0x278] sm:$0xff] }
 0x277   :  { %v1166_v16 = vadd.f32 %v1165_v24, %v908_v51  ;;  %v643_v24 = vld [vmem:[%s8133_s2 + $0x268] sm:$0xff] }
 0x278   :  { %v1676_v34 = vpop.f32.mrf.mxu3  ;;  %955 = vmatmul.f32.gmra.mxu0 %v441_v49  ;;  %1212 = vmatmul.f32.gmra.mxu1 %v442_v56  ;;  %v449_v49 = vld [vmem:[#allocation2 + $0xb58] sm:$0xff] }
 0x279   :  { %v5864_v9 = vadd.f32 %v1676_v34, %v1420_v63  ;;  %v564_v63 = vld [vmem:[%s8131_s0 + $0x270] sm:$0xff] }
 0x27a   :  { %1469 = vmatmul.f32.gmra.mxu2 %v443_v0  ;;  %v644_v34 = vld [vmem:[%s8133_s2 + $0x270] sm:$0xff]  ;;  %v563_v0 = vld [vmem:[%s8131_s0 + $0x268] sm:$0xff] }
 0x27b   :  { %v724_v56 = vmul.f32 %v644_v34, %v564_v63  ;;  %v560_v34 = vld [vmem:[%s8131_s0 + $0x250] sm:$0xff] }
 0x27d   :  { %1726 = vmatmul.f32.gmra.mxu3 %v444_v10  ;;  %v1422_v27 = vpop.f32.mrf.mxu2  ;;  %v5866_v23 = vpop.f32.mrf.mxu0  ;;  %v645_v10 = vld [vmem:[%s8133_s2 + $0x278] sm:$0xff] }
 0x27e   :  { %v1423_v21 = vadd.f32 %v1422_v27, %v1166_v16  ;;  %v725_v51 = vmul.f32 %v645_v10, %v565_v57  ;;  %v451_v27 = vld [vmem:[#allocation2 + $0xb68] sm:$0xff]  ;;  %v454_v10 = vld [vmem:[#allocation2 + $0xb80] sm:$0xff] }
 0x280   :  { %v1679_v5 = vpop.f32.mrf.mxu3  ;;  %958 = vmatmul.f32.gmra.mxu0 %v446_v39  ;;  %1215 = vmatmul.f32.gmra.mxu1 %v447_v31  ;;  %v723_v39 = vmul.f32 %v643_v24, %v563_v0  ;;  %v452_v31 = vld [vmem:[#allocation2 + $0xb70] sm:$0xff]  ;;  %v559_v24 = vld [vmem:[%s8131_s0 + $0x248] sm:$0xff] }
 0x281   :  { %v5868_v46 = vadd.f32 %v1679_v5, %v1423_v21  ;;  %1754 = vmatpush.msrb.mxu0 %v725_v51  ;;  %v562_v21 = vld [vmem:[%s8131_s0 + $0x260] sm:$0xff]  ;;  %v641_v51 = vld [vmem:[%s8133_s2 + $0x258] sm:$0xff] }
 0x282   :  { %1472 = vmatmul.f32.gmra.mxu2 %v448_v35  ;;  %v642_v5 = vld [vmem:[%s8133_s2 + $0x260] sm:$0xff]  ;;  %v453_v35 = vld [vmem:[#allocation2 + $0xb78] sm:$0xff] }
 0x283   :  { %1755 = vmatpush.msrb.mxu0 %v724_v56  ;;  %v722_v57 = vmul.f32 %v642_v5, %v562_v21  ;;  %v640_v56 = vld [vmem:[%s8133_s2 + $0x250] sm:$0xff] }
 0x284   :  { %v720_v0 = vmul.f32 %v640_v56, %v560_v34  ;;  %v456_v21 = vld [vmem:[#allocation2 + $0xb90] sm:$0xff]  ;;  %v459_v34 = vld [vmem:[#allocation2 + $0xba8] sm:$0xff] }
 0x285   :  { %1729 = vmatmul.f32.gmra.mxu3 %v449_v49  ;;  %v5888_v16 = vpop.f32.mrf.mxu0  ;;  %v561_v49 = vld [vmem:[%s8131_s0 + $0x258] sm:$0xff]  ;;  %1756 = vmatpush.msrb.mxu0 %v723_v39 }
 0x286   :  { %v721_v63 = vmul.f32 %v641_v51, %v561_v49  ;;  %v458_v49 = vld [vmem:[#allocation2 + $0xba0] sm:$0xff]  ;;  %v557_v51 = vld [vmem:[%s8131_s0 + $0x238] sm:$0xff] }
 0x287   :  { %1757 = vmatpush.msrb.mxu0 %v722_v57  ;;  %v457_v57 = vld [vmem:[#allocation2 + $0xb98] sm:$0xff] }
 0x288   :  { %961 = vmatmul.f32.gmra.mxu0 %v451_v27  ;;  %1218 = vmatmul.f32.gmra.mxu1 %v452_v31  ;;  %v639_v27 = vld [vmem:[%s8133_s2 + $0x248] sm:$0xff]  ;;  %v558_v31 = vld [vmem:[%s8131_s0 + $0x240] sm:$0xff] }
 0x289   :  { %1758 = vmatpush.msrb.mxu0 %v721_v63  ;;  %v719_v5 = vmul.f32 %v639_v27, %v559_v24  ;;  %v637_v63 = vld [vmem:[%s8133_s2 + $0x238] sm:$0xff]  ;;  %v556_v24 = vld [vmem:[%s8131_s0 + $0x230] sm:$0xff] }
 0x28a   :  { %1475 = vmatmul.f32.gmra.mxu2 %v453_v35  ;;  %v638_v35 = vld [vmem:[%s8133_s2 + $0x240] sm:$0xff]  ;;  %v717_v56 = vmul.f32 %v637_v63, %v557_v51 }
 0x28b   :  { %1759 = vmatpush.msrb.mxu0 %v720_v0  ;;  %v636_v0 = vld [vmem:[%s8133_s2 + $0x230] sm:$0xff]  ;;  %v462_v51 = vld [vmem:[#allocation2 + $0xbc0] sm:$0xff] }
 0x28c   :  { %v716_v27 = vmul.f32 %v636_v0, %v556_v24  ;;  %v553_v24 = vld [vmem:[%s8131_s0 + $0x218] sm:$0xff]  ;;  %v464_v0 = vld [vmem:[#allocation2 + $0xbd0] sm:$0xff] }
 0x28d   :  { %1732 = vmatmul.f32.gmra.mxu3 %v454_v10  ;;  %v5914_v39 = vpop.f32.mrf.mxu0  ;;  %v718_v10 = vmul.f32 %v638_v35, %v558_v31  ;;  %1760 = vmatpush.msrb.mxu0 %v719_v5  ;;  %v635_v5 = vld [vmem:[%s8133_s2 + $0x228] sm:$0xff]  ;;  %v461_v35 = vld [vmem:[#allocation2 + $0xbb8] sm:$0xff] }
 0x28e   :  { %8149 = vst [vmem:[#allocation21_spill] sm:$0xff] %v5914_v39 }
 0x28f   :  { %1761 = vmatpush.msrb.mxu0 %v718_v10  ;;  %v634_v10 = vld [vmem:[%s8133_s2 + $0x220] sm:$0xff] }
 0x290   :  { %964 = vmatmul.f32.gmra.mxu0 %v456_v21  ;;  %1221 = vmatmul.f32.gmra.mxu1 %v457_v57  ;;  %v555_v21 = vld [vmem:[%s8131_s0 + $0x228] sm:$0xff] }
 0x291   :  { %1762 = vmatpush.msrb.mxu0 %v717_v56  ;;  %v715_v57 = vmul.f32 %v635_v5, %v555_v21  ;;  %v633_v56 = vld [vmem:[%s8133_s2 + $0x218] sm:$0xff]  ;;  %v552_v5 = vld [vmem:[%s8131_s0 + $0x210] sm:$0xff] }
 0x292   :  { %1478 = vmatmul.f32.gmra.mxu2 %v458_v49  ;;  %v554_v49 = vld [vmem:[%s8131_s0 + $0x220] sm:$0xff]  ;;  %v713_v21 = vmul.f32 %v633_v56, %v553_v24  ;;  %v468_v56 = vld [vmem:[#allocation2 + $0xbf0] sm:$0xff] }
 0x293   :  { %1763 = vmatpush.msrb.mxu0 %v716_v27  ;;  %v714_v63 = vmul.f32 %v634_v10, %v554_v49  ;;  %v632_v27 = vld [vmem:[%s8133_s2 + $0x210] sm:$0xff]  ;;  %v631_v49 = vld [vmem:[%s8133_s2 + $0x208] sm:$0xff]  ;;  %v550_v24 = vld [vmem:[%s8131_s0 + $0x200] sm:$0xff] }
 0x295   :  { %1735 = vmatmul.f32.gmra.mxu3 %v459_v34  ;;  %v5940_v31 = vpop.f32.mrf.mxu0  ;;  %v463_v34 = vld [vmem:[#allocation2 + $0xbc8] sm:$0xff]  ;;  %1764 = vmatpush.msrb.mxu0 %v715_v57 }
 0x296   :  { %8150 = vst [vmem:[#allocation22_spill] sm:$0xff] %v5940_v31  ;;  %v551_v57 = vld [vmem:[%s8131_s0 + $0x208] sm:$0xff]  ;;  %v474_v31 = vld [vmem:[#allocation2 + $0xc20] sm:$0xff] }
 0x297   :  { %1765 = vmatpush.msrb.mxu0 %v714_v63  ;;  %v630_v63 = vld [vmem:[%s8133_s2 + $0x200] sm:$0xff] }
 0x298   :  { %967 = vmatmul.f32.gmra.mxu0 %v461_v35  ;;  %1224 = vmatmul.f32.gmra.mxu1 %v462_v51  ;;  %v712_v35 = vmul.f32 %v632_v27, %v552_v5  ;;  %v466_v51 = vld [vmem:[#allocation2 + $0xbe0] sm:$0xff]  ;;  %v710_v5 = vmul.f32 %v630_v63, %v550_v24  ;;  %v469_v27 = vld [vmem:[#allocation2 + $0xbf8] sm:$0xff] }
 0x299   :  { %1766 = vmatpush.msrb.mxu0 %v713_v21  ;;  %v478_v24 = vld [vmem:[#allocation2 + $0xc40] sm:$0xff] }
 0x29a   :  { %1481 = vmatmul.f32.gmra.mxu2 %v463_v34  ;;  %v711_v34 = vmul.f32 %v631_v49, %v551_v57  ;;  %v471_v57 = vld [vmem:[#allocation2 + $0xc08] sm:$0xff]  ;;  %v472_v49 = vld [vmem:[#allocation2 + $0xc10] sm:$0xff] }
 0x29b   :  { %1767 = vmatpush.msrb.mxu0 %v712_v35  ;;  %v476_v35 = vld [vmem:[#allocation2 + $0xc30] sm:$0xff] }
 0x29d   :  { %1738 = vmatmul.f32.gmra.mxu3 %v464_v0  ;;  %v5966_v10 = vpop.f32.mrf.mxu0  ;;  %v467_v0 = vld [vmem:[#allocation2 + $0xbe8] sm:$0xff]  ;;  %1768 = vmatpush.msrb.mxu0 %v711_v34 }
 0x29e   :  { %8151 = vst [vmem:[#allocation23_spill] sm:$0xff] %v5966_v10  ;;  %v473_v10 = vld [vmem:[#allocation2 + $0xc18] sm:$0xff]  ;;  %v479_v34 = vld [vmem:[#allocation2 + $0xc48] sm:$0xff] }
 0x29f   :  { %1769 = vmatpush.msrb.mxu0 %v710_v5  ;;  %v483_v5 = vld [vmem:[#allocation2 + $0xc68] sm:$0xff] }
 0x2a0   :  { %970 = vmatmul.f32.gmra.mxu0 %v466_v51  ;;  %1227 = vmatmul.f32.gmra.mxu1 %v467_v0  ;;  %v477_v51 = vld [vmem:[#allocation2 + $0xc38] sm:$0xff] }
 0x2a1   :  { %v481_v0 = vld [vmem:[#allocation2 + $0xc58] sm:$0xff] }
 0x2a2   :  { %1484 = vmatmul.f32.gmra.mxu2 %v468_v56  ;;  %v482_v56 = vld [vmem:[#allocation2 + $0xc60] sm:$0xff] }
 0x2a5   :  { %1741 = vmatmul.f32.gmra.mxu3 %v469_v27  ;;  %v5974_v21 = vpop.f32.mrf.mxu0  ;;  %v484_v27 = vld [vmem:[#allocation2 + $0xc70] sm:$0xff] }
 0x2a6   :  { %8152 = vst [vmem:[#allocation24_spill] sm:$0xff] %v5974_v21  ;;  %v140_v21 = vld [vmem:[#allocation2 + $0x1b0] sm:$0xff] }
 0x2a8   :  { %973 = vmatmul.f32.gmra.mxu0 %v471_v57  ;;  %1230 = vmatmul.f32.gmra.mxu1 %v472_v49  ;;  %v95_v49 = vld [vmem:[#allocation2 + $0x48] sm:$0xff] }
 0x2aa   :  { %1487 = vmatmul.f32.gmra.mxu2 %v473_v10  ;;  %v90_v10 = vld [vmem:[#allocation2 + $0x20] sm:$0xff] }
 0x2ad   :  { %1744 = vmatmul.f32.gmra.mxu3 %v474_v31  ;;  %v5976_v39 = vpop.f32.mrf.mxu0 }
 0x2ae   :  { %8153 = vst [vmem:[#allocation25_spill] sm:$0xff] %v5976_v39  ;;  %v2011_v39 = vld [vmem:[#allocation4] sm:$0xf] }
 0x2af   :  { %4635 = vmatpush.msk.msrb.mxu1 %vm2257_vm0, %v2011_v39 }
 0x2b0   :  { %976 = vmatmul.f32.gmra.mxu0 %v476_v35  ;;  %1233 = vmatmul.f32.gmra.mxu1 %v477_v51  ;;  %v100_v51 = vld [vmem:[#allocation2 + $0x70] sm:$0xff] }
 0x2b2   :  { %1490 = vmatmul.f32.gmra.mxu2 %v478_v24  ;;  %v5986_v24 = vpop.f32.mrf.mxu1 }
 0x2b5   :  { %1747 = vmatmul.f32.gmra.mxu3 %v479_v34  ;;  %v5978_v63 = vpop.f32.mrf.mxu0 }
 0x2b6   :  { %8154 = vst [vmem:[#allocation26_spill] sm:$0xff] %v5978_v63 }
 0x2b8   :  { %979 = vmatmul.f32.gmra.mxu0 %v481_v0  ;;  %1236 = vmatmul.f32.gmra.mxu1 %v482_v56  ;;  %v105_v0 = vld [vmem:[#allocation2 + $0x98] sm:$0xff] }
 0x2ba   :  { %1493 = vmatmul.f32.gmra.mxu2 %v483_v5  ;;  %v5990_v56 = vpop.f32.mrf.mxu1 }
 0x2bd   :  { %1750 = vmatmul.f32.gmra.mxu3 %v484_v27  ;;  %v5980_v31 = vpop.f32.mrf.mxu0  ;;  %v110_v27 = vld [vmem:[#allocation2 + $0xc0] sm:$0xff] }
 0x2be   :  { %8155 = vst [vmem:[#allocation27_spill] sm:$0xff] %v5980_v31 }
 0x2c0   :  { %1770 = vmatmul.f32.vlgmr.msrb.gmra.mxu0 %v90_v10 }
 0x2c2   :  { %v5994_v10 = vpop.f32.mrf.mxu1 }
 0x2c5   :  { %v5982_v57 = vpop.f32.mrf.mxu0 }
 0x2c6   :  { %8156 = vst [vmem:[#allocation28_spill] sm:$0xff] %v5982_v57 }
 0x2c8   :  { %1773 = vmatmul.f32.gmra.mxu0 %v95_v49  ;;  %v115_v49 = vld [vmem:[#allocation2 + $0xe8] sm:$0xff] }
 0x2cd   :  { %v5984_v35 = vpop.f32.mrf.mxu0 }
 0x2ce   :  { %8157 = vst [vmem:[#allocation29_spill] sm:$0xff] %v5984_v35  ;;  %v5998_v35 = vpop.f32.mrf.mxu1 }
 0x2d0   :  { %1776 = vmatmul.f32.gmra.mxu0 %v100_v51  ;;  %v120_v51 = vld [vmem:[#allocation2 + $0x110] sm:$0xff] }
 0x2d5   :  { %v5988_v34 = vpop.f32.mrf.mxu0 }
 0x2d6   :  { %8158 = vst [vmem:[#allocation30_spill] sm:$0xff] %v5988_v34  ;;  %v6004_v63 = vpop.f32.mrf.mxu1 }
 0x2d7   :  { %8163 = vst [vmem:[#allocation35_spill] sm:$0xff] %v6004_v63 }
 0x2d8   :  { %1779 = vmatmul.f32.gmra.mxu0 %v105_v0  ;;  %v125_v0 = vld [vmem:[#allocation2 + $0x138] sm:$0xff] }
 0x2dd   :  { %v5992_v5 = vpop.f32.mrf.mxu0 }
 0x2de   :  { %8159 = vst [vmem:[#allocation31_spill] sm:$0xff] %v5992_v5 }
 0x2e0   :  { %1782 = vmatmul.f32.gmra.mxu0 %v110_v27  ;;  %v130_v27 = vld [vmem:[#allocation2 + $0x160] sm:$0xff] }
 0x2e5   :  { %v5996_v57 = vpop.f32.mrf.mxu0 }
 0x2e6   :  { %8160 = vst [vmem:[#allocation32_spill] sm:$0xff] %v5996_v57  ;;  %v6008_v57 = vpop.f32.mrf.mxu1 }
 0x2e7   :  { %8165 = vst [vmem:[#allocation37_spill] sm:$0xff] %v6008_v57  ;;  %v150_v57 = vld [vmem:[#allocation2 + $0x200] sm:$0xff] }
 0x2e8   :  { %1785 = vmatmul.f32.gmra.mxu0 %v115_v49 }
 0x2ed   :  { %v6000_v31 = vpop.f32.mrf.mxu0 }
 0x2ee   :  { %8161 = vst [vmem:[#allocation33_spill] sm:$0xff] %v6000_v31  ;;  %v135_v31 = vld [vmem:[#allocation2 + $0x188] sm:$0xff] }
 0x2f0   :  { %1788 = vmatmul.f32.gmra.mxu0 %v120_v51  ;;  %v6012_v51 = vpop.f32.mrf.mxu1 }
 0x2f1   :  { %8167 = vst [vmem:[#allocation39_spill] sm:$0xff] %v6012_v51 }
 0x2f5   :  { %v6002_v34 = vpop.f32.mrf.mxu0 }
 0x2f6   :  { %8162 = vst [vmem:[#allocation34_spill] sm:$0xff] %v6002_v34 }
 0x2f8   :  { %1791 = vmatmul.f32.gmra.mxu0 %v125_v0  ;;  %v6016_v0 = vpop.f32.mrf.mxu1 }
 0x2f9   :  { %8169 = vst [vmem:[#allocation41_spill] sm:$0xff] %v6016_v0 }
 0x2fd   :  { %v6006_v5 = vpop.f32.mrf.mxu0 }
 0x2fe   :  { %8164 = vst [vmem:[#allocation36_spill] sm:$0xff] %v6006_v5 }
 0x300   :  { %1794 = vmatmul.f32.gmra.mxu0 %v130_v27  ;;  %v145_v27 = vld [vmem:[#allocation2 + $0x1d8] sm:$0xff]  ;;  %v6022_v39 = vpop.f32.mrf.mxu1 }
 0x301   :  { %8172 = vst [vmem:[#allocation44_spill] sm:$0xff] %v6022_v39 }
 0x305   :  { %v6010_v49 = vpop.f32.mrf.mxu0 }
 0x306   :  { %8166 = vst [vmem:[#allocation38_spill] sm:$0xff] %v6010_v49 }
 0x308   :  { %1797 = vmatmul.f32.gmra.mxu0 %v135_v31  ;;  %v155_v31 = vld [vmem:[#allocation2 + $0x228] sm:$0xff]  ;;  %v6026_v51 = vpop.f32.mrf.mxu1 }
 0x309   :  { %8174 = vst [vmem:[#allocation46_spill] sm:$0xff] %v6026_v51 }
 0x30d   :  { %v6014_v34 = vpop.f32.mrf.mxu0 }
 0x30e   :  { %8168 = vst [vmem:[#allocation40_spill] sm:$0xff] %v6014_v34 }
 0x310   :  { %1800 = vmatmul.f32.gmra.mxu0 %v140_v21  ;;  %v160_v21 = vld [vmem:[#allocation2 + $0x250] sm:$0xff]  ;;  %v6030_v0 = vpop.f32.mrf.mxu1 }
 0x311   :  { %8176 = vst [vmem:[#allocation48_spill] sm:$0xff] %v6030_v0  ;;  %v6047_v0 = vpop.f32.mrf.mxu2 }
 0x315   :  { %v6018_v5 = vpop.f32.mrf.mxu0 }
 0x316   :  { %8170 = vst [vmem:[#allocation42_spill] sm:$0xff] %v6018_v5 }
 0x318   :  { %1803 = vmatmul.f32.gmra.mxu0 %v145_v27  ;;  %v165_v27 = vld [vmem:[#allocation2 + $0x278] sm:$0xff] }
 0x31d   :  { %v6020_v63 = vpop.f32.mrf.mxu0 }
 0x31e   :  { %8171 = vst [vmem:[#allocation43_spill] sm:$0xff] %v6020_v63  ;;  %v6034_v63 = vpop.f32.mrf.mxu1 }
 0x31f   :  { %8178 = vst [vmem:[#allocation50_spill] sm:$0xff] %v6034_v63 }
 0x320   :  { %1806 = vmatmul.f32.gmra.mxu0 %v150_v57  ;;  %v170_v57 = vld [vmem:[#allocation2 + $0x2a0] sm:$0xff] }
 0x325   :  { %v6024_v49 = vpop.f32.mrf.mxu0 }
 0x326   :  { %8173 = vst [vmem:[#allocation45_spill] sm:$0xff] %v6024_v49  ;;  %v6039_v51 = vpop.f32.mrf.mxu1 }
 0x328   :  { %1809 = vmatmul.f32.gmra.mxu0 %v155_v31 }
 0x32d   :  { %v6028_v34 = vpop.f32.mrf.mxu0 }
 0x32e   :  { %8175 = vst [vmem:[#allocation47_spill] sm:$0xff] %v6028_v34  ;;  %v175_v34 = vld [vmem:[#allocation2 + $0x2c8] sm:$0xff] }
 0x330   :  { %1812 = vmatmul.f32.gmra.mxu0 %v160_v21 }
 0x335   :  { %v6032_v5 = vpop.f32.mrf.mxu0 }
 0x336   :  { %8177 = vst [vmem:[#allocation49_spill] sm:$0xff] %v6032_v5  ;;  %v180_v5 = vld [vmem:[#allocation2 + $0x2f0] sm:$0xff] }
 0x338   :  { %1815 = vmatmul.f32.gmra.mxu0 %v165_v27 }
 0x33d   :  { %v1771_v39 = vpop.f32.mrf.mxu0 }
 0x33e   :  { %v1772_v49 = vadd.f32 %v1771_v39, %v5756_v15  ;;  %v6044_v15 = vpop.f32.mrf.mxu1 }
 0x340   :  { %1818 = vmatmul.f32.gmra.mxu0 %v170_v57  ;;  %4636 = vmatmul.msk.f32.vlgmr.msrb.gmra.mxu1 %vm2016_vm1, %v1772_v49  ;;  %v185_v49 = vld [vmem:[#allocation2 + $0x318] sm:$0xff] }
 0x345   :  { %v1774_v31 = vpop.f32.mrf.mxu0 }
 0x346   :  { %v1775_v21 = vadd.f32 %v1774_v31, %v5758_v26  ;;  %v6050_v26 = vpop.f32.mrf.mxu1  ;;  %v190_v31 = vld [vmem:[#allocation2 + $0x340] sm:$0xff] }
 0x348   :  { %1821 = vmatmul.f32.gmra.mxu0 %v175_v34  ;;  %4637 = vmatmul.msk.f32.gmra.mxu1 %vm2016_vm1, %v1775_v21 }
 0x34d   :  { %v1777_v27 = vpop.f32.mrf.mxu0 }
 0x34e   :  { %v1778_v63 = vadd.f32 %v1777_v27, %v5760_v37 }
 0x350   :  { %1824 = vmatmul.f32.gmra.mxu0 %v180_v5  ;;  %4638 = vmatmul.msk.f32.gmra.mxu1 %vm2016_vm1, %v1778_v63  ;;  %v6054_v63 = vpop.f32.mrf.mxu2  ;;  %v6056_v5 = vpop.f32.mrf.mxu1 }
 0x351   :  { %8179 = vst [vmem:[#allocation51_spill] sm:$0xff] %v6056_v5 }
 0x355   :  { %v1780_v39 = vpop.f32.mrf.mxu0 }
 0x356   :  { %v1781_v57 = vadd.f32 %v1780_v39, %v5762_v48  ;;  %v195_v48 = vld [vmem:[#allocation2 + $0x368] sm:$0xff] }
 0x358   :  { %1827 = vmatmul.f32.gmra.mxu0 %v185_v49  ;;  %4639 = vmatmul.msk.f32.gmra.mxu1 %vm2016_vm1, %v1781_v57  ;;  %v6060_v39 = vpop.f32.mrf.mxu2  ;;  %v200_v57 = vld [vmem:[#allocation2 + $0x390] sm:$0xff] }
 0x35d   :  { %v1783_v34 = vpop.f32.mrf.mxu0 }
 0x35e   :  { %v1784_v37 = vadd.f32 %v1783_v34, %v5764_v59  ;;  %v6063_v34 = vpop.f32.mrf.mxu1 }
 0x35f   :  { %8180 = vst [vmem:[#allocation52_spill] sm:$0xff] %v6063_v34  ;;  %v215_v34 = vld [vmem:[#allocation2 + $0x408] sm:$0xff] }
 0x360   :  { %1830 = vmatmul.f32.gmra.mxu0 %v190_v31  ;;  %4640 = vmatmul.msk.f32.gmra.mxu1 %vm2016_vm1, %v1784_v37  ;;  %v205_v37 = vld [vmem:[#allocation2 + $0x3b8] sm:$0xff]  ;;  %v6066_v5 = vpop.f32.mrf.mxu2 }
 0x365   :  { %v1786_v21 = vpop.f32.mrf.mxu0 }
 0x366   :  { %v1787_v27 = vadd.f32 %v1786_v21, %v5766_v6  ;;  %v6070_v21 = vpop.f32.mrf.mxu1 }
 0x367   :  { %8181 = vst [vmem:[#allocation53_spill] sm:$0xff] %v6070_v21 }
 0x368   :  { %1833 = vmatmul.f32.gmra.mxu0 %v195_v48  ;;  %4641 = vmatmul.msk.f32.gmra.mxu1 %vm2016_vm1, %v1787_v27  ;;  %v210_v27 = vld [vmem:[#allocation2 + $0x3e0] sm:$0xff] }
 0x36d   :  { %v1789_v49 = vpop.f32.mrf.mxu0 }
 0x36e   :  { %v1790_v59 = vadd.f32 %v1789_v49, %v5768_v18  ;;  %v6073_v49 = vpop.f32.mrf.mxu2 }
 0x370   :  { %1836 = vmatmul.f32.gmra.mxu0 %v200_v57  ;;  %4642 = vmatmul.msk.f32.gmra.mxu1 %vm2016_vm1, %v1790_v59  ;;  %v6076_v57 = vpop.f32.mrf.mxu1 }
 0x371   :  { %8182 = vst [vmem:[#allocation54_spill] sm:$0xff] %v6076_v57 }
 0x375   :  { %v1792_v31 = vpop.f32.mrf.mxu0 }
 0x376   :  { %v1793_v6 = vadd.f32 %v1792_v31, %v5770_v30  ;;  %v2759_v31 = vld [vmem:[%s8137_s6 + $0x8] sm:$0xff] }
 0x377   :  { %3015 = vmatpush.msrb.mxu2 %v2759_v31 }
 0x378   :  { %1839 = vmatmul.f32.gmra.mxu0 %v205_v37  ;;  %4643 = vmatmul.msk.f32.gmra.mxu1 %vm2016_vm1, %v1793_v6  ;;  %v6085_v37 = vpop.f32.mrf.mxu1 }
 0x379   :  { %8183 = vst [vmem:[#allocation55_spill] sm:$0xff] %v6085_v37  ;;  %v230_v37 = vld [vmem:[#allocation2 + $0x480] sm:$0xff] }
 0x37d   :  { %v1795_v48 = vpop.f32.mrf.mxu0 }
 0x37e   :  { %v1796_v18 = vadd.f32 %v1795_v48, %v5772_v42  ;;  %v6083_v42 = vpop.f32.mrf.mxu2  ;;  %v220_v48 = vld [vmem:[#allocation2 + $0x430] sm:$0xff] }
 0x380   :  { %1842 = vmatmul.f32.gmra.mxu0 %v210_v27  ;;  %4644 = vmatmul.msk.f32.gmra.mxu1 %vm2016_vm1, %v1796_v18 }
 0x385   :  { %v1798_v59 = vpop.f32.mrf.mxu0 }
 0x386   :  { %v1799_v30 = vadd.f32 %v1798_v59, %v5774_v54  ;;  %v6089_v54 = vpop.f32.mrf.mxu2  ;;  %v225_v59 = vld [vmem:[#allocation2 + $0x458] sm:$0xff] }
 0x388   :  { %1845 = vmatmul.f32.gmra.mxu0 %v215_v34  ;;  %4645 = vmatmul.msk.f32.gmra.mxu1 %vm2016_vm1, %v1799_v30  ;;  %v6092_v34 = vpop.f32.mrf.mxu1 }
 0x389   :  { %8184 = vst [vmem:[#allocation56_spill] sm:$0xff] %v6092_v34 }
 0x38d   :  { %v1801_v6 = vpop.f32.mrf.mxu0 }
 0x38e   :  { %v1802_v27 = vadd.f32 %v1801_v6, %v5776_v2  ;;  %v6095_v57 = vpop.f32.mrf.mxu2 }
 0x390   :  { %1848 = vmatmul.f32.gmra.mxu0 %v220_v48  ;;  %4646 = vmatmul.msk.f32.gmra.mxu1 %vm2016_vm1, %v1802_v27  ;;  %v6099_v6 = vpop.f32.mrf.mxu1  ;;  %v235_v27 = vld [vmem:[#allocation2 + $0x4a8] sm:$0xff] }
 0x391   :  { %8185 = vst [vmem:[#allocation57_spill] sm:$0xff] %v6099_v6 }
 0x395   :  { %v1804_v18 = vpop.f32.mrf.mxu0 }
 0x396   :  { %v1805_v31 = vadd.f32 %v1804_v18, %v5778_v14  ;;  %v2758_v14 = vld [vmem:[%s8137_s6] sm:$0xff] }
 0x397   :  { %3016 = vmatpush.msrb.mxu2 %v2758_v14 }
 0x398   :  { %1851 = vmatmul.f32.gmra.mxu0 %v225_v59  ;;  %4647 = vmatmul.msk.f32.gmra.mxu1 %vm2016_vm1, %v1805_v31  ;;  %v6105_v59 = vpop.f32.mrf.mxu2  ;;  %v240_v31 = vld [vmem:[#allocation2 + $0x4d0] sm:$0xff] }
 0x39d   :  { %v1807_v30 = vpop.f32.mrf.mxu0 }
 0x39e   :  { %v1808_v2 = vadd.f32 %v1807_v30, %v5780_v28  ;;  %v6108_v28 = vpop.f32.mrf.mxu1 }
 0x39f   :  { %8186 = vst [vmem:[#allocation58_spill] sm:$0xff] %v6108_v28 }
 0x3a0   :  { %1854 = vmatmul.f32.gmra.mxu0 %v230_v37  ;;  %4648 = vmatmul.msk.f32.gmra.mxu1 %vm2016_vm1, %v1808_v2  ;;  %v6112_v2 = vpop.f32.mrf.mxu2 }
 0x3a5   :  { %v1810_v48 = vpop.f32.mrf.mxu0 }
 0x3a6   :  { %v1811_v18 = vadd.f32 %v1810_v48, %v5782_v41  ;;  %v6114_v14 = vpop.f32.mrf.mxu1  ;;  %v245_v41 = vld [vmem:[#allocation2 + $0x4f8] sm:$0xff] }
 0x3a7   :  { %8187 = vst [vmem:[#allocation59_spill] sm:$0xff] %v6114_v14  ;;  %v2598_v14 = vld [vmem:[%s8136_s5] sm:$0xff] }
 0x3a8   :  { %1857 = vmatmul.f32.gmra.mxu0 %v235_v27  ;;  %4649 = vmatmul.msk.f32.gmra.mxu1 %vm2016_vm1, %v1811_v18  ;;  %v6118_v27 = vld [vmem:[#allocation6] ss:$0 sm:$0xff]  ;;  %v6120_v18 = vpop.f32.mrf.mxu2 }
 0x3ad   :  { %v1813_v37 = vpop.f32.mrf.mxu0 }
 0x3ae   :  { %v1814_v30 = vadd.f32 %v1813_v37, %v5784_v55  ;;  %v250_v37 = vld [vmem:[#allocation2 + $0x520] sm:$0xff] }
 0x3b0   :  { %1860 = vmatmul.f32.gmra.mxu0 %v240_v31  ;;  %4650 = vmatmul.msk.f32.gmra.mxu1 %vm2016_vm1, %v1814_v30  ;;  %v6129_v21 = vpop.f32.mrf.mxu2 }
 0x3b5   :  { %v1816_v6 = vpop.f32.mrf.mxu0 }
 0x3b6   :  { %v1817_v48 = vadd.f32 %v1816_v6, %v5786_v4 }
 0x3b8   :  { %1863 = vmatmul.f32.gmra.mxu0 %v245_v41  ;;  %4651 = vmatmul.msk.f32.gmra.mxu1 %vm2016_vm1, %v1817_v48  ;;  %v255_v48 = vld [vmem:[#allocation2 + $0x548] sm:$0xff] }
 0x3bd   :  { %v1819_v28 = vpop.f32.mrf.mxu0  ;;  %v2278_v55 = vpop.f32.mrf.mxu1 }
 0x3be   :  { %v1820_v31 = vadd.f32 %v1819_v28, %v5788_v19  ;;  %v2279_v30 = vadd.f32 %v6118_v27, %v2278_v55  ;;  %v2599_v55 = vld [vmem:[%s8136_s5 + $0x8] sm:$0xff] }
 0x3c0   :  { %v2518_v34 = vmax.f32 %v2279_v30, 0.0  ;;  %1866 = vmatmul.f32.gmra.mxu0 %v250_v37  ;;  %4652 = vmatmul.msk.f32.gmra.mxu1 %vm2016_vm1, %v1820_v31  ;;  %v260_v30 = vld [vmem:[#allocation2 + $0x570] sm:$0xff] }
 0x3c2   :  { %v2678_v4 = vmul.f32 %v2598_v14, %v2518_v34 }
 0x3c4   :  { %4716 = vmatmul.msk.f32.vlgmr.msrb.gmra.mxu2 %vm2760_vm2, %v2678_v4 }
 0x3c5   :  { %v1822_v6 = vpop.f32.mrf.mxu0  ;;  %v2281_v41 = vpop.f32.mrf.mxu1 }
 0x3c6   :  { %v1823_v19 = vadd.f32 %v1822_v6, %v5790_v33  ;;  %v2282_v28 = vadd.f32 %v6118_v27, %v2281_v41  ;;  %v2600_v6 = vld [vmem:[%s8136_s5 + $0x10] sm:$0xff]  ;;  %v6143_v41 = vpop.f32.mrf.mxu2 }
 0x3c8   :  { %v2519_v37 = vmax.f32 %v2282_v28, 0.0  ;;  %1869 = vmatmul.f32.gmra.mxu0 %v255_v48  ;;  %4653 = vmatmul.msk.f32.gmra.mxu1 %vm2016_vm1, %v1823_v19 }
 0x3ca   :  { %v2679_v34 = vmul.f32 %v2599_v55, %v2519_v37  ;;  %v265_v37 = vld [vmem:[#allocation2 + $0x598] sm:$0xff] }
 0x3cc   :  { %4717 = vmatmul.msk.f32.gmra.mxu2 %vm2760_vm2, %v2679_v34 }
 0x3cd   :  { %v1825_v14 = vpop.f32.mrf.mxu0  ;;  %v2284_v31 = vpop.f32.mrf.mxu1 }
 0x3ce   :  { %v1826_v4 = vadd.f32 %v1825_v14, %v5792_v47  ;;  %v2285_v33 = vadd.f32 %v6118_v27, %v2284_v31  ;;  %v2601_v14 = vld [vmem:[%s8136_s5 + $0x18] sm:$0xff] }
 0x3d0   :  { %v2520_v28 = vmax.f32 %v2285_v33, 0.0  ;;  %1872 = vmatmul.f32.gmra.mxu0 %v260_v30  ;;  %4654 = vmatmul.msk.f32.gmra.mxu1 %vm2016_vm1, %v1826_v4  ;;  %v6153_v30 = vpop.f32.mrf.mxu2 }
 0x3d2   :  { %v2680_v48 = vmul.f32 %v2600_v6, %v2520_v28  ;;  %v270_v28 = vld [vmem:[#allocation2 + $0x5c0] sm:$0xff] }
 0x3d4   :  { %4718 = vmatmul.msk.f32.gmra.mxu2 %vm2760_vm2, %v2680_v48 }
 0x3d5   :  { %v1828_v19 = vpop.f32.mrf.mxu0  ;;  %v2287_v55 = vpop.f32.mrf.mxu1 }
 0x3d6   :  { %v1829_v47 = vadd.f32 %v1828_v19, %v5794_v62  ;;  %v2288_v34 = vadd.f32 %v6118_v27, %v2287_v55  ;;  %v2602_v19 = vld [vmem:[%s8136_s5 + $0x20] sm:$0xff] }
 0x3d8   :  { %v2521_v31 = vmax.f32 %v2288_v34, 0.0  ;;  %1875 = vmatmul.f32.gmra.mxu0 %v265_v37  ;;  %4655 = vmatmul.msk.f32.gmra.mxu1 %vm2016_vm1, %v1829_v47  ;;  %v6162_v47 = vpop.f32.mrf.mxu2 }
 0x3d9   :  { %8188 = vst [vmem:[#allocation60_spill] sm:$0xff] %v6162_v47 }
 0x3da   :  { %v2681_v4 = vmul.f32 %v2601_v14, %v2521_v31  ;;  %v275_v31 = vld [vmem:[#allocation2 + $0x5e8] sm:$0xff] }
 0x3dc   :  { %4719 = vmatmul.msk.f32.gmra.mxu2 %vm2760_vm2, %v2681_v4 }
 0x3dd   :  { %v1831_v33 = vpop.f32.mrf.mxu0  ;;  %v2290_v6 = vpop.f32.mrf.mxu1 }
 0x3de   :  { %v1832_v62 = vadd.f32 %v1831_v33, %v5796_v12  ;;  %v2291_v48 = vadd.f32 %v6118_v27, %v2290_v6  ;;  %v2603_v33 = vld [vmem:[%s8136_s5 + $0x28] sm:$0xff] }
 0x3e0   :  { %v2522_v55 = vmax.f32 %v2291_v48, 0.0  ;;  %1878 = vmatmul.f32.gmra.mxu0 %v270_v28  ;;  %4656 = vmatmul.msk.f32.gmra.mxu1 %vm2016_vm1, %v1832_v62 }
 0x3e2   :  { %v2682_v37 = vmul.f32 %v2602_v19, %v2522_v55  ;;  %v280_v19 = vld [vmem:[#allocation2 + $0x610] sm:$0xff]  ;;  %v6172_v55 = vpop.f32.mrf.mxu2 }
 0x3e3   :  { %8189 = vst [vmem:[#allocation61_spill] sm:$0xff] %v6172_v55 }
 0x3e4   :  { %4720 = vmatmul.msk.f32.gmra.mxu2 %vm2760_vm2, %v2682_v37 }
 0x3e5   :  { %v1834_v34 = vpop.f32.mrf.mxu0  ;;  %v2293_v14 = vpop.f32.mrf.mxu1 }
 0x3e6   :  { %v1835_v12 = vadd.f32 %v1834_v34, %v5798_v29  ;;  %v2294_v4 = vadd.f32 %v6118_v27, %v2293_v14  ;;  %v2604_v34 = vld [vmem:[%s8136_s5 + $0x30] sm:$0xff] }
 0x3e8   :  { %v2523_v6 = vmax.f32 %v2294_v4, 0.0  ;;  %1881 = vmatmul.f32.gmra.mxu0 %v275_v31  ;;  %4657 = vmatmul.msk.f32.gmra.mxu1 %vm2016_vm1, %v1835_v12 }
 0x3ea   :  { %v2683_v28 = vmul.f32 %v2603_v33, %v2523_v6  ;;  %v285_v33 = vld [vmem:[#allocation2 + $0x638] sm:$0xff] }
 0x3ec   :  { %4721 = vmatmul.msk.f32.gmra.mxu2 %vm2760_vm2, %v2683_v28  ;;  %v2605_v28 = vld [vmem:[%s8136_s5 + $0x38] sm:$0xff] }
 0x3ed   :  { %v1837_v62 = vpop.f32.mrf.mxu0  ;;  %v2296_v48 = vpop.f32.mrf.mxu1 }
 0x3ee   :  { %v1838_v29 = vadd.f32 %v1837_v62, %v5800_v45  ;;  %v2297_v37 = vadd.f32 %v6118_v27, %v2296_v48  ;;  %v6186_v62 = vpop.f32.mrf.mxu2 }
 0x3ef   :  { %8190 = vst [vmem:[#allocation62_spill] sm:$0xff] %v6186_v62 }
 0x3f0   :  { %v2524_v14 = vmax.f32 %v2297_v37, 0.0  ;;  %1884 = vmatmul.f32.gmra.mxu0 %v280_v19  ;;  %4658 = vmatmul.msk.f32.gmra.mxu1 %vm2016_vm1, %v1838_v29 }
 0x3f2   :  { %v2684_v31 = vmul.f32 %v2604_v34, %v2524_v14  ;;  %v290_v34 = vld [vmem:[#allocation2 + $0x660] sm:$0xff] }
 0x3f4   :  { %4722 = vmatmul.msk.f32.gmra.mxu2 %vm2760_vm2, %v2684_v31  ;;  %v2606_v31 = vld [vmem:[%s8136_s5 + $0x40] sm:$0xff] }
 0x3f5   :  { %v1840_v12 = vpop.f32.mrf.mxu0  ;;  %v2299_v4 = vpop.f32.mrf.mxu1 }
 0x3f6   :  { %v1841_v6 = vadd.f32 %v1840_v12, %v5802_v61  ;;  %v2300_v45 = vadd.f32 %v6118_v27, %v2299_v4  ;;  %v6196_v4 = vpop.f32.mrf.mxu2 }
 0x3f7   :  { %8191 = vst [vmem:[#allocation63_spill] sm:$0xff] %v6196_v4 }
 0x3f8   :  { %v2525_v48 = vmax.f32 %v2300_v45, 0.0  ;;  %1887 = vmatmul.f32.gmra.mxu0 %v285_v33  ;;  %4659 = vmatmul.msk.f32.gmra.mxu1 %vm2016_vm1, %v1841_v6 }
 0x3fa   :  { %v2685_v19 = vmul.f32 %v2605_v28, %v2525_v48  ;;  %v295_v28 = vld [vmem:[#allocation2 + $0x688] sm:$0xff] }
 0x3fc   :  { %4723 = vmatmul.msk.f32.gmra.mxu2 %vm2760_vm2, %v2685_v19  ;;  %v2607_v19 = vld [vmem:[%s8136_s5 + $0x48] sm:$0xff] }
 0x3fd   :  { %v1843_v29 = vpop.f32.mrf.mxu0  ;;  %v2302_v37 = vpop.f32.mrf.mxu1 }
 0x3fe   :  { %v1844_v61 = vadd.f32 %v1843_v29, %v5804_v13  ;;  %v2303_v14 = vadd.f32 %v6118_v27, %v2302_v37 }
 0x400   :  { %v2526_v12 = vmax.f32 %v2303_v14, 0.0  ;;  %1890 = vmatmul.f32.gmra.mxu0 %v290_v34  ;;  %4660 = vmatmul.msk.f32.gmra.mxu1 %vm2016_vm1, %v1844_v61  ;;  %v6205_v34 = vpop.f32.mrf.mxu2 }
 0x401   :  { %8192 = vst [vmem:[#allocation64_spill] sm:$0xff] %v6205_v34 }
 0x402   :  { %v2686_v33 = vmul.f32 %v2606_v31, %v2526_v12  ;;  %v300_v31 = vld [vmem:[#allocation2 + $0x6b0] sm:$0xff] }
 0x404   :  { %4724 = vmatmul.msk.f32.gmra.mxu2 %vm2760_vm2, %v2686_v33  ;;  %v2608_v33 = vld [vmem:[%s8136_s5 + $0x50] sm:$0xff] }
 0x405   :  { %v1846_v6 = vpop.f32.mrf.mxu0  ;;  %v2305_v45 = vpop.f32.mrf.mxu1 }
 0x406   :  { %v1847_v13 = vadd.f32 %v1846_v6, %v5806_v32  ;;  %v2306_v48 = vadd.f32 %v6118_v27, %v2305_v45 }
 0x408   :  { %v2527_v29 = vmax.f32 %v2306_v48, 0.0  ;;  %1893 = vmatmul.f32.gmra.mxu0 %v295_v28  ;;  %4661 = vmatmul.msk.f32.gmra.mxu1 %vm2016_vm1, %v1847_v13  ;;  %v305_v48 = vld [vmem:[#allocation2 + $0x6d8] sm:$0xff] }
 0x40a   :  { %v2687_v37 = vmul.f32 %v2607_v19, %v2527_v29  ;;  %v6215_v19 = vpop.f32.mrf.mxu2 }
 0x40b   :  { %8193 = vst [vmem:[#allocation65_spill] sm:$0xff] %v6215_v19  ;;  %v8200_v19 = vld [vmem:[#allocation14_spill] sm:$0xff] }
 0x40c   :  { %4725 = vmatmul.msk.f32.gmra.mxu2 %vm2760_vm2, %v2687_v37  ;;  %v2609_v37 = vld [vmem:[%s8136_s5 + $0x58] sm:$0xff] }
 0x40d   :  { %v1849_v61 = vpop.f32.mrf.mxu0  ;;  %v2308_v14 = vpop.f32.mrf.mxu1 }
 0x40e   :  { %v1850_v32 = vadd.f32 %v1849_v61, %v5808_v50  ;;  %v2309_v12 = vadd.f32 %v6118_v27, %v2308_v14 }
 0x410   :  { %v2528_v6 = vmax.f32 %v2309_v12, 0.0  ;;  %1896 = vmatmul.f32.gmra.mxu0 %v300_v31  ;;  %4662 = vmatmul.msk.f32.gmra.mxu1 %vm2016_vm1, %v1850_v32  ;;  %v310_v12 = vld [vmem:[#allocation2 + $0x700] sm:$0xff] }
 0x412   :  { %v2688_v45 = vmul.f32 %v2608_v33, %v2528_v6  ;;  %v2610_v6 = vld [vmem:[%s8136_s5 + $0x60] sm:$0xff] }
 0x414   :  { %4726 = vmatmul.msk.f32.gmra.mxu2 %vm2760_vm2, %v2688_v45  ;;  %v6229_v45 = vpop.f32.mrf.mxu2 }
 0x415   :  { %v1852_v28 = vpop.f32.mrf.mxu0  ;;  %v2311_v13 = vpop.f32.mrf.mxu1  ;;  %8194 = vst [vmem:[#allocation66_spill] sm:$0xff] %v6229_v45  ;;  %v2627_v45 = vld [vmem:[%s8136_s5 + $0xe8] sm:$0xff] }
 0x416   :  { %v1853_v50 = vadd.f32 %v1852_v28, %v5810_v3  ;;  %v2312_v29 = vadd.f32 %v6118_v27, %v2311_v13 }
 0x418   :  { %v2529_v61 = vmax.f32 %v2312_v29, 0.0  ;;  %1899 = vmatmul.f32.gmra.mxu0 %v305_v48  ;;  %4663 = vmatmul.msk.f32.gmra.mxu1 %vm2016_vm1, %v1853_v50  ;;  %v315_v29 = vld [vmem:[#allocation2 + $0x728] sm:$0xff] }
 0x41a   :  { %v2689_v14 = vmul.f32 %v2609_v37, %v2529_v61  ;;  %v2611_v61 = vld [vmem:[%s8136_s5 + $0x68] sm:$0xff] }
 0x41c   :  { %4727 = vmatmul.msk.f32.gmra.mxu2 %vm2760_vm2, %v2689_v14 }
 0x41d   :  { %v1855_v31 = vpop.f32.mrf.mxu0  ;;  %v2314_v32 = vpop.f32.mrf.mxu1 }
 0x41e   :  { %v1856_v33 = vadd.f32 %v1855_v31, %v5812_v22  ;;  %v2315_v3 = vadd.f32 %v6118_v27, %v2314_v32  ;;  %v6239_v31 = vpop.f32.mrf.mxu2 }
 0x41f   :  { %8195 = vst [vmem:[#allocation67_spill] sm:$0xff] %v6239_v31 }
 0x420   :  { %v2530_v28 = vmax.f32 %v2315_v3, 0.0  ;;  %1902 = vmatmul.f32.gmra.mxu0 %v310_v12  ;;  %4664 = vmatmul.msk.f32.gmra.mxu1 %vm2016_vm1, %v1856_v33  ;;  %v320_v3 = vld [vmem:[#allocation2 + $0x750] sm:$0xff] }
 0x422   :  { %v2690_v13 = vmul.f32 %v2610_v6, %v2530_v28  ;;  %v2612_v28 = vld [vmem:[%s8136_s5 + $0x70] sm:$0xff] }
 0x424   :  { %4728 = vmatmul.msk.f32.gmra.mxu2 %vm2760_vm2, %v2690_v13 }
 0x425   :  { %v1858_v48 = vpop.f32.mrf.mxu0  ;;  %v2317_v50 = vpop.f32.mrf.mxu1 }
 0x426   :  { %v1859_v22 = vadd.f32 %v1858_v48, %v5814_v40  ;;  %v2318_v37 = vadd.f32 %v6118_v27, %v2317_v50  ;;  %v6248_v50 = vpop.f32.mrf.mxu2 }
 0x427   :  { %8196 = vst [vmem:[#allocation68_spill] sm:$0xff] %v6248_v50  ;;  %v2626_v50 = vld [vmem:[%s8136_s5 + $0xe0] sm:$0xff] }
 0x428   :  { %v2531_v14 = vmax.f32 %v2318_v37, 0.0  ;;  %1905 = vmatmul.f32.gmra.mxu0 %v315_v29  ;;  %4665 = vmatmul.msk.f32.gmra.mxu1 %vm2016_vm1, %v1859_v22  ;;  %v325_v37 = vld [vmem:[#allocation2 + $0x778] sm:$0xff] }
 0x42a   :  { %v2691_v32 = vmul.f32 %v2611_v61, %v2531_v14  ;;  %v2613_v14 = vld [vmem:[%s8136_s5 + $0x78] sm:$0xff] }
 0x42c   :  { %4729 = vmatmul.msk.f32.gmra.mxu2 %vm2760_vm2, %v2691_v32 }
 0x42d   :  { %v1861_v12 = vpop.f32.mrf.mxu0  ;;  %v2320_v33 = vpop.f32.mrf.mxu1 }
 0x42e   :  { %v1862_v40 = vadd.f32 %v1861_v12, %v5816_v60  ;;  %v2321_v6 = vadd.f32 %v6118_v27, %v2320_v33 }
 0x430   :  { %v2532_v13 = vmax.f32 %v2321_v6, 0.0  ;;  %1908 = vmatmul.f32.gmra.mxu0 %v320_v3  ;;  %4666 = vmatmul.msk.f32.gmra.mxu1 %vm2016_vm1, %v1862_v40  ;;  %v330_v40 = vld [vmem:[#allocation2 + $0x7a0] sm:$0xff] }
 0x432   :  { %v2692_v48 = vmul.f32 %v2612_v28, %v2532_v13  ;;  %v6260_v28 = vpop.f32.mrf.mxu2  ;;  %v2614_v13 = vld [vmem:[%s8136_s5 + $0x80] sm:$0xff] }
 0x433   :  { %8197 = vst [vmem:[#allocation69_spill] sm:$0xff] %v6260_v28 }
 0x434   :  { %4730 = vmatmul.msk.f32.gmra.mxu2 %vm2760_vm2, %v2692_v48 }
 0x435   :  { %v1864_v29 = vpop.f32.mrf.mxu0  ;;  %v2323_v22 = vpop.f32.mrf.mxu1 }
 0x436   :  { %v1865_v60 = vadd.f32 %v1864_v29, %v5818_v17  ;;  %v2324_v61 = vadd.f32 %v6118_v27, %v2323_v22 }
 0x438   :  { %v2533_v32 = vmax.f32 %v2324_v61, 0.0  ;;  %1911 = vmatmul.f32.gmra.mxu0 %v325_v37  ;;  %4667 = vmatmul.msk.f32.gmra.mxu1 %vm2016_vm1, %v1865_v60  ;;  %v335_v60 = vld [vmem:[#allocation2 + $0x7c8] sm:$0xff] }
 0x43a   :  { %v2693_v12 = vmul.f32 %v2613_v14, %v2533_v32  ;;  %v2615_v14 = vld [vmem:[%s8136_s5 + $0x88] sm:$0xff] }
 0x43c   :  { %4731 = vmatmul.msk.f32.gmra.mxu2 %vm2760_vm2, %v2693_v12 }
 0x43d   :  { %v1867_v33 = vpop.f32.mrf.mxu0  ;;  %v2326_v3 = vpop.f32.mrf.mxu1 }
 0x43e   :  { %v1868_v6 = vadd.f32 %v1867_v33, %v5820_v38  ;;  %v2327_v17 = vadd.f32 %v6118_v27, %v2326_v3 }
 0x440   :  { %v2534_v48 = vmax.f32 %v2327_v17, 0.0  ;;  %1914 = vmatmul.f32.gmra.mxu0 %v330_v40  ;;  %4668 = vmatmul.msk.f32.gmra.mxu1 %vm2016_vm1, %v1868_v6  ;;  %v340_v6 = vld [vmem:[#allocation2 + $0x7f0] sm:$0xff] }
 0x442   :  { %v2694_v29 = vmul.f32 %v2614_v13, %v2534_v48  ;;  %v2616_v13 = vld [vmem:[%s8136_s5 + $0x90] sm:$0xff] }
 0x444   :  { %4732 = vmatmul.msk.f32.gmra.mxu2 %vm2760_vm2, %v2694_v29 }
 0x445   :  { %v1870_v22 = vpop.f32.mrf.mxu0  ;;  %v2329_v37 = vpop.f32.mrf.mxu1 }
 0x446   :  { %v1871_v38 = vadd.f32 %v1870_v22, %v5822_v58  ;;  %v2330_v61 = vadd.f32 %v6118_v27, %v2329_v37 }
 0x447   :  { %v6272_v32 = vpop.f32.mrf.mxu2 }
 0x448   :  { %v2535_v12 = vmax.f32 %v2330_v61, 0.0  ;;  %1917 = vmatmul.f32.gmra.mxu0 %v335_v60  ;;  %4669 = vmatmul.msk.f32.gmra.mxu1 %vm2016_vm1, %v1871_v38  ;;  %v345_v38 = vld [vmem:[#allocation2 + $0x818] sm:$0xff] }
 0x44a   :  { %v2695_v33 = vmul.f32 %v2615_v14, %v2535_v12  ;;  %v2617_v14 = vld [vmem:[%s8136_s5 + $0x98] sm:$0xff] }
 0x44c   :  { %4733 = vmatmul.msk.f32.gmra.mxu2 %vm2760_vm2, %v2695_v33 }
 0x44d   :  { %v1873_v3 = vpop.f32.mrf.mxu0  ;;  %v2332_v40 = vpop.f32.mrf.mxu1 }
 0x44e   :  { %v1874_v58 = vadd.f32 %v1873_v3, %v5824_v20  ;;  %v2333_v17 = vadd.f32 %v6118_v27, %v2332_v40 }
 0x44f   :  { %v6281_v48 = vpop.f32.mrf.mxu2 }
 0x450   :  { %v2536_v29 = vmax.f32 %v2333_v17, 0.0  ;;  %1920 = vmatmul.f32.gmra.mxu0 %v340_v6  ;;  %4670 = vmatmul.msk.f32.gmra.mxu1 %vm2016_vm1, %v1874_v58  ;;  %v350_v58 = vld [vmem:[#allocation2 + $0x840] sm:$0xff] }
 0x452   :  { %v2696_v22 = vmul.f32 %v2616_v13, %v2536_v29  ;;  %v2618_v13 = vld [vmem:[%s8136_s5 + $0xa0] sm:$0xff] }
 0x454   :  { %4734 = vmatmul.msk.f32.gmra.mxu2 %vm2760_vm2, %v2696_v22 }
 0x455   :  { %v1876_v37 = vpop.f32.mrf.mxu0  ;;  %v2335_v60 = vpop.f32.mrf.mxu1 }
 0x456   :  { %v1877_v20 = vadd.f32 %v1876_v37, %v5826_v43  ;;  %v2336_v61 = vadd.f32 %v6118_v27, %v2335_v60 }
 0x457   :  { %v6290_v12 = vpop.f32.mrf.mxu2 }
 0x458   :  { %v2537_v33 = vmax.f32 %v2336_v61, 0.0  ;;  %1923 = vmatmul.f32.gmra.mxu0 %v345_v38  ;;  %4671 = vmatmul.msk.f32.gmra.mxu1 %vm2016_vm1, %v1877_v20  ;;  %v355_v20 = vld [vmem:[#allocation2 + $0x868] sm:$0xff] }
 0x45a   :  { %v2697_v3 = vmul.f32 %v2617_v14, %v2537_v33  ;;  %v2619_v14 = vld [vmem:[%s8136_s5 + $0xa8] sm:$0xff] }
 0x45c   :  { %4735 = vmatmul.msk.f32.gmra.mxu2 %vm2760_vm2, %v2697_v3 }
 0x45d   :  { %v1879_v40 = vpop.f32.mrf.mxu0  ;;  %v2338_v6 = vpop.f32.mrf.mxu1 }
 0x45e   :  { %v1880_v43 = vadd.f32 %v1879_v40, %v5828_v1  ;;  %v2339_v17 = vadd.f32 %v6118_v27, %v2338_v6 }
 0x45f   :  { %v6299_v29 = vpop.f32.mrf.mxu2 }
 0x460   :  { %v2538_v22 = vmax.f32 %v2339_v17, 0.0  ;;  %1926 = vmatmul.f32.gmra.mxu0 %v350_v58  ;;  %4672 = vmatmul.msk.f32.gmra.mxu1 %vm2016_vm1, %v1880_v43  ;;  %v360_v43 = vld [vmem:[#allocation2 + $0x890] sm:$0xff] }
 0x462   :  { %v2698_v37 = vmul.f32 %v2618_v13, %v2538_v22  ;;  %v2620_v13 = vld [vmem:[%s8136_s5 + $0xb0] sm:$0xff] }
 0x464   :  { %4736 = vmatmul.msk.f32.gmra.mxu2 %vm2760_vm2, %v2698_v37 }
 0x465   :  { %v1882_v60 = vpop.f32.mrf.mxu0  ;;  %v2341_v38 = vpop.f32.mrf.mxu1 }
 0x466   :  { %v1883_v1 = vadd.f32 %v1882_v60, %v5830_v25  ;;  %v2342_v61 = vadd.f32 %v6118_v27, %v2341_v38  ;;  %v6320_v38 = vpop.f32.mrf.mxu3 }
 0x467   :  { %v6308_v33 = vpop.f32.mrf.mxu2 }
 0x468   :  { %v2539_v3 = vmax.f32 %v2342_v61, 0.0  ;;  %1929 = vmatmul.f32.gmra.mxu0 %v355_v20  ;;  %4673 = vmatmul.msk.f32.gmra.mxu1 %vm2016_vm1, %v1883_v1 }
 0x46a   :  { %v2699_v40 = vmul.f32 %v2619_v14, %v2539_v3  ;;  %v2621_v3 = vld [vmem:[%s8136_s5 + $0xb8] sm:$0xff] }
 0x46c   :  { %4737 = vmatmul.msk.f32.gmra.mxu2 %vm2760_vm2, %v2699_v40 }
 0x46d   :  { %v1885_v6 = vpop.f32.mrf.mxu0  ;;  %v2344_v58 = vpop.f32.mrf.mxu1 }
 0x46e   :  { %v1886_v25 = vadd.f32 %v1885_v6, %v5832_v52  ;;  %v2345_v17 = vadd.f32 %v6118_v27, %v2344_v58  ;;  %v365_v52 = vld [vmem:[#allocation2 + $0x8b8] sm:$0xff] }
 0x46f   :  { %v6317_v22 = vpop.f32.mrf.mxu2 }
 0x470   :  { %v2540_v37 = vmax.f32 %v2345_v17, 0.0  ;;  %1932 = vmatmul.f32.gmra.mxu0 %v360_v43  ;;  %4674 = vmatmul.msk.f32.gmra.mxu1 %vm2016_vm1, %v1886_v25  ;;  %v370_v17 = vld [vmem:[#allocation2 + $0x8e0] sm:$0xff] }
 0x472   :  { %v2700_v60 = vmul.f32 %v2620_v13, %v2540_v37  ;;  %v6332_v13 = vpop.f32.mrf.mxu3 }
 0x474   :  { %4738 = vmatmul.msk.f32.gmra.mxu2 %vm2760_vm2, %v2700_v60  ;;  %v2622_v60 = vld [vmem:[%s8136_s5 + $0xc0] sm:$0xff] }
 0x475   :  { %v1888_v20 = vpop.f32.mrf.mxu0  ;;  %v2347_v1 = vpop.f32.mrf.mxu1 }
 0x476   :  { %v1889_v61 = vadd.f32 %v1888_v20, %v5834_v11  ;;  %v2348_v14 = vadd.f32 %v6118_v27, %v2347_v1 }
 0x477   :  { %v6328_v40 = vpop.f32.mrf.mxu2 }
 0x478   :  { %v2541_v6 = vmax.f32 %v2348_v14, 0.0  ;;  %1935 = vmatmul.f32.gmra.mxu0 %v365_v52  ;;  %4675 = vmatmul.msk.f32.gmra.mxu1 %vm2016_vm1, %v1889_v61 }
 0x47a   :  { %v2701_v58 = vmul.f32 %v2621_v3, %v2541_v6  ;;  %v375_v3 = vld [vmem:[#allocation2 + $0x908] sm:$0xff] }
 0x47c   :  { %4739 = vmatmul.msk.f32.gmra.mxu2 %vm2760_vm2, %v2701_v58  ;;  %v2623_v58 = vld [vmem:[%s8136_s5 + $0xc8] sm:$0xff] }
 0x47d   :  { %v1891_v43 = vpop.f32.mrf.mxu0  ;;  %v2350_v25 = vpop.f32.mrf.mxu1 }
 0x47e   :  { %v1892_v11 = vadd.f32 %v1891_v43, %v5836_v44  ;;  %v2351_v37 = vadd.f32 %v6118_v27, %v2350_v25  ;;  %v6350_v25 = vpop.f32.mrf.mxu3 }
 0x47f   :  { %v6339_v20 = vpop.f32.mrf.mxu2 }
 0x480   :  { %v2542_v1 = vmax.f32 %v2351_v37, 0.0  ;;  %1938 = vmatmul.f32.gmra.mxu0 %v370_v17  ;;  %4676 = vmatmul.msk.f32.gmra.mxu1 %vm2016_vm1, %v1892_v11 }
 0x482   :  { %v2702_v52 = vmul.f32 %v2622_v60, %v2542_v1 }
 0x484   :  { %4740 = vmatmul.msk.f32.gmra.mxu2 %vm2760_vm2, %v2702_v52 }
 0x485   :  { %v1894_v61 = vpop.f32.mrf.mxu0  ;;  %v2353_v14 = vpop.f32.mrf.mxu1 }
 0x486   :  { %v1895_v44 = vadd.f32 %v1894_v61, %v5838_v8  ;;  %v2354_v6 = vadd.f32 %v6118_v27, %v2353_v14  ;;  %v380_v8 = vld [vmem:[#allocation2 + $0x930] sm:$0xff] }
 0x487   :  { %v6348_v43 = vpop.f32.mrf.mxu2  ;;  %v2624_v61 = vld [vmem:[%s8136_s5 + $0xd0] sm:$0xff] }
 0x488   :  { %v2543_v17 = vmax.f32 %v2354_v6, 0.0  ;;  %1941 = vmatmul.f32.gmra.mxu0 %v375_v3  ;;  %4677 = vmatmul.msk.f32.gmra.mxu1 %vm2016_vm1, %v1895_v44  ;;  %v6362_v3 = vpop.f32.mrf.mxu3 }
 0x48a   :  { %v2703_v11 = vmul.f32 %v2623_v58, %v2543_v17 }
 0x48c   :  { %4741 = vmatmul.msk.f32.gmra.mxu2 %vm2760_vm2, %v2703_v11 }
 0x48d   :  { %v1897_v37 = vpop.f32.mrf.mxu0  ;;  %v2356_v60 = vpop.f32.mrf.mxu1 }
 0x48e   :  { %v1898_v1 = vadd.f32 %v1897_v37, %v5840_v36  ;;  %v2357_v52 = vadd.f32 %v6118_v27, %v2356_v60  ;;  %v385_v36 = vld [vmem:[#allocation2 + $0x958] sm:$0xff] }
 0x48f   :  { %v6359_v14 = vpop.f32.mrf.mxu2  ;;  %v2625_v60 = vld [vmem:[%s8136_s5 + $0xd8] sm:$0xff] }
 0x490   :  { %v2544_v6 = vmax.f32 %v2357_v52, 0.0  ;;  %1944 = vmatmul.f32.gmra.mxu0 %v380_v8  ;;  %4678 = vmatmul.msk.f32.gmra.mxu1 %vm2016_vm1, %v1898_v1 }
 0x492   :  { %v2704_v44 = vmul.f32 %v2624_v61, %v2544_v6  ;;  %v6373_v61 = vpop.f32.mrf.mxu3 }
 0x494   :  { %4742 = vmatmul.msk.f32.gmra.mxu2 %vm2760_vm2, %v2704_v44 }
 0x495   :  { %v1900_v58 = vpop.f32.mrf.mxu0  ;;  %v2359_v17 = vpop.f32.mrf.mxu1 }
 0x496   :  { %v1901_v11 = vadd.f32 %v1900_v58, %v5842_v7  ;;  %v2360_v37 = vadd.f32 %v6118_v27, %v2359_v17  ;;  %v390_v7 = vld [vmem:[#allocation2 + $0x980] sm:$0xff]  ;;  %v8198_v58 = vld [vmem:[#allocation12_spill] sm:$0xff] }
 0x497   :  { %v6370_v52 = vpop.f32.mrf.mxu2 }
 0x498   :  { %v2545_v8 = vmax.f32 %v2360_v37, 0.0  ;;  %1947 = vmatmul.f32.gmra.mxu0 %v385_v36  ;;  %4679 = vmatmul.msk.f32.gmra.mxu1 %vm2016_vm1, %v1901_v11 }
 0x49a   :  { %v2705_v1 = vmul.f32 %v2625_v60, %v2545_v8  ;;  %v6385_v31 = vpop.f32.mrf.mxu3 }
 0x49c   :  { %4743 = vmatmul.msk.f32.gmra.mxu2 %vm2760_vm2, %v2705_v1  ;;  %v395_v1 = vld [vmem:[#allocation2 + $0x9a8] sm:$0xff] }
 0x49d   :  { %v1903_v6 = vpop.f32.mrf.mxu0  ;;  %v2362_v44 = vpop.f32.mrf.mxu1 }
 0x49e   :  { %v1904_v17 = vadd.f32 %v1903_v6, %v8198_v58  ;;  %v2363_v28 = vadd.f32 %v6118_v27, %v2362_v44  ;;  %v8199_v6 = vld [vmem:[#allocation13_spill] sm:$0xff] }
 0x49f   :  { %v6381_v37 = vpop.f32.mrf.mxu2 }
 0x4a0   :  { %v2546_v36 = vmax.f32 %v2363_v28, 0.0  ;;  %1950 = vmatmul.f32.gmra.mxu0 %v390_v7  ;;  %4680 = vmatmul.msk.f32.gmra.mxu1 %vm2016_vm1, %v1904_v17 }
 0x4a2   :  { %v2706_v11 = vmul.f32 %v2626_v50, %v2546_v36  ;;  %v6399_v4 = vpop.f32.mrf.mxu3 }
 0x4a4   :  { %4744 = vmatmul.msk.f32.gmra.mxu2 %vm2760_vm2, %v2706_v11  ;;  %v400_v11 = vld [vmem:[#allocation2 + $0x9d0] sm:$0xff] }
 0x4a5   :  { %v1906_v60 = vpop.f32.mrf.mxu0  ;;  %v2365_v8 = vpop.f32.mrf.mxu1 }
 0x4a6   :  { %v1907_v44 = vadd.f32 %v1906_v60, %v8199_v6  ;;  %v2366_v58 = vadd.f32 %v6118_v27, %v2365_v8  ;;  %v2628_v8 = vld [vmem:[%s8136_s5 + $0xf0] sm:$0xff] }
 0x4a7   :  { %v3054_v28 = vpop.f32.mrf.mxu2 }
 0x4a8   :  { %v2547_v7 = vmax.f32 %v2366_v58, 0.0  ;;  %1953 = vmatmul.f32.gmra.mxu0 %v395_v1  ;;  %4681 = vmatmul.msk.f32.gmra.mxu1 %vm2016_vm1, %v1907_v44 }
 0x4aa   :  { %v2707_v50 = vmul.f32 %v2627_v45, %v2547_v7  ;;  %v405_v7 = vld [vmem:[#allocation2 + $0x9f8] sm:$0xff] }
 0x4ac   :  { %4745 = vmatmul.msk.f32.gmra.mxu2 %vm2760_vm2, %v2707_v50 }
 0x4ad   :  { %v1909_v17 = vpop.f32.mrf.mxu0  ;;  %v2368_v36 = vpop.f32.mrf.mxu1 }
 0x4ae   :  { %v1910_v34 = vadd.f32 %v1909_v17, %v8200_v19  ;;  %v2369_v60 = vadd.f32 %v6118_v27, %v2368_v36  ;;  %v8201_v19 = vld [vmem:[#allocation15_spill] sm:$0xff]  ;;  %v2629_v36 = vld [vmem:[%s8136_s5 + $0xf8] sm:$0xff] }
 0x4af   :  { %v3057_v6 = vpop.f32.mrf.mxu2 }
 0x4b0   :  { %v2548_v1 = vmax.f32 %v2369_v60, 0.0  ;;  %1956 = vmatmul.f32.gmra.mxu0 %v400_v11  ;;  %4682 = vmatmul.msk.f32.gmra.mxu1 %vm2016_vm1, %v1910_v34  ;;  %v6409_v34 = vpop.f32.mrf.mxu3 }
 0x4b2   :  { %v2708_v45 = vmul.f32 %v2628_v8, %v2548_v1  ;;  %v410_v1 = vld [vmem:[#allocation2 + $0xa20] sm:$0xff] }
 0x4b4   :  { %4746 = vmatmul.msk.f32.gmra.mxu2 %vm2760_vm2, %v2708_v45  ;;  %v8202_v45 = vld [vmem:[#allocation16_spill] sm:$0xff] }
 0x4b5   :  { %v1912_v44 = vpop.f32.mrf.mxu0  ;;  %v2371_v58 = vpop.f32.mrf.mxu1 }
 0x4b6   :  { %v1913_v50 = vadd.f32 %v1912_v44, %v8201_v19  ;;  %v2372_v17 = vadd.f32 %v6118_v27, %v2371_v58  ;;  %v2630_v19 = vld [vmem:[%s8136_s5 + $0x100] sm:$0xff] }
 0x4b7   :  { %v3060_v62 = vpop.f32.mrf.mxu2 }
 0x4b8   :  { %v2549_v55 = vmax.f32 %v2372_v17, 0.0  ;;  %1959 = vmatmul.f32.gmra.mxu0 %v405_v7  ;;  %4683 = vmatmul.msk.f32.gmra.mxu1 %vm2016_vm1, %v1913_v50  ;;  %v6418_v50 = vpop.f32.mrf.mxu3 }
 0x4ba   :  { %v2709_v11 = vmul.f32 %v2629_v36, %v2549_v55 }
 0x4bc   :  { %4747 = vmatmul.msk.f32.gmra.mxu2 %vm2760_vm2, %v2709_v11 }
 0x4bd   :  { %v1915_v60 = vpop.f32.mrf.mxu0  ;;  %v2374_v8 = vpop.f32.mrf.mxu1 }
 0x4be   :  { %v1916_v44 = vadd.f32 %v1915_v60, %v8202_v45  ;;  %v2375_v58 = vadd.f32 %v6118_v27, %v2374_v8  ;;  %v415_v60 = vld [vmem:[#allocation2 + $0xa48] sm:$0xff]  ;;  %v8203_v8 = vld [vmem:[#allocation17_spill] sm:$0xff] }
 0x4bf   :  { %v3063_v17 = vpop.f32.mrf.mxu2 }
 0x4c0   :  { %v2550_v7 = vmax.f32 %v2375_v58, 0.0  ;;  %1962 = vmatmul.f32.gmra.mxu0 %v410_v1  ;;  %4684 = vmatmul.msk.f32.gmra.mxu1 %vm2016_vm1, %v1916_v44  ;;  %v2631_v1 = vld [vmem:[%s8136_s5 + $0x108] sm:$0xff] }
 0x4c1   :  { %3262 = vmatpush.msrb.mxu3 %v3063_v17  ;;  %v420_v17 = vld [vmem:[#allocation2 + $0xa70] sm:$0xff] }
 0x4c2   :  { %v2710_v55 = vmul.f32 %v2630_v19, %v2550_v7  ;;  %v6433_v7 = vpop.f32.mrf.mxu3 }
 0x4c3   :  { %3263 = vmatpush.msrb.mxu3 %v3060_v62 }
 0x4c4   :  { %4748 = vmatmul.msk.f32.gmra.mxu2 %vm2760_vm2, %v2710_v55 }
 0x4c5   :  { %3264 = vmatpush.msrb.mxu3 %v3057_v6  ;;  %v1918_v36 = vpop.f32.mrf.mxu0  ;;  %v2377_v11 = vpop.f32.mrf.mxu1 }
 0x4c6   :  { %v1919_v45 = vadd.f32 %v1918_v36, %v8203_v8  ;;  %v2378_v47 = vadd.f32 %v6118_v27, %v2377_v11  ;;  %v425_v8 = vld [vmem:[#allocation2 + $0xa98] sm:$0xff] }
 0x4c7   :  { %3265 = vmatpush.msrb.mxu3 %v3054_v28  ;;  %v6426_v44 = vpop.f32.mrf.mxu2  ;;  %v8204_v28 = vld [vmem:[#allocation18_spill] sm:$0xff] }
 0x4c8   :  { %v2551_v62 = vmax.f32 %v2378_v47, 0.0  ;;  %1965 = vmatmul.f32.gmra.mxu0 %v415_v60  ;;  %4685 = vmatmul.msk.f32.gmra.mxu1 %vm2016_vm1, %v1919_v45  ;;  %v8205_v45 = vld [vmem:[#allocation19_spill] sm:$0xff] }
 0x4c9   :  { %3266 = vmatpush.msrb.mxu3 %v6381_v37  ;;  %v2632_v37 = vld [vmem:[%s8136_s5 + $0x110] sm:$0xff] }
 0x4ca   :  { %v2711_v6 = vmul.f32 %v2631_v1, %v2551_v62  ;;  %v2633_v62 = vld [vmem:[%s8136_s5 + $0x118] sm:$0xff] }
 0x4cb   :  { %3267 = vmatpush.msrb.mxu3 %v6370_v52 }
 0x4cc   :  { %4749 = vmatmul.msk.f32.gmra.mxu2 %vm2760_vm2, %v2711_v6 }
 0x4cd   :  { %3268 = vmatpush.msrb.mxu3 %v6359_v14  ;;  %v1921_v58 = vpop.f32.mrf.mxu0  ;;  %v2380_v19 = vpop.f32.mrf.mxu1 }
 0x4ce   :  { %v1922_v55 = vadd.f32 %v1921_v58, %v8204_v28  ;;  %v2381_v47 = vadd.f32 %v6118_v27, %v2380_v19 }
 0x4cf   :  { %3269 = vmatpush.msrb.mxu3 %v6348_v43  ;;  %v6441_v52 = vpop.f32.mrf.mxu2 }
 0x4d0   :  { %v2552_v36 = vmax.f32 %v2381_v47, 0.0  ;;  %1968 = vmatmul.f32.gmra.mxu0 %v420_v17  ;;  %4686 = vmatmul.msk.f32.gmra.mxu1 %vm2016_vm1, %v1922_v55  ;;  %v8206_v17 = vld [vmem:[#allocation20_spill] sm:$0xff]  ;;  %v2634_v47 = vld [vmem:[%s8136_s5 + $0x120] sm:$0xff] }
 0x4d1   :  { %3270 = vmatpush.msrb.mxu3 %v6339_v20 }
 0x4d2   :  { %v2712_v14 = vmul.f32 %v2632_v37, %v2552_v36  ;;  %v4804_v37 = vld [vmem:[#allocation2] sm:$0xff] }
 0x4d3   :  { %3271 = vmatpush.msrb.mxu3 %v6328_v40  ;;  %v6456_v40 = vpop.f32.mrf.mxu3 }
 0x4d4   :  { %4750 = vmatmul.msk.f32.gmra.mxu2 %vm2760_vm2, %v2712_v14 }
 0x4d5   :  { %3272 = vmatpush.msrb.mxu3 %v6317_v22  ;;  %v1924_v11 = vpop.f32.mrf.mxu0  ;;  %v2383_v60 = vpop.f32.mrf.mxu1 }
 0x4d6   :  { %v1925_v43 = vadd.f32 %v1924_v11, %v8205_v45  ;;  %v2384_v1 = vadd.f32 %v6118_v27, %v2383_v60  ;;  %v435_v60 = vld [vmem:[#allocation2 + $0xae8] sm:$0xff] }
 0x4d7   :  { %3273 = vmatpush.msrb.mxu3 %v6308_v33  ;;  %v6454_v20 = vpop.f32.mrf.mxu2  ;;  %v430_v33 = vld [vmem:[#allocation2 + $0xac0] sm:$0xff]  ;;  %v2635_v45 = vld [vmem:[%s8136_s5 + $0x128] sm:$0xff] }
 0x4d8   :  { %v2553_v6 = vmax.f32 %v2384_v1, 0.0  ;;  %1971 = vmatmul.f32.gmra.mxu0 %v425_v8  ;;  %4687 = vmatmul.msk.f32.gmra.mxu1 %vm2016_vm1, %v1925_v43 }
 0x4d9   :  { %3274 = vmatpush.msrb.mxu3 %v6299_v29 }
 0x4da   :  { %v2713_v22 = vmul.f32 %v2633_v62, %v2553_v6  ;;  %v4805_v62 = vld [vmem:[#allocation2 + $0x28] sm:$0xff] }
 0x4db   :  { %3275 = vmatpush.msrb.mxu3 %v6290_v12 }
 0x4dc   :  { %4751 = vmatmul.msk.f32.gmra.mxu2 %vm2760_vm2, %v2713_v22 }
 0x4dd   :  { %3276 = vmatpush.msrb.mxu3 %v6281_v48  ;;  %v1927_v58 = vpop.f32.mrf.mxu0  ;;  %v2386_v19 = vpop.f32.mrf.mxu1 }
 0x4de   :  { %v1928_v28 = vadd.f32 %v1927_v58, %v8206_v17  ;;  %v2387_v55 = vadd.f32 %v6118_v27, %v2386_v19  ;;  %v6472_v48 = vpop.f32.mrf.mxu3  ;;  %v440_v19 = vld [vmem:[#allocation2 + $0xb10] sm:$0xff] }
 0x4df   :  { %3277 = vmatpush.msrb.mxu3 %v6272_v32  ;;  %v6469_v29 = vpop.f32.mrf.mxu2 }
 0x4e0   :  { %v2554_v12 = vmax.f32 %v2387_v55, 0.0  ;;  %3278 = vmatmul.f32.vlgmr.msrb.gmra.mxu3 %v4804_v37  ;;  %1974 = vmatmul.f32.gmra.mxu0 %v430_v33 }
 0x4e1   :  { %4688 = vmatmul.msk.f32.gmra.mxu1 %vm2016_vm1, %v1928_v28  ;;  %v2636_v28 = vld [vmem:[%s8136_s5 + $0x130] sm:$0xff] }
 0x4e2   :  { %v2714_v36 = vmul.f32 %v2634_v47, %v2554_v12  ;;  %v4806_v12 = vld [vmem:[#allocation2 + $0x50] sm:$0xff] }
 0x4e4   :  { %4752 = vmatmul.msk.f32.gmra.mxu2 %vm2760_vm2, %v2714_v36 }
 0x4e5   :  { %v1930_v14 = vpop.f32.mrf.mxu0  ;;  %v2389_v11 = vpop.f32.mrf.mxu1 }
 0x4e6   :  { %v1931_v8 = vadd.f32 %v1930_v14, %v5862_v53  ;;  %v2390_v32 = vadd.f32 %v6118_v27, %v2389_v11  ;;  %v6483_v22 = vpop.f32.mrf.mxu3  ;;  %v1169_v11 = vadd.f32 %v5986_v24, %v5866_v23 }
 0x4e7   :  { %v6480_v43 = vpop.f32.mrf.mxu2 }
 0x4e8   :  { %v2555_v1 = vmax.f32 %v2390_v32, 0.0  ;;  %3281 = vmatmul.f32.gmra.mxu3 %v4805_v62  ;;  %1977 = vmatmul.f32.gmra.mxu0 %v435_v60  ;;  %v1426_v62 = vadd.f32 %v6047_v0, %v1169_v11  ;;  %v455_v11 = vld [vmem:[#allocation2 + $0xb88] sm:$0xff] }
 0x4e9   :  { %4689 = vmatmul.msk.f32.gmra.mxu1 %vm2016_vm1, %v1931_v8 }
 0x4ea   :  { %v2715_v6 = vmul.f32 %v2635_v45, %v2555_v1  ;;  %v2637_v45 = vld [vmem:[%s8136_s5 + $0x138] sm:$0xff]  ;;  %v1683_v24 = vadd.f32 %v6320_v38, %v1426_v62  ;;  %v2639_v62 = vld [vmem:[%s8136_s5 + $0x148] sm:$0xff] }
 0x4ec   :  { %4753 = vmatmul.msk.f32.gmra.mxu2 %vm2760_vm2, %v2715_v6 }
 0x4ed   :  { %v1933_v53 = vpop.f32.mrf.mxu0  ;;  %v2392_v58 = vpop.f32.mrf.mxu1 }
 0x4ee   :  { %v1934_v33 = vadd.f32 %v1933_v53, %v5864_v9  ;;  %v2393_v17 = vadd.f32 %v6118_v27, %v2392_v58  ;;  %v445_v9 = vld [vmem:[#allocation2 + $0xb38] sm:$0xff]  ;;  %v6497_v60 = vpop.f32.mrf.mxu3  ;;  %v450_v58 = vld [vmem:[#allocation2 + $0xb60] sm:$0xff] }
 0x4ef   :  { %v6491_v55 = vpop.f32.mrf.mxu2  ;;  %v4807_v53 = vld [vmem:[#allocation2 + $0x78] sm:$0xff] }
 0x4f0   :  { %v2556_v47 = vmax.f32 %v2393_v17, 0.0  ;;  %3284 = vmatmul.f32.gmra.mxu3 %v4806_v12  ;;  %1980 = vmatmul.f32.gmra.mxu0 %v440_v19  ;;  %v1172_v19 = vadd.f32 %v5990_v56, %v5888_v16  ;;  %v6512_v17 = vld [vmem:[#allocation6] ss:$0 sm:$0xff] }
 0x4f1   :  { %4690 = vmatmul.msk.f32.gmra.mxu1 %vm2016_vm1, %v1934_v33 }
 0x4f2   :  { %v2716_v37 = vmul.f32 %v2636_v28, %v2556_v47  ;;  %v2638_v28 = vld [vmem:[%s8136_s5 + $0x140] sm:$0xff]  ;;  %v1429_v38 = vadd.f32 %v6054_v63, %v1172_v19  ;;  %v460_v19 = vld [vmem:[#allocation2 + $0xbb0] sm:$0xff] }
 0x4f4   :  { %4754 = vmatmul.msk.f32.gmra.mxu2 %vm2760_vm2, %v2716_v37  ;;  %v1686_v56 = vadd.f32 %v6332_v13, %v1429_v38  ;;  %v2640_v38 = vld [vmem:[%s8136_s5 + $0x150] sm:$0xff] }
 0x4f5   :  { %v1936_v36 = vpop.f32.mrf.mxu0  ;;  %v2395_v14 = vpop.f32.mrf.mxu1 }
 0x4f6   :  { %v1937_v8 = vadd.f32 %v1936_v36, %v5868_v46  ;;  %v2396_v32 = vadd.f32 %v6118_v27, %v2395_v14  ;;  %v6521_v12 = vpop.f32.mrf.mxu3  ;;  %v4809_v36 = vld [vmem:[#allocation2 + $0xa0] sm:$0xff] }
 0x4f7   :  { %v6504_v1 = vpop.f32.mrf.mxu2 }
 0x4f8   :  { %v2557_v6 = vmax.f32 %v2396_v32, 0.0  ;;  %3287 = vmatmul.f32.gmra.mxu3 %v4807_v53  ;;  %1983 = vmatmul.f32.gmra.mxu0 %v445_v9 }
 0x4f9   :  { %4691 = vmatmul.msk.f32.gmra.mxu1 %vm2016_vm1, %v1937_v8  ;;  %v8207_v8 = vld [vmem:[#allocation21_spill] sm:$0xff] }
 0x4fa   :  { %v2717_v23 = vmul.f32 %v2637_v45, %v2557_v6  ;;  %v1175_v32 = vadd.f32 %v5994_v10, %v8207_v8  ;;  %v465_v8 = vld [vmem:[#allocation2 + $0xbd8] sm:$0xff] }
 0x4fc   :  { %4755 = vmatmul.msk.f32.gmra.mxu2 %vm2760_vm2, %v2717_v23  ;;  %v1432_v53 = vadd.f32 %v6060_v39, %v1175_v32  ;;  %v4810_v23 = vld [vmem:[#allocation2 + $0xc8] sm:$0xff]  ;;  %v8209_v32 = vld [vmem:[#allocation23_spill] sm:$0xff] }
 0x4fd   :  { %v1939_v46 = vpop.f32.mrf.mxu0  ;;  %v2398_v27 = vpop.f32.mrf.mxu1 }
 0x4fe   :  { %v1940_v33 = vadd.f32 %v1939_v46, %v1683_v24  ;;  %v2399_v0 = vadd.f32 %v6512_v17, %v2398_v27  ;;  %v6536_v24 = vpop.f32.mrf.mxu3  ;;  %v1689_v46 = vadd.f32 %v6350_v25, %v1432_v53  ;;  %v2641_v53 = vld [vmem:[%s8136_s5 + $0x158] sm:$0xff] }
 0x4ff   :  { %v6518_v47 = vpop.f32.mrf.mxu2 }
 0x500   :  { %v2558_v37 = vmax.f32 %v2399_v0, 0.0  ;;  %3290 = vmatmul.f32.gmra.mxu3 %v4809_v36  ;;  %1986 = vmatmul.f32.gmra.mxu0 %v450_v58 }
 0x501   :  { %4692 = vmatmul.msk.f32.gmra.mxu1 %vm2016_vm1, %v1940_v33  ;;  %v8208_v33 = vld [vmem:[#allocation22_spill] sm:$0xff] }
 0x502   :  { %v2718_v16 = vmul.f32 %v2638_v28, %v2558_v37  ;;  %v1178_v0 = vadd.f32 %v5998_v35, %v8208_v33  ;;  %v470_v33 = vld [vmem:[#allocation2 + $0xc00] sm:$0xff] }
 0x504   :  { %4756 = vmatmul.msk.f32.gmra.mxu2 %vm2760_vm2, %v2718_v16  ;;  %v1435_v36 = vadd.f32 %v6066_v5, %v1178_v0  ;;  %v4811_v16 = vld [vmem:[#allocation2 + $0xf0] sm:$0xff]  ;;  %v8211_v0 = vld [vmem:[#allocation24_spill] sm:$0xff] }
 0x505   :  { %v1942_v14 = vpop.f32.mrf.mxu0  ;;  %v2401_v9 = vpop.f32.mrf.mxu1 }
 0x506   :  { %v1943_v63 = vadd.f32 %v1942_v14, %v1686_v56  ;;  %v2402_v45 = vadd.f32 %v6512_v17, %v2401_v9  ;;  %v1692_v35 = vadd.f32 %v6362_v3, %v1435_v36  ;;  %v6551_v14 = vpop.f32.mrf.mxu3 }
 0x507   :  { %v6532_v6 = vpop.f32.mrf.mxu2 }
 0x508   :  { %v2559_v13 = vmax.f32 %v2402_v45, 0.0  ;;  %3293 = vmatmul.f32.gmra.mxu3 %v4810_v23  ;;  %1989 = vmatmul.f32.gmra.mxu0 %v455_v11 }
 0x509   :  { %4693 = vmatmul.msk.f32.gmra.mxu1 %vm2016_vm1, %v1943_v63  ;;  %v8210_v63 = vld [vmem:[#allocation35_spill] sm:$0xff] }
 0x50a   :  { %v2719_v10 = vmul.f32 %v2639_v62, %v2559_v13  ;;  %v1181_v45 = vadd.f32 %v8210_v63, %v8209_v32  ;;  %v475_v63 = vld [vmem:[#allocation2 + $0xc28] sm:$0xff] }
 0x50c   :  { %4757 = vmatmul.msk.f32.gmra.mxu2 %vm2760_vm2, %v2719_v10  ;;  %v1438_v3 = vadd.f32 %v6073_v49, %v1181_v45  ;;  %v4812_v10 = vld [vmem:[#allocation2 + $0x118] sm:$0xff]  ;;  %v8213_v45 = vld [vmem:[#allocation25_spill] sm:$0xff] }
 0x50d   :  { %v1945_v27 = vpop.f32.mrf.mxu0  ;;  %v2404_v58 = vpop.f32.mrf.mxu1 }
 0x50e   :  { %v1946_v39 = vadd.f32 %v1945_v27, %v1689_v46  ;;  %v2405_v28 = vadd.f32 %v6512_v17, %v2404_v58  ;;  %v1695_v27 = vadd.f32 %v6373_v61, %v1438_v3  ;;  %v2643_v3 = vld [vmem:[%s8136_s5 + $0x168] sm:$0xff] }
 0x50f   :  { %v6546_v37 = vpop.f32.mrf.mxu2 }
 0x510   :  { %v2560_v25 = vmax.f32 %v2405_v28, 0.0  ;;  %3296 = vmatmul.f32.gmra.mxu3 %v4811_v16  ;;  %1992 = vmatmul.f32.gmra.mxu0 %v460_v19 }
 0x511   :  { %4694 = vmatmul.msk.f32.gmra.mxu1 %vm2016_vm1, %v1946_v39  ;;  %v8212_v39 = vld [vmem:[#allocation37_spill] sm:$0xff] }
 0x512   :  { %v2720_v56 = vmul.f32 %v2640_v38, %v2560_v25  ;;  %v1184_v28 = vadd.f32 %v8212_v39, %v8211_v0  ;;  %v6568_v38 = vpop.f32.mrf.mxu3  ;;  %v2642_v25 = vld [vmem:[%s8136_s5 + $0x160] sm:$0xff]  ;;  %v480_v39 = vld [vmem:[#allocation2 + $0xc50] sm:$0xff] }
 0x514   :  { %4758 = vmatmul.msk.f32.gmra.mxu2 %vm2760_vm2, %v2720_v56  ;;  %v1441_v61 = vadd.f32 %v6083_v42, %v1184_v28  ;;  %v8215_v28 = vld [vmem:[#allocation26_spill] sm:$0xff] }
 0x515   :  { %v1948_v9 = vpop.f32.mrf.mxu0  ;;  %v2407_v11 = vpop.f32.mrf.mxu1 }
 0x516   :  { %v1949_v5 = vadd.f32 %v1948_v9, %v1692_v35  ;;  %v2408_v62 = vadd.f32 %v6512_v17, %v2407_v11  ;;  %v4813_v35 = vld [vmem:[#allocation2 + $0x140] sm:$0xff]  ;;  %v1698_v11 = vadd.f32 %v6385_v31, %v1441_v61  ;;  %v2644_v61 = vld [vmem:[%s8136_s5 + $0x170] sm:$0xff] }
 0x517   :  { %v6560_v13 = vpop.f32.mrf.mxu2 }
 0x518   :  { %v2561_v23 = vmax.f32 %v2408_v62, 0.0  ;;  %3299 = vmatmul.f32.gmra.mxu3 %v4812_v10  ;;  %1995 = vmatmul.f32.gmra.mxu0 %v465_v8 }
 0x519   :  { %4695 = vmatmul.msk.f32.gmra.mxu1 %vm2016_vm1, %v1949_v5  ;;  %v8214_v5 = vld [vmem:[#allocation39_spill] sm:$0xff] }
 0x51a   :  { %v2721_v46 = vmul.f32 %v2641_v53, %v2561_v23  ;;  %v1187_v62 = vadd.f32 %v8214_v5, %v8213_v45  ;;  %v6589_v31 = vpop.f32.mrf.mxu3  ;;  %v485_v5 = vld [vmem:[#allocation2 + $0xc78] sm:$0xff] }
 0x51c   :  { %4759 = vmatmul.msk.f32.gmra.mxu2 %vm2760_vm2, %v2721_v46  ;;  %v1444_v10 = vadd.f32 %v6089_v54, %v1187_v62  ;;  %v8217_v62 = vld [vmem:[#allocation27_spill] sm:$0xff] }
 0x51d   :  { %v1951_v58 = vpop.f32.mrf.mxu0  ;;  %v2410_v19 = vpop.f32.mrf.mxu1 }
 0x51e   :  { %v1952_v49 = vadd.f32 %v1951_v58, %v1695_v27  ;;  %v2411_v36 = vadd.f32 %v6512_v17, %v2410_v19  ;;  %v4814_v27 = vld [vmem:[#allocation2 + $0x168] sm:$0xff]  ;;  %v1701_v19 = vadd.f32 %v6399_v4, %v1444_v10  ;;  %v4815_v4 = vld [vmem:[#allocation2 + $0x190] sm:$0xff]  ;;  %v2645_v10 = vld [vmem:[%s8136_s5 + $0x178] sm:$0xff] }
 0x51f   :  { %v6574_v16 = vpop.f32.mrf.mxu2 }
 0x520   :  { %v2562_v56 = vmax.f32 %v2411_v36, 0.0  ;;  %3302 = vmatmul.f32.gmra.mxu3 %v4813_v35  ;;  %1998 = vmatmul.f32.gmra.mxu0 %v470_v33 }
 0x521   :  { %4696 = vmatmul.msk.f32.gmra.mxu1 %vm2016_vm1, %v1952_v49  ;;  %v8216_v49 = vld [vmem:[#allocation41_spill] sm:$0xff] }
 0x522   :  { %v2722_v9 = vmul.f32 %v2642_v25, %v2562_v56  ;;  %v1190_v36 = vadd.f32 %v8216_v49, %v8215_v28  ;;  %v8219_v49 = vld [vmem:[#allocation28_spill] sm:$0xff] }
 0x524   :  { %4760 = vmatmul.msk.f32.gmra.mxu2 %vm2760_vm2, %v2722_v9  ;;  %v1447_v35 = vadd.f32 %v6095_v57, %v1190_v36  ;;  %v8220_v36 = vld [vmem:[#allocation46_spill] sm:$0xff] }
 0x525   :  { %v1954_v8 = vpop.f32.mrf.mxu0  ;;  %v2413_v32 = vpop.f32.mrf.mxu1 }
 0x526   :  { %v1955_v53 = vadd.f32 %v1954_v8, %v1698_v11  ;;  %v2414_v42 = vadd.f32 %v6512_v17, %v2413_v32  ;;  %v6602_v11 = vpop.f32.mrf.mxu3  ;;  %v1704_v32 = vadd.f32 %v6409_v34, %v1447_v35  ;;  %v4816_v34 = vld [vmem:[#allocation2 + $0x1b8] sm:$0xff] }
 0x527   :  { %v6586_v23 = vpop.f32.mrf.mxu2 }
 0x528   :  { %v2563_v46 = vmax.f32 %v2414_v42, 0.0  ;;  %3305 = vmatmul.f32.gmra.mxu3 %v4814_v27  ;;  %2001 = vmatmul.f32.gmra.mxu0 %v475_v63 }
 0x529   :  { %4697 = vmatmul.msk.f32.gmra.mxu1 %vm2016_vm1, %v1955_v53  ;;  %v8218_v53 = vld [vmem:[#allocation44_spill] sm:$0xff] }
 0x52a   :  { %v2723_v58 = vmul.f32 %v2643_v3, %v2563_v46  ;;  %v1193_v42 = vadd.f32 %v8218_v53, %v8217_v62  ;;  %v8222_v62 = vld [vmem:[#allocation48_spill] sm:$0xff] }
 0x52c   :  { %4761 = vmatmul.msk.f32.gmra.mxu2 %vm2760_vm2, %v2723_v58  ;;  %v1450_v27 = vadd.f32 %v6105_v59, %v1193_v42 }
 0x52d   :  { %v1957_v33 = vpop.f32.mrf.mxu0  ;;  %v2416_v0 = vpop.f32.mrf.mxu1 }
 0x52e   :  { %v1958_v54 = vadd.f32 %v1957_v33, %v1701_v19  ;;  %v2417_v25 = vadd.f32 %v6512_v17, %v2416_v0  ;;  %v1707_v33 = vadd.f32 %v6418_v50, %v1450_v27  ;;  %v6615_v0 = vpop.f32.mrf.mxu3 }
 0x52f   :  { %v3105_v56 = vpop.f32.mrf.mxu2 }
 0x530   :  { %v2564_v9 = vmax.f32 %v2417_v25, 0.0  ;;  %3308 = vmatmul.f32.gmra.mxu3 %v4815_v4  ;;  %2004 = vmatmul.f32.gmra.mxu0 %v480_v39  ;;  %v4817_v4 = vld [vmem:[#allocation2 + $0x1e0] sm:$0xff] }
 0x531   :  { %4698 = vmatmul.msk.f32.gmra.mxu1 %vm2016_vm1, %v1958_v54  ;;  %v1196_v54 = vadd.f32 %v8220_v36, %v8219_v49 }
 0x532   :  { %v2724_v8 = vmul.f32 %v2644_v61, %v2564_v9  ;;  %v2646_v61 = vld [vmem:[%s8136_s5 + $0x180] sm:$0xff] }
 0x533   :  { %v1453_v9 = vadd.f32 %v6112_v2, %v1196_v54 }
 0x534   :  { %4762 = vmatmul.msk.f32.gmra.mxu2 %vm2760_vm2, %v2724_v8 }
 0x535   :  { %v1960_v63 = vpop.f32.mrf.mxu0  ;;  %v2419_v45 = vpop.f32.mrf.mxu1 }
 0x536   :  { %v1961_v57 = vadd.f32 %v1960_v63, %v1704_v32  ;;  %v2420_v3 = vadd.f32 %v6512_v17, %v2419_v45  ;;  %v1710_v32 = vadd.f32 %v6433_v7, %v1453_v9 }
 0x537   :  { %v3108_v46 = vpop.f32.mrf.mxu2 }
 0x538   :  { %v2565_v58 = vmax.f32 %v2420_v3, 0.0  ;;  %3311 = vmatmul.f32.gmra.mxu3 %v4816_v34  ;;  %2007 = vmatmul.f32.gmra.mxu0 %v485_v5  ;;  %v8221_v5 = vld [vmem:[#allocation29_spill] sm:$0xff]  ;;  %v2647_v3 = vld [vmem:[%s8136_s5 + $0x188] sm:$0xff] }
 0x539   :  { %4699 = vmatmul.msk.f32.gmra.mxu1 %vm2016_vm1, %v1961_v57  ;;  %v1199_v53 = vadd.f32 %v8222_v62, %v8221_v5  ;;  %v6632_v57 = vpop.f32.mrf.mxu3  ;;  %v4822_v62 = vld [vmem:[#allocation2 + $0x280] sm:$0xff] }
 0x53a   :  { %v2725_v19 = vmul.f32 %v2645_v10, %v2565_v58 }
 0x53c   :  { %4763 = vmatmul.msk.f32.gmra.mxu2 %vm2760_vm2, %v2725_v19  ;;  %v8223_v19 = vld [vmem:[#allocation30_spill] sm:$0xff] }
 0x53d   :  { %v1963_v39 = vpop.f32.mrf.mxu0  ;;  %v2422_v28 = vpop.f32.mrf.mxu1 }
 0x53e   :  { %v1964_v25 = vadd.f32 %v1963_v39, %v1707_v33  ;;  %v2423_v59 = vadd.f32 %v6512_v17, %v2422_v28 }
 0x53f   :  { %v3111_v35 = vpop.f32.mrf.mxu2 }
 0x540   :  { %v2566_v50 = vmax.f32 %v2423_v59, 0.0  ;;  %3314 = vmatmul.f32.gmra.mxu3 %v4817_v4  ;;  %3519 = vmatpush.msra.mxu0 %v3111_v35  ;;  %v8225_v59 = vld [vmem:[#allocation31_spill] sm:$0xff] }
 0x541   :  { %4700 = vmatmul.msk.f32.gmra.mxu1 %vm2016_vm1, %v1964_v25  ;;  %v6657_v36 = vpop.f32.mrf.mxu3 }
 0x542   :  { %v2726_v8 = vmul.f32 %v2646_v61, %v2566_v50  ;;  %3520 = vmatpush.msra.mxu0 %v3108_v46  ;;  %v4818_v46 = vld [vmem:[#allocation2 + $0x208] sm:$0xff]  ;;  %v1205_v61 = vadd.f32 %v6039_v51, %v8225_v59  ;;  %v8231_v59 = vld [vmem:[#allocation61_spill] sm:$0xff] }
 0x544   :  { %4764 = vmatmul.msk.f32.gmra.mxu2 %vm2760_vm2, %v2726_v8  ;;  %3521 = vmatpush.msra.mxu0 %v3105_v56  ;;  %v1456_v56 = vadd.f32 %v6120_v18, %v1199_v53  ;;  %v8224_v18 = vld [vmem:[#allocation50_spill] sm:$0xff] }
 0x545   :  { %v1966_v63 = vpop.f32.mrf.mxu0  ;;  %v2425_v45 = vpop.f32.mrf.mxu1  ;;  %v1202_v33 = vadd.f32 %v8224_v18, %v8223_v19  ;;  %v4824_v19 = vld [vmem:[#allocation2 + $0x2a8] sm:$0xff] }
 0x546   :  { %v1967_v42 = vadd.f32 %v1966_v63, %v1710_v32  ;;  %v2426_v2 = vadd.f32 %v6512_v17, %v2425_v45  ;;  %3522 = vmatpush.msra.mxu0 %v6586_v23  ;;  %v1713_v23 = vadd.f32 %v6456_v40, %v1456_v56 }
 0x547   :  { %v6637_v7 = vpop.f32.mrf.mxu2  ;;  %v1459_v40 = vadd.f32 %v6129_v21, %v1202_v33 }
 0x548   :  { %v2567_v10 = vmax.f32 %v2426_v2, 0.0  ;;  %3317 = vmatmul.f32.gmra.mxu3 %v4818_v46  ;;  %3523 = vmatpush.msra.mxu0 %v6574_v16 }
 0x549   :  { %4701 = vmatmul.msk.f32.gmra.mxu1 %vm2016_vm1, %v1967_v42  ;;  %v6677_v4 = vpop.f32.mrf.mxu3 }
 0x54a   :  { %v2727_v27 = vmul.f32 %v2647_v3, %v2567_v10  ;;  %3524 = vmatpush.msra.mxu0 %v6560_v13  ;;  %v2648_v13 = vld [vmem:[%s8136_s5 + $0x190] sm:$0xff] }
 0x54b   :  { %v8227_v3 = vld [vmem:[#allocation33_spill] sm:$0xff] }
 0x54c   :  { %4765 = vmatmul.msk.f32.gmra.mxu2 %vm2760_vm2, %v2727_v27  ;;  %3525 = vmatpush.msra.mxu0 %v6546_v37  ;;  %v4819_v37 = vld [vmem:[#allocation2 + $0x230] sm:$0xff] }
 0x54d   :  { %v1969_v58 = vpop.f32.mrf.mxu0  ;;  %v2428_v34 = vpop.f32.mrf.mxu1 }
 0x54e   :  { %v1970_v39 = vadd.f32 %v1969_v58, %v1713_v23  ;;  %v2429_v28 = vadd.f32 %v6512_v17, %v2428_v34  ;;  %3526 = vmatpush.msra.mxu0 %v6532_v6  ;;  %v1716_v6 = vadd.f32 %v6472_v48, %v1459_v40  ;;  %v1462_v48 = vadd.f32 %v6143_v41, %v1205_v61  ;;  %v8226_v41 = vld [vmem:[#allocation32_spill] sm:$0xff]  ;;  %v4823_v23 = vld [vmem:[#allocation2 + $0x30] sm:$0xff]  ;;  %v8230_v40 = vld [vmem:[#allocation51_spill] sm:$0xff] }
 0x54f   :  { %v6653_v16 = vpop.f32.mrf.mxu2  ;;  %v1208_v32 = vadd.f32 %v6044_v15, %v8226_v41  ;;  %v8228_v58 = vld [vmem:[#allocation60_spill] sm:$0xff] }
 0x550   :  { %v2568_v49 = vmax.f32 %v2429_v28, 0.0  ;;  %3320 = vmatmul.f32.gmra.mxu3 %v4819_v37  ;;  %3527 = vmatpush.msra.mxu0 %v6518_v47 }
 0x551   :  { %4702 = vmatmul.msk.f32.gmra.mxu1 %vm2016_vm1, %v1970_v39 }
 0x552   :  { %v2728_v54 = vmul.f32 %v2648_v13, %v2568_v49  ;;  %3528 = vmatpush.msra.mxu0 %v6504_v1  ;;  %v2649_v1 = vld [vmem:[%s8136_s5 + $0x198] sm:$0xff] }
 0x553   :  { %v8229_v13 = vld [vmem:[#allocation34_spill] sm:$0xff] }
 0x554   :  { %4766 = vmatmul.msk.f32.gmra.mxu2 %vm2760_vm2, %v2728_v54  ;;  %3529 = vmatpush.msra.mxu0 %v6491_v55  ;;  %v4820_v55 = vld [vmem:[#allocation2 + $0x258] sm:$0xff]  ;;  %v1214_v49 = vadd.f32 %v8230_v40, %v8229_v13 }
 0x555   :  { %v1972_v25 = vpop.f32.mrf.mxu0  ;;  %v2431_v21 = vpop.f32.mrf.mxu1 }
 0x556   :  { %v1973_v35 = vadd.f32 %v1972_v25, %v1716_v6  ;;  %v2432_v47 = vadd.f32 %v6512_v17, %v2431_v21  ;;  %3530 = vmatpush.msra.mxu0 %v6480_v43  ;;  %v1719_v43 = vadd.f32 %v6483_v22, %v1462_v48  ;;  %v1465_v22 = vadd.f32 %v6153_v30, %v1208_v32  ;;  %v4825_v21 = vld [vmem:[#allocation2 + $0x58] sm:$0xff] }
 0x557   :  { %v6671_v9 = vpop.f32.mrf.mxu2  ;;  %v1211_v30 = vadd.f32 %v6050_v26, %v8227_v3  ;;  %v1471_v61 = vadd.f32 %v8231_v59, %v1214_v49  ;;  %v8235_v3 = vld [vmem:[#allocation38_spill] sm:$0xff]  ;;  %v8238_v49 = vld [vmem:[#allocation40_spill] sm:$0xff] }
 0x558   :  { %v2569_v50 = vmax.f32 %v2432_v47, 0.0  ;;  %3323 = vmatmul.f32.gmra.mxu3 %v4820_v55  ;;  %3531 = vmatpush.msra.mxu0 %v6469_v29 }
 0x559   :  { %4703 = vmatmul.msk.f32.gmra.mxu1 %vm2016_vm1, %v1973_v35  ;;  %v1468_v34 = vadd.f32 %v8228_v58, %v1211_v30  ;;  %v4826_v35 = vld [vmem:[#allocation2 + $0x2d0] sm:$0xff] }
 0x55a   :  { %v2729_v51 = vmul.f32 %v2649_v1, %v2569_v50  ;;  %3532 = vmatpush.msra.mxu0 %v6454_v20  ;;  %v4821_v20 = vld [vmem:[#allocation2 + $0x8] sm:$0xff]  ;;  %v1728_v50 = vadd.f32 %v6536_v24, %v1471_v61  ;;  %v2653_v24 = vld [vmem:[%s8136_s5 + $0x1b8] sm:$0xff]  ;;  %v8236_v30 = vld [vmem:[#allocation53_spill] sm:$0xff] }
 0x55b   :  { %v1725_v39 = vadd.f32 %v6521_v12, %v1468_v34  ;;  %v2652_v12 = vld [vmem:[%s8136_s5 + $0x1b0] sm:$0xff]  ;;  %v4829_v34 = vld [vmem:[#allocation2 + $0xa8] sm:$0xff] }
 0x55c   :  { %4767 = vmatmul.msk.f32.gmra.mxu2 %vm2760_vm2, %v2729_v51  ;;  %3533 = vmatpush.msra.mxu0 %v6441_v52  ;;  %v2650_v52 = vld [vmem:[%s8136_s5 + $0x1a0] sm:$0xff]  ;;  %v8232_v51 = vld [vmem:[#allocation36_spill] sm:$0xff] }
 0x55d   :  { %v1975_v8 = vpop.f32.mrf.mxu0 }
 0x55e   :  { %v1976_v63 = vadd.f32 %v1975_v8, %v1719_v43  ;;  %v2434_v45 = vpop.f32.mrf.mxu1  ;;  %3534 = vmatpush.msra.mxu0 %v6426_v44  ;;  %v1722_v44 = vadd.f32 %v6497_v60, %v1465_v22  ;;  %v2651_v60 = vld [vmem:[%s8136_s5 + $0x1a8] sm:$0xff] }
 0x55f   :  { %v2435_v29 = vadd.f32 %v6512_v17, %v2434_v45  ;;  %v6686_v5 = vpop.f32.mrf.mxu2  ;;  %3535 = vmatmul.f32.vlgmr.msra.gmra.mxu0 %v4821_v20  ;;  %v8233_v43 = vld [vmem:[#allocation52_spill] sm:$0xff]  ;;  %v8234_v20 = vld [vmem:[#allocation62_spill] sm:$0xff] }
 0x560   :  { %3326 = vmatmul.f32.gmra.mxu3 %v4822_v62  ;;  %v1217_v8 = vadd.f32 %v8233_v43, %v8232_v51 }
 0x561   :  { %v2570_v53 = vmax.f32 %v2435_v29, 0.0  ;;  %4704 = vmatmul.msk.f32.gmra.mxu1 %vm2016_vm1, %v1976_v63  ;;  %v4827_v29 = vld [vmem:[#allocation2 + $0x80] sm:$0xff] }
 0x562   :  { %v1474_v22 = vadd.f32 %v8234_v20, %v1217_v8 }
 0x563   :  { %v2730_v15 = vmul.f32 %v2650_v52, %v2570_v53  ;;  %v6693_v42 = vpop.f32.mrf.mxu3  ;;  %v4828_v52 = vld [vmem:[#allocation2 + $0x2f8] sm:$0xff] }
 0x565   :  { %4768 = vmatmul.msk.f32.gmra.mxu2 %vm2760_vm2, %v2730_v15  ;;  %v1978_v2 = vpop.f32.mrf.mxu0 }
 0x566   :  { %v1979_v56 = vadd.f32 %v1978_v2, %v1722_v44  ;;  %v2437_v10 = vpop.f32.mrf.mxu1  ;;  %v1731_v44 = vadd.f32 %v6551_v14, %v1474_v22  ;;  %v2654_v14 = vld [vmem:[%s8136_s5 + $0x1c0] sm:$0xff] }
 0x567   :  { %v2438_v46 = vadd.f32 %v6512_v17, %v2437_v10  ;;  %v6700_v27 = vpop.f32.mrf.mxu2  ;;  %3538 = vmatmul.f32.gmra.mxu0 %v4823_v23 }
 0x568   :  { %3329 = vmatmul.f32.gmra.mxu3 %v4824_v19 }
 0x569   :  { %v2571_v18 = vmax.f32 %v2438_v46, 0.0  ;;  %4705 = vmatmul.msk.f32.gmra.mxu1 %vm2016_vm1, %v1979_v56  ;;  %v1220_v56 = vadd.f32 %v8236_v30, %v8235_v3 }
 0x56b   :  { %v2731_v26 = vmul.f32 %v2651_v60, %v2571_v18  ;;  %v6707_v33 = vpop.f32.mrf.mxu3  ;;  %v8237_v60 = vld [vmem:[#allocation63_spill] sm:$0xff] }
 0x56c   :  { %v1477_v19 = vadd.f32 %v8237_v60, %v1220_v56  ;;  %v4830_v18 = vld [vmem:[#allocation2 + $0x320] sm:$0xff] }
 0x56d   :  { %4769 = vmatmul.msk.f32.gmra.mxu2 %vm2760_vm2, %v2731_v26  ;;  %v1981_v28 = vpop.f32.mrf.mxu0 }
 0x56e   :  { %v1982_v37 = vadd.f32 %v1981_v28, %v1725_v39  ;;  %v2440_v54 = vpop.f32.mrf.mxu1  ;;  %v1734_v13 = vadd.f32 %v6568_v38, %v1477_v19  ;;  %v2655_v38 = vld [vmem:[%s8136_s5 + $0x1c8] sm:$0xff] }
 0x56f   :  { %v2441_v6 = vadd.f32 %v6512_v17, %v2440_v54  ;;  %v6714_v25 = vpop.f32.mrf.mxu2  ;;  %3541 = vmatmul.f32.gmra.mxu0 %v4825_v21 }
 0x570   :  { %3332 = vmatmul.f32.gmra.mxu3 %v4826_v35  ;;  %v8240_v35 = vld [vmem:[#allocation64_spill] sm:$0xff] }
 0x571   :  { %v2572_v47 = vmax.f32 %v2441_v6, 0.0  ;;  %4706 = vmatmul.msk.f32.gmra.mxu1 %vm2016_vm1, %v1982_v37  ;;  %v8239_v37 = vld [vmem:[#allocation54_spill] sm:$0xff] }
 0x572   :  { %v1223_v54 = vadd.f32 %v8239_v37, %v8238_v49 }
 0x573   :  { %v2732_v1 = vmul.f32 %v2652_v12, %v2572_v47  ;;  %v6721_v48 = vpop.f32.mrf.mxu3  ;;  %v4831_v12 = vld [vmem:[#allocation2 + $0xd0] sm:$0xff] }
 0x574   :  { %v1480_v47 = vadd.f32 %v8240_v35, %v1223_v54 }
 0x575   :  { %4770 = vmatmul.msk.f32.gmra.mxu2 %vm2760_vm2, %v2732_v1  ;;  %v1984_v55 = vpop.f32.mrf.mxu0  ;;  %v4832_v1 = vld [vmem:[#allocation2 + $0x348] sm:$0xff] }
 0x576   :  { %v1985_v41 = vadd.f32 %v1984_v55, %v1728_v50  ;;  %v2443_v32 = vpop.f32.mrf.mxu1  ;;  %v1737_v43 = vadd.f32 %v6589_v31, %v1480_v47  ;;  %v2656_v31 = vld [vmem:[%s8136_s5 + $0x1d0] sm:$0xff] }
 0x577   :  { %v2444_v63 = vadd.f32 %v6512_v17, %v2443_v32  ;;  %v6728_v45 = vpop.f32.mrf.mxu2  ;;  %3544 = vmatmul.f32.gmra.mxu0 %v4827_v29  ;;  %v8242_v32 = vld [vmem:[#allocation55_spill] sm:$0xff] }
 0x578   :  { %3335 = vmatmul.f32.gmra.mxu3 %v4828_v52  ;;  %v4833_v52 = vld [vmem:[#allocation2 + $0xf8] sm:$0xff] }
 0x579   :  { %v2573_v62 = vmax.f32 %v2444_v63, 0.0  ;;  %4707 = vmatmul.msk.f32.gmra.mxu1 %vm2016_vm1, %v1985_v41  ;;  %v8241_v41 = vld [vmem:[#allocation42_spill] sm:$0xff] }
 0x57a   :  { %v1226_v63 = vadd.f32 %v8242_v32, %v8241_v41  ;;  %v4838_v41 = vld [vmem:[#allocation2 + $0x3c0] sm:$0xff] }
 0x57b   :  { %v2733_v53 = vmul.f32 %v2653_v24, %v2573_v62  ;;  %v6735_v15 = vpop.f32.mrf.mxu3  ;;  %v8243_v62 = vld [vmem:[#allocation65_spill] sm:$0xff] }
 0x57d   :  { %4771 = vmatmul.msk.f32.gmra.mxu2 %vm2760_vm2, %v2733_v53  ;;  %v1987_v2 = vpop.f32.mrf.mxu0  ;;  %v1483_v53 = vadd.f32 %v8243_v62, %v1226_v63  ;;  %v8251_v62 = vld [vmem:[#allocation58_spill] sm:$0xff] }
 0x57e   :  { %v1988_v10 = vadd.f32 %v1987_v2, %v1731_v44  ;;  %v2446_v46 = vpop.f32.mrf.mxu1  ;;  %v4834_v44 = vld [vmem:[#allocation2 + $0x370] sm:$0xff] }
 0x57f   :  { %v2447_v23 = vadd.f32 %v6512_v17, %v2446_v46  ;;  %v6742_v58 = vpop.f32.mrf.mxu2  ;;  %3547 = vmatmul.f32.gmra.mxu0 %v4829_v34  ;;  %v1740_v56 = vadd.f32 %v6602_v11, %v1483_v53  ;;  %v8244_v46 = vld [vmem:[#allocation43_spill] sm:$0xff]  ;;  %v2657_v11 = vld [vmem:[%s8136_s5 + $0x1d8] sm:$0xff] }
 0x580   :  { %3338 = vmatmul.f32.gmra.mxu3 %v4830_v18 }
 0x581   :  { %v2574_v26 = vmax.f32 %v2447_v23, 0.0  ;;  %4708 = vmatmul.msk.f32.gmra.mxu1 %vm2016_vm1, %v1988_v10  ;;  %v8245_v23 = vld [vmem:[#allocation56_spill] sm:$0xff] }
 0x582   :  { %v1229_v34 = vadd.f32 %v8245_v23, %v8244_v46  ;;  %v2659_v23 = vld [vmem:[%s8136_s5 + $0x1e8] sm:$0xff] }
 0x583   :  { %v2734_v39 = vmul.f32 %v2654_v14, %v2574_v26  ;;  %v6749_v28 = vpop.f32.mrf.mxu3  ;;  %v4835_v26 = vld [vmem:[#allocation2 + $0x120] sm:$0xff] }
 0x585   :  { %4772 = vmatmul.msk.f32.gmra.mxu2 %vm2760_vm2, %v2734_v39  ;;  %v1990_v40 = vpop.f32.mrf.mxu0  ;;  %v8246_v39 = vld [vmem:[#allocation66_spill] sm:$0xff] }
 0x586   :  { %v1991_v6 = vadd.f32 %v1990_v40, %v1734_v13  ;;  %v2449_v21 = vpop.f32.mrf.mxu1  ;;  %v1486_v13 = vadd.f32 %v8246_v39, %v1229_v34  ;;  %v4836_v40 = vld [vmem:[#allocation2 + $0x398] sm:$0xff]  ;;  %v8253_v39 = vld [vmem:[#allocation49_spill] sm:$0xff] }
 0x587   :  { %v2450_v59 = vadd.f32 %v6512_v17, %v2449_v21  ;;  %v6756_v61 = vpop.f32.mrf.mxu2  ;;  %3550 = vmatmul.f32.gmra.mxu0 %v4831_v12  ;;  %v8248_v12 = vld [vmem:[#allocation57_spill] sm:$0xff] }
 0x588   :  { %3341 = vmatmul.f32.gmra.mxu3 %v4832_v1 }
 0x589   :  { %v2575_v50 = vmax.f32 %v2450_v59, 0.0  ;;  %4709 = vmatmul.msk.f32.gmra.mxu1 %vm2016_vm1, %v1991_v6  ;;  %v1743_v6 = vadd.f32 %v6615_v0, %v1486_v13  ;;  %v8247_v59 = vld [vmem:[#allocation45_spill] sm:$0xff]  ;;  %v2658_v0 = vld [vmem:[%s8136_s5 + $0x1e0] sm:$0xff] }
 0x58a   :  { %v1232_v35 = vadd.f32 %v8248_v12, %v8247_v59  ;;  %v8254_v13 = vld [vmem:[#allocation59_spill] sm:$0xff]  ;;  %v8255_v59 = vld [vmem:[#allocation69_spill] sm:$0xff] }
 0x58b   :  { %v2735_v55 = vmul.f32 %v2655_v38, %v2575_v50  ;;  %v6763_v51 = vpop.f32.mrf.mxu3 }
 0x58d   :  { %4773 = vmatmul.msk.f32.gmra.mxu2 %vm2760_vm2, %v2735_v55  ;;  %v1993_v8 = vpop.f32.mrf.mxu0  ;;  %v4837_v55 = vld [vmem:[#allocation2 + $0x148] sm:$0xff] }
 0x58e   :  { %v1994_v29 = vadd.f32 %v1993_v8, %v1737_v43  ;;  %v2452_v20 = vpop.f32.mrf.mxu1  ;;  %v8249_v43 = vld [vmem:[#allocation67_spill] sm:$0xff] }
 0x58f   :  { %v2453_v22 = vadd.f32 %v6512_v17, %v2452_v20  ;;  %v6770_v24 = vpop.f32.mrf.mxu2  ;;  %3553 = vmatmul.f32.gmra.mxu0 %v4833_v52  ;;  %v1489_v8 = vadd.f32 %v8249_v43, %v1232_v35  ;;  %v8250_v52 = vld [vmem:[#allocation47_spill] sm:$0xff]  ;;  %v2660_v35 = vld [vmem:[%s8136_s5 + $0x1f0] sm:$0xff] }
 0x590   :  { %3344 = vmatmul.f32.gmra.mxu3 %v4834_v44  ;;  %v1235_v53 = vadd.f32 %v8251_v62, %v8250_v52 }
 0x591   :  { %v2576_v2 = vmax.f32 %v2453_v22, 0.0  ;;  %4710 = vmatmul.msk.f32.gmra.mxu1 %vm2016_vm1, %v1994_v29  ;;  %v1746_v20 = vadd.f32 %v6632_v57, %v1489_v8  ;;  %v4840_v57 = vld [vmem:[#allocation2 + $0x3e8] sm:$0xff] }
 0x593   :  { %v2736_v3 = vmul.f32 %v2656_v31, %v2576_v2  ;;  %v6777_v30 = vpop.f32.mrf.mxu3 }
 0x595   :  { %4774 = vmatmul.msk.f32.gmra.mxu2 %vm2760_vm2, %v2736_v3  ;;  %v1996_v10 = vpop.f32.mrf.mxu0 }
 0x596   :  { %v1997_v60 = vadd.f32 %v1996_v10, %v1740_v56  ;;  %v2455_v19 = vpop.f32.mrf.mxu1  ;;  %v4839_v56 = vld [vmem:[#allocation2 + $0x170] sm:$0xff]  ;;  %v8252_v10 = vld [vmem:[#allocation68_spill] sm:$0xff] }
 0x597   :  { %v2456_v14 = vadd.f32 %v6512_v17, %v2455_v19  ;;  %v6784_v18 = vpop.f32.mrf.mxu2  ;;  %3556 = vmatmul.f32.gmra.mxu0 %v4835_v26  ;;  %v1492_v46 = vadd.f32 %v8252_v10, %v1235_v53  ;;  %v4846_v10 = vld [vmem:[#allocation2 + $0x460] sm:$0xff] }
 0x598   :  { %3347 = vmatmul.f32.gmra.mxu3 %v4836_v40 }
 0x599   :  { %v2577_v49 = vmax.f32 %v2456_v14, 0.0  ;;  %4711 = vmatmul.msk.f32.gmra.mxu1 %vm2016_vm1, %v1997_v60  ;;  %v1749_v14 = vadd.f32 %v6657_v36, %v1492_v46  ;;  %v4842_v36 = vld [vmem:[#allocation2 + $0x410] sm:$0xff] }
 0x59b   :  { %v2737_v37 = vmul.f32 %v2657_v11, %v2577_v49  ;;  %v6791_v54 = vpop.f32.mrf.mxu3  ;;  %v1238_v11 = vadd.f32 %v8254_v13, %v8253_v39  ;;  %v2663_v39 = vld [vmem:[%s8136_s5 + $0x208] sm:$0xff] }
 0x59c   :  { %v4848_v13 = vld [vmem:[#allocation2 + $0x488] sm:$0xff] }
 0x59d   :  { %4775 = vmatmul.msk.f32.gmra.mxu2 %vm2760_vm2, %v2737_v37  ;;  %v1999_v21 = vpop.f32.mrf.mxu0  ;;  %v1495_v12 = vadd.f32 %v8255_v59, %v1238_v11 }
 0x59e   :  { %v2000_v47 = vadd.f32 %v1999_v21, %v1743_v6  ;;  %v2458_v38 = vpop.f32.mrf.mxu1  ;;  %v4841_v21 = vld [vmem:[#allocation2 + $0x198] sm:$0xff] }
 0x59f   :  { %v2459_v1 = vadd.f32 %v6512_v17, %v2458_v38  ;;  %v6798_v50 = vpop.f32.mrf.mxu2  ;;  %3559 = vmatmul.f32.gmra.mxu0 %v4837_v55  ;;  %v1752_v55 = vadd.f32 %v6677_v4, %v1495_v12 }
 0x5a0   :  { %3350 = vmatmul.f32.gmra.mxu3 %v4838_v41 }
 0x5a1   :  { %v2578_v32 = vmax.f32 %v2459_v1, 0.0  ;;  %4712 = vmatmul.msk.f32.gmra.mxu1 %vm2016_vm1, %v2000_v47 }
 0x5a3   :  { %v2738_v63 = vmul.f32 %v2658_v0, %v2578_v32  ;;  %v6805_v29 = vpop.f32.mrf.mxu3 }
 0x5a5   :  { %4776 = vmatmul.msk.f32.gmra.mxu2 %vm2760_vm2, %v2738_v63  ;;  %v2002_v22 = vpop.f32.mrf.mxu0  ;;  %v4843_v63 = vld [vmem:[#allocation2 + $0x1c0] sm:$0xff] }
 0x5a6   :  { %v2003_v31 = vadd.f32 %v2002_v22, %v1746_v20  ;;  %v2461_v44 = vpop.f32.mrf.mxu1  ;;  %v2661_v20 = vld [vmem:[%s8136_s5 + $0x1f8] sm:$0xff] }
 0x5a7   :  { %v2462_v2 = vadd.f32 %v6512_v17, %v2461_v44  ;;  %v3150_v3 = vpop.f32.mrf.mxu2  ;;  %3562 = vmatmul.f32.gmra.mxu0 %v4839_v56  ;;  %v4844_v22 = vld [vmem:[#allocation2 + $0x438] sm:$0xff]  ;;  %v2662_v56 = vld [vmem:[%s8136_s5 + $0x200] sm:$0xff] }
 0x5a8   :  { %3353 = vmatmul.f32.gmra.mxu3 %v4840_v57 }
 0x5a9   :  { %v2579_v34 = vmax.f32 %v2462_v2, 0.0  ;;  %4713 = vmatmul.msk.f32.gmra.mxu1 %vm2016_vm1, %v2003_v31  ;;  %v4845_v2 = vld [vmem:[#allocation2 + $0x1e8] sm:$0xff] }
 0x5ab   :  { %v2739_v60 = vmul.f32 %v2659_v23, %v2579_v34  ;;  %v6817_v19 = vpop.f32.mrf.mxu3 }
 0x5ad   :  { %4777 = vmatmul.msk.f32.gmra.mxu2 %vm2760_vm2, %v2739_v60  ;;  %v2005_v26 = vpop.f32.mrf.mxu0 }
 0x5ae   :  { %v2006_v40 = vadd.f32 %v2005_v26, %v1749_v14  ;;  %v2464_v49 = vpop.f32.mrf.mxu1  ;;  %v4847_v26 = vld [vmem:[#allocation2 + $0x210] sm:$0xff] }
 0x5af   :  { %v2465_v37 = vadd.f32 %v6512_v17, %v2464_v49  ;;  %v3153_v6 = vpop.f32.mrf.mxu2  ;;  %3565 = vmatmul.f32.gmra.mxu0 %v4841_v21  ;;  %v4849_v21 = vld [vmem:[#allocation2 + $0x238] sm:$0xff] }
 0x5b0   :  { %3356 = vmatmul.f32.gmra.mxu3 %v4842_v36 }
 0x5b1   :  { %v2580_v47 = vmax.f32 %v2465_v37, 0.0  ;;  %4714 = vmatmul.msk.f32.gmra.mxu1 %vm2016_vm1, %v2006_v40 }
 0x5b3   :  { %v2740_v38 = vmul.f32 %v2660_v35, %v2580_v47  ;;  %v6829_v1 = vpop.f32.mrf.mxu3  ;;  %v4851_v47 = vld [vmem:[#allocation2 + $0x260] sm:$0xff] }
 0x5b5   :  { %4778 = vmatmul.msk.f32.gmra.mxu2 %vm2760_vm2, %v2740_v38  ;;  %v2008_v43 = vpop.f32.mrf.mxu0 }
 0x5b6   :  { %v2009_v8 = vadd.f32 %v2008_v43, %v1752_v55  ;;  %v2467_v0 = vpop.f32.mrf.mxu1 }
 0x5b7   :  { %v2468_v41 = vadd.f32 %v6512_v17, %v2467_v0  ;;  %v3156_v32 = vpop.f32.mrf.mxu2  ;;  %3568 = vmatmul.f32.gmra.mxu0 %v4843_v63 }
 0x5b8   :  { %3359 = vmatmul.f32.gmra.mxu3 %v4844_v22 }
 0x5b9   :  { %v2581_v52 = vmax.f32 %v2468_v41, 0.0  ;;  %4715 = vmatmul.msk.f32.gmra.mxu1 %vm2016_vm1, %v2009_v8  ;;  %v4854_v41 = vld [vmem:[#allocation2 + $0x288] sm:$0xff] }
 0x5bb   :  { %v2741_v4 = vmul.f32 %v2661_v20, %v2581_v52  ;;  %v6838_v62 = vpop.f32.mrf.mxu3 }
 0x5bd   :  { %4779 = vmatmul.msk.f32.gmra.mxu2 %vm2760_vm2, %v2741_v4  ;;  %v4856_v4 = vld [vmem:[#allocation2 + $0x38] sm:$0xff] }
 0x5be   :  { %v2470_v53 = vpop.f32.mrf.mxu1 }
 0x5bf   :  { %v2471_v31 = vadd.f32 %v6512_v17, %v2470_v53  ;;  %v3159_v44 = vpop.f32.mrf.mxu2  ;;  %3571 = vmatmul.f32.gmra.mxu0 %v4845_v2  ;;  %v4857_v53 = vld [vmem:[#allocation2 + $0x2b0] sm:$0xff]  ;;  %v4858_v2 = vld [vmem:[#allocation2 + $0x528] sm:$0xff] }
 0x5c0   :  { %3362 = vmatmul.f32.gmra.mxu3 %v4846_v10  ;;  %3776 = vmatpush.msra.mxu1 %v3159_v44 }
 0x5c1   :  { %v2582_v46 = vmax.f32 %v2471_v31, 0.0  ;;  %v2667_v31 = vld [vmem:[%s8136_s5 + $0x228] sm:$0xff] }
 0x5c2   :  { %3777 = vmatpush.msra.mxu1 %v3156_v32 }
 0x5c3   :  { %v2742_v23 = vmul.f32 %v2662_v56, %v2582_v46  ;;  %v6845_v57 = vpop.f32.mrf.mxu3 }
 0x5c4   :  { %3778 = vmatpush.msra.mxu1 %v3153_v6 }
 0x5c5   :  { %4780 = vmatmul.msk.f32.gmra.mxu2 %vm2760_vm2, %v2742_v23 }
 0x5c6   :  { %v2473_v34 = vpop.f32.mrf.mxu1  ;;  %3779 = vmatpush.msra.mxu1 %v3150_v3 }
 0x5c7   :  { %v2474_v60 = vadd.f32 %v6512_v17, %v2473_v34  ;;  %v6849_v14 = vpop.f32.mrf.mxu2  ;;  %3574 = vmatmul.f32.gmra.mxu0 %v4847_v26  ;;  %v4859_v26 = vld [vmem:[#allocation2 + $0x60] sm:$0xff] }
 0x5c8   :  { %3365 = vmatmul.f32.gmra.mxu3 %v4848_v13  ;;  %3780 = vmatpush.msra.mxu1 %v6798_v50  ;;  %v4850_v50 = vld [vmem:[#allocation2 + $0x4b0] sm:$0xff] }
 0x5c9   :  { %v2583_v11 = vmax.f32 %v2474_v60, 0.0  ;;  %v2668_v13 = vld [vmem:[%s8136_s5 + $0x230] sm:$0xff] }
 0x5ca   :  { %3781 = vmatpush.msra.mxu1 %v6784_v18  ;;  %v2664_v18 = vld [vmem:[%s8136_s5 + $0x210] sm:$0xff] }
 0x5cb   :  { %v2743_v40 = vmul.f32 %v2663_v39, %v2583_v11  ;;  %v6856_v49 = vpop.f32.mrf.mxu3  ;;  %v4860_v39 = vld [vmem:[#allocation2 + $0x2d8] sm:$0xff] }
 0x5cc   :  { %8256 = vst [vmem:[#allocation12_spill] sm:$0xff] %v6856_v49  ;;  %3782 = vmatpush.msra.mxu1 %v6770_v24  ;;  %v4952_v49 = vld [vmem:[#allocation2 + $0x1f8] sm:$0xff] }
 0x5cd   :  { %4781 = vmatmul.msk.f32.gmra.mxu2 %vm2760_vm2, %v2743_v40  ;;  %v4861_v40 = vld [vmem:[#allocation2 + $0x550] sm:$0xff] }
 0x5ce   :  { %v2476_v3 = vpop.f32.mrf.mxu1  ;;  %3783 = vmatpush.msra.mxu1 %v6756_v61 }
 0x5cf   :  { %v2477_v37 = vadd.f32 %v6512_v17, %v2476_v3  ;;  %v6862_v6 = vpop.f32.mrf.mxu2  ;;  %3577 = vmatmul.f32.gmra.mxu0 %v4849_v21 }
 0x5d0   :  { %3368 = vmatmul.f32.gmra.mxu3 %v4850_v50  ;;  %3784 = vmatpush.msra.mxu1 %v6742_v58  ;;  %v4852_v58 = vld [vmem:[#allocation2 + $0x4d8] sm:$0xff] }
 0x5d1   :  { %v2584_v24 = vmax.f32 %v2477_v37, 0.0 }
 0x5d2   :  { %3785 = vmatpush.msra.mxu1 %v6728_v45  ;;  %v2665_v45 = vld [vmem:[%s8136_s5 + $0x218] sm:$0xff] }
 0x5d3   :  { %v2744_v59 = vmul.f32 %v2664_v18, %v2584_v24  ;;  %v6869_v12 = vpop.f32.mrf.mxu3 }
 0x5d4   :  { %8257 = vst [vmem:[#allocation13_spill] sm:$0xff] %v6869_v12  ;;  %3786 = vmatpush.msra.mxu1 %v6714_v25  ;;  %v4947_v12 = vld [vmem:[#allocation2 + $0x938] sm:$0xff] }
 0x5d5   :  { %4782 = vmatmul.msk.f32.gmra.mxu2 %vm2760_vm2, %v2744_v59  ;;  %v4862_v59 = vld [vmem:[#allocation2 + $0x88] sm:$0xff] }
 0x5d6   :  { %v2479_v61 = vpop.f32.mrf.mxu1  ;;  %3787 = vmatpush.msra.mxu1 %v6700_v27 }
 0x5d7   :  { %v2480_v35 = vadd.f32 %v6512_v17, %v2479_v61  ;;  %v6875_v36 = vpop.f32.mrf.mxu2  ;;  %3580 = vmatmul.f32.gmra.mxu0 %v4851_v47  ;;  %v4863_v61 = vld [vmem:[#allocation2 + $0x300] sm:$0xff] }
 0x5d8   :  { %3371 = vmatmul.f32.gmra.mxu3 %v4852_v58  ;;  %3788 = vmatpush.msra.mxu1 %v6686_v5  ;;  %v4853_v5 = vld [vmem:[#allocation2 + $0x10] sm:$0xff] }
 0x5d9   :  { %v2585_v25 = vmax.f32 %v2480_v35, 0.0  ;;  %v2669_v35 = vld [vmem:[%s8136_s5 + $0x238] sm:$0xff] }
 0x5da   :  { %3789 = vmatpush.msra.mxu1 %v6671_v9  ;;  %v2666_v9 = vld [vmem:[%s8136_s5 + $0x220] sm:$0xff] }
 0x5db   :  { %v2745_v38 = vmul.f32 %v2665_v45, %v2585_v25  ;;  %v6882_v55 = vpop.f32.mrf.mxu3  ;;  %v4864_v45 = vld [vmem:[#allocation2 + $0x578] sm:$0xff] }
 0x5dc   :  { %8258 = vst [vmem:[#allocation14_spill] sm:$0xff] %v6882_v55  ;;  %3790 = vmatpush.msra.mxu1 %v6653_v16  ;;  %v6885_v27 = vpop.f32.mrf.mxu0  ;;  %v4855_v16 = vld [vmem:[#allocation2 + $0x500] sm:$0xff]  ;;  %v4944_v55 = vld [vmem:[#allocation2 + $0x1a8] sm:$0xff] }
 0x5dd   :  { %4783 = vmatmul.msk.f32.gmra.mxu2 %vm2760_vm2, %v2745_v38 }
 0x5de   :  { %v2482_v43 = vpop.f32.mrf.mxu1  ;;  %3791 = vmatpush.msra.mxu1 %v6637_v7 }
 0x5df   :  { %v2483_v8 = vadd.f32 %v6512_v17, %v2482_v43  ;;  %v6890_v0 = vpop.f32.mrf.mxu2  ;;  %3792 = vmatmul.f32.vlgmr.msra.gmra.mxu1 %v4853_v5  ;;  %3583 = vmatmul.f32.gmra.mxu0 %v4854_v41  ;;  %v4865_v41 = vld [vmem:[#allocation2 + $0xb0] sm:$0xff] }
 0x5e0   :  { %3374 = vmatmul.f32.gmra.mxu3 %v4855_v16  ;;  %v2670_v16 = vld [vmem:[%s8136_s5 + $0x240] sm:$0xff] }
 0x5e1   :  { %v2586_v32 = vmax.f32 %v2483_v8, 0.0 }
 0x5e3   :  { %v2746_v63 = vmul.f32 %v2666_v9, %v2586_v32  ;;  %v6895_v20 = vpop.f32.mrf.mxu3  ;;  %v4866_v9 = vld [vmem:[#allocation2 + $0x328] sm:$0xff] }
 0x5e4   :  { %8259 = vst [vmem:[#allocation15_spill] sm:$0xff] %v6895_v20  ;;  %v6897_v22 = vpop.f32.mrf.mxu0  ;;  %v4941_v20 = vld [vmem:[#allocation2 + $0x670] sm:$0xff] }
 0x5e5   :  { %4784 = vmatmul.msk.f32.gmra.mxu2 %vm2760_vm2, %v2746_v63  ;;  %v4867_v63 = vld [vmem:[#allocation2 + $0x5a0] sm:$0xff] }
 0x5e6   :  { %v2485_v7 = vpop.f32.mrf.mxu1 }
 0x5e7   :  { %v2486_v52 = vadd.f32 %v6512_v17, %v2485_v7  ;;  %3795 = vmatmul.f32.gmra.mxu1 %v4856_v4  ;;  %3586 = vmatmul.f32.gmra.mxu0 %v4857_v53 }
 0x5e8   :  { %v6904_v44 = vpop.f32.mrf.mxu2  ;;  %3377 = vmatmul.f32.gmra.mxu3 %v4858_v2 }
 0x5e9   :  { %v2587_v56 = vmax.f32 %v2486_v52, 0.0 }
 0x5eb   :  { %v2747_v10 = vmul.f32 %v2667_v31, %v2587_v56  ;;  %v6906_v46 = vpop.f32.mrf.mxu3  ;;  %v6944_v31 = vld [vmem:[#allocation6] ss:$0 sm:$0xff]  ;;  %v4869_v56 = vld [vmem:[#allocation2 + $0xd8] sm:$0xff] }
 0x5ec   :  { %8260 = vst [vmem:[#allocation16_spill] sm:$0xff] %v6906_v46  ;;  %v6908_v23 = vpop.f32.mrf.mxu0  ;;  %v4937_v46 = vld [vmem:[#allocation2 + $0x648] sm:$0xff] }
 0x5ed   :  { %4785 = vmatmul.msk.f32.gmra.mxu2 %vm2760_vm2, %v2747_v10  ;;  %v4870_v10 = vld [vmem:[#allocation2 + $0x350] sm:$0xff] }
 0x5ee   :  { %v2488_v34 = vpop.f32.mrf.mxu1 }
 0x5ef   :  { %v2489_v60 = vadd.f32 %v6512_v17, %v2488_v34  ;;  %3798 = vmatmul.f32.gmra.mxu1 %v4859_v26  ;;  %3589 = vmatmul.f32.gmra.mxu0 %v4860_v39  ;;  %v2671_v34 = vld [vmem:[%s8136_s5 + $0x248] sm:$0xff] }
 0x5f0   :  { %v6915_v11 = vpop.f32.mrf.mxu2  ;;  %3380 = vmatmul.f32.gmra.mxu3 %v4861_v40  ;;  %v4871_v26 = vld [vmem:[#allocation2 + $0x5c8] sm:$0xff] }
 0x5f1   :  { %v2588_v3 = vmax.f32 %v2489_v60, 0.0 }
 0x5f3   :  { %v2748_v37 = vmul.f32 %v2668_v13, %v2588_v3  ;;  %v6917_v21 = vpop.f32.mrf.mxu3 }
 0x5f4   :  { %8261 = vst [vmem:[#allocation17_spill] sm:$0xff] %v6917_v21  ;;  %v6919_v18 = vpop.f32.mrf.mxu0  ;;  %v4933_v21 = vld [vmem:[#allocation2 + $0x620] sm:$0xff] }
 0x5f5   :  { %4786 = vmatmul.msk.f32.gmra.mxu2 %vm2760_vm2, %v2748_v37 }
 0x5f6   :  { %v2491_v50 = vpop.f32.mrf.mxu1 }
 0x5f7   :  { %v2492_v24 = vadd.f32 %v6512_v17, %v2491_v50  ;;  %3801 = vmatmul.f32.gmra.mxu1 %v4862_v59  ;;  %3592 = vmatmul.f32.gmra.mxu0 %v4863_v61  ;;  %v4873_v59 = vld [vmem:[#allocation2 + $0x378] sm:$0xff]  ;;  %v2672_v61 = vld [vmem:[%s8136_s5 + $0x250] sm:$0xff] }
 0x5f8   :  { %v6926_v47 = vpop.f32.mrf.mxu2  ;;  %3383 = vmatmul.f32.gmra.mxu3 %v4864_v45  ;;  %v4874_v45 = vld [vmem:[#allocation2 + $0x5f0] sm:$0xff] }
 0x5f9   :  { %v2589_v58 = vmax.f32 %v2492_v24, 0.0  ;;  %v4872_v24 = vld [vmem:[#allocation2 + $0x100] sm:$0xff] }
 0x5fb   :  { %v2749_v25 = vmul.f32 %v2669_v35, %v2589_v58  ;;  %v6928_v38 = vpop.f32.mrf.mxu3 }
 0x5fc   :  { %8262 = vst [vmem:[#allocation18_spill] sm:$0xff] %v6928_v38  ;;  %v6930_v43 = vpop.f32.mrf.mxu0  ;;  %v4929_v38 = vld [vmem:[#allocation2 + $0x5f8] sm:$0xff] }
 0x5fd   :  { %4787 = vmatmul.msk.f32.gmra.mxu2 %vm2760_vm2, %v2749_v25 }
 0x5fe   :  { %v2494_v8 = vpop.f32.mrf.mxu1 }
 0x5ff   :  { %v2495_v5 = vadd.f32 %v6512_v17, %v2494_v8  ;;  %3804 = vmatmul.f32.gmra.mxu1 %v4865_v41  ;;  %3595 = vmatmul.f32.gmra.mxu0 %v4866_v9 }
 0x600   :  { %v6937_v32 = vpop.f32.mrf.mxu2  ;;  %3386 = vmatmul.f32.gmra.mxu3 %v4867_v63  ;;  %v4876_v63 = vld [vmem:[#allocation2 + $0x3a0] sm:$0xff] }
 0x601   :  { %v2590_v7 = vmax.f32 %v2495_v5, 0.0 }
 0x603   :  { %v2750_v52 = vmul.f32 %v2670_v16, %v2590_v7  ;;  %v6939_v4 = vpop.f32.mrf.mxu3  ;;  %v4875_v16 = vld [vmem:[#allocation2 + $0x128] sm:$0xff]  ;;  %v2673_v7 = vld [vmem:[%s8136_s5 + $0x258] sm:$0xff] }
 0x604   :  { %8263 = vst [vmem:[#allocation19_spill] sm:$0xff] %v6939_v4  ;;  %v6941_v53 = vpop.f32.mrf.mxu0  ;;  %v4925_v4 = vld [vmem:[#allocation2 + $0x5d0] sm:$0xff] }
 0x605   :  { %4788 = vmatmul.msk.f32.gmra.mxu2 %vm2760_vm2, %v2750_v52 }
 0x606   :  { %v2497_v17 = vpop.f32.mrf.mxu1 }
 0x607   :  { %v2498_v2 = vadd.f32 %v6944_v31, %v2497_v17  ;;  %3807 = vmatmul.f32.gmra.mxu1 %v4869_v56  ;;  %3598 = vmatmul.f32.gmra.mxu0 %v4870_v10  ;;  %v4877_v17 = vld [vmem:[#allocation2 + $0x618] sm:$0xff] }
 0x608   :  { %v6950_v60 = vpop.f32.mrf.mxu2  ;;  %3389 = vmatmul.f32.gmra.mxu3 %v4871_v26 }
 0x609   :  { %v2591_v39 = vmax.f32 %v2498_v2, 0.0 }
 0x60b   :  { %v2751_v13 = vmul.f32 %v2671_v34, %v2591_v39  ;;  %v6952_v40 = vpop.f32.mrf.mxu3 }
 0x60c   :  { %8264 = vst [vmem:[#allocation20_spill] sm:$0xff] %v6952_v40  ;;  %v6954_v3 = vpop.f32.mrf.mxu0 }
 0x60d   :  { %4789 = vmatmul.msk.f32.gmra.mxu2 %vm2760_vm2, %v2751_v13  ;;  %v4878_v13 = vld [vmem:[#allocation2 + $0x150] sm:$0xff] }
 0x60e   :  { %v2500_v37 = vpop.f32.mrf.mxu1 }
 0x60f   :  { %v2501_v50 = vadd.f32 %v6944_v31, %v2500_v37  ;;  %3810 = vmatmul.f32.gmra.mxu1 %v4872_v24  ;;  %3601 = vmatmul.f32.gmra.mxu0 %v4873_v59  ;;  %v4879_v37 = vld [vmem:[#allocation2 + $0x3c8] sm:$0xff]  ;;  %v4880_v59 = vld [vmem:[#allocation2 + $0x640] sm:$0xff] }
 0x610   :  { %v6961_v35 = vpop.f32.mrf.mxu2  ;;  %3392 = vmatmul.f32.gmra.mxu3 %v4874_v45 }
 0x611   :  { %v2592_v58 = vmax.f32 %v2501_v50, 0.0  ;;  %v2674_v50 = vld [vmem:[%s8136_s5 + $0x260] sm:$0xff] }
 0x613   :  { %v2752_v25 = vmul.f32 %v2672_v61, %v2592_v58  ;;  %v6963_v8 = vpop.f32.mrf.mxu3 }
 0x614   :  { %8265 = vst [vmem:[#allocation21_spill] sm:$0xff] %v6963_v8  ;;  %v6965_v5 = vpop.f32.mrf.mxu0  ;;  %v4921_v8 = vld [vmem:[#allocation2 + $0x5a8] sm:$0xff] }
 0x615   :  { %4790 = vmatmul.msk.f32.gmra.mxu2 %vm2760_vm2, %v2752_v25 }
 0x616   :  { %v2503_v41 = vpop.f32.mrf.mxu1 }
 0x617   :  { %v2504_v9 = vadd.f32 %v6944_v31, %v2503_v41  ;;  %3813 = vmatmul.f32.gmra.mxu1 %v4875_v16  ;;  %3604 = vmatmul.f32.gmra.mxu0 %v4876_v63  ;;  %v4881_v16 = vld [vmem:[#allocation2 + $0x178] sm:$0xff]  ;;  %v4882_v63 = vld [vmem:[#allocation2 + $0x3f0] sm:$0xff] }
 0x618   :  { %v6972_v52 = vpop.f32.mrf.mxu2  ;;  %3395 = vmatmul.f32.gmra.mxu3 %v4877_v17 }
 0x619   :  { %v2593_v2 = vmax.f32 %v2504_v9, 0.0 }
 0x61b   :  { %v2753_v56 = vmul.f32 %v2673_v7, %v2593_v2  ;;  %v6974_v10 = vpop.f32.mrf.mxu3  ;;  %v2675_v7 = vld [vmem:[%s8136_s5 + $0x268] sm:$0xff] }
 0x61c   :  { %8266 = vst [vmem:[#allocation22_spill] sm:$0xff] %v6974_v10  ;;  %v6976_v34 = vpop.f32.mrf.mxu0  ;;  %v4883_v2 = vld [vmem:[#allocation2 + $0x668] sm:$0xff]  ;;  %v4919_v10 = vld [vmem:[#allocation2 + $0x820] sm:$0xff] }
 0x61d   :  { %4791 = vmatmul.msk.f32.gmra.mxu2 %vm2760_vm2, %v2753_v56 }
 0x61e   :  { %v2506_v26 = vpop.f32.mrf.mxu1 }
 0x61f   :  { %v2507_v39 = vadd.f32 %v6944_v31, %v2506_v26  ;;  %3816 = vmatmul.f32.gmra.mxu1 %v4878_v13  ;;  %3607 = vmatmul.f32.gmra.mxu0 %v4879_v37 }
 0x620   :  { %v6983_v24 = vpop.f32.mrf.mxu2  ;;  %3398 = vmatmul.f32.gmra.mxu3 %v4880_v59  ;;  %v4884_v59 = vld [vmem:[#allocation2 + $0x1a0] sm:$0xff] }
 0x621   :  { %v2594_v61 = vmax.f32 %v2507_v39, 0.0 }
 0x623   :  { %v2754_v45 = vmul.f32 %v2674_v50, %v2594_v61  ;;  %v6985_v58 = vpop.f32.mrf.mxu3  ;;  %v4885_v61 = vld [vmem:[#allocation2 + $0x418] sm:$0xff] }
 0x624   :  { %8267 = vst [vmem:[#allocation23_spill] sm:$0xff] %v6985_v58  ;;  %v6987_v25 = vpop.f32.mrf.mxu0 }
 0x625   :  { %4792 = vmatmul.msk.f32.gmra.mxu2 %vm2760_vm2, %v2754_v45  ;;  %v2676_v45 = vld [vmem:[%s8136_s5 + $0x270] sm:$0xff] }
 0x626   :  { %v2509_v41 = vpop.f32.mrf.mxu1 }
 0x627   :  { %v2510_v9 = vadd.f32 %v6944_v31, %v2509_v41  ;;  %3819 = vmatmul.f32.gmra.mxu1 %v4881_v16  ;;  %3610 = vmatmul.f32.gmra.mxu0 %v4882_v63 }
 0x628   :  { %v3198_v17 = vpop.f32.mrf.mxu2  ;;  %3401 = vmatmul.f32.gmra.mxu3 %v4883_v2 }
 0x629   :  { %v2595_v56 = vmax.f32 %v2510_v9, 0.0  ;;  %v4886_v9 = vld [vmem:[#allocation2 + $0x690] sm:$0xff] }
 0x62b   :  { %v2755_v26 = vmul.f32 %v2675_v7, %v2595_v56  ;;  %v6994_v39 = vpop.f32.mrf.mxu3 }
 0x62c   :  { %8268 = vst [vmem:[#allocation35_spill] sm:$0xff] %v6994_v39  ;;  %v6996_v13 = vpop.f32.mrf.mxu0 }
 0x62d   :  { %4793 = vmatmul.msk.f32.gmra.mxu2 %vm2760_vm2, %v2755_v26 }
 0x62e   :  { %v2512_v37 = vpop.f32.mrf.mxu1 }
 0x62f   :  { %v2513_v50 = vadd.f32 %v6944_v31, %v2512_v37  ;;  %3822 = vmatmul.f32.gmra.mxu1 %v4884_v59  ;;  %3613 = vmatmul.f32.gmra.mxu0 %v4885_v61  ;;  %v4887_v37 = vld [vmem:[#allocation2 + $0x1c8] sm:$0xff]  ;;  %v4888_v59 = vld [vmem:[#allocation2 + $0x440] sm:$0xff]  ;;  %v2677_v61 = vld [vmem:[%s8136_s5 + $0x278] sm:$0xff] }
 0x630   :  { %v3201_v41 = vpop.f32.mrf.mxu2  ;;  %3404 = vmatmul.f32.gmra.mxu3 %v4886_v9 }
 0x631   :  { %v2596_v16 = vmax.f32 %v2513_v50, 0.0  ;;  %v4889_v50 = vld [vmem:[#allocation2 + $0x6b8] sm:$0xff] }
 0x633   :  { %v2756_v63 = vmul.f32 %v2676_v45, %v2596_v16  ;;  %v7003_v7 = vpop.f32.mrf.mxu3 }
 0x634   :  { %8269 = vst [vmem:[#allocation24_spill] sm:$0xff] %v7003_v7  ;;  %v7005_v2 = vpop.f32.mrf.mxu0 }
 0x635   :  { %4794 = vmatmul.msk.f32.gmra.mxu2 %vm2760_vm2, %v2756_v63  ;;  %v4891_v63 = vld [vmem:[#allocation2 + $0x468] sm:$0xff] }
 0x636   :  { %v2515_v56 = vpop.f32.mrf.mxu1 }
 0x637   :  { %v2516_v26 = vadd.f32 %v6944_v31, %v2515_v56  ;;  %3825 = vmatmul.f32.gmra.mxu1 %v4887_v37  ;;  %3616 = vmatmul.f32.gmra.mxu0 %v4888_v59  ;;  %v4890_v31 = vld [vmem:[#allocation2 + $0x1f0] sm:$0xff]  ;;  %v4892_v37 = vld [vmem:[#allocation2 + $0x6e0] sm:$0xff] }
 0x638   :  { %v3204_v9 = vpop.f32.mrf.mxu2  ;;  %3407 = vmatmul.f32.gmra.mxu3 %v4889_v50 }
 0x639   :  { %v2597_v45 = vmax.f32 %v2516_v26, 0.0  ;;  %v4893_v26 = vld [vmem:[#allocation2 + $0x218] sm:$0xff] }
 0x63b   :  { %v2757_v16 = vmul.f32 %v2677_v61, %v2597_v45  ;;  %v7012_v7 = vpop.f32.mrf.mxu3  ;;  %v4894_v45 = vld [vmem:[#allocation2 + $0x708] sm:$0xff] }
 0x63c   :  { %8270 = vst [vmem:[#allocation37_spill] sm:$0xff] %v7012_v7  ;;  %v7014_v39 = vpop.f32.mrf.mxu0  ;;  %v4917_v7 = vld [vmem:[#allocation2 + $0x580] sm:$0xff] }
 0x63d   :  { %4795 = vmatmul.msk.f32.gmra.mxu2 %vm2760_vm2, %v2757_v16  ;;  %v4895_v16 = vld [vmem:[#allocation2 + $0x490] sm:$0xff] }
 0x63f   :  { %3828 = vmatmul.f32.gmra.mxu1 %v4890_v31  ;;  %3619 = vmatmul.f32.gmra.mxu0 %v4891_v63 }
 0x640   :  { %v3207_v56 = vpop.f32.mrf.mxu2  ;;  %3410 = vmatmul.f32.gmra.mxu3 %v4892_v37  ;;  %v4900_v37 = vld [vmem:[#allocation2 + $0x758] sm:$0xff] }
 0x641   :  { %4033 = vmatpush.msra.mxu2 %v3207_v56  ;;  %v4898_v56 = vld [vmem:[#allocation2 + $0x4b8] sm:$0xff] }
 0x643   :  { %v7017_v59 = vpop.f32.mrf.mxu3  ;;  %4034 = vmatpush.msra.mxu2 %v3204_v9  ;;  %v4897_v9 = vld [vmem:[#allocation2 + $0x730] sm:$0xff] }
 0x644   :  { %8271 = vst [vmem:[#allocation25_spill] sm:$0xff] %v7017_v59  ;;  %v7019_v50 = vpop.f32.mrf.mxu0  ;;  %v4915_v59 = vld [vmem:[#allocation2 + $0x7f8] sm:$0xff] }
 0x645   :  { %8272 = vst [vmem:[#allocation39_spill] sm:$0xff] %v7019_v50  ;;  %4035 = vmatpush.msra.mxu2 %v3201_v41  ;;  %v4951_v50 = vld [vmem:[#allocation2 + $0x960] sm:$0xff] }
 0x647   :  { %4036 = vmatpush.msra.mxu2 %v3198_v17  ;;  %3831 = vmatmul.f32.gmra.mxu1 %v4893_v26  ;;  %v4896_v17 = vld [vmem:[#allocation2 + $0x240] sm:$0xff] }
 0x648   :  { %v7021_v61 = vpop.f32.mrf.mxu2  ;;  %3413 = vmatmul.f32.gmra.mxu3 %v4894_v45  ;;  %3622 = vmatmul.f32.gmra.mxu0 %v4895_v16  ;;  %v4901_v26 = vld [vmem:[#allocation2 + $0x4e0] sm:$0xff] }
 0x649   :  { %4037 = vmatpush.msra.mxu2 %v6983_v24  ;;  %v4903_v16 = vld [vmem:[#allocation2 + $0x780] sm:$0xff] }
 0x64b   :  { %v7024_v31 = vpop.f32.mrf.mxu3  ;;  %4038 = vmatpush.msra.mxu2 %v6972_v52 }
 0x64c   :  { %8273 = vst [vmem:[#allocation26_spill] sm:$0xff] %v7024_v31  ;;  %v7027_v63 = vpop.f32.mrf.mxu0 }
 0x64d   :  { %8274 = vst [vmem:[#allocation41_spill] sm:$0xff] %v7027_v63  ;;  %4039 = vmatpush.msra.mxu2 %v6961_v35 }
 0x64f   :  { %4040 = vmatpush.msra.mxu2 %v6950_v60  ;;  %3834 = vmatmul.f32.gmra.mxu1 %v4896_v17  ;;  %v4899_v60 = vld [vmem:[#allocation2 + $0x268] sm:$0xff]  ;;  %v4904_v17 = vld [vmem:[#allocation2 + $0x18] sm:$0xff] }
 0x650   :  { %v7031_v41 = vpop.f32.mrf.mxu2  ;;  %3416 = vmatmul.f32.gmra.mxu3 %v4897_v9  ;;  %3625 = vmatmul.f32.gmra.mxu0 %v4898_v56 }
 0x651   :  { %4041 = vmatpush.msra.mxu2 %v6937_v32 }
 0x653   :  { %v7034_v24 = vpop.f32.mrf.mxu3  ;;  %4042 = vmatpush.msra.mxu2 %v6926_v47 }
 0x654   :  { %8275 = vst [vmem:[#allocation27_spill] sm:$0xff] %v7034_v24  ;;  %v7037_v52 = vpop.f32.mrf.mxu0  ;;  %v4913_v24 = vld [vmem:[#allocation2 + $0x558] sm:$0xff] }
 0x655   :  { %8276 = vst [vmem:[#allocation44_spill] sm:$0xff] %v7037_v52  ;;  %4043 = vmatpush.msra.mxu2 %v6915_v11  ;;  %v4943_v52 = vld [vmem:[#allocation2 + $0x910] sm:$0xff] }
 0x657   :  { %4044 = vmatpush.msra.mxu2 %v6904_v44  ;;  %3837 = vmatmul.f32.gmra.mxu1 %v4899_v60  ;;  %v4902_v44 = vld [vmem:[#allocation2 + $0x290] sm:$0xff]  ;;  %v4906_v60 = vld [vmem:[#allocation2 + $0x2b8] sm:$0xff] }
 0x658   :  { %v7041_v35 = vpop.f32.mrf.mxu2  ;;  %3419 = vmatmul.f32.gmra.mxu3 %v4900_v37  ;;  %3628 = vmatmul.f32.gmra.mxu0 %v4901_v26  ;;  %v4908_v37 = vld [vmem:[#allocation2 + $0x40] sm:$0xff]  ;;  %v4909_v26 = vld [vmem:[#allocation2 + $0x530] sm:$0xff] }
 0x659   :  { %4045 = vmatpush.msra.mxu2 %v6890_v0  ;;  %v4905_v0 = vld [vmem:[#allocation2 + $0x508] sm:$0xff] }
 0x65b   :  { %v7044_v32 = vpop.f32.mrf.mxu3  ;;  %4046 = vmatpush.msra.mxu2 %v6875_v36 }
 0x65c   :  { %8277 = vst [vmem:[#allocation28_spill] sm:$0xff] %v7044_v32  ;;  %v7047_v47 = vpop.f32.mrf.mxu1  ;;  %v7049_v45 = vpop.f32.mrf.mxu0  ;;  %v4911_v32 = vld [vmem:[#allocation2 + $0x7d0] sm:$0xff] }
 0x65d   :  { %8278 = vst [vmem:[#allocation46_spill] sm:$0xff] %v7049_v45  ;;  %4047 = vmatpush.msra.mxu2 %v6862_v6  ;;  %v4939_v45 = vld [vmem:[#allocation2 + $0x8e8] sm:$0xff] }
 0x65f   :  { %4048 = vmatpush.msra.mxu2 %v6849_v14  ;;  %3840 = vmatmul.f32.gmra.mxu1 %v4902_v44  ;;  %v4907_v14 = vld [vmem:[#allocation2 + $0x7a8] sm:$0xff] }
 0x660   :  { %v7053_v11 = vpop.f32.mrf.mxu2  ;;  %3422 = vmatmul.f32.gmra.mxu3 %v4903_v16  ;;  %4049 = vmatmul.f32.vlgmr.msra.gmra.mxu2 %v4904_v17 }
 0x661   :  { %3631 = vmatmul.f32.gmra.mxu0 %v4905_v0  ;;  %v4910_v0 = vld [vmem:[#allocation2 + $0x2e0] sm:$0xff] }
 0x663   :  { %v7055_v9 = vpop.f32.mrf.mxu3 }
 0x664   :  { %8279 = vst [vmem:[#allocation29_spill] sm:$0xff] %v7055_v9  ;;  %v7057_v36 = vpop.f32.mrf.mxu1  ;;  %v7059_v56 = vpop.f32.mrf.mxu0 }
 0x665   :  { %8280 = vst [vmem:[#allocation48_spill] sm:$0xff] %v7059_v56  ;;  %v4935_v56 = vld [vmem:[#allocation2 + $0x8c0] sm:$0xff] }
 0x667   :  { %3843 = vmatmul.f32.gmra.mxu1 %v4906_v60  ;;  %v4912_v60 = vld [vmem:[#allocation2 + $0x68] sm:$0xff] }
 0x668   :  { %v7061_v6 = vpop.f32.mrf.mxu2  ;;  %3425 = vmatmul.f32.gmra.mxu3 %v4907_v14  ;;  %4052 = vmatmul.f32.gmra.mxu2 %v4908_v37 }
 0x669   :  { %3634 = vmatmul.f32.gmra.mxu0 %v4909_v26 }
 0x66b   :  { %v7063_v44 = vpop.f32.mrf.mxu3 }
 0x66c   :  { %8281 = vst [vmem:[#allocation30_spill] sm:$0xff] %v7063_v44  ;;  %v7065_v16 = vpop.f32.mrf.mxu1  ;;  %v7067_v17 = vpop.f32.mrf.mxu0  ;;  %v4914_v44 = vld [vmem:[#allocation2 + $0x308] sm:$0xff] }
 0x66d   :  { %8282 = vst [vmem:[#allocation50_spill] sm:$0xff] %v7067_v17  ;;  %v4931_v17 = vld [vmem:[#allocation2 + $0x898] sm:$0xff] }
 0x66f   :  { %3846 = vmatmul.f32.gmra.mxu1 %v4910_v0  ;;  %v4916_v0 = vld [vmem:[#allocation2 + $0x90] sm:$0xff] }
 0x670   :  { %v7069_v9 = vpop.f32.mrf.mxu2  ;;  %3428 = vmatmul.f32.gmra.mxu3 %v4911_v32  ;;  %4055 = vmatmul.f32.gmra.mxu2 %v4912_v60 }
 0x671   :  { %3637 = vmatmul.f32.gmra.mxu0 %v4913_v24 }
 0x673   :  { %v7071_v14 = vpop.f32.mrf.mxu3 }
 0x674   :  { %8283 = vst [vmem:[#allocation31_spill] sm:$0xff] %v7071_v14  ;;  %v7073_v37 = vpop.f32.mrf.mxu1  ;;  %v7075_v26 = vpop.f32.mrf.mxu0  ;;  %v4918_v14 = vld [vmem:[#allocation2 + $0x330] sm:$0xff] }
 0x675   :  { %8284 = vst [vmem:[#allocation32_spill] sm:$0xff] %v7075_v26 }
 0x677   :  { %3849 = vmatmul.f32.gmra.mxu1 %v4914_v44  ;;  %v4920_v44 = vld [vmem:[#allocation2 + $0xb8] sm:$0xff] }
 0x678   :  { %v7077_v31 = vpop.f32.mrf.mxu2  ;;  %3431 = vmatmul.f32.gmra.mxu3 %v4915_v59  ;;  %4058 = vmatmul.f32.gmra.mxu2 %v4916_v0 }
 0x679   :  { %3640 = vmatmul.f32.gmra.mxu0 %v4917_v7 }
 0x67b   :  { %v7079_v32 = vpop.f32.mrf.mxu3 }
 0x67c   :  { %8285 = vst [vmem:[#allocation33_spill] sm:$0xff] %v7079_v32  ;;  %v7081_v60 = vpop.f32.mrf.mxu1  ;;  %v7083_v24 = vpop.f32.mrf.mxu0  ;;  %v4922_v32 = vld [vmem:[#allocation2 + $0x358] sm:$0xff] }
 0x67d   :  { %8286 = vst [vmem:[#allocation60_spill] sm:$0xff] %v7083_v24  ;;  %v4923_v24 = vld [vmem:[#allocation2 + $0x848] sm:$0xff] }
 0x67f   :  { %3852 = vmatmul.f32.gmra.mxu1 %v4918_v14  ;;  %v4924_v14 = vld [vmem:[#allocation2 + $0xe0] sm:$0xff] }
 0x680   :  { %v7085_v58 = vpop.f32.mrf.mxu2  ;;  %3434 = vmatmul.f32.gmra.mxu3 %v4919_v10  ;;  %4061 = vmatmul.f32.gmra.mxu2 %v4920_v44 }
 0x681   :  { %3643 = vmatmul.f32.gmra.mxu0 %v4921_v8 }
 0x683   :  { %v7087_v59 = vpop.f32.mrf.mxu3 }
 0x684   :  { %8287 = vst [vmem:[#allocation34_spill] sm:$0xff] %v7087_v59  ;;  %v7089_v0 = vpop.f32.mrf.mxu1  ;;  %v7091_v7 = vpop.f32.mrf.mxu0  ;;  %v4926_v59 = vld [vmem:[#allocation2 + $0x380] sm:$0xff] }
 0x685   :  { %8288 = vst [vmem:[#allocation51_spill] sm:$0xff] %v7091_v7  ;;  %v4927_v7 = vld [vmem:[#allocation2 + $0x870] sm:$0xff] }
 0x687   :  { %3855 = vmatmul.f32.gmra.mxu1 %v4922_v32  ;;  %v4928_v32 = vld [vmem:[#allocation2 + $0x108] sm:$0xff] }
 0x688   :  { %v7093_v40 = vpop.f32.mrf.mxu2  ;;  %3437 = vmatmul.f32.gmra.mxu3 %v4923_v24  ;;  %4064 = vmatmul.f32.gmra.mxu2 %v4924_v14 }
 0x689   :  { %3646 = vmatmul.f32.gmra.mxu0 %v4925_v4  ;;  %v4930_v4 = vld [vmem:[#allocation2 + $0x3a8] sm:$0xff] }
 0x68b   :  { %v7095_v10 = vpop.f32.mrf.mxu3 }
 0x68c   :  { %8289 = vst [vmem:[#allocation61_spill] sm:$0xff] %v7095_v10  ;;  %v7097_v44 = vpop.f32.mrf.mxu1  ;;  %v7099_v8 = vpop.f32.mrf.mxu0 }
 0x68d   :  { %8290 = vst [vmem:[#allocation36_spill] sm:$0xff] %v7099_v8  ;;  %v4932_v8 = vld [vmem:[#allocation2 + $0x130] sm:$0xff] }
 0x68f   :  { %3858 = vmatmul.f32.gmra.mxu1 %v4926_v59 }
 0x690   :  { %v7101_v26 = vpop.f32.mrf.mxu2  ;;  %3440 = vmatmul.f32.gmra.mxu3 %v4927_v7  ;;  %4067 = vmatmul.f32.gmra.mxu2 %v4928_v32 }
 0x691   :  { %3649 = vmatmul.f32.gmra.mxu0 %v4929_v38  ;;  %v4934_v38 = vld [vmem:[#allocation2 + $0x3d0] sm:$0xff] }
 0x693   :  { %v7103_v24 = vpop.f32.mrf.mxu3 }
 0x694   :  { %8291 = vst [vmem:[#allocation52_spill] sm:$0xff] %v7103_v24  ;;  %v7105_v14 = vpop.f32.mrf.mxu1  ;;  %v7109_v59 = vpop.f32.mrf.mxu0 }
 0x695   :  { %8292 = vst [vmem:[#allocation62_spill] sm:$0xff] %v7109_v59 }
 0x697   :  { %3861 = vmatmul.f32.gmra.mxu1 %v4930_v4  ;;  %v4936_v4 = vld [vmem:[#allocation2 + $0x158] sm:$0xff] }
 0x698   :  { %v7107_v10 = vpop.f32.mrf.mxu2  ;;  %3443 = vmatmul.f32.gmra.mxu3 %v4931_v17  ;;  %4070 = vmatmul.f32.gmra.mxu2 %v4932_v8 }
 0x699   :  { %3652 = vmatmul.f32.gmra.mxu0 %v4933_v21  ;;  %v4938_v21 = vld [vmem:[#allocation2 + $0x3f8] sm:$0xff] }
 0x69b   :  { %v7111_v7 = vpop.f32.mrf.mxu3 }
 0x69c   :  { %8293 = vst [vmem:[#allocation38_spill] sm:$0xff] %v7111_v7  ;;  %v7113_v32 = vpop.f32.mrf.mxu1  ;;  %v7117_v17 = vpop.f32.mrf.mxu0 }
 0x69d   :  { %8294 = vst [vmem:[#allocation53_spill] sm:$0xff] %v7117_v17  ;;  %v4942_v17 = vld [vmem:[#allocation2 + $0x420] sm:$0xff] }
 0x69f   :  { %3864 = vmatmul.f32.gmra.mxu1 %v4934_v38  ;;  %v4940_v38 = vld [vmem:[#allocation2 + $0x180] sm:$0xff] }
 0x6a0   :  { %v7115_v24 = vpop.f32.mrf.mxu2  ;;  %3446 = vmatmul.f32.gmra.mxu3 %v4935_v56  ;;  %4073 = vmatmul.f32.gmra.mxu2 %v4936_v4 }
 0x6a1   :  { %3655 = vmatmul.f32.gmra.mxu0 %v4937_v46 }
 0x6a3   :  { %v7119_v8 = vpop.f32.mrf.mxu3 }
 0x6a4   :  { %8295 = vst [vmem:[#allocation63_spill] sm:$0xff] %v7119_v8  ;;  %v7121_v59 = vpop.f32.mrf.mxu1  ;;  %v7127_v46 = vpop.f32.mrf.mxu0 }
 0x6a5   :  { %8297 = vst [vmem:[#allocation54_spill] sm:$0xff] %v7127_v46  ;;  %v4948_v46 = vld [vmem:[#allocation2 + $0x1d0] sm:$0xff] }
 0x6a7   :  { %3867 = vmatmul.f32.gmra.mxu1 %v4938_v21  ;;  %v4945_v21 = vld [vmem:[#allocation2 + $0x698] sm:$0xff] }
 0x6a8   :  { %v3246_v7 = vpop.f32.mrf.mxu2  ;;  %3449 = vmatmul.f32.gmra.mxu3 %v4939_v45  ;;  %4076 = vmatmul.f32.gmra.mxu2 %v4940_v38 }
 0x6a9   :  { %3658 = vmatmul.f32.gmra.mxu0 %v4941_v20 }
 0x6ab   :  { %v7123_v56 = vpop.f32.mrf.mxu3 }
 0x6ac   :  { %8296 = vst [vmem:[#allocation40_spill] sm:$0xff] %v7123_v56  ;;  %v7125_v4 = vpop.f32.mrf.mxu1  ;;  %v7133_v20 = vpop.f32.mrf.mxu0  ;;  %v4946_v56 = vld [vmem:[#allocation2 + $0x448] sm:$0xff] }
 0x6ad   :  { %8299 = vst [vmem:[#allocation42_spill] sm:$0xff] %v7133_v20 }
 0x6af   :  { %3870 = vmatmul.f32.gmra.mxu1 %v4942_v17  ;;  %v4949_v17 = vld [vmem:[#allocation2 + $0x6c0] sm:$0xff] }
 0x6b0   :  { %v3249_v8 = vpop.f32.mrf.mxu2  ;;  %3452 = vmatmul.f32.gmra.mxu3 %v4943_v52  ;;  %4079 = vmatmul.f32.gmra.mxu2 %v4944_v55 }
 0x6b1   :  { %3661 = vmatmul.f32.gmra.mxu0 %v4945_v21  ;;  %v4950_v21 = vld [vmem:[#allocation2 + $0x470] sm:$0xff] }
 0x6b3   :  { %v7129_v45 = vpop.f32.mrf.mxu3 }
 0x6b4   :  { %8298 = vst [vmem:[#allocation64_spill] sm:$0xff] %v7129_v45  ;;  %v7131_v38 = vpop.f32.mrf.mxu1  ;;  %v7139_v20 = vpop.f32.mrf.mxu0 }
 0x6b7   :  { %3873 = vmatmul.f32.gmra.mxu1 %v4946_v56  ;;  %v4953_v56 = vld [vmem:[#allocation2 + $0x6e8] sm:$0xff] }
 0x6b8   :  { %v3252_v63 = vpop.f32.mrf.mxu2  ;;  %3455 = vmatmul.f32.gmra.mxu3 %v4947_v12  ;;  %4082 = vmatmul.f32.gmra.mxu2 %v4948_v46 }
 0x6b9   :  { %3664 = vmatmul.f32.gmra.mxu0 %v4949_v17  ;;  %v4954_v17 = vld [vmem:[#allocation2 + $0x498] sm:$0xff] }
 0x6bb   :  { %v7135_v52 = vpop.f32.mrf.mxu3 }
 0x6bc   :  { %8300 = vst [vmem:[#allocation55_spill] sm:$0xff] %v7135_v52  ;;  %v7137_v55 = vpop.f32.mrf.mxu1  ;;  %v4956_v52 = vld [vmem:[#allocation2 + $0x220] sm:$0xff] }
 0x6bf   :  { %3876 = vmatmul.f32.gmra.mxu1 %v4950_v21  ;;  %v4955_v21 = vld [vmem:[#allocation2 + $0x988] sm:$0xff] }
 0x6c0   :  { %v3255_v45 = vpop.f32.mrf.mxu2  ;;  %3458 = vmatmul.f32.gmra.mxu3 %v4951_v50  ;;  %4085 = vmatmul.f32.gmra.mxu2 %v4952_v49  ;;  %v4957_v49 = vld [vmem:[#allocation2 + $0x710] sm:$0xff]  ;;  %v7146_v50 = vpop.f32.mrf.mxu0 }
 0x6c1   :  { %4290 = vmatpush.msra.mxu3 %v3255_v45  ;;  %3667 = vmatmul.f32.gmra.mxu0 %v4953_v56 }
 0x6c3   :  { %v7141_v12 = vpop.f32.mrf.mxu3  ;;  %4291 = vmatpush.msra.mxu3 %v3252_v63 }
 0x6c4   :  { %v7143_v46 = vpop.f32.mrf.mxu1 }
 0x6c5   :  { %4292 = vmatpush.msra.mxu3 %v3249_v8  ;;  %v4959_v8 = vld [vmem:[#allocation2 + $0x9b0] sm:$0xff] }
 0x6c7   :  { %4293 = vmatpush.msra.mxu3 %v3246_v7  ;;  %3879 = vmatmul.f32.gmra.mxu1 %v4954_v17  ;;  %v4958_v7 = vld [vmem:[#allocation2 + $0x4c0] sm:$0xff] }
 0x6c8   :  { %3461 = vmatmul.f32.gmra.mxu3 %v4955_v21  ;;  %4088 = vmatmul.f32.gmra.mxu2 %v4956_v52  ;;  %v4960_v52 = vld [vmem:[#allocation2 + $0x248] sm:$0xff]  ;;  %v7161_v17 = vpop.f32.mrf.mxu0  ;;  %v4964_v21 = vld [vmem:[#allocation2 + $0x270] sm:$0xff] }
 0x6c9   :  { %4294 = vmatpush.msra.mxu3 %v7115_v24  ;;  %3670 = vmatmul.f32.gmra.mxu0 %v4957_v49  ;;  %v4961_v24 = vld [vmem:[#allocation2 + $0x738] sm:$0xff]  ;;  %v7166_v49 = vld [vmem:[#allocation7] ss:$0 sm:$0xff] }
 0x6cb   :  { %v7148_v45 = vpop.f32.mrf.mxu3  ;;  %4295 = vmatpush.msra.mxu3 %v7107_v10 }
 0x6cc   :  { %v7151_v63 = vpop.f32.mrf.mxu1 }
 0x6cd   :  { %4296 = vmatpush.msra.mxu3 %v7101_v26  ;;  %v4963_v26 = vld [vmem:[#allocation2 + $0x9d8] sm:$0xff] }
 0x6cf   :  { %4297 = vmatpush.msra.mxu3 %v7093_v40  ;;  %3882 = vmatmul.f32.gmra.mxu1 %v4958_v7  ;;  %v4962_v40 = vld [vmem:[#allocation2 + $0x4e8] sm:$0xff] }
 0x6d0   :  { %3464 = vmatmul.f32.gmra.mxu3 %v4959_v8  ;;  %4091 = vmatmul.f32.gmra.mxu2 %v4960_v52  ;;  %v4967_v8 = vld [vmem:[#allocation2 + $0xa00] sm:$0xff] }
 0x6d1   :  { %4298 = vmatpush.msra.mxu3 %v7085_v58  ;;  %3673 = vmatmul.f32.gmra.mxu0 %v4961_v24  ;;  %v4965_v58 = vld [vmem:[#allocation2 + $0x760] sm:$0xff]  ;;  %v4968_v24 = vld [vmem:[#allocation2 + $0x298] sm:$0xff] }
 0x6d3   :  { %v7156_v56 = vpop.f32.mrf.mxu3  ;;  %4299 = vmatpush.msra.mxu3 %v7077_v31 }
 0x6d4   :  { %8301 = vst [vmem:[#allocation65_spill] sm:$0xff] %v7156_v56  ;;  %v7159_v10 = vpop.f32.mrf.mxu1  ;;  %v5044_v56 = vld [vmem:[#allocation2 + $0x590] sm:$0xff] }
 0x6d5   :  { %4300 = vmatpush.msra.mxu3 %v7069_v9  ;;  %v3280_v9 = vadd.f32 %v7166_v49, %v6693_v42 }
 0x6d7   :  { %4301 = vmatpush.msra.mxu3 %v7061_v6  ;;  %3885 = vmatmul.f32.gmra.mxu1 %v4962_v40  ;;  %v7176_v6 = vpop.f32.mrf.mxu0  ;;  %v3537_v52 = vadd.f32 %v6885_v27, %v3280_v9  ;;  %v4972_v9 = vld [vmem:[#allocation2 + $0x2c0] sm:$0xff] }
 0x6d8   :  { %3467 = vmatmul.f32.gmra.mxu3 %v4963_v26  ;;  %4094 = vmatmul.f32.gmra.mxu2 %v4964_v21 }
 0x6d9   :  { %4302 = vmatpush.msra.mxu3 %v7053_v11  ;;  %3676 = vmatmul.f32.gmra.mxu0 %v4965_v58  ;;  %v4966_v11 = vld [vmem:[#allocation2 + $0x510] sm:$0xff]  ;;  %v3794_v40 = vadd.f32 %v7047_v47, %v3537_v52  ;;  %v4970_v58 = vld [vmem:[#allocation2 + $0x538] sm:$0xff] }
 0x6da   :  { %v4973_v47 = vld [vmem:[#allocation2 + $0x7b0] sm:$0xff] }
 0x6db   :  { %v7168_v31 = vpop.f32.mrf.mxu3  ;;  %4303 = vmatpush.msra.mxu3 %v7041_v35  ;;  %v4969_v35 = vld [vmem:[#allocation2 + $0x788] sm:$0xff] }
 0x6dc   :  { %8302 = vst [vmem:[#allocation43_spill] sm:$0xff] %v7168_v31  ;;  %v7171_v7 = vpop.f32.mrf.mxu1  ;;  %v5030_v31 = vld [vmem:[#allocation2 + $0x790] sm:$0xff] }
 0x6dd   :  { %4304 = vmatpush.msra.mxu3 %v7031_v41 }
 0x6df   :  { %4305 = vmatpush.msra.mxu3 %v7021_v61  ;;  %3888 = vmatmul.f32.gmra.mxu1 %v4966_v11  ;;  %v3283_v61 = vadd.f32 %v7166_v49, %v6707_v33  ;;  %v4971_v11 = vld [vmem:[#allocation2 + $0xa28] sm:$0xff] }
 0x6e0   :  { %3470 = vmatmul.f32.gmra.mxu3 %v4967_v8  ;;  %4097 = vmatmul.f32.gmra.mxu2 %v4968_v24  ;;  %v7190_v8 = vpop.f32.mrf.mxu0 }
 0x6e1   :  { %3679 = vmatmul.f32.gmra.mxu0 %v4969_v35  ;;  %v3540_v27 = vadd.f32 %v6897_v22, %v3283_v61  ;;  %v4975_v22 = vld [vmem:[#allocation2 + $0xa50] sm:$0xff] }
 0x6e3   :  { %v7181_v41 = vpop.f32.mrf.mxu3  ;;  %v4050_v26 = vpop.f32.mrf.mxu2  ;;  %v3797_v52 = vadd.f32 %v7057_v36, %v3540_v27 }
 0x6e4   :  { %8303 = vst [vmem:[#allocation56_spill] sm:$0xff] %v7181_v41  ;;  %v7183_v42 = vadd.f32 %v4050_v26, %v3794_v40  ;;  %v7185_v21 = vpop.f32.mrf.mxu1  ;;  %v3286_v26 = vadd.f32 %v7166_v49, %v6721_v48  ;;  %v8327_v41 = vld [vmem:[#allocation15_spill] sm:$0xff] }
 0x6e6   :  { %v3543_v61 = vadd.f32 %v6908_v23, %v3286_v26  ;;  %v4979_v23 = vld [vmem:[#allocation2 + $0xa78] sm:$0xff] }
 0x6e7   :  { %3891 = vmatmul.f32.gmra.mxu1 %v4970_v58  ;;  %v4974_v58 = vld [vmem:[#allocation2 + $0x560] sm:$0xff] }
 0x6e8   :  { %3473 = vmatmul.f32.gmra.mxu3 %v4971_v11  ;;  %4100 = vmatmul.f32.gmra.mxu2 %v4972_v9  ;;  %v4976_v11 = vld [vmem:[#allocation2 + $0x2e8] sm:$0xff]  ;;  %v4977_v9 = vld [vmem:[#allocation2 + $0x7d8] sm:$0xff]  ;;  %v3800_v36 = vadd.f32 %v7065_v16, %v3543_v61  ;;  %v7203_v27 = vpop.f32.mrf.mxu0  ;;  %v4981_v16 = vld [vmem:[#allocation2 + $0x800] sm:$0xff] }
 0x6e9   :  { %3682 = vmatmul.f32.gmra.mxu0 %v4973_v47 }
 0x6eb   :  { %v7193_v24 = vpop.f32.mrf.mxu3  ;;  %v4053_v35 = vpop.f32.mrf.mxu2 }
 0x6ec   :  { %8304 = vst [vmem:[#allocation66_spill] sm:$0xff] %v7193_v24  ;;  %v7195_v40 = vadd.f32 %v4053_v35, %v3797_v52  ;;  %v7197_v33 = vpop.f32.mrf.mxu1 }
 0x6ef   :  { %3894 = vmatmul.f32.gmra.mxu1 %v4974_v58  ;;  %v3289_v58 = vadd.f32 %v7166_v49, %v6735_v15 }
 0x6f0   :  { %3476 = vmatmul.f32.gmra.mxu3 %v4975_v22  ;;  %4103 = vmatmul.f32.gmra.mxu2 %v4976_v11  ;;  %v4978_v22 = vld [vmem:[#allocation2 + $0x588] sm:$0xff]  ;;  %v4980_v11 = vld [vmem:[#allocation2 + $0x310] sm:$0xff]  ;;  %v7221_v15 = vpop.f32.mrf.mxu0 }
 0x6f1   :  { %3685 = vmatmul.f32.gmra.mxu0 %v4977_v9  ;;  %v3546_v26 = vadd.f32 %v6919_v18, %v3289_v58  ;;  %v4983_v18 = vld [vmem:[#allocation2 + $0xaa0] sm:$0xff] }
 0x6f3   :  { %v7205_v47 = vpop.f32.mrf.mxu3  ;;  %v4056_v52 = vpop.f32.mrf.mxu2  ;;  %v3803_v61 = vadd.f32 %v7073_v37, %v3546_v26  ;;  %v4985_v37 = vld [vmem:[#allocation2 + $0x828] sm:$0xff] }
 0x6f4   :  { %8305 = vst [vmem:[#allocation45_spill] sm:$0xff] %v7205_v47  ;;  %v7207_v35 = vadd.f32 %v4056_v52, %v3800_v36  ;;  %v7209_v48 = vpop.f32.mrf.mxu1 }
 0x6f7   :  { %3897 = vmatmul.f32.gmra.mxu1 %v4978_v22  ;;  %v3292_v22 = vadd.f32 %v7166_v49, %v6749_v28  ;;  %v3295_v28 = vadd.f32 %v7166_v49, %v6763_v51 }
 0x6f8   :  { %3479 = vmatmul.f32.gmra.mxu3 %v4979_v23  ;;  %4106 = vmatmul.f32.gmra.mxu2 %v4980_v11  ;;  %v4982_v23 = vld [vmem:[#allocation2 + $0x5b0] sm:$0xff]  ;;  %v4984_v11 = vld [vmem:[#allocation2 + $0x338] sm:$0xff] }
 0x6f9   :  { %3688 = vmatmul.f32.gmra.mxu0 %v4981_v16  ;;  %v3549_v58 = vadd.f32 %v6930_v43, %v3292_v22  ;;  %v4987_v43 = vld [vmem:[#allocation2 + $0xac8] sm:$0xff]  ;;  %v3552_v22 = vadd.f32 %v6941_v53, %v3295_v28 }
 0x6fa   :  { %v4992_v28 = vld [vmem:[#allocation2 + $0x388] sm:$0xff] }
 0x6fb   :  { %v7215_v9 = vpop.f32.mrf.mxu3  ;;  %v4059_v36 = vpop.f32.mrf.mxu2  ;;  %v3806_v26 = vadd.f32 %v7081_v60, %v3549_v58  ;;  %v4989_v60 = vld [vmem:[#allocation2 + $0x850] sm:$0xff]  ;;  %v3809_v58 = vadd.f32 %v7089_v0, %v3552_v22  ;;  %v4993_v0 = vld [vmem:[#allocation2 + $0x878] sm:$0xff] }
 0x6fc   :  { %8306 = vst [vmem:[#allocation57_spill] sm:$0xff] %v7215_v9  ;;  %v7217_v52 = vadd.f32 %v4059_v36, %v3803_v61  ;;  %v7219_v47 = vpop.f32.mrf.mxu1 }
 0x6ff   :  { %3900 = vmatmul.f32.gmra.mxu1 %v4982_v23  ;;  %v7235_v23 = vpop.f32.mrf.mxu0 }
 0x700   :  { %3482 = vmatmul.f32.gmra.mxu3 %v4983_v18  ;;  %4109 = vmatmul.f32.gmra.mxu2 %v4984_v11  ;;  %v4986_v18 = vld [vmem:[#allocation2 + $0x5d8] sm:$0xff]  ;;  %v4988_v11 = vld [vmem:[#allocation2 + $0x360] sm:$0xff] }
 0x701   :  { %3691 = vmatmul.f32.gmra.mxu0 %v4985_v37 }
 0x703   :  { %v7227_v16 = vpop.f32.mrf.mxu3  ;;  %v4062_v61 = vpop.f32.mrf.mxu2 }
 0x704   :  { %8307 = vst [vmem:[#allocation67_spill] sm:$0xff] %v7227_v16  ;;  %v7229_v36 = vadd.f32 %v4062_v61, %v3806_v26  ;;  %v7231_v9 = vpop.f32.mrf.mxu1  ;;  %v4990_v16 = vld [vmem:[#allocation2 + $0x600] sm:$0xff] }
 0x707   :  { %3903 = vmatmul.f32.gmra.mxu1 %v4986_v18  ;;  %v3298_v18 = vadd.f32 %v7166_v49, %v6777_v30  ;;  %v3301_v30 = vadd.f32 %v7166_v49, %v6791_v54 }
 0x708   :  { %3485 = vmatmul.f32.gmra.mxu3 %v4987_v43  ;;  %4112 = vmatmul.f32.gmra.mxu2 %v4988_v11  ;;  %v4991_v43 = vld [vmem:[#allocation2 + $0xaf0] sm:$0xff]  ;;  %v7248_v11 = vpop.f32.mrf.mxu0 }
 0x709   :  { %3694 = vmatmul.f32.gmra.mxu0 %v4989_v60  ;;  %v3555_v53 = vadd.f32 %v6954_v3, %v3298_v18  ;;  %v4995_v3 = vld [vmem:[#allocation2 + $0xb18] sm:$0xff]  ;;  %v3558_v18 = vadd.f32 %v6965_v5, %v3301_v30 }
 0x70a   :  { %v5000_v30 = vld [vmem:[#allocation2 + $0x3d8] sm:$0xff] }
 0x70b   :  { %v7239_v37 = vpop.f32.mrf.mxu3  ;;  %v4065_v26 = vpop.f32.mrf.mxu2  ;;  %v3812_v22 = vadd.f32 %v7097_v44, %v3555_v53  ;;  %v3815_v44 = vadd.f32 %v7105_v14, %v3558_v18  ;;  %v5001_v14 = vld [vmem:[#allocation2 + $0x8c8] sm:$0xff] }
 0x70c   :  { %8308 = vst [vmem:[#allocation47_spill] sm:$0xff] %v7239_v37  ;;  %v7241_v61 = vadd.f32 %v4065_v26, %v3809_v58  ;;  %v7243_v51 = vpop.f32.mrf.mxu1  ;;  %v5024_v37 = vld [vmem:[#allocation2 + $0x4c8] sm:$0xff] }
 0x70f   :  { %3906 = vmatmul.f32.gmra.mxu1 %v4990_v16 }
 0x710   :  { %3488 = vmatmul.f32.gmra.mxu3 %v4991_v43  ;;  %4115 = vmatmul.f32.gmra.mxu2 %v4992_v28  ;;  %v4994_v43 = vld [vmem:[#allocation2 + $0x628] sm:$0xff]  ;;  %v4996_v28 = vld [vmem:[#allocation2 + $0x3b0] sm:$0xff]  ;;  %v7261_v53 = vpop.f32.mrf.mxu0 }
 0x711   :  { %3697 = vmatmul.f32.gmra.mxu0 %v4993_v0  ;;  %v4997_v0 = vld [vmem:[#allocation2 + $0x8a0] sm:$0xff] }
 0x713   :  { %v7251_v60 = vpop.f32.mrf.mxu3  ;;  %v4068_v58 = vpop.f32.mrf.mxu2 }
 0x714   :  { %8309 = vst [vmem:[#allocation58_spill] sm:$0xff] %v7251_v60  ;;  %v7253_v26 = vadd.f32 %v4068_v58, %v3812_v22  ;;  %v7257_v16 = vpop.f32.mrf.mxu1  ;;  %v4998_v60 = vld [vmem:[#allocation2 + $0x650] sm:$0xff] }
 0x717   :  { %3909 = vmatmul.f32.gmra.mxu1 %v4994_v43  ;;  %v3304_v43 = vadd.f32 %v7166_v49, %v6805_v29 }
 0x718   :  { %3491 = vmatmul.f32.gmra.mxu3 %v4995_v3  ;;  %4118 = vmatmul.f32.gmra.mxu2 %v4996_v28  ;;  %v4999_v3 = vld [vmem:[#allocation2 + $0xb40] sm:$0xff]  ;;  %v7277_v29 = vpop.f32.mrf.mxu0 }
 0x719   :  { %3700 = vmatmul.f32.gmra.mxu0 %v4997_v0  ;;  %v3561_v5 = vadd.f32 %v6976_v34, %v3304_v43  ;;  %v5003_v34 = vld [vmem:[#allocation2 + $0xb68] sm:$0xff] }
 0x71b   :  { %v7263_v22 = vpop.f32.mrf.mxu3  ;;  %v4071_v58 = vpop.f32.mrf.mxu2  ;;  %v3818_v18 = vadd.f32 %v7113_v32, %v3561_v5 }
 0x71c   :  { %8310 = vst [vmem:[#allocation68_spill] sm:$0xff] %v7263_v22  ;;  %v7265_v54 = vadd.f32 %v4071_v58, %v3815_v44  ;;  %v7270_v28 = vpop.f32.mrf.mxu1  ;;  %v5022_v22 = vld [vmem:[#allocation2 + $0x740] sm:$0xff] }
 0x71f   :  { %3912 = vmatmul.f32.gmra.mxu1 %v4998_v60  ;;  %v3307_v60 = vadd.f32 %v7166_v49, %v6817_v19  ;;  %v3310_v19 = vadd.f32 %v7166_v49, %v6829_v1 }
 0x720   :  { %3494 = vmatmul.f32.gmra.mxu3 %v4999_v3  ;;  %4121 = vmatmul.f32.gmra.mxu2 %v5000_v30  ;;  %v5002_v3 = vld [vmem:[#allocation2 + $0x678] sm:$0xff]  ;;  %v5004_v30 = vld [vmem:[#allocation2 + $0x400] sm:$0xff] }
 0x721   :  { %3703 = vmatmul.f32.gmra.mxu0 %v5001_v14  ;;  %v3564_v43 = vadd.f32 %v6987_v25, %v3307_v60  ;;  %v5005_v14 = vld [vmem:[#allocation2 + $0x8f0] sm:$0xff]  ;;  %v3567_v60 = vadd.f32 %v6996_v13, %v3310_v19 }
 0x722   :  { %v5007_v25 = vld [vmem:[#allocation2 + $0xb90] sm:$0xff] }
 0x723   :  { %v7273_v0 = vpop.f32.mrf.mxu3  ;;  %v4074_v44 = vpop.f32.mrf.mxu2  ;;  %v3821_v32 = vadd.f32 %v7121_v59, %v3564_v43  ;;  %v5009_v59 = vld [vmem:[#allocation2 + $0x918] sm:$0xff]  ;;  %v3824_v43 = vadd.f32 %v7125_v4, %v3567_v60  ;;  %v5012_v19 = vld [vmem:[#allocation2 + $0x450] sm:$0xff]  ;;  %v5013_v4 = vld [vmem:[#allocation2 + $0x940] sm:$0xff] }
 0x724   :  { %8311 = vst [vmem:[#allocation49_spill] sm:$0xff] %v7273_v0  ;;  %v7275_v58 = vadd.f32 %v4074_v44, %v3818_v18  ;;  %v7283_v5 = vpop.f32.mrf.mxu1 }
 0x727   :  { %3915 = vmatmul.f32.gmra.mxu1 %v5002_v3  ;;  %v7291_v3 = vpop.f32.mrf.mxu0 }
 0x728   :  { %3497 = vmatmul.f32.gmra.mxu3 %v5003_v34  ;;  %4124 = vmatmul.f32.gmra.mxu2 %v5004_v30  ;;  %v5006_v34 = vld [vmem:[#allocation2 + $0x6a0] sm:$0xff]  ;;  %v5008_v30 = vld [vmem:[#allocation2 + $0x428] sm:$0xff] }
 0x729   :  { %3706 = vmatmul.f32.gmra.mxu0 %v5005_v14 }
 0x72b   :  { %v7285_v18 = vpop.f32.mrf.mxu3  ;;  %v4077_v44 = vpop.f32.mrf.mxu2 }
 0x72c   :  { %8312 = vst [vmem:[#allocation59_spill] sm:$0xff] %v7285_v18  ;;  %v7287_v0 = vadd.f32 %v4077_v44, %v3821_v32  ;;  %v7299_v1 = vpop.f32.mrf.mxu1  ;;  %v5010_v18 = vld [vmem:[#allocation2 + $0x6c8] sm:$0xff] }
 0x72f   :  { %3918 = vmatmul.f32.gmra.mxu1 %v5006_v34  ;;  %v3313_v34 = vadd.f32 %v7166_v49, %v6838_v62  ;;  %v3316_v62 = vadd.f32 %v7166_v49, %v6845_v57 }
 0x730   :  { %3500 = vmatmul.f32.gmra.mxu3 %v5007_v25  ;;  %4127 = vmatmul.f32.gmra.mxu2 %v5008_v30  ;;  %v5011_v25 = vld [vmem:[#allocation2 + $0xbb8] sm:$0xff]  ;;  %v7304_v30 = vpop.f32.mrf.mxu0 }
 0x731   :  { %3709 = vmatmul.f32.gmra.mxu0 %v5009_v59  ;;  %v3570_v13 = vadd.f32 %v7005_v2, %v3313_v34  ;;  %v5015_v2 = vld [vmem:[#allocation2 + $0xbe0] sm:$0xff]  ;;  %v3573_v34 = vadd.f32 %v7014_v39, %v3316_v62 }
 0x732   :  { %v8317_v39 = vld [vmem:[#allocation39_spill] sm:$0xff] }
 0x733   :  { %v7295_v14 = vpop.f32.mrf.mxu3  ;;  %v4080_v32 = vpop.f32.mrf.mxu2  ;;  %v3827_v60 = vadd.f32 %v7131_v38, %v3570_v13  ;;  %v3830_v38 = vadd.f32 %v7137_v55, %v3573_v34  ;;  %v5021_v55 = vld [vmem:[#allocation2 + $0x990] sm:$0xff] }
 0x734   :  { %8313 = vst [vmem:[#allocation69_spill] sm:$0xff] %v7295_v14  ;;  %v7297_v44 = vadd.f32 %v4080_v32, %v3824_v43  ;;  %v5018_v14 = vld [vmem:[#allocation2 + $0x718] sm:$0xff] }
 0x737   :  { %3921 = vmatmul.f32.gmra.mxu1 %v5010_v18  ;;  %v7313_v18 = vpop.f32.mrf.mxu1 }
 0x738   :  { %3503 = vmatmul.f32.gmra.mxu3 %v5011_v25  ;;  %4130 = vmatmul.f32.gmra.mxu2 %v5012_v19  ;;  %v5014_v25 = vld [vmem:[#allocation2 + $0x6f0] sm:$0xff]  ;;  %v5016_v19 = vld [vmem:[#allocation2 + $0x478] sm:$0xff]  ;;  %v7317_v13 = vpop.f32.mrf.mxu0 }
 0x739   :  { %3712 = vmatmul.f32.gmra.mxu0 %v5013_v4  ;;  %v5017_v4 = vld [vmem:[#allocation2 + $0x968] sm:$0xff] }
 0x73b   :  { %v7307_v59 = vpop.f32.mrf.mxu3  ;;  %v4083_v43 = vpop.f32.mrf.mxu2 }
 0x73c   :  { %8314 = vst [vmem:[#allocation70_spill] sm:$0xff] %v7307_v59  ;;  %v7309_v32 = vadd.f32 %v4083_v43, %v3827_v60  ;;  %v8316_v59 = vld [vmem:[#allocation12_spill] sm:$0xff] }
 0x73f   :  { %3924 = vmatmul.f32.gmra.mxu1 %v5014_v25  ;;  %v3319_v25 = vadd.f32 %v7166_v49, %v8316_v59 }
 0x740   :  { %3506 = vmatmul.f32.gmra.mxu3 %v5015_v2  ;;  %4133 = vmatmul.f32.gmra.mxu2 %v5016_v19  ;;  %v5019_v2 = vld [vmem:[#allocation2 + $0xc08] sm:$0xff]  ;;  %v5020_v19 = vld [vmem:[#allocation2 + $0x4a0] sm:$0xff]  ;;  %v7333_v59 = vpop.f32.mrf.mxu0 }
 0x741   :  { %3715 = vmatmul.f32.gmra.mxu0 %v5017_v4  ;;  %v3576_v62 = vadd.f32 %v8317_v39, %v3319_v25  ;;  %v7326_v4 = vpop.f32.mrf.mxu1  ;;  %v5023_v25 = vld [vmem:[#allocation2 + $0xc30] sm:$0xff] }
 0x742   :  { %v8320_v39 = vld [vmem:[#allocation41_spill] sm:$0xff] }
 0x743   :  { %v7319_v60 = vpop.f32.mrf.mxu3  ;;  %v4086_v43 = vpop.f32.mrf.mxu2  ;;  %v3833_v34 = vadd.f32 %v7143_v46, %v3576_v62 }
 0x744   :  { %8315 = vst [vmem:[#allocation71_spill] sm:$0xff] %v7319_v60  ;;  %v7321_v57 = vadd.f32 %v4086_v43, %v3830_v38 }
 0x747   :  { %3927 = vmatmul.f32.gmra.mxu1 %v5018_v14  ;;  %v8319_v14 = vld [vmem:[#allocation13_spill] sm:$0xff] }
 0x748   :  { %3509 = vmatmul.f32.gmra.mxu3 %v5019_v2  ;;  %4136 = vmatmul.f32.gmra.mxu2 %v5020_v19  ;;  %v3322_v2 = vadd.f32 %v7166_v49, %v8319_v14  ;;  %v8323_v14 = vld [vmem:[#allocation14_spill] sm:$0xff]  ;;  %v7347_v24 = vpop.f32.mrf.mxu0 }
 0x749   :  { %3718 = vmatmul.f32.gmra.mxu0 %v5021_v55  ;;  %v5025_v55 = vld [vmem:[#allocation2 + $0x9b8] sm:$0xff]  ;;  %v7339_v62 = vpop.f32.mrf.mxu1 }
 0x74a   :  { %v3579_v19 = vadd.f32 %v8320_v39, %v3322_v2  ;;  %v5027_v2 = vld [vmem:[#allocation2 + $0xc58] sm:$0xff] }
 0x74b   :  { %v7329_v60 = vpop.f32.mrf.mxu3  ;;  %v4089_v38 = vpop.f32.mrf.mxu2 }
 0x74c   :  { %8318 = vst [vmem:[#allocation12_spill] sm:$0xff] %v7329_v60  ;;  %v7331_v43 = vadd.f32 %v4089_v38, %v3833_v34  ;;  %v3836_v46 = vadd.f32 %v7151_v63, %v3579_v19  ;;  %v5029_v63 = vld [vmem:[#allocation2 + $0x9e0] sm:$0xff] }
 0x74f   :  { %3930 = vmatmul.f32.gmra.mxu1 %v5022_v22  ;;  %v3325_v22 = vadd.f32 %v7166_v49, %v8323_v14 }
 0x750   :  { %3512 = vmatmul.f32.gmra.mxu3 %v5023_v25  ;;  %4139 = vmatmul.f32.gmra.mxu2 %v5024_v37  ;;  %v5026_v25 = vld [vmem:[#allocation2 + $0x768] sm:$0xff] }
 0x751   :  { %3721 = vmatmul.f32.gmra.mxu0 %v5025_v55  ;;  %v8324_v37 = vld [vmem:[#allocation44_spill] sm:$0xff]  ;;  %v5028_v55 = vld [vmem:[#allocation2 + $0x4f0] sm:$0xff]  ;;  %v7355_v14 = vpop.f32.mrf.mxu1 }
 0x752   :  { %v3582_v39 = vadd.f32 %v8324_v37, %v3325_v22  ;;  %v8328_v22 = vld [vmem:[#allocation46_spill] sm:$0xff] }
 0x753   :  { %v7341_v34 = vpop.f32.mrf.mxu3  ;;  %v4092_v38 = vpop.f32.mrf.mxu2 }
 0x754   :  { %8321 = vst [vmem:[#allocation39_spill] sm:$0xff] %v7341_v34  ;;  %v7343_v60 = vadd.f32 %v4092_v38, %v3836_v46  ;;  %v3839_v19 = vadd.f32 %v7159_v10, %v3582_v39  ;;  %v5033_v10 = vld [vmem:[#allocation2 + $0xa08] sm:$0xff] }
 0x756   :  { %8322 = vst [vmem:[#allocation13_spill] sm:$0xff] %v7343_v60  ;;  %v5036_v60 = vld [vmem:[#allocation2 + $0x540] sm:$0xff] }
 0x757   :  { %3933 = vmatmul.f32.gmra.mxu1 %v5026_v25  ;;  %v3328_v25 = vadd.f32 %v7166_v49, %v8327_v41  ;;  %v8331_v41 = vld [vmem:[#allocation16_spill] sm:$0xff] }
 0x758   :  { %3515 = vmatmul.f32.gmra.mxu3 %v5027_v2  ;;  %4142 = vmatmul.f32.gmra.mxu2 %v5028_v55  ;;  %v5031_v2 = vld [vmem:[#allocation2 + $0x20] sm:$0xff]  ;;  %v5032_v55 = vld [vmem:[#allocation2 + $0x518] sm:$0xff] }
 0x759   :  { %3724 = vmatmul.f32.gmra.mxu0 %v5029_v63  ;;  %v3585_v37 = vadd.f32 %v8328_v22, %v3328_v25  ;;  %v7360_v63 = vpop.f32.mrf.mxu0  ;;  %v5035_v25 = vld [vmem:[#allocation2 + $0x48] sm:$0xff] }
 0x75a   :  { %v8332_v22 = vld [vmem:[#allocation48_spill] sm:$0xff] }
 0x75b   :  { %v7351_v34 = vpop.f32.mrf.mxu3  ;;  %v4095_v46 = vpop.f32.mrf.mxu2  ;;  %v3842_v39 = vadd.f32 %v7171_v7, %v3585_v37 }
 0x75c   :  { %8325 = vst [vmem:[#allocation41_spill] sm:$0xff] %v7351_v34  ;;  %v7353_v38 = vadd.f32 %v4095_v46, %v3839_v19 }
 0x75e   :  { %8326 = vst [vmem:[#allocation14_spill] sm:$0xff] %v7353_v38  ;;  %v7369_v38 = vpop.f32.mrf.mxu1 }
 0x75f   :  { %3936 = vmatmul.f32.gmra.mxu1 %v5030_v31  ;;  %v3331_v31 = vadd.f32 %v7166_v49, %v8331_v41 }
 0x760   :  { %4306 = vmatmul.f32.vlgmr.msra.gmra.mxu3 %v5031_v2  ;;  %4145 = vmatmul.f32.gmra.mxu2 %v5032_v55  ;;  %v5034_v2 = vld [vmem:[#allocation2 + $0x7b8] sm:$0xff] }
 0x761   :  { %3727 = vmatmul.f32.gmra.mxu0 %v5033_v10  ;;  %v3588_v55 = vadd.f32 %v8332_v22, %v3331_v31  ;;  %v5037_v10 = vld [vmem:[#allocation2 + $0xa30] sm:$0xff]  ;;  %v7373_v37 = vpop.f32.mrf.mxu0  ;;  %v8336_v31 = vld [vmem:[#allocation50_spill] sm:$0xff]  ;;  %v5040_v22 = vld [vmem:[#allocation2 + $0x568] sm:$0xff] }
 0x763   :  { %v7363_v19 = vpop.f32.mrf.mxu3  ;;  %v4098_v46 = vpop.f32.mrf.mxu2  ;;  %v3845_v7 = vadd.f32 %v7185_v21, %v3588_v55  ;;  %v5041_v21 = vld [vmem:[#allocation2 + $0xa58] sm:$0xff] }
 0x764   :  { %8329 = vst [vmem:[#allocation44_spill] sm:$0xff] %v7363_v19  ;;  %v7365_v34 = vadd.f32 %v4098_v46, %v3842_v39  ;;  %v8335_v19 = vld [vmem:[#allocation17_spill] sm:$0xff] }
 0x766   :  { %8330 = vst [vmem:[#allocation15_spill] sm:$0xff] %v7365_v34  ;;  %v5038_v34 = vld [vmem:[#allocation2 + $0x7e0] sm:$0xff] }
 0x767   :  { %3939 = vmatmul.f32.gmra.mxu1 %v5034_v2  ;;  %v3334_v2 = vadd.f32 %v7166_v49, %v8335_v19 }
 0x768   :  { %4309 = vmatmul.f32.gmra.mxu3 %v5035_v25  ;;  %4148 = vmatmul.f32.gmra.mxu2 %v5036_v60  ;;  %v5039_v25 = vld [vmem:[#allocation2 + $0x70] sm:$0xff] }
 0x769   :  { %3730 = vmatmul.f32.gmra.mxu0 %v5037_v10  ;;  %v3591_v60 = vadd.f32 %v8336_v31, %v3334_v2  ;;  %v7382_v10 = vpop.f32.mrf.mxu1  ;;  %v7389_v19 = vpop.f32.mrf.mxu0  ;;  %v5043_v2 = vld [vmem:[#allocation2 + $0x98] sm:$0xff]  ;;  %v8340_v31 = vld [vmem:[#allocation32_spill] sm:$0xff] }
 0x76b   :  { %v7375_v39 = vpop.f32.mrf.mxu3  ;;  %v4101_v46 = vpop.f32.mrf.mxu2  ;;  %v3848_v55 = vadd.f32 %v7197_v33, %v3591_v60 }
 0x76c   :  { %8333 = vst [vmem:[#allocation46_spill] sm:$0xff] %v7375_v39  ;;  %v7377_v41 = vadd.f32 %v4101_v46, %v3845_v7 }
 0x76e   :  { %8334 = vst [vmem:[#allocation16_spill] sm:$0xff] %v7377_v41  ;;  %v5042_v41 = vld [vmem:[#allocation2 + $0x808] sm:$0xff] }
 0x76f   :  { %3942 = vmatmul.f32.gmra.mxu1 %v5038_v34  ;;  %v8339_v34 = vld [vmem:[#allocation18_spill] sm:$0xff] }
 0x770   :  { %4312 = vmatmul.f32.gmra.mxu3 %v5039_v25  ;;  %4151 = vmatmul.f32.gmra.mxu2 %v5040_v22  ;;  %v3337_v25 = vadd.f32 %v7166_v49, %v8339_v34  ;;  %v8343_v34 = vld [vmem:[#allocation19_spill] sm:$0xff] }
 0x771   :  { %3733 = vmatmul.f32.gmra.mxu0 %v5041_v21  ;;  %v5045_v21 = vld [vmem:[#allocation2 + $0xa80] sm:$0xff]  ;;  %v7395_v60 = vpop.f32.mrf.mxu1 }
 0x772   :  { %v3594_v22 = vadd.f32 %v8340_v31, %v3337_v25  ;;  %v5047_v25 = vld [vmem:[#allocation2 + $0xc0] sm:$0xff] }
 0x773   :  { %v7385_v39 = vpop.f32.mrf.mxu3  ;;  %v4104_v7 = vpop.f32.mrf.mxu2 }
 0x774   :  { %8337 = vst [vmem:[#allocation48_spill] sm:$0xff] %v7385_v39  ;;  %v7387_v46 = vadd.f32 %v4104_v7, %v3848_v55  ;;  %v3851_v33 = vadd.f32 %v7209_v48, %v3594_v22  ;;  %v5049_v48 = vld [vmem:[#allocation2 + $0xaa8] sm:$0xff] }
 0x776   :  { %8338 = vst [vmem:[#allocation17_spill] sm:$0xff] %v7387_v46  ;;  %v7403_v46 = vpop.f32.mrf.mxu0 }
 0x777   :  { %3945 = vmatmul.f32.gmra.mxu1 %v5042_v41  ;;  %v3340_v41 = vadd.f32 %v7166_v49, %v8343_v34  ;;  %8344 = vst [vmem:[#allocation32_spill] sm:$0xff] %v7403_v46  ;;  %v5050_v46 = vld [vmem:[#allocation2 + $0x858] sm:$0xff] }
 0x778   :  { %4315 = vmatmul.f32.gmra.mxu3 %v5043_v2  ;;  %4154 = vmatmul.f32.gmra.mxu2 %v5044_v56  ;;  %v5046_v2 = vld [vmem:[#allocation2 + $0x830] sm:$0xff]  ;;  %v8345_v56 = vld [vmem:[#allocation60_spill] sm:$0xff] }
 0x779   :  { %3736 = vmatmul.f32.gmra.mxu0 %v5045_v21  ;;  %v3597_v31 = vadd.f32 %v8345_v56, %v3340_v41  ;;  %v5048_v21 = vld [vmem:[#allocation2 + $0x5b8] sm:$0xff]  ;;  %v7411_v34 = vpop.f32.mrf.mxu1  ;;  %v8349_v41 = vld [vmem:[#allocation51_spill] sm:$0xff] }
 0x77b   :  { %v7397_v55 = vpop.f32.mrf.mxu3  ;;  %v4107_v7 = vpop.f32.mrf.mxu2  ;;  %v3854_v22 = vadd.f32 %v7219_v47, %v3597_v31  ;;  %v5053_v47 = vld [vmem:[#allocation2 + $0xad0] sm:$0xff] }
 0x77c   :  { %8341 = vst [vmem:[#allocation50_spill] sm:$0xff] %v7397_v55  ;;  %v7399_v39 = vadd.f32 %v4107_v7, %v3851_v33 }
 0x77e   :  { %8342 = vst [vmem:[#allocation18_spill] sm:$0xff] %v7399_v39  ;;  %v8348_v39 = vld [vmem:[#allocation20_spill] sm:$0xff] }
 0x77f   :  { %3948 = vmatmul.f32.gmra.mxu1 %v5046_v2  ;;  %v3343_v2 = vadd.f32 %v7166_v49, %v8348_v39  ;;  %v8353_v39 = vld [vmem:[#allocation21_spill] sm:$0xff] }
 0x780   :  { %4318 = vmatmul.f32.gmra.mxu3 %v5047_v25  ;;  %4157 = vmatmul.f32.gmra.mxu2 %v5048_v21  ;;  %v5051_v25 = vld [vmem:[#allocation2 + $0xe8] sm:$0xff]  ;;  %v5052_v21 = vld [vmem:[#allocation2 + $0x5e0] sm:$0xff] }
 0x781   :  { %3739 = vmatmul.f32.gmra.mxu0 %v5049_v48  ;;  %v3600_v56 = vadd.f32 %v8349_v41, %v3343_v2  ;;  %v7416_v48 = vpop.f32.mrf.mxu0  ;;  %v5055_v2 = vld [vmem:[#allocation2 + $0x110] sm:$0xff]  ;;  %v8354_v41 = vld [vmem:[#allocation36_spill] sm:$0xff] }
 0x782   :  { %8350 = vst [vmem:[#allocation20_spill] sm:$0xff] %v7416_v48  ;;  %v5056_v48 = vld [vmem:[#allocation2 + $0x608] sm:$0xff] }
 0x783   :  { %v7407_v55 = vpop.f32.mrf.mxu3  ;;  %v4110_v33 = vpop.f32.mrf.mxu2  ;;  %v3857_v31 = vadd.f32 %v7231_v9, %v3600_v56 }
 0x784   :  { %8346 = vst [vmem:[#allocation19_spill] sm:$0xff] %v7407_v55  ;;  %v7409_v7 = vadd.f32 %v4110_v33, %v3854_v22 }
 0x786   :  { %8347 = vst [vmem:[#allocation60_spill] sm:$0xff] %v7409_v7  ;;  %v7425_v7 = vpop.f32.mrf.mxu1 }
 0x787   :  { %3951 = vmatmul.f32.gmra.mxu1 %v5050_v46  ;;  %v3346_v46 = vadd.f32 %v7166_v49, %v8353_v39 }
 0x788   :  { %4321 = vmatmul.f32.gmra.mxu3 %v5051_v25  ;;  %4160 = vmatmul.f32.gmra.mxu2 %v5052_v21  ;;  %v5054_v25 = vld [vmem:[#allocation2 + $0x880] sm:$0xff] }
 0x789   :  { %3742 = vmatmul.f32.gmra.mxu0 %v5053_v47  ;;  %v3603_v21 = vadd.f32 %v8354_v41, %v3346_v46  ;;  %v5057_v47 = vld [vmem:[#allocation2 + $0xaf8] sm:$0xff]  ;;  %v7429_v56 = vpop.f32.mrf.mxu0  ;;  %v5060_v41 = vld [vmem:[#allocation2 + $0x630] sm:$0xff] }
 0x78a   :  { %8355 = vst [vmem:[#allocation21_spill] sm:$0xff] %v7429_v56  ;;  %v8359_v46 = vld [vmem:[#allocation62_spill] sm:$0xff] }
 0x78b   :  { %v7419_v22 = vpop.f32.mrf.mxu3  ;;  %v4113_v33 = vpop.f32.mrf.mxu2  ;;  %v3860_v9 = vadd.f32 %v7243_v51, %v3603_v21  ;;  %v5061_v51 = vld [vmem:[#allocation2 + $0xb20] sm:$0xff]  ;;  %v5064_v56 = vld [vmem:[#allocation2 + $0x658] sm:$0xff] }
 0x78c   :  { %8351 = vst [vmem:[#allocation51_spill] sm:$0xff] %v7419_v22  ;;  %v7421_v55 = vadd.f32 %v4113_v33, %v3857_v31  ;;  %v8358_v22 = vld [vmem:[#allocation22_spill] sm:$0xff] }
 0x78e   :  { %8352 = vst [vmem:[#allocation72_spill] sm:$0xff] %v7421_v55  ;;  %v5058_v55 = vld [vmem:[#allocation2 + $0x8a8] sm:$0xff] }
 0x78f   :  { %3954 = vmatmul.f32.gmra.mxu1 %v5054_v25  ;;  %v3349_v25 = vadd.f32 %v7166_v49, %v8358_v22 }
 0x790   :  { %4324 = vmatmul.f32.gmra.mxu3 %v5055_v2  ;;  %4163 = vmatmul.f32.gmra.mxu2 %v5056_v48  ;;  %v5059_v2 = vld [vmem:[#allocation2 + $0x138] sm:$0xff] }
 0x791   :  { %3745 = vmatmul.f32.gmra.mxu0 %v5057_v47  ;;  %v3606_v48 = vadd.f32 %v8359_v46, %v3349_v25  ;;  %v7438_v47 = vpop.f32.mrf.mxu1  ;;  %v7445_v22 = vpop.f32.mrf.mxu0  ;;  %v5063_v25 = vld [vmem:[#allocation2 + $0x160] sm:$0xff]  ;;  %v8363_v46 = vld [vmem:[#allocation53_spill] sm:$0xff] }
 0x793   :  { %v7431_v31 = vpop.f32.mrf.mxu3  ;;  %v4116_v33 = vpop.f32.mrf.mxu2  ;;  %v3863_v21 = vadd.f32 %v7257_v16, %v3606_v48 }
 0x794   :  { %8356 = vst [vmem:[#allocation36_spill] sm:$0xff] %v7431_v31  ;;  %v7433_v39 = vadd.f32 %v4116_v33, %v3860_v9 }
 0x796   :  { %8357 = vst [vmem:[#allocation73_spill] sm:$0xff] %v7433_v39  ;;  %v5062_v39 = vld [vmem:[#allocation2 + $0x8d0] sm:$0xff] }
 0x797   :  { %3957 = vmatmul.f32.gmra.mxu1 %v5058_v55  ;;  %v8362_v55 = vld [vmem:[#allocation23_spill] sm:$0xff] }
 0x798   :  { %4327 = vmatmul.f32.gmra.mxu3 %v5059_v2  ;;  %4166 = vmatmul.f32.gmra.mxu2 %v5060_v41  ;;  %v3352_v2 = vadd.f32 %v7166_v49, %v8362_v55  ;;  %v8366_v55 = vld [vmem:[#allocation35_spill] sm:$0xff] }
 0x799   :  { %3748 = vmatmul.f32.gmra.mxu0 %v5061_v51  ;;  %v5065_v51 = vld [vmem:[#allocation2 + $0xb48] sm:$0xff]  ;;  %v7451_v48 = vpop.f32.mrf.mxu1 }
 0x79a   :  { %v3609_v41 = vadd.f32 %v8363_v46, %v3352_v2  ;;  %v5067_v2 = vld [vmem:[#allocation2 + $0x188] sm:$0xff] }
 0x79b   :  { %v7441_v31 = vpop.f32.mrf.mxu3  ;;  %v4119_v9 = vpop.f32.mrf.mxu2 }
 0x79c   :  { %8360 = vst [vmem:[#allocation22_spill] sm:$0xff] %v7441_v31  ;;  %v7443_v33 = vadd.f32 %v4119_v9, %v3863_v21  ;;  %v3866_v16 = vadd.f32 %v7270_v28, %v3609_v41  ;;  %v5069_v28 = vld [vmem:[#allocation2 + $0xb70] sm:$0xff] }
 0x79e   :  { %8361 = vst [vmem:[#allocation62_spill] sm:$0xff] %v7443_v33  ;;  %v7459_v33 = vpop.f32.mrf.mxu0 }
 0x79f   :  { %3960 = vmatmul.f32.gmra.mxu1 %v5062_v39  ;;  %v3355_v39 = vadd.f32 %v7166_v49, %v8366_v55  ;;  %8367 = vst [vmem:[#allocation35_spill] sm:$0xff] %v7459_v33  ;;  %v5070_v33 = vld [vmem:[#allocation2 + $0x920] sm:$0xff] }
 0x7a0   :  { %4330 = vmatmul.f32.gmra.mxu3 %v5063_v25  ;;  %4169 = vmatmul.f32.gmra.mxu2 %v5064_v56  ;;  %v5066_v25 = vld [vmem:[#allocation2 + $0x8f8] sm:$0xff] }
 0x7a1   :  { %3751 = vmatmul.f32.gmra.mxu0 %v5065_v51  ;;  %v8368_v56 = vld [vmem:[#allocation54_spill] sm:$0xff]  ;;  %v5068_v51 = vld [vmem:[#allocation2 + $0x680] sm:$0xff]  ;;  %v7467_v55 = vpop.f32.mrf.mxu1 }
 0x7a2   :  { %v3612_v46 = vadd.f32 %v8368_v56, %v3355_v39  ;;  %v8372_v39 = vld [vmem:[#allocation42_spill] sm:$0xff] }
 0x7a3   :  { %v7453_v21 = vpop.f32.mrf.mxu3  ;;  %v4122_v9 = vpop.f32.mrf.mxu2 }
 0x7a4   :  { %8364 = vst [vmem:[#allocation23_spill] sm:$0xff] %v7453_v21  ;;  %v7455_v31 = vadd.f32 %v4122_v9, %v3866_v16  ;;  %v3869_v41 = vadd.f32 %v7283_v5, %v3612_v46  ;;  %v5073_v5 = vld [vmem:[#allocation2 + $0xb98] sm:$0xff] }
 0x7a6   :  { %8365 = vst [vmem:[#allocation53_spill] sm:$0xff] %v7455_v31  ;;  %v8371_v31 = vld [vmem:[#allocation24_spill] sm:$0xff] }
 0x7a7   :  { %3963 = vmatmul.f32.gmra.mxu1 %v5066_v25  ;;  %v3358_v25 = vadd.f32 %v7166_v49, %v8371_v31  ;;  %v8375_v31 = vld [vmem:[#allocation37_spill] sm:$0xff] }
 0x7a8   :  { %4333 = vmatmul.f32.gmra.mxu3 %v5067_v2  ;;  %4172 = vmatmul.f32.gmra.mxu2 %v5068_v51  ;;  %v5071_v2 = vld [vmem:[#allocation2 + $0x1b0] sm:$0xff]  ;;  %v5072_v51 = vld [vmem:[#allocation2 + $0x6a8] sm:$0xff] }
 0x7a9   :  { %3754 = vmatmul.f32.gmra.mxu0 %v5069_v28  ;;  %v3615_v56 = vadd.f32 %v8372_v39, %v3358_v25  ;;  %v7472_v28 = vpop.f32.mrf.mxu0  ;;  %v5075_v25 = vld [vmem:[#allocation2 + $0x1d8] sm:$0xff] }
 0x7ab   :  { %v7463_v21 = vpop.f32.mrf.mxu3  ;;  %v4125_v16 = vpop.f32.mrf.mxu2  ;;  %v3872_v46 = vadd.f32 %v7299_v1, %v3615_v56 }
 0x7ac   :  { %8369 = vst [vmem:[#allocation54_spill] sm:$0xff] %v7463_v21  ;;  %v7465_v9 = vadd.f32 %v4125_v16, %v3869_v41 }
 0x7ae   :  { %8370 = vst [vmem:[#allocation74_spill] sm:$0xff] %v7465_v9  ;;  %v7481_v9 = vpop.f32.mrf.mxu1 }
 0x7af   :  { %3966 = vmatmul.f32.gmra.mxu1 %v5070_v33  ;;  %v3361_v33 = vadd.f32 %v7166_v49, %v8375_v31 }
 0x7b0   :  { %4336 = vmatmul.f32.gmra.mxu3 %v5071_v2  ;;  %4175 = vmatmul.f32.gmra.mxu2 %v5072_v51  ;;  %v5074_v2 = vld [vmem:[#allocation2 + $0x948] sm:$0xff]  ;;  %v5076_v51 = vld [vmem:[#allocation2 + $0x6d0] sm:$0xff] }
 0x7b1   :  { %3757 = vmatmul.f32.gmra.mxu0 %v5073_v5  ;;  %v3618_v39 = vadd.f32 %v7139_v20, %v3361_v33  ;;  %v5077_v5 = vld [vmem:[#allocation2 + $0xbc0] sm:$0xff]  ;;  %v7485_v56 = vpop.f32.mrf.mxu0  ;;  %v5080_v33 = vld [vmem:[#allocation2 + $0x6f8] sm:$0xff] }
 0x7b3   :  { %v7475_v41 = vpop.f32.mrf.mxu3  ;;  %v4128_v16 = vpop.f32.mrf.mxu2  ;;  %v3875_v1 = vadd.f32 %v7313_v18, %v3618_v39  ;;  %v5081_v18 = vld [vmem:[#allocation2 + $0xbe8] sm:$0xff] }
 0x7b4   :  { %8373 = vst [vmem:[#allocation24_spill] sm:$0xff] %v7475_v41  ;;  %v7477_v21 = vadd.f32 %v4128_v16, %v3872_v46  ;;  %v8377_v41 = vld [vmem:[#allocation25_spill] sm:$0xff] }
 0x7b6   :  { %8374 = vst [vmem:[#allocation42_spill] sm:$0xff] %v7477_v21  ;;  %v5078_v21 = vld [vmem:[#allocation2 + $0x970] sm:$0xff] }
 0x7b7   :  { %3969 = vmatmul.f32.gmra.mxu1 %v5074_v2  ;;  %v3364_v2 = vadd.f32 %v7166_v49, %v8377_v41 }
 0x7b8   :  { %4339 = vmatmul.f32.gmra.mxu3 %v5075_v25  ;;  %4178 = vmatmul.f32.gmra.mxu2 %v5076_v51  ;;  %v5079_v25 = vld [vmem:[#allocation2 + $0x200] sm:$0xff]  ;;  %v7494_v51 = vpop.f32.mrf.mxu1 }
 0x7b9   :  { %3760 = vmatmul.f32.gmra.mxu0 %v5077_v5  ;;  %v3621_v20 = vadd.f32 %v7146_v50, %v3364_v2  ;;  %v7501_v41 = vpop.f32.mrf.mxu0  ;;  %v5083_v50 = vld [vmem:[#allocation2 + $0x228] sm:$0xff] }
 0x7bb   :  { %v7487_v46 = vpop.f32.mrf.mxu3  ;;  %v4131_v16 = vpop.f32.mrf.mxu2  ;;  %v3878_v39 = vadd.f32 %v7326_v4, %v3621_v20 }
 0x7bc   :  { %8376 = vst [vmem:[#allocation37_spill] sm:$0xff] %v7487_v46  ;;  %v7489_v31 = vadd.f32 %v4131_v16, %v3875_v1  ;;  %v5082_v46 = vld [vmem:[#allocation2 + $0x998] sm:$0xff] }
 0x7bf   :  { %3972 = vmatmul.f32.gmra.mxu1 %v5078_v21  ;;  %v8380_v21 = vld [vmem:[#allocation26_spill] sm:$0xff] }
 0x7c0   :  { %4342 = vmatmul.f32.gmra.mxu3 %v5079_v25  ;;  %4181 = vmatmul.f32.gmra.mxu2 %v5080_v33  ;;  %v3367_v25 = vadd.f32 %v7166_v49, %v8380_v21  ;;  %v5084_v33 = vld [vmem:[#allocation2 + $0x720] sm:$0xff]  ;;  %v7507_v20 = vpop.f32.mrf.mxu1 }
 0x7c1   :  { %3763 = vmatmul.f32.gmra.mxu0 %v5081_v18  ;;  %v5085_v18 = vld [vmem:[#allocation2 + $0xc10] sm:$0xff]  ;;  %v8383_v21 = vld [vmem:[#allocation27_spill] sm:$0xff] }
 0x7c2   :  { %v3624_v2 = vadd.f32 %v7161_v17, %v3367_v25  ;;  %v5087_v17 = vld [vmem:[#allocation2 + $0x250] sm:$0xff] }
 0x7c3   :  { %v7497_v5 = vpop.f32.mrf.mxu3  ;;  %v4134_v1 = vpop.f32.mrf.mxu2 }
 0x7c4   :  { %8378 = vst [vmem:[#allocation25_spill] sm:$0xff] %v7497_v5  ;;  %v7499_v16 = vadd.f32 %v4134_v1, %v3878_v39  ;;  %v3881_v4 = vadd.f32 %v7339_v62, %v3624_v2  ;;  %v5089_v62 = vld [vmem:[#allocation2 + $0xc38] sm:$0xff] }
 0x7c6   :  { %8379 = vst [vmem:[#allocation75_spill] sm:$0xff] %v7499_v16  ;;  %v5086_v16 = vld [vmem:[#allocation2 + $0x9c0] sm:$0xff] }
 0x7c7   :  { %3975 = vmatmul.f32.gmra.mxu1 %v5082_v46  ;;  %v3370_v46 = vadd.f32 %v7166_v49, %v8383_v21 }
 0x7c8   :  { %4345 = vmatmul.f32.gmra.mxu3 %v5083_v50  ;;  %4184 = vmatmul.f32.gmra.mxu2 %v5084_v33  ;;  %v7515_v50 = vpop.f32.mrf.mxu0  ;;  %v5088_v33 = vld [vmem:[#allocation2 + $0x748] sm:$0xff]  ;;  %v7523_v21 = vpop.f32.mrf.mxu1 }
 0x7c9   :  { %3766 = vmatmul.f32.gmra.mxu0 %v5085_v18  ;;  %v3627_v25 = vadd.f32 %v7176_v6, %v3370_v46  ;;  %v5092_v46 = vld [vmem:[#allocation2 + $0x770] sm:$0xff] }
 0x7cb   :  { %v7509_v39 = vpop.f32.mrf.mxu3  ;;  %v4137_v1 = vpop.f32.mrf.mxu2  ;;  %v3884_v2 = vadd.f32 %v7355_v14, %v3627_v25  ;;  %v5093_v14 = vld [vmem:[#allocation2 + $0xc60] sm:$0xff] }
 0x7cc   :  { %8381 = vst [vmem:[#allocation26_spill] sm:$0xff] %v7509_v39  ;;  %v7511_v5 = vadd.f32 %v4137_v1, %v3881_v4 }
 0x7ce   :  { %8382 = vst [vmem:[#allocation76_spill] sm:$0xff] %v7511_v5  ;;  %v5090_v5 = vld [vmem:[#allocation2 + $0x9e8] sm:$0xff] }
 0x7cf   :  { %3978 = vmatmul.f32.gmra.mxu1 %v5086_v16  ;;  %v8385_v16 = vld [vmem:[#allocation28_spill] sm:$0xff] }
 0x7d0   :  { %4348 = vmatmul.f32.gmra.mxu3 %v5087_v17  ;;  %4187 = vmatmul.f32.gmra.mxu2 %v5088_v33  ;;  %v3373_v39 = vadd.f32 %v7166_v49, %v8385_v16  ;;  %v5091_v17 = vld [vmem:[#allocation2 + $0x278] sm:$0xff]  ;;  %v7528_v33 = vpop.f32.mrf.mxu0  ;;  %v8387_v16 = vld [vmem:[#allocation29_spill] sm:$0xff] }
 0x7d1   :  { %3769 = vmatmul.f32.gmra.mxu0 %v5089_v62 }
 0x7d2   :  { %v3630_v6 = vadd.f32 %v7190_v8, %v3373_v39  ;;  %v5095_v8 = vld [vmem:[#allocation2 + $0x2a0] sm:$0xff] }
 0x7d3   :  { %v7519_v18 = vpop.f32.mrf.mxu3  ;;  %v4140_v4 = vpop.f32.mrf.mxu2 }
 0x7d4   :  { %8384 = vst [vmem:[#allocation27_spill] sm:$0xff] %v7519_v18  ;;  %v7521_v1 = vadd.f32 %v4140_v4, %v3884_v2  ;;  %v3887_v25 = vadd.f32 %v7369_v38, %v3630_v6  ;;  %v7537_v18 = vpop.f32.mrf.mxu1 }
 0x7d7   :  { %3981 = vmatmul.f32.gmra.mxu1 %v5090_v5  ;;  %v3376_v5 = vadd.f32 %v7166_v49, %v8387_v16  ;;  %v8388_v16 = vld [vmem:[#allocation30_spill] sm:$0xff] }
 0x7d8   :  { %4351 = vmatmul.f32.gmra.mxu3 %v5091_v17  ;;  %4190 = vmatmul.f32.gmra.mxu2 %v5092_v46  ;;  %v5094_v17 = vld [vmem:[#allocation2 + $0xa10] sm:$0xff]  ;;  %v5096_v46 = vld [vmem:[#allocation2 + $0x798] sm:$0xff] }
 0x7d9   :  { %3772 = vmatmul.f32.gmra.mxu0 %v5093_v14  ;;  %v3633_v39 = vadd.f32 %v7203_v27, %v3376_v5  ;;  %v5097_v27 = vld [vmem:[#allocation2 + $0xa38] sm:$0xff]  ;;  %v5098_v5 = vld [vmem:[#allocation2 + $0x2c8] sm:$0xff] }
 0x7db   :  { %v7531_v62 = vpop.f32.mrf.mxu3  ;;  %v4143_v2 = vpop.f32.mrf.mxu2  ;;  %v3890_v38 = vadd.f32 %v7382_v10, %v3633_v39 }
 0x7dc   :  { %8386 = vst [vmem:[#allocation28_spill] sm:$0xff] %v7531_v62  ;;  %v7533_v4 = vadd.f32 %v4143_v2, %v3887_v25  ;;  %v3379_v62 = vadd.f32 %v7166_v49, %v8388_v16  ;;  %v5102_v16 = vld [vmem:[#allocation2 + $0x7e8] sm:$0xff] }
 0x7de   :  { %v3636_v10 = vadd.f32 %v7221_v15, %v3379_v62  ;;  %v5100_v15 = vld [vmem:[#allocation2 + $0xa60] sm:$0xff]  ;;  %v5101_v62 = vld [vmem:[#allocation2 + $0x2f0] sm:$0xff] }
 0x7df   :  { %3984 = vmatmul.f32.gmra.mxu1 %v5094_v17  ;;  %v5099_v17 = vld [vmem:[#allocation2 + $0x7c0] sm:$0xff] }
 0x7e0   :  { %4354 = vmatmul.f32.gmra.mxu3 %v5095_v8  ;;  %4193 = vmatmul.f32.gmra.mxu2 %v5096_v46  ;;  %v7551_v8 = vpop.f32.mrf.mxu1 }
 0x7e3   :  { %v4307_v6 = vpop.f32.mrf.mxu3  ;;  %v4146_v14 = vpop.f32.mrf.mxu2 }
 0x7e4   :  { %v4308_v25 = vadd.f32 %v4307_v6, %v7183_v42  ;;  %v7542_v2 = vadd.f32 %v4146_v14, %v3890_v38  ;;  %v3893_v42 = vadd.f32 %v7395_v60, %v3636_v10  ;;  %v8389_v14 = vld [vmem:[#allocation31_spill] sm:$0xff] }
 0x7e6   :  { %4548 = vst.msk [vmem:[%s8139_s8] sm:$0xff] %vm4547_vm3, %v4308_v25  ;;  %v3382_v25 = vadd.f32 %v7166_v49, %v8389_v14  ;;  %v5105_v14 = vld [vmem:[#allocation2 + $0x810] sm:$0xff] }
 0x7e7   :  { %3987 = vmatmul.f32.gmra.mxu1 %v5097_v27 }
 0x7e8   :  { %4357 = vmatmul.f32.gmra.mxu3 %v5098_v5  ;;  %4196 = vmatmul.f32.gmra.mxu2 %v5099_v17  ;;  %v3639_v60 = vadd.f32 %v7235_v23, %v3382_v25  ;;  %v7565_v27 = vpop.f32.mrf.mxu1  ;;  %v5103_v23 = vld [vmem:[#allocation2 + $0xa88] sm:$0xff] }
 0x7eb   :  { %v4310_v39 = vpop.f32.mrf.mxu3  ;;  %v4149_v46 = vpop.f32.mrf.mxu2 }
 0x7ec   :  { %v4311_v38 = vadd.f32 %v4310_v39, %v7195_v40  ;;  %v7555_v6 = vadd.f32 %v4149_v46, %v3893_v42  ;;  %v3896_v40 = vadd.f32 %v7411_v34, %v3639_v60  ;;  %v8390_v39 = vld [vmem:[#allocation33_spill] sm:$0xff] }
 0x7ed   :  { %v3385_v46 = vadd.f32 %v7166_v49, %v8390_v39 }
 0x7ee   :  { %4549 = vst.msk [vmem:[%s8139_s8 + $0x8] sm:$0xff] %vm4547_vm3, %v4311_v38  ;;  %v5104_v38 = vld [vmem:[#allocation2 + $0x318] sm:$0xff] }
 0x7ef   :  { %3990 = vmatmul.f32.gmra.mxu1 %v5100_v15  ;;  %v3642_v34 = vadd.f32 %v7248_v11, %v3385_v46  ;;  %v5106_v11 = vld [vmem:[#allocation2 + $0xab0] sm:$0xff] }
 0x7f0   :  { %4360 = vmatmul.f32.gmra.mxu3 %v5101_v62  ;;  %4199 = vmatmul.f32.gmra.mxu2 %v5102_v16  ;;  %v7581_v16 = vpop.f32.mrf.mxu1 }
 0x7f3   :  { %v4313_v5 = vpop.f32.mrf.mxu3  ;;  %v4152_v10 = vpop.f32.mrf.mxu2 }
 0x7f4   :  { %v4314_v17 = vadd.f32 %v4313_v5, %v7207_v35  ;;  %v7568_v42 = vadd.f32 %v4152_v10, %v3896_v40  ;;  %v3899_v35 = vadd.f32 %v7425_v7, %v3642_v34  ;;  %v8391_v40 = vld [vmem:[#allocation34_spill] sm:$0xff]  ;;  %v5107_v10 = vld [vmem:[#allocation2 + $0x340] sm:$0xff]  ;;  %v8392_v34 = vld [vmem:[#allocation61_spill] sm:$0xff] }
 0x7f5   :  { %v3388_v5 = vadd.f32 %v7166_v49, %v8391_v40 }
 0x7f6   :  { %4550 = vst.msk [vmem:[%s8139_s8 + $0x10] sm:$0xff] %vm4547_vm3, %v4314_v17  ;;  %v5108_v17 = vld [vmem:[#allocation2 + $0x838] sm:$0xff] }
 0x7f7   :  { %3993 = vmatmul.f32.gmra.mxu1 %v5103_v23  ;;  %v3645_v7 = vadd.f32 %v7261_v53, %v3388_v5  ;;  %v5109_v53 = vld [vmem:[#allocation2 + $0xad8] sm:$0xff] }
 0x7f8   :  { %4363 = vmatmul.f32.gmra.mxu3 %v5104_v38  ;;  %4202 = vmatmul.f32.gmra.mxu2 %v5105_v14  ;;  %v3391_v14 = vadd.f32 %v7166_v49, %v8392_v34 }
 0x7fb   :  { %v4316_v25 = vpop.f32.mrf.mxu3  ;;  %v4155_v15 = vpop.f32.mrf.mxu2 }
 0x7fc   :  { %v4317_v62 = vadd.f32 %v4316_v25, %v7217_v52  ;;  %v7579_v60 = vadd.f32 %v4155_v15, %v3899_v35  ;;  %v3902_v52 = vadd.f32 %v7438_v47, %v3645_v7  ;;  %v7600_v35 = vpop.f32.mrf.mxu1  ;;  %v5110_v25 = vld [vmem:[#allocation2 + $0x368] sm:$0xff]  ;;  %v3648_v47 = vadd.f32 %v7277_v29, %v3391_v14  ;;  %v5111_v15 = vld [vmem:[#allocation2 + $0x860] sm:$0xff]  ;;  %v5113_v29 = vld [vmem:[#allocation2 + $0x390] sm:$0xff] }
 0x7fe   :  { %4551 = vst.msk [vmem:[%s8139_s8 + $0x18] sm:$0xff] %vm4547_vm3, %v4317_v62 }
 0x7ff   :  { %3996 = vmatmul.f32.gmra.mxu1 %v5106_v11 }
 0x800   :  { %4366 = vmatmul.f32.gmra.mxu3 %v5107_v10  ;;  %4205 = vmatmul.f32.gmra.mxu2 %v5108_v17  ;;  %v8393_v10 = vld [vmem:[#allocation52_spill] sm:$0xff]  ;;  %v5112_v17 = vld [vmem:[#allocation2 + $0xb00] sm:$0xff] }
 0x801   :  { %v3394_v7 = vadd.f32 %v7166_v49, %v8393_v10 }
 0x803   :  { %v4319_v39 = vpop.f32.mrf.mxu3  ;;  %v4158_v46 = vpop.f32.mrf.mxu2 }
 0x804   :  { %v4320_v23 = vadd.f32 %v4319_v39, %v7229_v36  ;;  %v7592_v38 = vadd.f32 %v4158_v46, %v3902_v52  ;;  %v3905_v36 = vadd.f32 %v7451_v48, %v3648_v47  ;;  %v3651_v48 = vadd.f32 %v7291_v3, %v3394_v7  ;;  %v5114_v52 = vld [vmem:[#allocation2 + $0x888] sm:$0xff]  ;;  %v7614_v39 = vpop.f32.mrf.mxu1  ;;  %v5116_v47 = vld [vmem:[#allocation2 + $0x3b8] sm:$0xff]  ;;  %v8395_v7 = vld [vmem:[#allocation63_spill] sm:$0xff] }
 0x805   :  { %v5115_v3 = vld [vmem:[#allocation2 + $0xb28] sm:$0xff] }
 0x806   :  { %4552 = vst.msk [vmem:[%s8139_s8 + $0x20] sm:$0xff] %vm4547_vm3, %v4320_v23 }
 0x807   :  { %3999 = vmatmul.f32.gmra.mxu1 %v5109_v53  ;;  %v8394_v53 = vld [vmem:[#allocation38_spill] sm:$0xff] }
 0x808   :  { %4369 = vmatmul.f32.gmra.mxu3 %v5110_v25  ;;  %4208 = vmatmul.f32.gmra.mxu2 %v5111_v15  ;;  %v3397_v25 = vadd.f32 %v7166_v49, %v8394_v53  ;;  %v5117_v15 = vld [vmem:[#allocation2 + $0x8b0] sm:$0xff]  ;;  %v8396_v53 = vld [vmem:[#allocation40_spill] sm:$0xff] }
 0x80b   :  { %v4322_v62 = vpop.f32.mrf.mxu3  ;;  %v4161_v40 = vpop.f32.mrf.mxu2 }
 0x80c   :  { %v4323_v5 = vadd.f32 %v4322_v62, %v7241_v61  ;;  %v7605_v11 = vadd.f32 %v4161_v40, %v3905_v36  ;;  %v3908_v61 = vadd.f32 %v7467_v55, %v3651_v48  ;;  %v3654_v55 = vadd.f32 %v7304_v30, %v3397_v25  ;;  %v7628_v36 = vpop.f32.mrf.mxu1  ;;  %v5118_v30 = vld [vmem:[#allocation2 + $0xb50] sm:$0xff]  ;;  %v5120_v48 = vld [vmem:[#allocation2 + $0x8d8] sm:$0xff] }
 0x80d   :  { %v3403_v25 = vadd.f32 %v7166_v49, %v8396_v53  ;;  %v5129_v53 = vld [vmem:[#allocation2 + $0x950] sm:$0xff] }
 0x80e   :  { %4553 = vst.msk [vmem:[%s8139_s8 + $0x28] sm:$0xff] %vm4547_vm3, %v4323_v5 }
 0x80f   :  { %4002 = vmatmul.f32.gmra.mxu1 %v5112_v17  ;;  %v3400_v17 = vadd.f32 %v7166_v49, %v8395_v7 }
 0x810   :  { %4372 = vmatmul.f32.gmra.mxu3 %v5113_v29  ;;  %4211 = vmatmul.f32.gmra.mxu2 %v5114_v52  ;;  %v5119_v29 = vld [vmem:[#allocation2 + $0x3e0] sm:$0xff] }
 0x813   :  { %v4325_v46 = vpop.f32.mrf.mxu3  ;;  %v4164_v23 = vpop.f32.mrf.mxu2 }
 0x814   :  { %v4326_v34 = vadd.f32 %v4325_v46, %v7253_v26  ;;  %v7618_v14 = vadd.f32 %v4164_v23, %v3908_v61  ;;  %v3911_v26 = vadd.f32 %v7481_v9, %v3654_v55  ;;  %v3657_v9 = vadd.f32 %v7317_v13, %v3400_v17  ;;  %v5121_v13 = vld [vmem:[#allocation2 + $0xb78] sm:$0xff]  ;;  %v5125_v17 = vld [vmem:[#allocation2 + $0x430] sm:$0xff] }
 0x816   :  { %4554 = vst.msk [vmem:[%s8139_s8 + $0x30] sm:$0xff] %vm4547_vm3, %v4326_v34  ;;  %v7644_v34 = vpop.f32.mrf.mxu1 }
 0x817   :  { %4005 = vmatmul.f32.gmra.mxu1 %v5115_v3  ;;  %v5122_v3 = vld [vmem:[#allocation2 + $0x408] sm:$0xff] }
 0x818   :  { %4375 = vmatmul.f32.gmra.mxu3 %v5116_v47  ;;  %4214 = vmatmul.f32.gmra.mxu2 %v5117_v15  ;;  %v5123_v47 = vld [vmem:[#allocation2 + $0x900] sm:$0xff] }
 0x81b   :  { %v4328_v62 = vpop.f32.mrf.mxu3  ;;  %v4167_v40 = vpop.f32.mrf.mxu2 }
 0x81c   :  { %v4329_v5 = vadd.f32 %v4328_v62, %v7265_v54  ;;  %v7631_v10 = vadd.f32 %v4167_v40, %v3911_v26  ;;  %v3914_v54 = vadd.f32 %v7494_v51, %v3657_v9  ;;  %v3660_v51 = vadd.f32 %v7333_v59, %v3403_v25  ;;  %v8397_v40 = vld [vmem:[#allocation64_spill] sm:$0xff]  ;;  %v5124_v59 = vld [vmem:[#allocation2 + $0xba0] sm:$0xff] }
 0x81e   :  { %4555 = vst.msk [vmem:[%s8139_s8 + $0x38] sm:$0xff] %vm4547_vm3, %v4329_v5  ;;  %v3406_v5 = vadd.f32 %v7166_v49, %v8397_v40  ;;  %v7663_v7 = vpop.f32.mrf.mxu1 }
 0x81f   :  { %4008 = vmatmul.f32.gmra.mxu1 %v5118_v30  ;;  %v5126_v30 = vld [vmem:[#allocation2 + $0x928] sm:$0xff] }
 0x820   :  { %4378 = vmatmul.f32.gmra.mxu3 %v5119_v29  ;;  %4217 = vmatmul.f32.gmra.mxu2 %v5120_v48 }
 0x823   :  { %v4331_v52 = vpop.f32.mrf.mxu3  ;;  %v4170_v61 = vpop.f32.mrf.mxu2 }
 0x824   :  { %v4332_v46 = vadd.f32 %v4331_v52, %v7275_v58  ;;  %v7642_v23 = vadd.f32 %v4170_v61, %v3914_v54  ;;  %v3917_v58 = vadd.f32 %v7507_v20, %v3660_v51  ;;  %v3663_v20 = vadd.f32 %v7347_v24, %v3406_v5  ;;  %v8398_v52 = vld [vmem:[#allocation55_spill] sm:$0xff]  ;;  %v5128_v24 = vld [vmem:[#allocation2 + $0x458] sm:$0xff] }
 0x825   :  { %v3409_v61 = vadd.f32 %v7166_v49, %v8398_v52  ;;  %v8399_v52 = vld [vmem:[#allocation65_spill] sm:$0xff] }
 0x826   :  { %4556 = vst.msk [vmem:[%s8139_s8 + $0x40] sm:$0xff] %vm4547_vm3, %v4332_v46  ;;  %v5127_v46 = vld [vmem:[#allocation2 + $0xbc8] sm:$0xff]  ;;  %v7677_v25 = vpop.f32.mrf.mxu1 }
 0x827   :  { %4011 = vmatmul.f32.gmra.mxu1 %v5121_v13 }
 0x828   :  { %4381 = vmatmul.f32.gmra.mxu3 %v5122_v3  ;;  %4220 = vmatmul.f32.gmra.mxu2 %v5123_v47  ;;  %v7683_v47 = vld [vmem:[#allocation7] ss:$0 sm:$0xff] }
 0x82b   :  { %v4334_v55 = vpop.f32.mrf.mxu3  ;;  %v4173_v15 = vpop.f32.mrf.mxu2 }
 0x82c   :  { %v4335_v26 = vadd.f32 %v4334_v55, %v7287_v0  ;;  %v7655_v62 = vadd.f32 %v4173_v15, %v3917_v58  ;;  %v3920_v0 = vadd.f32 %v7523_v21, %v3663_v20  ;;  %v3666_v21 = vadd.f32 %v7360_v63, %v3409_v61  ;;  %v5131_v63 = vld [vmem:[#allocation2 + $0xbf0] sm:$0xff]  ;;  %v5132_v55 = vld [vmem:[#allocation2 + $0x480] sm:$0xff]  ;;  %v5133_v15 = vld [vmem:[#allocation2 + $0x978] sm:$0xff] }
 0x82d   :  { %v3412_v58 = vadd.f32 %v7683_v47, %v7141_v12  ;;  %v5135_v20 = vld [vmem:[#allocation2 + $0x4a8] sm:$0xff]  ;;  %v3418_v61 = vadd.f32 %v7683_v47, %v8399_v52  ;;  %v5144_v52 = vld [vmem:[#allocation2 + $0xa18] sm:$0xff] }
 0x82e   :  { %4557 = vst.msk [vmem:[%s8139_s8 + $0x48] sm:$0xff] %vm4547_vm3, %v4335_v26  ;;  %v7693_v26 = vpop.f32.mrf.mxu1 }
 0x82f   :  { %4014 = vmatmul.f32.gmra.mxu1 %v5124_v59 }
 0x830   :  { %4384 = vmatmul.f32.gmra.mxu3 %v5125_v17  ;;  %4223 = vmatmul.f32.gmra.mxu2 %v5126_v30  ;;  %v3415_v17 = vadd.f32 %v7683_v47, %v7148_v45  ;;  %v5136_v30 = vld [vmem:[#allocation2 + $0x9a0] sm:$0xff] }
 0x833   :  { %v4337_v29 = vpop.f32.mrf.mxu3  ;;  %v4176_v9 = vpop.f32.mrf.mxu2 }
 0x834   :  { %v4338_v48 = vadd.f32 %v4337_v29, %v7297_v44  ;;  %v7668_v54 = vadd.f32 %v4176_v9, %v3920_v0  ;;  %v3923_v44 = vadd.f32 %v7537_v18, %v3666_v21  ;;  %v3669_v18 = vadd.f32 %v7373_v37, %v3412_v58  ;;  %v5134_v37 = vld [vmem:[#allocation2 + $0xc18] sm:$0xff]  ;;  %v5139_v21 = vld [vmem:[#allocation2 + $0x9c8] sm:$0xff]  ;;  %v8402_v58 = vld [vmem:[#allocation43_spill] sm:$0xff] }
 0x836   :  { %4558 = vst.msk [vmem:[%s8139_s8 + $0x50] sm:$0xff] %vm4547_vm3, %v4338_v48  ;;  %v7709_v48 = vpop.f32.mrf.mxu1 }
 0x837   :  { %4017 = vmatmul.f32.gmra.mxu1 %v5127_v46  ;;  %v5138_v46 = vld [vmem:[#allocation2 + $0x4d0] sm:$0xff] }
 0x838   :  { %4387 = vmatmul.f32.gmra.mxu3 %v5128_v24  ;;  %4226 = vmatmul.f32.gmra.mxu2 %v5129_v53 }
 0x83b   :  { %v4340_v13 = vpop.f32.mrf.mxu3  ;;  %v4179_v3 = vpop.f32.mrf.mxu2 }
 0x83c   :  { %v4341_v49 = vadd.f32 %v4340_v13, %v7309_v32  ;;  %v7681_v51 = vadd.f32 %v4179_v3, %v3923_v44  ;;  %v3926_v32 = vadd.f32 %v7551_v8, %v3669_v18  ;;  %v3672_v8 = vadd.f32 %v7389_v19, %v3415_v17  ;;  %v5137_v19 = vld [vmem:[#allocation2 + $0xc40] sm:$0xff]  ;;  %v8401_v13 = vld [vmem:[#allocation13_spill] sm:$0xff]  ;;  %v5140_v18 = vld [vmem:[#allocation2 + $0xc68] sm:$0xff] }
 0x83e   :  { %4559 = vst.msk [vmem:[%s8139_s8 + $0x58] sm:$0xff] %vm4547_vm3, %v4341_v49 }
 0x83f   :  { %4020 = vmatmul.f32.gmra.mxu1 %v5131_v63  ;;  %v3421_v63 = vadd.f32 %v7683_v47, %v8402_v58 }
 0x840   :  { %4390 = vmatmul.f32.gmra.mxu3 %v5132_v55  ;;  %4229 = vmatmul.f32.gmra.mxu2 %v5133_v15  ;;  %v7728_v55 = vpop.f32.mrf.mxu1  ;;  %v5141_v15 = vld [vmem:[#allocation2 + $0x4f8] sm:$0xff] }
 0x843   :  { %v4343_v40 = vpop.f32.mrf.mxu3  ;;  %v4182_v5 = vpop.f32.mrf.mxu2 }
 0x844   :  { %v4344_v12 = vadd.f32 %v4343_v40, %v7321_v57  ;;  %v7696_v59 = vadd.f32 %v4182_v5, %v3926_v32  ;;  %v3929_v57 = vadd.f32 %v7565_v27, %v3672_v8  ;;  %v8400_v27 = vld [vmem:[#allocation32_spill] sm:$0xff]  ;;  %v5142_v40 = vld [vmem:[#allocation2 + $0x9f0] sm:$0xff] }
 0x845   :  { %v3675_v24 = vadd.f32 %v8400_v27, %v3418_v61 }
 0x846   :  { %4560 = vst.msk [vmem:[%s8139_s8 + $0x60] sm:$0xff] %vm4547_vm3, %v4344_v12 }
 0x847   :  { %4023 = vmatmul.f32.gmra.mxu1 %v5134_v37  ;;  %v8404_v37 = vld [vmem:[#allocation14_spill] sm:$0xff] }
 0x848   :  { %4393 = vmatmul.f32.gmra.mxu3 %v5135_v20  ;;  %4232 = vmatmul.f32.gmra.mxu2 %v5136_v30  ;;  %v8405_v30 = vld [vmem:[#allocation56_spill] sm:$0xff] }
 0x84b   :  { %v4346_v0 = vpop.f32.mrf.mxu3  ;;  %v4185_v29 = vpop.f32.mrf.mxu2 }
 0x84c   :  { %v4347_v9 = vadd.f32 %v4346_v0, %v7331_v43  ;;  %v7707_v45 = vadd.f32 %v4185_v29, %v3929_v57  ;;  %v3932_v43 = vadd.f32 %v7581_v16, %v3675_v24  ;;  %v8403_v16 = vld [vmem:[#allocation20_spill] sm:$0xff]  ;;  %v3424_v57 = vadd.f32 %v7683_v47, %v8405_v30  ;;  %v5143_v0 = vld [vmem:[#allocation2 + $0x520] sm:$0xff]  ;;  %v8406_v29 = vld [vmem:[#allocation21_spill] sm:$0xff] }
 0x84d   :  { %v3678_v32 = vadd.f32 %v8403_v16, %v3421_v63  ;;  %v8409_v63 = vld [vmem:[#allocation16_spill] sm:$0xff]  ;;  %v8410_v16 = vld [vmem:[#allocation45_spill] sm:$0xff] }
 0x84e   :  { %4561 = vst.msk [vmem:[%s8139_s8 + $0x68] sm:$0xff] %vm4547_vm3, %v4347_v9  ;;  %v3681_v9 = vadd.f32 %v8406_v29, %v3424_v57 }
 0x84f   :  { %4026 = vmatmul.f32.gmra.mxu1 %v5137_v19  ;;  %v3935_v5 = vadd.f32 %v7600_v35, %v3678_v32  ;;  %v3430_v32 = vadd.f32 %v7683_v47, %v8410_v16  ;;  %v8417_v16 = vld [vmem:[#allocation47_spill] sm:$0xff] }
 0x850   :  { %4396 = vmatmul.f32.gmra.mxu3 %v5138_v46  ;;  %4235 = vmatmul.f32.gmra.mxu2 %v5139_v21  ;;  %v3938_v35 = vadd.f32 %v7614_v39, %v3681_v9  ;;  %v8407_v46 = vld [vmem:[#allocation15_spill] sm:$0xff]  ;;  %v8408_v21 = vld [vmem:[#allocation66_spill] sm:$0xff] }
 0x851   :  { %v5149_v9 = vld [vmem:[#allocation2 + $0x598] sm:$0xff] }
 0x853   :  { %v4349_v53 = vpop.f32.mrf.mxu3  ;;  %v4188_v44 = vpop.f32.mrf.mxu2 }
 0x854   :  { %v4350_v3 = vadd.f32 %v4349_v53, %v8401_v13  ;;  %v7720_v49 = vadd.f32 %v4188_v44, %v3932_v43  ;;  %v3427_v43 = vadd.f32 %v7683_v47, %v8408_v21  ;;  %v5145_v53 = vld [vmem:[#allocation2 + $0x548] sm:$0xff]  ;;  %v5146_v13 = vld [vmem:[#allocation2 + $0xa40] sm:$0xff] }
 0x856   :  { %4562 = vst.msk [vmem:[%s8139_s8 + $0x70] sm:$0xff] %vm4547_vm3, %v4350_v3  ;;  %v3684_v44 = vadd.f32 %v7445_v22, %v3427_v43  ;;  %v8411_v22 = vld [vmem:[#allocation35_spill] sm:$0xff] }
 0x857   :  { %4029 = vmatmul.f32.gmra.mxu1 %v5140_v18  ;;  %v8415_v43 = vld [vmem:[#allocation67_spill] sm:$0xff] }
 0x858   :  { %4399 = vmatmul.f32.gmra.mxu3 %v5141_v15  ;;  %4238 = vmatmul.f32.gmra.mxu2 %v5142_v40  ;;  %v3941_v39 = vadd.f32 %v7628_v36, %v3684_v44  ;;  %v5147_v40 = vld [vmem:[#allocation2 + $0x570] sm:$0xff]  ;;  %v5151_v44 = vld [vmem:[#allocation2 + $0x5c0] sm:$0xff] }
 0x85b   :  { %v4352_v12 = vpop.f32.mrf.mxu3  ;;  %v4191_v17 = vpop.f32.mrf.mxu2 }
 0x85c   :  { %v4353_v20 = vadd.f32 %v4352_v12, %v8404_v37  ;;  %v7733_v8 = vadd.f32 %v4191_v17, %v3935_v5  ;;  %v3687_v5 = vadd.f32 %v8411_v22, %v3430_v32  ;;  %v5148_v12 = vld [vmem:[#allocation2 + $0xa68] sm:$0xff]  ;;  %v3439_v32 = vadd.f32 %v7683_v47, %v8417_v16  ;;  %v5154_v22 = vld [vmem:[#allocation2 + $0xae0] sm:$0xff] }
 0x85d   :  { %v5162_v16 = vld [vmem:[#allocation2 + $0xb80] sm:$0xff] }
 0x85e   :  { %4563 = vst.msk [vmem:[%s8139_s8 + $0x78] sm:$0xff] %vm4547_vm3, %v4353_v20  ;;  %v3944_v36 = vadd.f32 %v7644_v34, %v3687_v5  ;;  %v8412_v20 = vld [vmem:[#allocation17_spill] sm:$0xff] }
 0x860   :  { %4402 = vmatmul.f32.gmra.mxu3 %v5143_v0  ;;  %4241 = vmatmul.f32.gmra.mxu2 %v5144_v52  ;;  %v8413_v0 = vld [vmem:[#allocation57_spill] sm:$0xff] }
 0x861   :  { %v3433_v29 = vadd.f32 %v7683_v47, %v8413_v0  ;;  %v5155_v0 = vld [vmem:[#allocation2 + $0x610] sm:$0xff] }
 0x863   :  { %v4355_v61 = vpop.f32.mrf.mxu3  ;;  %v4194_v19 = vpop.f32.mrf.mxu2  ;;  %v3690_v52 = vadd.f32 %v7472_v28, %v3433_v29  ;;  %v5156_v29 = vld [vmem:[#allocation2 + $0xb08] sm:$0xff] }
 0x864   :  { %v4356_v27 = vadd.f32 %v4355_v61, %v8407_v46  ;;  %v7744_v24 = vadd.f32 %v4194_v19, %v3938_v35  ;;  %v5150_v35 = vld [vmem:[#allocation2 + $0xa90] sm:$0xff]  ;;  %v8414_v46 = vld [vmem:[#allocation18_spill] sm:$0xff] }
 0x865   :  { %v3947_v34 = vadd.f32 %v7663_v7, %v3690_v52 }
 0x866   :  { %4564 = vst.msk [vmem:[%s8139_s8 + $0x80] sm:$0xff] %vm4547_vm3, %v4356_v27 }
 0x868   :  { %4405 = vmatmul.f32.gmra.mxu3 %v5145_v53  ;;  %4244 = vmatmul.f32.gmra.mxu2 %v5146_v13  ;;  %v3436_v53 = vadd.f32 %v7683_v47, %v8415_v43  ;;  %v5152_v13 = vld [vmem:[#allocation2 + $0xab8] sm:$0xff]  ;;  %v5158_v43 = vld [vmem:[#allocation2 + $0xb30] sm:$0xff] }
 0x86a   :  { %v3693_v28 = vadd.f32 %v7485_v56, %v3436_v53  ;;  %v3696_v56 = vadd.f32 %v7501_v41, %v3439_v32 }
 0x86b   :  { %v4358_v3 = vpop.f32.mrf.mxu3  ;;  %v4197_v58 = vpop.f32.mrf.mxu2 }
 0x86c   :  { %v4359_v18 = vadd.f32 %v4358_v3, %v8409_v63  ;;  %v7755_v15 = vadd.f32 %v4197_v58, %v3941_v39  ;;  %v3950_v7 = vadd.f32 %v7677_v25, %v3693_v28  ;;  %v8416_v58 = vld [vmem:[#allocation60_spill] sm:$0xff]  ;;  %v3953_v25 = vadd.f32 %v7693_v26, %v3696_v56  ;;  %v8422_v28 = vld [vmem:[#allocation62_spill] sm:$0xff] }
 0x86e   :  { %4565 = vst.msk [vmem:[%s8139_s8 + $0x88] sm:$0xff] %vm4547_vm3, %v4359_v18 }
 0x870   :  { %4408 = vmatmul.f32.gmra.mxu3 %v5147_v40  ;;  %4247 = vmatmul.f32.gmra.mxu2 %v5148_v12  ;;  %v5153_v40 = vld [vmem:[#allocation2 + $0x5e8] sm:$0xff] }
 0x873   :  { %v4361_v17 = vpop.f32.mrf.mxu3  ;;  %v4200_v37 = vpop.f32.mrf.mxu2 }
 0x874   :  { %v4362_v30 = vadd.f32 %v4361_v17, %v8412_v20  ;;  %v7766_v57 = vadd.f32 %v4200_v37, %v3944_v36  ;;  %v8418_v36 = vld [vmem:[#allocation72_spill] sm:$0xff]  ;;  %v8419_v20 = vld [vmem:[#allocation58_spill] sm:$0xff] }
 0x876   :  { %4566 = vst.msk [vmem:[%s8139_s8 + $0x90] sm:$0xff] %vm4547_vm3, %v4362_v30  ;;  %v3442_v30 = vadd.f32 %v7683_v47, %v8419_v20  ;;  %v5166_v20 = vld [vmem:[#allocation2 + $0xbd0] sm:$0xff] }
 0x878   :  { %4411 = vmatmul.f32.gmra.mxu3 %v5149_v9  ;;  %4250 = vmatmul.f32.gmra.mxu2 %v5150_v35  ;;  %v3699_v41 = vadd.f32 %v7515_v50, %v3442_v30  ;;  %v8420_v35 = vld [vmem:[#allocation73_spill] sm:$0xff] }
 0x87a   :  { %v3956_v26 = vadd.f32 %v7709_v48, %v3699_v41  ;;  %v5167_v41 = vld [vmem:[#allocation2 + $0x700] sm:$0xff] }
 0x87b   :  { %v4364_v61 = vpop.f32.mrf.mxu3  ;;  %v4203_v19 = vpop.f32.mrf.mxu2 }
 0x87c   :  { %v4365_v27 = vadd.f32 %v4364_v61, %v8414_v46  ;;  %v7777_v21 = vadd.f32 %v4203_v19, %v3947_v34  ;;  %v8421_v19 = vld [vmem:[#allocation68_spill] sm:$0xff] }
 0x87d   :  { %v3445_v46 = vadd.f32 %v7683_v47, %v8421_v19  ;;  %v8427_v19 = vld [vmem:[#allocation76_spill] sm:$0xff] }
 0x87e   :  { %4567 = vst.msk [vmem:[%s8139_s8 + $0x98] sm:$0xff] %vm4547_vm3, %v4365_v27  ;;  %v5157_v27 = vld [vmem:[#allocation2 + $0x638] sm:$0xff] }
 0x87f   :  { %v3702_v50 = vadd.f32 %v7528_v33, %v3445_v46 }
 0x880   :  { %4414 = vmatmul.f32.gmra.mxu3 %v5151_v44  ;;  %4253 = vmatmul.f32.gmra.mxu2 %v5152_v13 }
 0x881   :  { %v3959_v48 = vadd.f32 %v7728_v55, %v3702_v50  ;;  %v5161_v55 = vld [vmem:[#allocation2 + $0x688] sm:$0xff] }
 0x882   :  { %v5172_v50 = vld [vmem:[#allocation2 + $0xc48] sm:$0xff] }
 0x883   :  { %v4367_v39 = vpop.f32.mrf.mxu3  ;;  %v4206_v3 = vpop.f32.mrf.mxu2 }
 0x884   :  { %v4368_v63 = vadd.f32 %v4367_v39, %v8416_v58  ;;  %v7788_v18 = vadd.f32 %v4206_v3, %v3950_v7  ;;  %v5159_v39 = vld [vmem:[#allocation2 + $0x660] sm:$0xff]  ;;  %v5160_v3 = vld [vmem:[#allocation2 + $0xb58] sm:$0xff]  ;;  %v8423_v58 = vld [vmem:[#allocation53_spill] sm:$0xff] }
 0x886   :  { %4568 = vst.msk [vmem:[%s8139_s8 + $0xa0] sm:$0xff] %vm4547_vm3, %v4368_v63 }
 0x888   :  { %4417 = vmatmul.f32.gmra.mxu3 %v5153_v40  ;;  %4256 = vmatmul.f32.gmra.mxu2 %v5154_v22  ;;  %v8424_v40 = vld [vmem:[#allocation74_spill] sm:$0xff]  ;;  %v5163_v22 = vld [vmem:[#allocation2 + $0x6b0] sm:$0xff] }
 0x88b   :  { %v4370_v5 = vpop.f32.mrf.mxu3  ;;  %v4209_v12 = vpop.f32.mrf.mxu2 }
 0x88c   :  { %v4371_v17 = vadd.f32 %v4370_v5, %v8418_v36  ;;  %v7799_v37 = vadd.f32 %v4209_v12, %v3953_v25  ;;  %v5164_v25 = vld [vmem:[#allocation2 + $0xba8] sm:$0xff]  ;;  %v8425_v12 = vld [vmem:[#allocation42_spill] sm:$0xff] }
 0x88e   :  { %4569 = vst.msk [vmem:[%s8139_s8 + $0xa8] sm:$0xff] %vm4547_vm3, %v4371_v17  ;;  %v5165_v17 = vld [vmem:[#allocation2 + $0x6d8] sm:$0xff] }
 0x890   :  { %4420 = vmatmul.f32.gmra.mxu3 %v5155_v0  ;;  %4259 = vmatmul.f32.gmra.mxu2 %v5156_v29  ;;  %v5168_v29 = vld [vmem:[#allocation2 + $0xbf8] sm:$0xff] }
 0x893   :  { %v4373_v9 = vpop.f32.mrf.mxu3  ;;  %v4212_v52 = vpop.f32.mrf.mxu2 }
 0x894   :  { %v4374_v34 = vadd.f32 %v4373_v9, %v8420_v35  ;;  %v7810_v61 = vadd.f32 %v4212_v52, %v3956_v26  ;;  %v8426_v9 = vld [vmem:[#allocation75_spill] sm:$0xff]  ;;  %v5169_v35 = vld [vmem:[#allocation2 + $0x728] sm:$0xff] }
 0x896   :  { %4570 = vst.msk [vmem:[%s8139_s8 + $0xb0] sm:$0xff] %vm4547_vm3, %v4374_v34 }
 0x898   :  { %4423 = vmatmul.f32.gmra.mxu3 %v5157_v27  ;;  %4262 = vmatmul.f32.gmra.mxu2 %v5158_v43  ;;  %v5171_v27 = vld [vmem:[#allocation2 + $0x750] sm:$0xff] }
 0x89b   :  { %v4376_v53 = vpop.f32.mrf.mxu3  ;;  %v4215_v44 = vpop.f32.mrf.mxu2 }
 0x89c   :  { %v4377_v13 = vadd.f32 %v4376_v53, %v8422_v28  ;;  %v7821_v7 = vadd.f32 %v4215_v44, %v3959_v48  ;;  %v5173_v53 = vld [vmem:[#allocation2 + $0x778] sm:$0xff]  ;;  %v5174_v44 = vld [vmem:[#allocation2 + $0xc70] sm:$0xff] }
 0x89e   :  { %4571 = vst.msk [vmem:[%s8139_s8 + $0xb8] sm:$0xff] %vm4547_vm3, %v4377_v13 }
 0x8a0   :  { %4426 = vmatmul.f32.gmra.mxu3 %v5159_v39  ;;  %4265 = vmatmul.f32.gmra.mxu2 %v5160_v3  ;;  %v5175_v39 = vld [vmem:[#allocation2 + $0x7a0] sm:$0xff] }
 0x8a3   :  { %v4379_v33 = vpop.f32.mrf.mxu3 }
 0x8a4   :  { %v4380_v63 = vadd.f32 %v4379_v33, %v8423_v58  ;;  %v5176_v33 = vld [vmem:[#allocation2 + $0x7c8] sm:$0xff] }
 0x8a6   :  { %4572 = vst.msk [vmem:[%s8139_s8 + $0xc0] sm:$0xff] %vm4547_vm3, %v4380_v63  ;;  %v5177_v63 = vld [vmem:[#allocation2 + $0x7f0] sm:$0xff] }
 0x8a8   :  { %4429 = vmatmul.f32.gmra.mxu3 %v5161_v55  ;;  %4268 = vmatmul.f32.gmra.mxu2 %v5162_v16  ;;  %v5178_v16 = vld [vmem:[#allocation2 + $0x818] sm:$0xff] }
 0x8ab   :  { %v4382_v32 = vpop.f32.mrf.mxu3 }
 0x8ac   :  { %v4383_v56 = vadd.f32 %v4382_v32, %v8424_v40  ;;  %v5179_v40 = vld [vmem:[#allocation2 + $0x840] sm:$0xff] }
 0x8ae   :  { %4573 = vst.msk [vmem:[%s8139_s8 + $0xc8] sm:$0xff] %vm4547_vm3, %v4383_v56 }
 0x8b0   :  { %4432 = vmatmul.f32.gmra.mxu3 %v5163_v22  ;;  %4271 = vmatmul.f32.gmra.mxu2 %v5164_v25  ;;  %v5180_v22 = vld [vmem:[#allocation2 + $0x868] sm:$0xff] }
 0x8b3   :  { %v4385_v5 = vpop.f32.mrf.mxu3 }
 0x8b4   :  { %v4386_v36 = vadd.f32 %v4385_v5, %v8425_v12  ;;  %v5181_v5 = vld [vmem:[#allocation2 + $0x890] sm:$0xff] }
 0x8b6   :  { %4574 = vst.msk [vmem:[%s8139_s8 + $0xd0] sm:$0xff] %vm4547_vm3, %v4386_v36  ;;  %v5182_v36 = vld [vmem:[#allocation2 + $0x8b8] sm:$0xff] }
 0x8b8   :  { %4435 = vmatmul.f32.gmra.mxu3 %v5165_v17  ;;  %4274 = vmatmul.f32.gmra.mxu2 %v5166_v20  ;;  %v5183_v20 = vld [vmem:[#allocation2 + $0x8e0] sm:$0xff] }
 0x8bb   :  { %v4388_v30 = vpop.f32.mrf.mxu3 }
 0x8bc   :  { %v4389_v0 = vadd.f32 %v4388_v30, %v7489_v31  ;;  %v5170_v31 = vld [vmem:[#allocation2 + $0xc20] sm:$0xff] }
 0x8be   :  { %4575 = vst.msk [vmem:[%s8139_s8 + $0xd8] sm:$0xff] %vm4547_vm3, %v4389_v0  ;;  %v5184_v0 = vld [vmem:[#allocation2 + $0x908] sm:$0xff] }
 0x8c0   :  { %4438 = vmatmul.f32.gmra.mxu3 %v5167_v41  ;;  %4277 = vmatmul.f32.gmra.mxu2 %v5168_v29  ;;  %v5185_v29 = vld [vmem:[#allocation2 + $0x930] sm:$0xff] }
 0x8c3   :  { %v4391_v26 = vpop.f32.mrf.mxu3 }
 0x8c4   :  { %v4392_v52 = vadd.f32 %v4391_v26, %v8426_v9  ;;  %v5186_v9 = vld [vmem:[#allocation2 + $0x958] sm:$0xff] }
 0x8c6   :  { %4576 = vst.msk [vmem:[%s8139_s8 + $0xe0] sm:$0xff] %vm4547_vm3, %v4392_v52 }
 0x8c8   :  { %4441 = vmatmul.f32.gmra.mxu3 %v5169_v35  ;;  %4280 = vmatmul.f32.gmra.mxu2 %v5170_v31  ;;  %v5187_v35 = vld [vmem:[#allocation2 + $0x980] sm:$0xff] }
 0x8cb   :  { %v4394_v34 = vpop.f32.mrf.mxu3 }
 0x8cc   :  { %v4395_v46 = vadd.f32 %v4394_v34, %v8427_v19  ;;  %v5188_v34 = vld [vmem:[#allocation2 + $0x9a8] sm:$0xff] }
 0x8ce   :  { %4577 = vst.msk [vmem:[%s8139_s8 + $0xe8] sm:$0xff] %vm4547_vm3, %v4395_v46  ;;  %v5189_v46 = vld [vmem:[#allocation2 + $0x9d0] sm:$0xff] }
 0x8d0   :  { %4444 = vmatmul.f32.gmra.mxu3 %v5171_v27  ;;  %4283 = vmatmul.f32.gmra.mxu2 %v5172_v50  ;;  %v5190_v50 = vld [vmem:[#allocation2 + $0x9f8] sm:$0xff] }
 0x8d3   :  { %v4397_v43 = vpop.f32.mrf.mxu3 }
 0x8d4   :  { %v4398_v48 = vadd.f32 %v4397_v43, %v7521_v1 }
 0x8d6   :  { %4578 = vst.msk [vmem:[%s8139_s8 + $0xf0] sm:$0xff] %vm4547_vm3, %v4398_v48  ;;  %v5191_v48 = vld [vmem:[#allocation2 + $0xa20] sm:$0xff] }
 0x8d8   :  { %4447 = vmatmul.f32.gmra.mxu3 %v5173_v53  ;;  %4286 = vmatmul.f32.gmra.mxu2 %v5174_v44  ;;  %v5192_v44 = vld [vmem:[#allocation2 + $0xa48] sm:$0xff] }
 0x8db   :  { %v4400_v28 = vpop.f32.mrf.mxu3 }
 0x8dc   :  { %v4401_v13 = vadd.f32 %v4400_v28, %v7533_v4 }
 0x8de   :  { %4579 = vst.msk [vmem:[%s8139_s8 + $0xf8] sm:$0xff] %vm4547_vm3, %v4401_v13  ;;  %v3704_v13 = vpop.f32.mrf.mxu0 }
 0x8e0   :  { %4450 = vmatmul.f32.gmra.mxu3 %v5175_v39  ;;  %v3961_v39 = vpop.f32.mrf.mxu1 }
 0x8e3   :  { %v4403_v1 = vpop.f32.mrf.mxu3 }
 0x8e4   :  { %v4404_v3 = vadd.f32 %v4403_v1, %v7542_v2  ;;  %v5193_v1 = vld [vmem:[#allocation2 + $0xa70] sm:$0xff] }
 0x8e6   :  { %4580 = vst.msk [vmem:[%s8139_s8 + $0x100] sm:$0xff] %vm4547_vm3, %v4404_v3 }
 0x8e8   :  { %4453 = vmatmul.f32.gmra.mxu3 %v5176_v33 }
 0x8eb   :  { %v4406_v58 = vpop.f32.mrf.mxu3 }
 0x8ec   :  { %v4407_v4 = vadd.f32 %v4406_v58, %v7555_v6  ;;  %v3707_v58 = vpop.f32.mrf.mxu0 }
 0x8ee   :  { %4581 = vst.msk [vmem:[%s8139_s8 + $0x108] sm:$0xff] %vm4547_vm3, %v4407_v4  ;;  %v3964_v4 = vpop.f32.mrf.mxu1 }
 0x8f0   :  { %4456 = vmatmul.f32.gmra.mxu3 %v5177_v63 }
 0x8f3   :  { %v4409_v55 = vpop.f32.mrf.mxu3 }
 0x8f4   :  { %v4410_v2 = vadd.f32 %v4409_v55, %v7568_v42 }
 0x8f6   :  { %4582 = vst.msk [vmem:[%s8139_s8 + $0x110] sm:$0xff] %vm4547_vm3, %v4410_v2 }
 0x8f8   :  { %4459 = vmatmul.f32.gmra.mxu3 %v5178_v16  ;;  %v5195_v16 = vld [vmem:[#allocation2 + $0xac0] sm:$0xff] }
 0x8fb   :  { %v4412_v32 = vpop.f32.mrf.mxu3 }
 0x8fc   :  { %v4413_v6 = vadd.f32 %v4412_v32, %v7579_v60 }
 0x8fe   :  { %4583 = vst.msk [vmem:[%s8139_s8 + $0x118] sm:$0xff] %vm4547_vm3, %v4413_v6  ;;  %v3967_v6 = vpop.f32.mrf.mxu1 }
 0x900   :  { %4462 = vmatmul.f32.gmra.mxu3 %v5179_v40 }
 0x903   :  { %v4415_v56 = vpop.f32.mrf.mxu3 }
 0x904   :  { %v4416_v42 = vadd.f32 %v4415_v56, %v7592_v38 }
 0x906   :  { %4584 = vst.msk [vmem:[%s8139_s8 + $0x120] sm:$0xff] %vm4547_vm3, %v4416_v42  ;;  %v5196_v42 = vld [vmem:[#allocation2 + $0xae8] sm:$0xff] }
 0x908   :  { %4465 = vmatmul.f32.gmra.mxu3 %v5180_v22 }
 0x90b   :  { %v4418_v25 = vpop.f32.mrf.mxu3 }
 0x90c   :  { %v4419_v60 = vadd.f32 %v4418_v25, %v7605_v11 }
 0x90e   :  { %4585 = vst.msk [vmem:[%s8139_s8 + $0x128] sm:$0xff] %vm4547_vm3, %v4419_v60  ;;  %v3970_v60 = vpop.f32.mrf.mxu1 }
 0x910   :  { %4468 = vmatmul.f32.gmra.mxu3 %v5181_v5 }
 0x913   :  { %v4421_v12 = vpop.f32.mrf.mxu3 }
 0x914   :  { %v4422_v38 = vadd.f32 %v4421_v12, %v7618_v14 }
 0x916   :  { %4586 = vst.msk [vmem:[%s8139_s8 + $0x130] sm:$0xff] %vm4547_vm3, %v4422_v38 }
 0x918   :  { %4471 = vmatmul.f32.gmra.mxu3 %v5182_v36 }
 0x91b   :  { %v4424_v17 = vpop.f32.mrf.mxu3 }
 0x91c   :  { %v4425_v11 = vadd.f32 %v4424_v17, %v7631_v10  ;;  %v3973_v17 = vpop.f32.mrf.mxu1 }
 0x91e   :  { %4587 = vst.msk [vmem:[%s8139_s8 + $0x138] sm:$0xff] %vm4547_vm3, %v4425_v11 }
 0x920   :  { %4474 = vmatmul.f32.gmra.mxu3 %v5183_v20 }
 0x923   :  { %v4427_v30 = vpop.f32.mrf.mxu3 }
 0x924   :  { %v4428_v14 = vadd.f32 %v4427_v30, %v7642_v23  ;;  %v8428_v30 = vld [vmem:[#allocation49_spill] sm:$0xff] }
 0x926   :  { %4588 = vst.msk [vmem:[%s8139_s8 + $0x140] sm:$0xff] %vm4547_vm3, %v4428_v14  ;;  %v3448_v14 = vadd.f32 %v7683_v47, %v8428_v30 }
 0x928   :  { %4477 = vmatmul.f32.gmra.mxu3 %v5184_v0 }
 0x92b   :  { %v4430_v41 = vpop.f32.mrf.mxu3 }
 0x92c   :  { %v4431_v10 = vadd.f32 %v4430_v41, %v7655_v62  ;;  %v3705_v41 = vadd.f32 %v3704_v13, %v3448_v14  ;;  %v8431_v13 = vld [vmem:[#allocation70_spill] sm:$0xff] }
 0x92e   :  { %4589 = vst.msk [vmem:[%s8139_s8 + $0x148] sm:$0xff] %vm4547_vm3, %v4431_v10  ;;  %v3962_v10 = vadd.f32 %v3961_v39, %v3705_v41  ;;  %v3457_v39 = vadd.f32 %v7683_v47, %v8431_v13 }
 0x930   :  { %4480 = vmatmul.f32.gmra.mxu3 %v5185_v29  ;;  %v5199_v29 = vld [vmem:[#allocation2 + $0xb60] sm:$0xff] }
 0x933   :  { %v4433_v26 = vpop.f32.mrf.mxu3 }
 0x934   :  { %v4434_v23 = vadd.f32 %v4433_v26, %v7668_v54  ;;  %v3976_v26 = vpop.f32.mrf.mxu1 }
 0x936   :  { %4590 = vst.msk [vmem:[%s8139_s8 + $0x150] sm:$0xff] %vm4547_vm3, %v4434_v23 }
 0x938   :  { %4483 = vmatmul.f32.gmra.mxu3 %v5186_v9 }
 0x93b   :  { %v4436_v52 = vpop.f32.mrf.mxu3 }
 0x93c   :  { %v4437_v62 = vadd.f32 %v4436_v52, %v7681_v51 }
 0x93e   :  { %4591 = vst.msk [vmem:[%s8139_s8 + $0x158] sm:$0xff] %vm4547_vm3, %v4437_v62  ;;  %v8429_v62 = vld [vmem:[#allocation59_spill] sm:$0xff] }
 0x940   :  { %4486 = vmatmul.f32.gmra.mxu3 %v5187_v35  ;;  %v3451_v35 = vadd.f32 %v7683_v47, %v8429_v62 }
 0x943   :  { %v4439_v31 = vpop.f32.mrf.mxu3 }
 0x944   :  { %v4440_v54 = vadd.f32 %v4439_v31, %v7696_v59 }
 0x946   :  { %4592 = vst.msk [vmem:[%s8139_s8 + $0x160] sm:$0xff] %vm4547_vm3, %v4440_v54  ;;  %v3708_v54 = vadd.f32 %v3707_v58, %v3451_v35 }
 0x948   :  { %4489 = vmatmul.f32.gmra.mxu3 %v5188_v34  ;;  %v5200_v34 = vld [vmem:[#allocation2 + $0xb88] sm:$0xff] }
 0x94b   :  { %v4442_v19 = vpop.f32.mrf.mxu3 }
 0x94c   :  { %v4443_v51 = vadd.f32 %v4442_v19, %v7707_v45 }
 0x94e   :  { %4593 = vst.msk [vmem:[%s8139_s8 + $0x168] sm:$0xff] %vm4547_vm3, %v4443_v51 }
 0x950   :  { %4492 = vmatmul.f32.gmra.mxu3 %v5189_v46 }
 0x953   :  { %v4445_v27 = vpop.f32.mrf.mxu3 }
 0x954   :  { %v4446_v59 = vadd.f32 %v4445_v27, %v7720_v49  ;;  %v3979_v27 = vpop.f32.mrf.mxu1 }
 0x956   :  { %4594 = vst.msk [vmem:[%s8139_s8 + $0x170] sm:$0xff] %vm4547_vm3, %v4446_v59  ;;  %v8430_v59 = vld [vmem:[#allocation69_spill] sm:$0xff] }
 0x958   :  { %4495 = vmatmul.f32.gmra.mxu3 %v5190_v50  ;;  %v3454_v50 = vadd.f32 %v7683_v47, %v8430_v59 }
 0x95b   :  { %v4448_v43 = vpop.f32.mrf.mxu3 }
 0x95c   :  { %v4449_v45 = vadd.f32 %v4448_v43, %v7733_v8 }
 0x95e   :  { %4595 = vst.msk [vmem:[%s8139_s8 + $0x178] sm:$0xff] %vm4547_vm3, %v4449_v45 }
 0x960   :  { %4498 = vmatmul.f32.gmra.mxu3 %v5191_v48 }
 0x963   :  { %v4451_v53 = vpop.f32.mrf.mxu3 }
 0x964   :  { %v4452_v49 = vadd.f32 %v4451_v53, %v7744_v24  ;;  %v4218_v24 = vpop.f32.mrf.mxu2 }
 0x965   :  { %v4219_v23 = vadd.f32 %v4218_v24, %v3962_v10  ;;  %v3982_v24 = vpop.f32.mrf.mxu1  ;;  %v5205_v10 = vld [vmem:[#allocation2 + $0xc50] sm:$0xff] }
 0x966   :  { %4596 = vst.msk [vmem:[%s8139_s8 + $0x180] sm:$0xff] %vm4547_vm3, %v4452_v49  ;;  %v5201_v49 = vld [vmem:[#allocation2 + $0xbb0] sm:$0xff] }
 0x968   :  { %4501 = vmatmul.f32.gmra.mxu3 %v5192_v44 }
 0x96b   :  { %v4454_v28 = vpop.f32.mrf.mxu3 }
 0x96c   :  { %v4455_v8 = vadd.f32 %v4454_v28, %v7755_v15  ;;  %v5194_v15 = vld [vmem:[#allocation2 + $0xa98] sm:$0xff]  ;;  %v4221_v55 = vpop.f32.mrf.mxu2 }
 0x96e   :  { %4597 = vst.msk [vmem:[%s8139_s8 + $0x188] sm:$0xff] %vm4547_vm3, %v4455_v8 }
 0x970   :  { %4504 = vmatmul.f32.gmra.mxu3 %v5193_v1 }
 0x973   :  { %v4457_v3 = vpop.f32.mrf.mxu3 }
 0x974   :  { %v4458_v33 = vadd.f32 %v4457_v3, %v7766_v57  ;;  %v3710_v57 = vpop.f32.mrf.mxu0  ;;  %v4224_v56 = vpop.f32.mrf.mxu2 }
 0x975   :  { %v3711_v48 = vadd.f32 %v3710_v57, %v3454_v50 }
 0x976   :  { %4598 = vst.msk [vmem:[%s8139_s8 + $0x190] sm:$0xff] %vm4547_vm3, %v4458_v33 }
 0x977   :  { %v3968_v53 = vadd.f32 %v3967_v6, %v3711_v48  ;;  %v3985_v6 = vpop.f32.mrf.mxu1 }
 0x978   :  { %4507 = vmatmul.f32.gmra.mxu3 %v5194_v15  ;;  %v5202_v15 = vld [vmem:[#allocation2 + $0xbd8] sm:$0xff] }
 0x979   :  { %v4225_v44 = vadd.f32 %v4224_v56, %v3968_v53  ;;  %v5203_v56 = vld [vmem:[#allocation2 + $0xc00] sm:$0xff] }
 0x97b   :  { %v4460_v63 = vpop.f32.mrf.mxu3 }
 0x97c   :  { %v4461_v2 = vadd.f32 %v4460_v63, %v7777_v21  ;;  %v3713_v22 = vpop.f32.mrf.mxu0  ;;  %v4227_v5 = vpop.f32.mrf.mxu2 }
 0x97d   :  { %v3714_v3 = vadd.f32 %v3713_v22, %v3457_v39 }
 0x97e   :  { %4599 = vst.msk [vmem:[%s8139_s8 + $0x198] sm:$0xff] %vm4547_vm3, %v4461_v2 }
 0x97f   :  { %v3971_v58 = vadd.f32 %v3970_v60, %v3714_v3 }
 0x980   :  { %4510 = vmatmul.f32.gmra.mxu3 %v5195_v16 }
 0x983   :  { %v4463_v32 = vpop.f32.mrf.mxu3 }
 0x984   :  { %v4464_v40 = vadd.f32 %v4463_v32, %v7788_v18  ;;  %v5197_v18 = vld [vmem:[#allocation2 + $0xb10] sm:$0xff]  ;;  %v3716_v36 = vpop.f32.mrf.mxu0  ;;  %v4230_v11 = vpop.f32.mrf.mxu2 }
 0x986   :  { %4600 = vst.msk [vmem:[%s8139_s8 + $0x1a0] sm:$0xff] %vm4547_vm3, %v4464_v40 }
 0x988   :  { %4513 = vmatmul.f32.gmra.mxu3 %v5196_v42 }
 0x98b   :  { %v4466_v21 = vpop.f32.mrf.mxu3 }
 0x98c   :  { %v4467_v25 = vadd.f32 %v4466_v21, %v7799_v37  ;;  %v5198_v37 = vld [vmem:[#allocation2 + $0xb38] sm:$0xff]  ;;  %v4233_v52 = vpop.f32.mrf.mxu2 }
 0x98e   :  { %4601 = vst.msk [vmem:[%s8139_s8 + $0x1a8] sm:$0xff] %vm4547_vm3, %v4467_v25  ;;  %v8433_v25 = vld [vmem:[#allocation12_spill] sm:$0xff] }
 0x98f   :  { %v3463_v60 = vadd.f32 %v7683_v47, %v8433_v25 }
 0x990   :  { %4516 = vmatmul.f32.gmra.mxu3 %v5197_v18 }
 0x993   :  { %v4469_v12 = vpop.f32.mrf.mxu3 }
 0x994   :  { %v4470_v38 = vadd.f32 %v4469_v12, %v7810_v61  ;;  %v3719_v61 = vpop.f32.mrf.mxu0  ;;  %v4236_v45 = vpop.f32.mrf.mxu2 }
 0x995   :  { %v3720_v18 = vadd.f32 %v3719_v61, %v3463_v60 }
 0x996   :  { %4602 = vst.msk [vmem:[%s8139_s8 + $0x1b0] sm:$0xff] %vm4547_vm3, %v4470_v38 }
 0x997   :  { %v3977_v38 = vadd.f32 %v3976_v26, %v3720_v18 }
 0x998   :  { %4519 = vmatmul.f32.gmra.mxu3 %v5198_v37 }
 0x999   :  { %v4234_v37 = vadd.f32 %v4233_v52, %v3977_v38  ;;  %v8435_v52 = vld [vmem:[#allocation41_spill] sm:$0xff] }
 0x99a   :  { %v3469_v62 = vadd.f32 %v7683_v47, %v8435_v52 }
 0x99b   :  { %v4472_v20 = vpop.f32.mrf.mxu3 }
 0x99c   :  { %v4473_v0 = vadd.f32 %v4472_v20, %v7821_v7  ;;  %v3965_v7 = vadd.f32 %v3964_v4, %v3708_v54  ;;  %v3722_v19 = vpop.f32.mrf.mxu0  ;;  %v4239_v33 = vpop.f32.mrf.mxu2  ;;  %v4228_v4 = vadd.f32 %v4227_v5, %v3971_v58 }
 0x99e   :  { %4603 = vst.msk [vmem:[%s8139_s8 + $0x1b8] sm:$0xff] %vm4547_vm3, %v4473_v0  ;;  %v4222_v51 = vadd.f32 %v4221_v55, %v3965_v7  ;;  %v8432_v55 = vld [vmem:[#allocation71_spill] sm:$0xff] }
 0x99f   :  { %v3460_v2 = vadd.f32 %v7683_v47, %v8432_v55 }
 0x9a0   :  { %4522 = vmatmul.f32.gmra.mxu3 %v5199_v29 }
 0x9a1   :  { %v3717_v32 = vadd.f32 %v3716_v36, %v3460_v2  ;;  %v5204_v36 = vld [vmem:[#allocation2 + $0xc28] sm:$0xff] }
 0x9a3   :  { %v4475_v9 = vpop.f32.mrf.mxu3  ;;  %v3974_v40 = vadd.f32 %v3973_v17, %v3717_v32  ;;  %v3988_v17 = vpop.f32.mrf.mxu1 }
 0x9a4   :  { %v4476_v31 = vadd.f32 %v4475_v9, %v4219_v23  ;;  %v3725_v8 = vpop.f32.mrf.mxu0  ;;  %v4242_v42 = vpop.f32.mrf.mxu2 }
 0x9a5   :  { %v4231_v21 = vadd.f32 %v4230_v11, %v3974_v40  ;;  %v8434_v11 = vld [vmem:[#allocation39_spill] sm:$0xff]  ;;  %v3726_v54 = vadd.f32 %v3725_v8, %v3469_v62 }
 0x9a6   :  { %4604 = vst.msk [vmem:[%s8139_s8 + $0x1c0] sm:$0xff] %vm4547_vm3, %v4476_v31  ;;  %v3466_v14 = vadd.f32 %v7683_v47, %v8434_v11 }
 0x9a7   :  { %v3983_v7 = vadd.f32 %v3982_v24, %v3726_v54 }
 0x9a8   :  { %4525 = vmatmul.f32.gmra.mxu3 %v5200_v34  ;;  %v3723_v41 = vadd.f32 %v3722_v19, %v3466_v14  ;;  %v5206_v34 = vld [vmem:[#allocation2 + $0xc78] sm:$0xff] }
 0x9a9   :  { %v4240_v19 = vadd.f32 %v4239_v33, %v3983_v7 }
 0x9aa   :  { %v3980_v61 = vadd.f32 %v3979_v27, %v3723_v41  ;;  %v8436_v27 = vld [vmem:[#allocation44_spill] sm:$0xff] }
 0x9ab   :  { %v4478_v46 = vpop.f32.mrf.mxu3  ;;  %v3991_v9 = vpop.f32.mrf.mxu1  ;;  %v3472_v59 = vadd.f32 %v7683_v47, %v8436_v27 }
 0x9ac   :  { %v4479_v43 = vadd.f32 %v4478_v46, %v4222_v51  ;;  %v3728_v57 = vpop.f32.mrf.mxu0  ;;  %v4245_v30 = vpop.f32.mrf.mxu2  ;;  %v4237_v26 = vadd.f32 %v4236_v45, %v3980_v61  ;;  %v8441_v61 = vld [vmem:[#allocation51_spill] sm:$0xff] }
 0x9ad   :  { %v3729_v45 = vadd.f32 %v3728_v57, %v3472_v59 }
 0x9ae   :  { %4605 = vst.msk [vmem:[%s8139_s8 + $0x1c8] sm:$0xff] %vm4547_vm3, %v4479_v43 }
 0x9af   :  { %v3986_v53 = vadd.f32 %v3985_v6, %v3729_v45 }
 0x9b0   :  { %4528 = vmatmul.f32.gmra.mxu3 %v5201_v49 }
 0x9b1   :  { %v4243_v49 = vadd.f32 %v4242_v42, %v3986_v53  ;;  %v8439_v42 = vld [vmem:[#allocation50_spill] sm:$0xff] }
 0x9b3   :  { %v4481_v28 = vpop.f32.mrf.mxu3  ;;  %v3994_v43 = vpop.f32.mrf.mxu1 }
 0x9b4   :  { %v4482_v1 = vadd.f32 %v4481_v28, %v4225_v44  ;;  %v3731_v12 = vpop.f32.mrf.mxu0  ;;  %v4248_v31 = vpop.f32.mrf.mxu2  ;;  %v8437_v28 = vld [vmem:[#allocation46_spill] sm:$0xff] }
 0x9b5   :  { %v3475_v8 = vadd.f32 %v7683_v47, %v8437_v28 }
 0x9b6   :  { %4606 = vst.msk [vmem:[%s8139_s8 + $0x1d0] sm:$0xff] %vm4547_vm3, %v4482_v1 }
 0x9b7   :  { %v3732_v1 = vadd.f32 %v3731_v12, %v3475_v8 }
 0x9b8   :  { %4531 = vmatmul.f32.gmra.mxu3 %v5202_v15 }
 0x9b9   :  { %v3989_v3 = vadd.f32 %v3988_v17, %v3732_v1  ;;  %v8444_v1 = vld [vmem:[#allocation23_spill] sm:$0xff] }
 0x9bb   :  { %v4484_v63 = vpop.f32.mrf.mxu3  ;;  %v3997_v24 = vpop.f32.mrf.mxu1  ;;  %v4246_v58 = vadd.f32 %v4245_v30, %v3989_v3 }
 0x9bc   :  { %v4485_v16 = vadd.f32 %v4484_v63, %v4228_v4  ;;  %v3734_v29 = vpop.f32.mrf.mxu0  ;;  %v4251_v48 = vpop.f32.mrf.mxu2  ;;  %v8438_v4 = vld [vmem:[#allocation48_spill] sm:$0xff] }
 0x9bd   :  { %v3478_v63 = vadd.f32 %v7683_v47, %v8438_v4 }
 0x9be   :  { %4607 = vst.msk [vmem:[%s8139_s8 + $0x1d8] sm:$0xff] %vm4547_vm3, %v4485_v16 }
 0x9bf   :  { %v3735_v2 = vadd.f32 %v3734_v29, %v3478_v63 }
 0x9c0   :  { %4534 = vmatmul.f32.gmra.mxu3 %v5203_v56 }
 0x9c1   :  { %v3992_v57 = vadd.f32 %v3991_v9, %v3735_v2  ;;  %v8445_v2 = vld [vmem:[#allocation54_spill] sm:$0xff] }
 0x9c3   :  { %v4487_v22 = vpop.f32.mrf.mxu3  ;;  %v4000_v32 = vpop.f32.mrf.mxu1  ;;  %v4249_v6 = vadd.f32 %v4248_v31, %v3992_v57  ;;  %v8442_v31 = vld [vmem:[#allocation36_spill] sm:$0xff] }
 0x9c4   :  { %v4488_v5 = vadd.f32 %v4487_v22, %v4231_v21  ;;  %v3737_v46 = vpop.f32.mrf.mxu0  ;;  %v4254_v33 = vpop.f32.mrf.mxu2  ;;  %v3481_v21 = vadd.f32 %v7683_v47, %v8439_v42  ;;  %v3490_v54 = vadd.f32 %v7683_v47, %v8442_v31 }
 0x9c6   :  { %4608 = vst.msk [vmem:[%s8139_s8 + $0x1e0] sm:$0xff] %vm4547_vm3, %v4488_v5  ;;  %v3738_v25 = vadd.f32 %v3737_v46, %v3481_v21 }
 0x9c8   :  { %4537 = vmatmul.f32.gmra.mxu3 %v5204_v36  ;;  %v3995_v60 = vadd.f32 %v3994_v43, %v3738_v25  ;;  %v8440_v36 = vld [vmem:[#allocation19_spill] sm:$0xff]  ;;  %v8443_v43 = vld [vmem:[#allocation22_spill] sm:$0xff] }
 0x9c9   :  { %v3484_v17 = vadd.f32 %v7683_v47, %v8440_v36  ;;  %v3493_v45 = vadd.f32 %v7683_v47, %v8443_v43 }
 0x9ca   :  { %v4252_v18 = vadd.f32 %v4251_v48, %v3995_v60 }
 0x9cb   :  { %v4490_v20 = vpop.f32.mrf.mxu3  ;;  %v4003_v12 = vpop.f32.mrf.mxu1 }
 0x9cc   :  { %v4491_v0 = vadd.f32 %v4490_v20, %v4234_v37  ;;  %v3740_v39 = vpop.f32.mrf.mxu0  ;;  %v4257_v40 = vpop.f32.mrf.mxu2 }
 0x9cd   :  { %v3741_v30 = vadd.f32 %v3740_v39, %v3484_v17 }
 0x9ce   :  { %4609 = vst.msk [vmem:[%s8139_s8 + $0x1e8] sm:$0xff] %vm4547_vm3, %v4491_v0 }
 0x9cf   :  { %v3998_v11 = vadd.f32 %v3997_v24, %v3741_v30  ;;  %v3496_v24 = vadd.f32 %v7683_v47, %v8444_v1 }
 0x9d0   :  { %4540 = vmatmul.f32.gmra.mxu3 %v5205_v10  ;;  %v3487_v10 = vadd.f32 %v7683_v47, %v8441_v61 }
 0x9d1   :  { %v4255_v14 = vadd.f32 %v4254_v33, %v3998_v11 }
 0x9d3   :  { %v4493_v23 = vpop.f32.mrf.mxu3 }
 0x9d4   :  { %v4494_v35 = vadd.f32 %v4493_v23, %v4237_v26  ;;  %v3743_v16 = vpop.f32.mrf.mxu0  ;;  %v4260_v20 = vpop.f32.mrf.mxu2 }
 0x9d5   :  { %v4006_v26 = vpop.f32.mrf.mxu1  ;;  %v3744_v23 = vadd.f32 %v3743_v16, %v3487_v10  ;;  %v3499_v16 = vadd.f32 %v7683_v47, %v8445_v2 }
 0x9d6   :  { %4610 = vst.msk [vmem:[%s8139_s8 + $0x1f0] sm:$0xff] %vm4547_vm3, %v4494_v35 }
 0x9d7   :  { %v4001_v52 = vadd.f32 %v4000_v32, %v3744_v23 }
 0x9d8   :  { %4543 = vmatmul.f32.gmra.mxu3 %v5206_v34 }
 0x9d9   :  { %v4258_v62 = vadd.f32 %v4257_v40, %v4001_v52 }
 0x9db   :  { %v4496_v51 = vpop.f32.mrf.mxu3 }
 0x9dc   :  { %v4497_v50 = vadd.f32 %v4496_v51, %v4240_v19  ;;  %v3746_v5 = vpop.f32.mrf.mxu0  ;;  %v4263_v9 = vpop.f32.mrf.mxu2 }
 0x9dd   :  { %v3747_v19 = vadd.f32 %v3746_v5, %v3490_v54  ;;  %v4009_v51 = vpop.f32.mrf.mxu1 }
 0x9de   :  { %4611 = vst.msk [vmem:[%s8139_s8 + $0x1f8] sm:$0xff] %vm4547_vm3, %v4497_v50 }
 0x9df   :  { %v4004_v46 = vadd.f32 %v4003_v12, %v3747_v19  ;;  %v8449_v19 = vld [vmem:[#allocation26_spill] sm:$0xff] }
 0x9e1   :  { %v4261_v59 = vadd.f32 %v4260_v20, %v4004_v46 }
 0x9e3   :  { %v4499_v44 = vpop.f32.mrf.mxu3 }
 0x9e4   :  { %v4500_v13 = vadd.f32 %v4499_v44, %v4243_v49  ;;  %v3749_v0 = vpop.f32.mrf.mxu0  ;;  %v4266_v27 = vpop.f32.mrf.mxu2 }
 0x9e5   :  { %v3750_v53 = vadd.f32 %v3749_v0, %v3493_v45  ;;  %v4012_v28 = vpop.f32.mrf.mxu1 }
 0x9e6   :  { %4612 = vst.msk [vmem:[%s8139_s8 + $0x200] sm:$0xff] %vm4547_vm3, %v4500_v13 }
 0x9e7   :  { %v4007_v44 = vadd.f32 %v4006_v26, %v3750_v53  ;;  %v8448_v26 = vld [vmem:[#allocation25_spill] sm:$0xff]  ;;  %v8450_v53 = vld [vmem:[#allocation27_spill] sm:$0xff] }
 0x9e8   :  { %v3508_v23 = vadd.f32 %v7683_v47, %v8448_v26 }
 0x9e9   :  { %v4264_v8 = vadd.f32 %v4263_v9, %v4007_v44 }
 0x9eb   :  { %v4502_v15 = vpop.f32.mrf.mxu3 }
 0x9ec   :  { %v4503_v55 = vadd.f32 %v4502_v15, %v4246_v58  ;;  %v3752_v34 = vpop.f32.mrf.mxu0  ;;  %v4269_v13 = vpop.f32.mrf.mxu2 }
 0x9ed   :  { %v3753_v33 = vadd.f32 %v3752_v34, %v3496_v24  ;;  %v4015_v63 = vpop.f32.mrf.mxu1 }
 0x9ee   :  { %4613 = vst.msk [vmem:[%s8139_s8 + $0x208] sm:$0xff] %vm4547_vm3, %v4503_v55 }
 0x9ef   :  { %v4010_v58 = vadd.f32 %v4009_v51, %v3753_v33  ;;  %v3511_v51 = vadd.f32 %v7683_v47, %v8449_v19 }
 0x9f1   :  { %v4267_v4 = vadd.f32 %v4266_v27, %v4010_v58 }
 0x9f3   :  { %v4505_v56 = vpop.f32.mrf.mxu3 }
 0x9f4   :  { %v4506_v22 = vadd.f32 %v4505_v56, %v4249_v6  ;;  %v3755_v49 = vpop.f32.mrf.mxu0  ;;  %v4272_v32 = vpop.f32.mrf.mxu2 }
 0x9f5   :  { %v3756_v6 = vadd.f32 %v3755_v49, %v3499_v16  ;;  %v4018_v5 = vpop.f32.mrf.mxu1  ;;  %v3514_v49 = vadd.f32 %v7683_v47, %v8450_v53 }
 0x9f6   :  { %4614 = vst.msk [vmem:[%s8139_s8 + $0x210] sm:$0xff] %vm4547_vm3, %v4506_v22  ;;  %v8446_v22 = vld [vmem:[#allocation24_spill] sm:$0xff] }
 0x9f7   :  { %v4013_v40 = vadd.f32 %v4012_v28, %v3756_v6  ;;  %v3502_v25 = vadd.f32 %v7683_v47, %v8446_v22 }
 0x9f9   :  { %v4270_v56 = vadd.f32 %v4269_v13, %v4013_v40 }
 0x9fb   :  { %v4508_v38 = vpop.f32.mrf.mxu3 }
 0x9fc   :  { %v4509_v37 = vadd.f32 %v4508_v38, %v4252_v18  ;;  %v3758_v15 = vpop.f32.mrf.mxu0  ;;  %v4275_v12 = vpop.f32.mrf.mxu2 }
 0x9fd   :  { %v3759_v18 = vadd.f32 %v3758_v15, %v3502_v25  ;;  %v4021_v0 = vpop.f32.mrf.mxu1 }
 0x9fe   :  { %4615 = vst.msk [vmem:[%s8139_s8 + $0x218] sm:$0xff] %vm4547_vm3, %v4509_v37  ;;  %v8447_v37 = vld [vmem:[#allocation37_spill] sm:$0xff] }
 0x9ff   :  { %v4016_v38 = vadd.f32 %v4015_v63, %v3759_v18  ;;  %v3505_v20 = vadd.f32 %v7683_v47, %v8447_v37 }
 0xa01   :  { %v4273_v36 = vadd.f32 %v4272_v32, %v4016_v38 }
 0xa03   :  { %v4511_v41 = vpop.f32.mrf.mxu3 }
 0xa04   :  { %v4512_v29 = vadd.f32 %v4511_v41, %v4255_v14  ;;  %v3761_v42 = vpop.f32.mrf.mxu0  ;;  %v4278_v61 = vpop.f32.mrf.mxu2 }
 0xa05   :  { %v3762_v14 = vadd.f32 %v3761_v42, %v3505_v20  ;;  %v4024_v31 = vpop.f32.mrf.mxu1 }
 0xa06   :  { %4616 = vst.msk [vmem:[%s8139_s8 + $0x220] sm:$0xff] %vm4547_vm3, %v4512_v29 }
 0xa07   :  { %v4019_v41 = vadd.f32 %v4018_v5, %v3762_v14 }
 0xa09   :  { %v4276_v10 = vadd.f32 %v4275_v12, %v4019_v41 }
 0xa0b   :  { %v4514_v35 = vpop.f32.mrf.mxu3 }
 0xa0c   :  { %v4515_v7 = vadd.f32 %v4514_v35, %v4258_v62  ;;  %v3764_v11 = vpop.f32.mrf.mxu0 }
 0xa0d   :  { %v3765_v52 = vadd.f32 %v3764_v11, %v3508_v23  ;;  %v4027_v45 = vpop.f32.mrf.mxu1 }
 0xa0e   :  { %4617 = vst.msk [vmem:[%s8139_s8 + $0x228] sm:$0xff] %vm4547_vm3, %v4515_v7  ;;  %v4281_v7 = vpop.f32.mrf.mxu2 }
 0xa0f   :  { %v4022_v35 = vadd.f32 %v4021_v0, %v3765_v52 }
 0xa11   :  { %v4279_v54 = vadd.f32 %v4278_v61, %v4022_v35 }
 0xa13   :  { %v4517_v50 = vpop.f32.mrf.mxu3 }
 0xa14   :  { %v4518_v48 = vadd.f32 %v4517_v50, %v4261_v59  ;;  %v3767_v62 = vpop.f32.mrf.mxu0 }
 0xa15   :  { %v3768_v27 = vadd.f32 %v3767_v62, %v3511_v51  ;;  %v4030_v15 = vpop.f32.mrf.mxu1 }
 0xa16   :  { %4618 = vst.msk [vmem:[%s8139_s8 + $0x230] sm:$0xff] %vm4547_vm3, %v4518_v48  ;;  %v4284_v28 = vpop.f32.mrf.mxu2 }
 0xa17   :  { %v4025_v59 = vadd.f32 %v4024_v31, %v3768_v27 }
 0xa19   :  { %v4282_v43 = vadd.f32 %v4281_v7, %v4025_v59 }
 0xa1b   :  { %v4520_v39 = vpop.f32.mrf.mxu3 }
 0xa1c   :  { %v4521_v3 = vadd.f32 %v4520_v39, %v4264_v8  ;;  %v3770_v50 = vpop.f32.mrf.mxu0 }
 0xa1d   :  { %v3771_v8 = vadd.f32 %v3770_v50, %v3514_v49 }
 0xa1e   :  { %4619 = vst.msk [vmem:[%s8139_s8 + $0x238] sm:$0xff] %vm4547_vm3, %v4521_v3  ;;  %v8451_v3 = vld [vmem:[#allocation28_spill] sm:$0xff]  ;;  %v4287_v63 = vpop.f32.mrf.mxu2 }
 0xa1f   :  { %v4028_v13 = vadd.f32 %v4027_v45, %v3771_v8  ;;  %v3517_v33 = vadd.f32 %v7683_v47, %v8451_v3 }
 0xa21   :  { %v4285_v39 = vadd.f32 %v4284_v28, %v4028_v13 }
 0xa23   :  { %v4523_v55 = vpop.f32.mrf.mxu3 }
 0xa24   :  { %v4524_v57 = vadd.f32 %v4523_v55, %v4267_v4  ;;  %v3773_v1 = vpop.f32.mrf.mxu0 }
 0xa25   :  { %v3774_v4 = vadd.f32 %v3773_v1, %v3517_v33 }
 0xa26   :  { %4620 = vst.msk [vmem:[%s8139_s8 + $0x240] sm:$0xff] %vm4547_vm3, %v4524_v57 }
 0xa27   :  { %v4031_v55 = vadd.f32 %v4030_v15, %v3774_v4 }
 0xa29   :  { %v4288_v2 = vadd.f32 %v4287_v63, %v4031_v55 }
 0xa2b   :  { %v4526_v21 = vpop.f32.mrf.mxu3 }
 0xa2c   :  { %v4527_v60 = vadd.f32 %v4526_v21, %v4270_v56 }
 0xa2e   :  { %4621 = vst.msk [vmem:[%s8139_s8 + $0x248] sm:$0xff] %vm4547_vm3, %v4527_v60 }
 0xa33   :  { %v4529_v17 = vpop.f32.mrf.mxu3 }
 0xa34   :  { %v4530_v30 = vadd.f32 %v4529_v17, %v4273_v36 }
 0xa36   :  { %4622 = vst.msk [vmem:[%s8139_s8 + $0x250] sm:$0xff] %vm4547_vm3, %v4530_v30 }
 0xa3b   :  { %v4532_v29 = vpop.f32.mrf.mxu3 }
 0xa3c   :  { %v4533_v9 = vadd.f32 %v4532_v29, %v4276_v10 }
 0xa3e   :  { %4623 = vst.msk [vmem:[%s8139_s8 + $0x258] sm:$0xff] %vm4547_vm3, %v4533_v9 }
 0xa43   :  { %v4535_v34 = vpop.f32.mrf.mxu3 }
 0xa44   :  { %v4536_v46 = vadd.f32 %v4535_v34, %v4279_v54 }
 0xa46   :  { %4624 = vst.msk [vmem:[%s8139_s8 + $0x260] sm:$0xff] %vm4547_vm3, %v4536_v46 }
 0xa4b   :  { %v4538_v48 = vpop.f32.mrf.mxu3 }
 0xa4c   :  { %v4539_v44 = vadd.f32 %v4538_v48, %v4282_v43 }
 0xa4e   :  { %4625 = vst.msk [vmem:[%s8139_s8 + $0x268] sm:$0xff] %vm4547_vm3, %v4539_v44 }
 0xa53   :  { %v4541_v24 = vpop.f32.mrf.mxu3 }
 0xa54   :  { %v4542_v58 = vadd.f32 %v4541_v24, %v4285_v39 }
 0xa56   :  { %4626 = vst.msk [vmem:[%s8139_s8 + $0x270] sm:$0xff] %vm4547_vm3, %v4542_v58 }
 0xa5b   :  { %v4544_v16 = vpop.f32.mrf.mxu3 }
 0xa5c   :  { %v4545_v57 = vadd.f32 %v4544_v16, %v4288_v2 }
 0xa5e   :  { %4627 = vst.msk [vmem:[%s8139_s8 + $0x278] sm:$0xff] %vm4547_vm3, %v4545_v57 }
 0xa5f   :  { %4632 = vsyncpa [#allocation3], 1 }
 0xa60   :  { %4633 = vsyncpa [#allocation5], 1 }
 0xa61   :  { %4634 = vsyncpa [#allocation8], 1 }

</bundles_post_ra>
